<compile_context>
chip_gen: v7x
topology: tpu7x:2x2x1
jax: 0.10.0
libtpu: 0.0.40
codegen_flags: <defaults>
</compile_context>

<pallas_src>
import functools

import numpy as np
import jax
import jax.numpy as jnp
from jax import lax
from jax.experimental import pallas as pl
from jax.experimental.pallas import tpu as pltpu


# ----------------------------------------------------------------------------
# Sliding "valid" window sum along axis 0 (sublane axis) of a 2-D array.
# Power-of-two windows use log-doubling (log2(B) shifted adds); other sizes
# fall back to direct accumulation.
# ----------------------------------------------------------------------------
def _window_sum_rows(x, window):
    if window == 1:
        return x
    if (window & (window - 1)) == 0:  # power of two -> log-doubling
        s = x
        shift = 1
        while shift < window:
            n = s.shape[0]
            s = (lax.slice_in_dim(s, 0, n - shift, axis=0)
                 + lax.slice_in_dim(s, shift, n, axis=0))
            shift *= 2
        return s
    out_len = x.shape[0] - window + 1
    acc = lax.slice_in_dim(x, 0, out_len, axis=0)
    for k in range(1, window):
        acc = acc + lax.slice_in_dim(x, k, k + out_len, axis=0)
    return acc


# ----------------------------------------------------------------------------
# Kernel: one grid step processes one packed group of P planes.
#   x_ref, y_ref : (H, Wp)    f32, Wp = P * W (P planes packed along lanes)
#   s_ref        : (Wp, Wpo)  f32, block-banded 0/1 width-sum matrix
#   m_ref        : (Wpo, P)   f32, per-plane column selector for the mean
#   q_ref        : (1, P)     f32, per-plane quality
# ----------------------------------------------------------------------------
def _q_kernel(x_ref, y_ref, s_ref, m_ref, q_ref, *, block_size, w_out):
    B = block_size
    N = float(B * B)
    S = s_ref[...]
    M = m_ref[...]

    def box(a):                                   # a: (H, Wp)
        rows = _window_sum_rows(a, B)             # (H_out, Wp) sublane adds
        return jnp.dot(rows, S,                   # width sum on the idle MXU
                       precision=lax.Precision.HIGHEST,
                       preferred_element_type=jnp.float32)   # (H_out, Wpo)

    # Form each moment from the refs right before its box() chain
    # (short live ranges; re-reading VMEM refs is a cheap vld).
    x_sum = box(x_ref[...])
    y_sum = box(y_ref[...])
    xy_sum = box(x_ref[...] * y_ref[...])
    x_sq_sum = box(x_ref[...] * x_ref[...])
    y_sq_sum = box(y_ref[...] * y_ref[...])

    sum_mul = x_sum * y_sum                         # outputs_labels_sum_mul
    sum_mul_sq = x_sum * x_sum + y_sum * y_sum      # outputs_labels_sum_mul_sq
    numerator = 4.0 * (N * xy_sum - sum_mul) * sum_mul
    denom_temp = N * (x_sq_sum + y_sq_sum) - sum_mul_sq
    denominator = denom_temp * sum_mul_sq

    qmap = jnp.ones_like(denominator)
    qmap = jnp.where((denom_temp == 0.0) & (sum_mul_sq != 0.0),
                     (2.0 * sum_mul) / sum_mul_sq, qmap)
    qmap = jnp.where(denominator != 0.0, numerator / denominator, qmap)

    h_out = qmap.shape[0]
    row_sum = jnp.sum(qmap, axis=0, keepdims=True)              # (1, Wpo)
    q = jnp.dot(row_sum, M, precision=lax.Precision.HIGHEST,
                preferred_element_type=jnp.float32)             # (1, P)
    q_ref[...] = (q * (1.0 / float(h_out * w_out))).astype(q_ref.dtype)


# ----------------------------------------------------------------------------
# Generation-aware VMEM limit and lane-packing factor.
# ----------------------------------------------------------------------------
def _vmem_limit_bytes():
    try:
        cap = int(pltpu.get_tpu_info().vmem_capacity_bytes)
    except Exception:
        cap = 64 << 20          # conservative fallback (v7x-sized)
    return min(int(cap * 0.7), 96 << 20)


def _pick_pack_factor(bc, h, w, block_size, budget_bytes, lane_cap=512):
    """Largest divisor P of bc such that: packed width P*w <= lane_cap lanes,
    the grid keeps >= 2 steps (v7x megacore / pipelining), and the estimated
    per-step working set (inputs double-buffered + ~12 f32 temps + S) fits."""
    w_out = w - block_size + 1
    best = 1
    for p in range(2, bc + 1):
        if bc % p:
            continue
        if bc // p < 2:                 # keep at least 2 grid steps
            continue
        wp = p * w
        if wp > lane_cap:
            continue
        est = 16 * h * wp * 4 + wp * (p * w_out) * 4
        if est > budget_bytes:
            continue
        best = p
    return best


# ----------------------------------------------------------------------------
# Q.forward equivalent.
#   outputs, labels : (bs, nbands, H, W)  ->  (bs, nbands) per-band quality
# ----------------------------------------------------------------------------
def q_forward(outputs, labels, block_size=32):
    outputs = jnp.asarray(outputs, jnp.float32)
    labels = jnp.asarray(labels, jnp.float32)
    bs, nbands, h, w = labels.shape
    if h < block_size or w < block_size:
        raise ValueError("spatial dims must be >= block_size (valid conv).")

    bc = bs * nbands
    h_out = h - block_size + 1
    w_out = w - block_size + 1

    vmem_limit = _vmem_limit_bytes()
    P = _pick_pack_factor(bc, h, w, block_size, budget_bytes=vmem_limit // 2)
    G = bc // P
    wp = P * w
    wpo = P * w_out
    # TODO(synk): planes too large for VMEM (~16 f32 temporaries per plane)
    # need a spatially tiled variant with (block_size - 1)-row halos.

    # Pack P planes side by side along the lane axis: (G, H, P*W).
    x = outputs.reshape(G, P, h, w).transpose(0, 2, 1, 3).reshape(G, h, wp)
    y = labels.reshape(G, P, h, w).transpose(0, 2, 1, 3).reshape(G, h, wp)

    # Block-banded 0/1 width-sum matrix: column j = (plane p, offset c) sums
    # input lanes [p*w + c, p*w + c + block_size); never crosses a plane seam.
    ii = np.arange(wp)
    jj = np.arange(wpo)
    p_i, c_i = ii // w, ii % w
    p_j, c_j = jj // w_out, jj % w_out
    S = ((p_i[:, None] == p_j[None, :])
         & (c_i[:, None] >= c_j[None, :])
         & (c_i[:, None] < c_j[None, :] + block_size)).astype(np.float32)
    # Per-plane column selector for the final spatial mean.
    M = (p_j[:, None] == np.arange(P)[None, :]).astype(np.float32)
    S = jnp.asarray(S)
    M = jnp.asarray(M)

    kernel = functools.partial(_q_kernel, block_size=block_size, w_out=w_out)
    q = pl.pallas_call(
        kernel,
        out_shape=jax.ShapeDtypeStruct((G, 1, P), jnp.float32),
        grid_spec=pltpu.PrefetchScalarGridSpec(
            num_scalar_prefetch=0,
            grid=(G,),
            in_specs=[
                pl.BlockSpec((None, h, wp), lambda i: (i, 0, 0)),
                pl.BlockSpec((None, h, wp), lambda i: (i, 0, 0)),
                pl.BlockSpec((wp, wpo), lambda i: (0, 0)),   # fetched once
                pl.BlockSpec((wpo, P), lambda i: (0, 0)),    # fetched once
            ],
            out_specs=pl.BlockSpec((None, 1, P), lambda i: (i, 0, 0)),
        ),
        compiler_params=pltpu.CompilerParams(
            dimension_semantics=("parallel",),
            vmem_limit_bytes=vmem_limit,
        ),
    )(x, y, S, M)

    return q.reshape(bs, nbands)


# ----------------------------------------------------------------------------
# Pure-JAX reference (same math as the PyTorch module) for validation.
# ----------------------------------------------------------------------------
def _q_reference(outputs, labels, block_size):
    B = block_size
    N = float(B * B)

    def box(a):
        return lax.reduce_window(a, 0.0, lax.add,
                                 (1, 1, B, B), (1, 1, 1, 1), "VALID")

    x_sum, y_sum = box(outputs), box(labels)
    xy_sum = box(outputs * labels)
    x_sq_sum, y_sq_sum = box(outputs * outputs), box(labels * labels)
    sum_mul = x_sum * y_sum
    sum_mul_sq = x_sum ** 2 + y_sum ** 2
    numerator = 4.0 * (N * xy_sum - sum_mul) * sum_mul
    denom_temp = N * (x_sq_sum + y_sq_sum) - sum_mul_sq
    denominator = denom_temp * sum_mul_sq
    qmap = jnp.ones_like(denominator)
    qmap = jnp.where((denom_temp == 0.0) & (sum_mul_sq != 0.0),
                     2.0 * sum_mul / sum_mul_sq, qmap)
    qmap = jnp.where(denominator != 0.0, numerator / denominator, qmap)
    return jnp.mean(qmap, axis=(2, 3))


if __name__ == "__main__":
    key = jax.random.PRNGKey(0)
    k1, k2 = jax.random.split(key)
    bs, C, H, W = 2, 4, 64, 64
    block_size = 32

    labels = jax.random.uniform(k1, (bs, C, H, W), jnp.float32, 0.0, 255.0)
    outputs = labels + 5.0 * jax.random.normal(k2, (bs, C, H, W), jnp.float32)

    quality = q_forward(outputs, labels, block_size=block_size)
    quality = jax.block_until_ready(quality)
    assert quality.shape == (bs, C)

    ref = _q_reference(outputs, labels, block_size)
    ref = jax.block_until_ready(ref)
    assert bool(jnp.allclose(quality, ref, rtol=2e-2, atol=2e-2)), (quality, ref)

    print("KERNEL_OK")
</pallas_src>

<mosaic_0001>
module attributes {stable_mosaic.version = 11 : i64} {
  func.func @_q_kernel(%arg0: i32, %arg1: memref<1x64x256xf32, #tpu.memory_space<vmem>>, %arg2: memref<1x64x256xf32, #tpu.memory_space<vmem>>, %arg3: memref<256x132xf32, #tpu.memory_space<vmem>>, %arg4: memref<132x4xf32, #tpu.memory_space<vmem>>, %arg5: memref<1x1x4xf32, #tpu.memory_space<vmem>>) attributes {dimension_semantics = [#tpu.dimension_semantics<parallel>], iteration_bounds = array<i64: 2>, scalar_prefetch = 0 : i64, scratch_operands = 0 : i64, tpu.core_type = #tpu.core_type<tc>, window_params = [{transform_indices = @transform_0, window_bounds = array<i64: 1, 64, 256>}, {transform_indices = @transform_1, window_bounds = array<i64: 1, 64, 256>}, {pipeline_mode = #tpu.pipeline_mode<synchronous>, transform_indices = @transform_2, window_bounds = array<i64: 256, 132>}, {pipeline_mode = #tpu.pipeline_mode<synchronous>, transform_indices = @transform_3, window_bounds = array<i64: 132, 4>}, {transform_indices = @transform_4, window_bounds = array<i64: 1, 1, 4>}]} {
    %c0 = arith.constant 0 : index
    %c0_0 = arith.constant 0 : index
    %0 = vector.load %arg3[%c0, %c0_0] : memref<256x132xf32, #tpu.memory_space<vmem>>, vector<256x132xf32>
    %c0_1 = arith.constant 0 : index
    %c0_2 = arith.constant 0 : index
    %1 = vector.load %arg4[%c0_1, %c0_2] : memref<132x4xf32, #tpu.memory_space<vmem>>, vector<132x4xf32>
    %c0_3 = arith.constant 0 : index
    %c0_4 = arith.constant 0 : index
    %c0_5 = arith.constant 0 : index
    %2 = vector.load %arg1[%c0_3, %c0_4, %c0_5] : memref<1x64x256xf32, #tpu.memory_space<vmem>>, vector<1x64x256xf32>
    %3 = vector.shape_cast %2 : vector<1x64x256xf32> to vector<64x256xf32>
    %4 = vector.extract_strided_slice %3 {offsets = [0, 0], sizes = [63, 256], strides = [1, 1]} : vector<64x256xf32> to vector<63x256xf32>
    %5 = vector.extract_strided_slice %3 {offsets = [1, 0], sizes = [63, 256], strides = [1, 1]} : vector<64x256xf32> to vector<63x256xf32>
    %6 = arith.addf %4, %5 : vector<63x256xf32>
    %7 = vector.extract_strided_slice %6 {offsets = [0, 0], sizes = [61, 256], strides = [1, 1]} : vector<63x256xf32> to vector<61x256xf32>
    %8 = vector.extract_strided_slice %6 {offsets = [2, 0], sizes = [61, 256], strides = [1, 1]} : vector<63x256xf32> to vector<61x256xf32>
    %9 = arith.addf %7, %8 : vector<61x256xf32>
    %10 = vector.extract_strided_slice %9 {offsets = [0, 0], sizes = [57, 256], strides = [1, 1]} : vector<61x256xf32> to vector<57x256xf32>
    %11 = vector.extract_strided_slice %9 {offsets = [4, 0], sizes = [57, 256], strides = [1, 1]} : vector<61x256xf32> to vector<57x256xf32>
    %12 = arith.addf %10, %11 : vector<57x256xf32>
    %13 = vector.extract_strided_slice %12 {offsets = [0, 0], sizes = [49, 256], strides = [1, 1]} : vector<57x256xf32> to vector<49x256xf32>
    %14 = vector.extract_strided_slice %12 {offsets = [8, 0], sizes = [49, 256], strides = [1, 1]} : vector<57x256xf32> to vector<49x256xf32>
    %15 = arith.addf %13, %14 : vector<49x256xf32>
    %16 = vector.extract_strided_slice %15 {offsets = [0, 0], sizes = [33, 256], strides = [1, 1]} : vector<49x256xf32> to vector<33x256xf32>
    %17 = vector.extract_strided_slice %15 {offsets = [16, 0], sizes = [33, 256], strides = [1, 1]} : vector<49x256xf32> to vector<33x256xf32>
    %18 = arith.addf %16, %17 : vector<33x256xf32>
    %cst = arith.constant dense<0.000000e+00> : vector<33x132xf32>
    %19 = tpu.matmul %18, %0, %cst {dimension_numbers = #tpu.dot_dimension_numbers<[1], [0], [0], [1], [0, 0, 1, 1], [], []>, precision = #tpu.contract_precision<fp32>} : vector<33x256xf32>, vector<256x132xf32>, vector<33x132xf32> -> vector<33x132xf32>
    %c0_6 = arith.constant 0 : index
    %c0_7 = arith.constant 0 : index
    %c0_8 = arith.constant 0 : index
    %20 = vector.load %arg2[%c0_6, %c0_7, %c0_8] : memref<1x64x256xf32, #tpu.memory_space<vmem>>, vector<1x64x256xf32>
    %21 = vector.shape_cast %20 : vector<1x64x256xf32> to vector<64x256xf32>
    %22 = vector.extract_strided_slice %21 {offsets = [0, 0], sizes = [63, 256], strides = [1, 1]} : vector<64x256xf32> to vector<63x256xf32>
    %23 = vector.extract_strided_slice %21 {offsets = [1, 0], sizes = [63, 256], strides = [1, 1]} : vector<64x256xf32> to vector<63x256xf32>
    %24 = arith.addf %22, %23 : vector<63x256xf32>
    %25 = vector.extract_strided_slice %24 {offsets = [0, 0], sizes = [61, 256], strides = [1, 1]} : vector<63x256xf32> to vector<61x256xf32>
    %26 = vector.extract_strided_slice %24 {offsets = [2, 0], sizes = [61, 256], strides = [1, 1]} : vector<63x256xf32> to vector<61x256xf32>
    %27 = arith.addf %25, %26 : vector<61x256xf32>
    %28 = vector.extract_strided_slice %27 {offsets = [0, 0], sizes = [57, 256], strides = [1, 1]} : vector<61x256xf32> to vector<57x256xf32>
    %29 = vector.extract_strided_slice %27 {offsets = [4, 0], sizes = [57, 256], strides = [1, 1]} : vector<61x256xf32> to vector<57x256xf32>
    %30 = arith.addf %28, %29 : vector<57x256xf32>
    %31 = vector.extract_strided_slice %30 {offsets = [0, 0], sizes = [49, 256], strides = [1, 1]} : vector<57x256xf32> to vector<49x256xf32>
    %32 = vector.extract_strided_slice %30 {offsets = [8, 0], sizes = [49, 256], strides = [1, 1]} : vector<57x256xf32> to vector<49x256xf32>
    %33 = arith.addf %31, %32 : vector<49x256xf32>
    %34 = vector.extract_strided_slice %33 {offsets = [0, 0], sizes = [33, 256], strides = [1, 1]} : vector<49x256xf32> to vector<33x256xf32>
    %35 = vector.extract_strided_slice %33 {offsets = [16, 0], sizes = [33, 256], strides = [1, 1]} : vector<49x256xf32> to vector<33x256xf32>
    %36 = arith.addf %34, %35 : vector<33x256xf32>
    %cst_9 = arith.constant dense<0.000000e+00> : vector<33x132xf32>
    %37 = tpu.matmul %36, %0, %cst_9 {dimension_numbers = #tpu.dot_dimension_numbers<[1], [0], [0], [1], [0, 0, 1, 1], [], []>, precision = #tpu.contract_precision<fp32>} : vector<33x256xf32>, vector<256x132xf32>, vector<33x132xf32> -> vector<33x132xf32>
    %c0_10 = arith.constant 0 : index
    %c0_11 = arith.constant 0 : index
    %c0_12 = arith.constant 0 : index
    %38 = vector.load %arg1[%c0_10, %c0_11, %c0_12] : memref<1x64x256xf32, #tpu.memory_space<vmem>>, vector<1x64x256xf32>
    %39 = vector.shape_cast %38 : vector<1x64x256xf32> to vector<64x256xf32>
    %c0_13 = arith.constant 0 : index
    %c0_14 = arith.constant 0 : index
    %c0_15 = arith.constant 0 : index
    %40 = vector.load %arg2[%c0_13, %c0_14, %c0_15] : memref<1x64x256xf32, #tpu.memory_space<vmem>>, vector<1x64x256xf32>
    %41 = vector.shape_cast %40 : vector<1x64x256xf32> to vector<64x256xf32>
    %42 = arith.mulf %39, %41 : vector<64x256xf32>
    %43 = vector.extract_strided_slice %42 {offsets = [0, 0], sizes = [63, 256], strides = [1, 1]} : vector<64x256xf32> to vector<63x256xf32>
    %44 = vector.extract_strided_slice %42 {offsets = [1, 0], sizes = [63, 256], strides = [1, 1]} : vector<64x256xf32> to vector<63x256xf32>
    %45 = arith.addf %43, %44 : vector<63x256xf32>
    %46 = vector.extract_strided_slice %45 {offsets = [0, 0], sizes = [61, 256], strides = [1, 1]} : vector<63x256xf32> to vector<61x256xf32>
    %47 = vector.extract_strided_slice %45 {offsets = [2, 0], sizes = [61, 256], strides = [1, 1]} : vector<63x256xf32> to vector<61x256xf32>
    %48 = arith.addf %46, %47 : vector<61x256xf32>
    %49 = vector.extract_strided_slice %48 {offsets = [0, 0], sizes = [57, 256], strides = [1, 1]} : vector<61x256xf32> to vector<57x256xf32>
    %50 = vector.extract_strided_slice %48 {offsets = [4, 0], sizes = [57, 256], strides = [1, 1]} : vector<61x256xf32> to vector<57x256xf32>
    %51 = arith.addf %49, %50 : vector<57x256xf32>
    %52 = vector.extract_strided_slice %51 {offsets = [0, 0], sizes = [49, 256], strides = [1, 1]} : vector<57x256xf32> to vector<49x256xf32>
    %53 = vector.extract_strided_slice %51 {offsets = [8, 0], sizes = [49, 256], strides = [1, 1]} : vector<57x256xf32> to vector<49x256xf32>
    %54 = arith.addf %52, %53 : vector<49x256xf32>
    %55 = vector.extract_strided_slice %54 {offsets = [0, 0], sizes = [33, 256], strides = [1, 1]} : vector<49x256xf32> to vector<33x256xf32>
    %56 = vector.extract_strided_slice %54 {offsets = [16, 0], sizes = [33, 256], strides = [1, 1]} : vector<49x256xf32> to vector<33x256xf32>
    %57 = arith.addf %55, %56 : vector<33x256xf32>
    %cst_16 = arith.constant dense<0.000000e+00> : vector<33x132xf32>
    %58 = tpu.matmul %57, %0, %cst_16 {dimension_numbers = #tpu.dot_dimension_numbers<[1], [0], [0], [1], [0, 0, 1, 1], [], []>, precision = #tpu.contract_precision<fp32>} : vector<33x256xf32>, vector<256x132xf32>, vector<33x132xf32> -> vector<33x132xf32>
    %c0_17 = arith.constant 0 : index
    %c0_18 = arith.constant 0 : index
    %c0_19 = arith.constant 0 : index
    %59 = vector.load %arg1[%c0_17, %c0_18, %c0_19] : memref<1x64x256xf32, #tpu.memory_space<vmem>>, vector<1x64x256xf32>
    %60 = vector.shape_cast %59 : vector<1x64x256xf32> to vector<64x256xf32>
    %c0_20 = arith.constant 0 : index
    %c0_21 = arith.constant 0 : index
    %c0_22 = arith.constant 0 : index
    %61 = vector.load %arg1[%c0_20, %c0_21, %c0_22] : memref<1x64x256xf32, #tpu.memory_space<vmem>>, vector<1x64x256xf32>
    %62 = vector.shape_cast %61 : vector<1x64x256xf32> to vector<64x256xf32>
    %63 = arith.mulf %60, %62 : vector<64x256xf32>
    %64 = vector.extract_strided_slice %63 {offsets = [0, 0], sizes = [63, 256], strides = [1, 1]} : vector<64x256xf32> to vector<63x256xf32>
    %65 = vector.extract_strided_slice %63 {offsets = [1, 0], sizes = [63, 256], strides = [1, 1]} : vector<64x256xf32> to vector<63x256xf32>
    %66 = arith.addf %64, %65 : vector<63x256xf32>
    %67 = vector.extract_strided_slice %66 {offsets = [0, 0], sizes = [61, 256], strides = [1, 1]} : vector<63x256xf32> to vector<61x256xf32>
    %68 = vector.extract_strided_slice %66 {offsets = [2, 0], sizes = [61, 256], strides = [1, 1]} : vector<63x256xf32> to vector<61x256xf32>
    %69 = arith.addf %67, %68 : vector<61x256xf32>
    %70 = vector.extract_strided_slice %69 {offsets = [0, 0], sizes = [57, 256], strides = [1, 1]} : vector<61x256xf32> to vector<57x256xf32>
    %71 = vector.extract_strided_slice %69 {offsets = [4, 0], sizes = [57, 256], strides = [1, 1]} : vector<61x256xf32> to vector<57x256xf32>
    %72 = arith.addf %70, %71 : vector<57x256xf32>
    %73 = vector.extract_strided_slice %72 {offsets = [0, 0], sizes = [49, 256], strides = [1, 1]} : vector<57x256xf32> to vector<49x256xf32>
    %74 = vector.extract_strided_slice %72 {offsets = [8, 0], sizes = [49, 256], strides = [1, 1]} : vector<57x256xf32> to vector<49x256xf32>
    %75 = arith.addf %73, %74 : vector<49x256xf32>
    %76 = vector.extract_strided_slice %75 {offsets = [0, 0], sizes = [33, 256], strides = [1, 1]} : vector<49x256xf32> to vector<33x256xf32>
    %77 = vector.extract_strided_slice %75 {offsets = [16, 0], sizes = [33, 256], strides = [1, 1]} : vector<49x256xf32> to vector<33x256xf32>
    %78 = arith.addf %76, %77 : vector<33x256xf32>
    %cst_23 = arith.constant dense<0.000000e+00> : vector<33x132xf32>
    %79 = tpu.matmul %78, %0, %cst_23 {dimension_numbers = #tpu.dot_dimension_numbers<[1], [0], [0], [1], [0, 0, 1, 1], [], []>, precision = #tpu.contract_precision<fp32>} : vector<33x256xf32>, vector<256x132xf32>, vector<33x132xf32> -> vector<33x132xf32>
    %c0_24 = arith.constant 0 : index
    %c0_25 = arith.constant 0 : index
    %c0_26 = arith.constant 0 : index
    %80 = vector.load %arg2[%c0_24, %c0_25, %c0_26] : memref<1x64x256xf32, #tpu.memory_space<vmem>>, vector<1x64x256xf32>
    %81 = vector.shape_cast %80 : vector<1x64x256xf32> to vector<64x256xf32>
    %c0_27 = arith.constant 0 : index
    %c0_28 = arith.constant 0 : index
    %c0_29 = arith.constant 0 : index
    %82 = vector.load %arg2[%c0_27, %c0_28, %c0_29] : memref<1x64x256xf32, #tpu.memory_space<vmem>>, vector<1x64x256xf32>
    %83 = vector.shape_cast %82 : vector<1x64x256xf32> to vector<64x256xf32>
    %84 = arith.mulf %81, %83 : vector<64x256xf32>
    %85 = vector.extract_strided_slice %84 {offsets = [0, 0], sizes = [63, 256], strides = [1, 1]} : vector<64x256xf32> to vector<63x256xf32>
    %86 = vector.extract_strided_slice %84 {offsets = [1, 0], sizes = [63, 256], strides = [1, 1]} : vector<64x256xf32> to vector<63x256xf32>
    %87 = arith.addf %85, %86 : vector<63x256xf32>
    %88 = vector.extract_strided_slice %87 {offsets = [0, 0], sizes = [61, 256], strides = [1, 1]} : vector<63x256xf32> to vector<61x256xf32>
    %89 = vector.extract_strided_slice %87 {offsets = [2, 0], sizes = [61, 256], strides = [1, 1]} : vector<63x256xf32> to vector<61x256xf32>
    %90 = arith.addf %88, %89 : vector<61x256xf32>
    %91 = vector.extract_strided_slice %90 {offsets = [0, 0], sizes = [57, 256], strides = [1, 1]} : vector<61x256xf32> to vector<57x256xf32>
    %92 = vector.extract_strided_slice %90 {offsets = [4, 0], sizes = [57, 256], strides = [1, 1]} : vector<61x256xf32> to vector<57x256xf32>
    %93 = arith.addf %91, %92 : vector<57x256xf32>
    %94 = vector.extract_strided_slice %93 {offsets = [0, 0], sizes = [49, 256], strides = [1, 1]} : vector<57x256xf32> to vector<49x256xf32>
    %95 = vector.extract_strided_slice %93 {offsets = [8, 0], sizes = [49, 256], strides = [1, 1]} : vector<57x256xf32> to vector<49x256xf32>
    %96 = arith.addf %94, %95 : vector<49x256xf32>
    %97 = vector.extract_strided_slice %96 {offsets = [0, 0], sizes = [33, 256], strides = [1, 1]} : vector<49x256xf32> to vector<33x256xf32>
    %98 = vector.extract_strided_slice %96 {offsets = [16, 0], sizes = [33, 256], strides = [1, 1]} : vector<49x256xf32> to vector<33x256xf32>
    %99 = arith.addf %97, %98 : vector<33x256xf32>
    %cst_30 = arith.constant dense<0.000000e+00> : vector<33x132xf32>
    %100 = tpu.matmul %99, %0, %cst_30 {dimension_numbers = #tpu.dot_dimension_numbers<[1], [0], [0], [1], [0, 0, 1, 1], [], []>, precision = #tpu.contract_precision<fp32>} : vector<33x256xf32>, vector<256x132xf32>, vector<33x132xf32> -> vector<33x132xf32>
    %101 = arith.mulf %19, %37 : vector<33x132xf32>
    %102 = arith.mulf %19, %19 : vector<33x132xf32>
    %103 = arith.mulf %37, %37 : vector<33x132xf32>
    %104 = arith.addf %102, %103 : vector<33x132xf32>
    %cst_31 = arith.constant 1.024000e+03 : f32
    %105 = vector.broadcast %cst_31 : f32 to vector<33x132xf32>
    %106 = arith.mulf %105, %58 : vector<33x132xf32>
    %107 = arith.subf %106, %101 : vector<33x132xf32>
    %cst_32 = arith.constant 4.000000e+00 : f32
    %108 = vector.broadcast %cst_32 : f32 to vector<33x132xf32>
    %109 = arith.mulf %108, %107 : vector<33x132xf32>
    %110 = arith.mulf %109, %101 : vector<33x132xf32>
    %111 = arith.addf %79, %100 : vector<33x132xf32>
    %cst_33 = arith.constant 1.024000e+03 : f32
    %112 = vector.broadcast %cst_33 : f32 to vector<33x132xf32>
    %113 = arith.mulf %112, %111 : vector<33x132xf32>
    %114 = arith.subf %113, %104 : vector<33x132xf32>
    %115 = arith.mulf %114, %104 : vector<33x132xf32>
    %cst_34 = arith.constant 1.000000e+00 : f32
    %116 = vector.broadcast %cst_34 : f32 to vector<33x132xf32>
    %cst_35 = arith.constant 0.000000e+00 : f32
    %117 = vector.broadcast %cst_35 : f32 to vector<33x132xf32>
    %118 = arith.cmpf oeq, %114, %117 : vector<33x132xf32>
    %cst_36 = arith.constant 0.000000e+00 : f32
    %119 = vector.broadcast %cst_36 : f32 to vector<33x132xf32>
    %120 = arith.cmpf one, %104, %119 : vector<33x132xf32>
    %121 = arith.andi %118, %120 : vector<33x132xi1>
    %cst_37 = arith.constant 2.000000e+00 : f32
    %122 = vector.broadcast %cst_37 : f32 to vector<33x132xf32>
    %123 = arith.mulf %122, %101 : vector<33x132xf32>
    %124 = arith.divf %123, %104 : vector<33x132xf32>
    %125 = arith.select %121, %124, %116 : vector<33x132xi1>, vector<33x132xf32>
    %cst_38 = arith.constant 0.000000e+00 : f32
    %126 = vector.broadcast %cst_38 : f32 to vector<33x132xf32>
    %127 = arith.cmpf one, %115, %126 : vector<33x132xf32>
    %128 = arith.divf %110, %115 : vector<33x132xf32>
    %129 = arith.select %127, %128, %125 : vector<33x132xi1>, vector<33x132xf32>
    %cst_39 = arith.constant dense<0.000000e+00> : vector<132xf32>
    %130 = vector.multi_reduction <add>, %129, %cst_39 [0] : vector<33x132xf32> to vector<132xf32>
    %131 = vector.shape_cast %130 : vector<132xf32> to vector<1x132xf32>
    %cst_40 = arith.constant dense<0.000000e+00> : vector<1x4xf32>
    %132 = tpu.matmul %131, %1, %cst_40 {dimension_numbers = #tpu.dot_dimension_numbers<[1], [0], [0], [1], [0, 0, 1, 1], [], []>, precision = #tpu.contract_precision<fp32>} : vector<1x132xf32>, vector<132x4xf32>, vector<1x4xf32> -> vector<1x4xf32>
    %cst_41 = arith.constant 9.18273639E-4 : f32
    %133 = vector.broadcast %cst_41 : f32 to vector<1x4xf32>
    %134 = arith.mulf %132, %133 : vector<1x4xf32>
    %c0_42 = arith.constant 0 : index
    %c0_43 = arith.constant 0 : index
    %c0_44 = arith.constant 0 : index
    %135 = vector.load %arg5[%c0_42, %c0_43, %c0_44] : memref<1x1x4xf32, #tpu.memory_space<vmem>>, vector<1x1x4xf32>
    %136 = vector.shape_cast %135 : vector<1x1x4xf32> to vector<1x4xf32>
    %137 = vector.shape_cast %134 : vector<1x4xf32> to vector<1x1x4xf32>
    tpu.vector_store %arg5[%c0_42, %c0_43, %c0_44], %137 {strides = array<i32>} : memref<1x1x4xf32, #tpu.memory_space<vmem>>, vector<1x1x4xf32>,
    return
  }
  func.func @transform_0(%arg0: i32) -> (i32, i32, i32) {
    %c0_i32 = arith.constant 0 : i32
    %c0_i32_0 = arith.constant 0 : i32
    %c0_i32_1 = arith.constant 0 : i32
    return %arg0, %c0_i32, %c0_i32_0 : i32, i32, i32
  }
  func.func @transform_1(%arg0: i32) -> (i32, i32, i32) {
    %c0_i32 = arith.constant 0 : i32
    %c0_i32_0 = arith.constant 0 : i32
    %c0_i32_1 = arith.constant 0 : i32
    return %arg0, %c0_i32, %c0_i32_0 : i32, i32, i32
  }
  func.func @transform_2(%arg0: i32) -> (i32, i32) {
    %c0_i32 = arith.constant 0 : i32
    %c0_i32_0 = arith.constant 0 : i32
    %c0_i32_1 = arith.constant 0 : i32
    return %c0_i32, %c0_i32_0 : i32, i32
  }
  func.func @transform_3(%arg0: i32) -> (i32, i32) {
    %c0_i32 = arith.constant 0 : i32
    %c0_i32_0 = arith.constant 0 : i32
    %c0_i32_1 = arith.constant 0 : i32
    return %c0_i32, %c0_i32_0 : i32, i32
  }
  func.func @transform_4(%arg0: i32) -> (i32, i32, i32) {
    %c0_i32 = arith.constant 0 : i32
    %c0_i32_0 = arith.constant 0 : i32
    %c0_i32_1 = arith.constant 0 : i32
    return %arg0, %c0_i32, %c0_i32_0 : i32, i32, i32
  }
}

</mosaic_0001>

<bundles_post_ra>
// kernel: tpu_custom_call.1
= control target key start
LH: loop header
LB: loop body
LE: loop exit
PB: predicated region body
PF: predicated region fallthrough
CT: control target
= control target key end

     0   :  { %9 = vsyncpa [#allocation3], 0  ;;  %s17678_s0 = inlined_call_operand.vmem [shape: f32[2,64,256], index: 0, kind: input, shape index: {}]   ;;  %s17679_s1 = inlined_call_operand.vmem [shape: f32[2,64,256], index: 1, kind: input, shape index: {}]   ;;  %s17680_s2 = inlined_call_operand.vmem [shape: f32[256,132], index: 2, kind: input, shape index: {}]   ;;  %s17681_s3 = inlined_call_operand.vmem [shape: f32[132,4], index: 3, kind: input, shape index: {}]   ;;  %s17682_s4 = inlined_call_operand.hbm [shape: f32[2,1,4], index: 4, kind: output, shape index: {}]  }
   0x1   :  { %11 = vsyncpa [#allocation3 + $0x1], 0  ;;  %s12888_s15 = smov 0   ;;  %s12890_s16 = smov 0  }
   0x2   :  { %s12892_s17 = smov 0   ;;  %s12894_s18 = smov 0  }
   0x3 LB: > { %s12909_s19 = sadd.s32 4294967295, %s12858_s18   ;;  %s10333_s20 = sadd.s32 4294967294, %s12858_s18   ;;  %s12858_s18 = sphi %s12894_s18, %s20021_s18   ;;  %s12854_s17 = sphi %s12892_s17, %s20020_s17   ;;  %s12850_s16 = sphi %s12890_s16, %s20019_s16   ;;  %s12846_s15 = sphi %s12888_s15, %s20018_s15  }
   0x4   : > { %s12913_s21 = sadd.s32 1, %s12858_s18   ;;  %s118_s22 = sadd.s32 1, %s12854_s17 }
   0x5   : > { %s115_s23 = ssub.s32 %s12858_s18, %s12913_s21  ;;  %p128_p0 = scmp.ne.s32.totalorder %s12854_s17, %s12850_s16 }
   0x6   : > { %p116_p1 = scmp.eq.s32.totalorder %s115_s23, 0  ;;  %p129_p2 = scmp.eq.s32.totalorder %s12909_s19, 1 }
   0x7   : > { %p134_p3 = scmp.ne.s32.totalorder %s12850_s16, %s12846_s15  ;;  %p135_p4 = scmp.eq.s32.totalorder %s10333_s20, 1 }
   0x8   : > { %s12924_s24 = scalar_select %p116_p1, %s12854_s17, %s118_s22  }
   0x9   : > { %p12926_p5 = por %p129_p2, %p128_p0  ;;  %p12930_p6 = por %p135_p4, %p134_p3 }
   0xa   : > { %p10336_p7 = scmp.ge.s32.totalorder %s12858_s18, 1  ;;  %p175_p8 = scmp.lt.s32.totalorder %s12858_s18, 3 }
   0xc   : > { %p176_p9 = pnand %p10336_p7, %p175_p8 }
   0xe   : > { %179 = sbr.rel (%p176_p9) target bundleno = 1803 (0x70b), region = 36 }
  0x15   : > { %v216_v0 = vld [vmem:[%s17680_s2 + $0x8] sm:$0xff]  ;;  %v218_v1 = vld [vmem:[%s17680_s2 + $0x18] sm:$0xff]  ;;  %v215_v2 = vld [vmem:[%s17680_s2] sm:$0xff]  ;;  %p205_p10 = scmp.lt.s32.totalorder %s12909_s19, 1  ;;  %vm328_vm0 = vcmask 1046528   ;;  %vm407_vm1 = vcmask 1045504  }
  0x16   : > { %v573_v3 = vand.u32 4294901760, %v216_v0  ;;  %v577_v4 = vand.u32 4294901760, %v218_v1  ;;  %v217_v5 = vld [vmem:[%s17680_s2 + $0x10] sm:$0xff]  ;;  %v575_v6 = vand.u32 4294901760, %v215_v2  ;;  %v220_v7 = vld [vmem:[%s17680_s2 + $0x28] sm:$0xff]  ;;  %v222_v8 = vld [vmem:[%s17680_s2 + $0x38] sm:$0xff] }
  0x17   : > { %v579_v9 = vand.u32 4294901760, %v217_v5  ;;  %v581_v10 = vand.u32 4294901760, %v220_v7  ;;  %v585_v11 = vand.u32 4294901760, %v222_v8  ;;  %v219_v12 = vld [vmem:[%s17680_s2 + $0x20] sm:$0xff]  ;;  %v221_v13 = vld [vmem:[%s17680_s2 + $0x30] sm:$0xff]  ;;  %v224_v18 = vld [vmem:[%s17680_s2 + $0x48] sm:$0xff] }
  0x18   : > { %v12960_v14 = vpack.c.bf16 %v577_v4, %v573_v3  ;;  %v12962_v15 = vsub.f32 %v216_v0, %v573_v3  ;;  %v12964_v16 = vsub.f32 %v218_v1, %v577_v4  ;;  %v12966_v17 = vsub.f32 %v215_v2, %v575_v6  ;;  %v226_v19 = vld [vmem:[%s17680_s2 + $0x58] sm:$0xff]  ;;  %v223_v24 = vld [vmem:[%s17680_s2 + $0x40] sm:$0xff]  ;;  %v225_v29 = vld [vmem:[%s17680_s2 + $0x50] sm:$0xff]  ;;  %s13350_s29 = scalar_select %p205_p10, %s12909_s19, 1 }
  0x19   : > { %v12974_v20 = vpack.c.bf16 %v579_v9, %v575_v6  ;;  %v12976_v21 = vsub.f32 %v217_v5, %v579_v9  ;;  %v12978_v22 = vpack.c.bf16 %v585_v11, %v581_v10  ;;  %v583_v23 = vand.u32 4294901760, %v219_v12  ;;  %v228_v34 = vld [vmem:[%s17680_s2 + $0x68] sm:$0xff]  ;;  %v230_v35 = vld [vmem:[%s17680_s2 + $0x78] sm:$0xff]  ;;  %v227_v40 = vld [vmem:[%s17680_s2 + $0x60] sm:$0xff] }
  0x1a   : > { %18602 = vst [vmem:[#allocation5_spill] sm:$0xff] %v12960_v14  ;;  %18603 = vst [vmem:[#allocation6_spill] sm:$0xff] %v12962_v15  ;;  %10347 = vmatprep.subr.bf16.mxu0 %v12960_v14  ;;  %v12986_v25 = vpack.c.bf16 %v12964_v16, %v12962_v15  ;;  %v587_v26 = vand.u32 4294901760, %v221_v13  ;;  %v12988_v27 = vsub.f32 %v220_v7, %v581_v10  ;;  %v589_v32 = vand.u32 4294901760, %v224_v18  ;;  %v229_v45 = vld [vmem:[%s17680_s2 + $0x70] sm:$0xff]  ;;  %v232_v50 = vld [vmem:[%s17680_s2 + $0x88] sm:$0xff] }
  0x1b   : > { %18604 = vst [vmem:[#allocation7_spill] sm:$0xff] %v12964_v16  ;;  %18605 = vst [vmem:[#allocation8_spill] sm:$0xff] %v12966_v17  ;;  %v12990_v28 = vsub.f32 %v222_v8, %v585_v11  ;;  %10349 = vmatpush1.bf16.msra.mxu0 %v12974_v20  ;;  %v12998_v30 = vpack.c.bf16 %v12976_v21, %v12966_v17  ;;  %v13000_v31 = vsub.f32 %v219_v12, %v583_v23  ;;  %v234_v51 = vld [vmem:[%s17680_s2 + $0x98] sm:$0xff]  ;;  %v231_v56 = vld [vmem:[%s17680_s2 + $0x80] sm:$0xff]  ;;  %s10344_s22 = sshll.u32 %s13350_s29, 7  ;;  %vm486_vm2 = vcmask 1043456  }
  0x1c   : > { %18606 = vst [vmem:[#allocation9_spill] sm:$0xff] %v12974_v20  ;;  %18607 = vst [vmem:[#allocation10_spill] sm:$0xff] %v12976_v21  ;;  %v593_v33 = vand.u32 4294901760, %v226_v19  ;;  %10859 = vmatprep.subr.bf16.mxu1 %v12986_v25  ;;  %10351 = vmatprep.subr.bf16.mxu0 %v12978_v22  ;;  %v13010_v36 = vpack.c.bf16 %v587_v26, %v583_v23  ;;  %v13016_v38 = vsub.f32 %v221_v13, %v587_v26  ;;  %v233_v61 = vld [vmem:[%s17680_s2 + $0x90] sm:$0xff]  ;;  %v236_v2 = vld [vmem:[%s17680_s2 + $0xa8] sm:$0xff]  ;;  %s13441_s11 = scalar_lea.vmem %s17678_s0, %s10344_s22  ;;  %s13652_s28 = scalar_lea.vmem %s17679_s1, %s10344_s22 }
  0x1d   : > { %18608 = vst [vmem:[#allocation11_spill] sm:$0xff] %v12978_v22  ;;  %18609 = vst [vmem:[#allocation12_spill] sm:$0xff] %v12986_v25  ;;  %v13014_v37 = vpack.c.bf16 %v12990_v28, %v12988_v27  ;;  %v591_v39 = vand.u32 4294901760, %v223_v24  ;;  %10861 = vmatpush1.bf16.msra.mxu1 %v12998_v30  ;;  %v595_v42 = vand.u32 4294901760, %v225_v29  ;;  %v13024_v43 = vsub.f32 %v224_v18, %v589_v32  ;;  %v238_v3 = vld [vmem:[%s17680_s2 + $0xb8] sm:$0xff]  ;;  %v235_v8 = vld [vmem:[%s17680_s2 + $0xa0] sm:$0xff] }
  0x1e   : > { %18610 = vst [vmem:[#allocation13_spill] sm:$0xff] %v12998_v30  ;;  %18611 = vst [vmem:[#allocation14_spill] sm:$0xff] %v13010_v36  ;;  %v13022_v41 = vpack.c.bf16 %v593_v33, %v589_v32  ;;  %v13026_v44 = vsub.f32 %v226_v19, %v593_v33  ;;  %v13034_v46 = vpack.c.bf16 %v13016_v38, %v13000_v31  ;;  %v597_v48 = vand.u32 4294901760, %v228_v34  ;;  %v237_v13 = vld [vmem:[%s17680_s2 + $0xb0] sm:$0xff]  ;;  %v240_v26 = vld [vmem:[%s17680_s2 + $0xc8] sm:$0xff]  ;;  %s203_s29 = sand.u32 1, %s12850_s16  }
  0x1f   : > { %18612 = vst [vmem:[#allocation15_spill] sm:$0xff] %v13014_v37  ;;  %18614 = vst [vmem:[#allocation17_spill] sm:$0xff] %v13024_v43  ;;  %10863 = vmatprep.subr.bf16.mxu1 %v13014_v37  ;;  %v13036_v47 = vsub.f32 %v223_v24, %v591_v39  ;;  %v601_v49 = vand.u32 4294901760, %v230_v35  ;;  %10353 = vmatpush1.bf16.msra.mxu0 %v13010_v36  ;;  %v13045_v52 = vpack.c.bf16 %v595_v42, %v591_v39  ;;  %v239_v39 = vld [vmem:[%s17680_s2 + $0xc0] sm:$0xff]  ;;  %v249_v30 = vld [vmem:[%s17680_s2 + $0x110] sm:$0xff]  ;;  %s10341_s22 = sshll.u32 %s12909_s19, 4 }
  0x20   : > { %18613 = vst [vmem:[#allocation16_spill] sm:$0xff] %v13022_v41  ;;  %18615 = vst [vmem:[#allocation18_spill] sm:$0xff] %v13026_v44  ;;  %v13049_v53 = vpack.c.bf16 %v13026_v44, %v13024_v43  ;;  %v13051_v54 = vsub.f32 %v225_v29, %v595_v42  ;;  %v599_v55 = vand.u32 4294901760, %v227_v40  ;;  %10355 = vmatprep.subr.bf16.mxu0 %v13022_v41  ;;  %v603_v58 = vand.u32 4294901760, %v229_v45  ;;  %v242_v29 = vld [vmem:[%s17680_s2 + $0xd8] sm:$0xff]  ;;  %s204_s30 = scalar_lea.vmem [#allocation2], %s203_s29  ;;  %s17635_s8 = scalar_lea.hbm %s17682_s4, %s10341_s22 }
  0x21   : > { %18616 = vst [vmem:[#allocation19_spill] sm:$0xff] %v13034_v46  ;;  %18617 = vst [vmem:[#allocation20_spill] sm:$0xff] %v13036_v47  ;;  %v13057_v57 = vpack.c.bf16 %v601_v49, %v597_v48  ;;  %v13059_v59 = vsub.f32 %v228_v34, %v597_v48  ;;  %v13061_v60 = vsub.f32 %v230_v35, %v601_v49  ;;  %10865 = vmatpush1.bf16.msra.mxu1 %v13034_v46  ;;  %v241_v49 = vld [vmem:[%s17680_s2 + $0xd0] sm:$0xff]  ;;  %s10266_s5 = sshll.u32 %s204_s30, 4  ;;  %s10254_s9 = scalar_lea.sflag [#allocation3], %s203_s29  ;;  %s17637_s5 = int_to_ptr.vmem [resolvable:$true] %s10266_s5 }
  0x22   : > { %18618 = vst [vmem:[#allocation21_spill] sm:$0xff] %v13045_v52  ;;  %18619 = vst [vmem:[#allocation22_spill] sm:$0xff] %v13049_v53  ;;  %v13069_v62 = vpack.c.bf16 %v13051_v54, %v13036_v47  ;;  %v13071_v63 = vsub.f32 %v227_v40, %v599_v55  ;;  %v605_v0 = vand.u32 4294901760, %v232_v50  ;;  %v609_v1 = vand.u32 4294901760, %v234_v51  ;;  %10867 = vmatprep.subr.bf16.mxu1 %v13049_v53  ;;  %s12796_s10 = scalar_lea.vmem %s17637_s5, 16  ;;  %s12862_s19 = smov [#allocation2]  }
  0x23   : > { %18620 = vst [vmem:[#allocation23_spill] sm:$0xff] %v13051_v54  ;;  %18621 = vst [vmem:[#allocation24_spill] sm:$0xff] %v13057_v57  ;;  %v13080_v4 = vpack.c.bf16 %v603_v58, %v599_v55  ;;  %v13084_v5 = vpack.c.bf16 %v13061_v60, %v13059_v59  ;;  %v13086_v6 = vsub.f32 %v229_v45, %v603_v58  ;;  %v607_v7 = vand.u32 4294901760, %v231_v56  ;;  %v244_v58 = vld [vmem:[%s17680_s2 + $0xe8] sm:$0xff]  ;;  %p12797_p11 = scmp.ne.s32.totalorder %s17637_s5, %s12796_s10 }
  0x24   : > { %18622 = vst [vmem:[#allocation25_spill] sm:$0xff] %v13059_v59  ;;  %18623 = vst [vmem:[#allocation26_spill] sm:$0xff] %v13061_v60  ;;  %10357 = vmatpush1.bf16.msra.mxu0 %v13045_v52  ;;  %v13092_v9 = vpack.c.bf16 %v609_v1, %v605_v0  ;;  %v611_v10 = vand.u32 4294901760, %v233_v61  ;;  %v13094_v11 = vsub.f32 %v232_v50, %v605_v0  ;;  %v613_v23 = vand.u32 4294901760, %v236_v2 }
  0x25   : > { %18624 = vst [vmem:[#allocation27_spill] sm:$0xff] %v13069_v62  ;;  %18625 = vst [vmem:[#allocation28_spill] sm:$0xff] %v13071_v63  ;;  %v13096_v12 = vsub.f32 %v234_v51, %v609_v1  ;;  %10359 = vmatprep.subr.bf16.mxu0 %v13057_v57  ;;  %v13104_v18 = vpack.c.bf16 %v13086_v6, %v13071_v63  ;;  %v13106_v19 = vsub.f32 %v231_v56, %v607_v7  ;;  %p12798_p12 = pnand %p12797_p11, %p12926_p5 }
  0x26   : > { %18626 = vst [vmem:[#allocation29_spill] sm:$0xff] %v13080_v4  ;;  %18627 = vst [vmem:[#allocation30_spill] sm:$0xff] %v13084_v5  ;;  %v617_v24 = vand.u32 4294901760, %v238_v3  ;;  %10869 = vmatpush1.bf16.msra.mxu1 %v13069_v62  ;;  %v13115_v32 = vpack.c.bf16 %v611_v10, %v607_v7  ;;  %v13121_v34 = vsub.f32 %v233_v61, %v611_v10  ;;  %v615_v35 = vand.u32 4294901760, %v235_v8  ;;  %v246_v61 = vld [vmem:[%s17680_s2 + $0xf8] sm:$0xff]  ;;  %v243_v7 = vld [vmem:[%s17680_s2 + $0xe0] sm:$0xff] }
  0x27   : > { %18628 = vst [vmem:[#allocation31_spill] sm:$0xff] %v13086_v6  ;;  %18629 = vst [vmem:[#allocation32_spill] sm:$0xff] %v13092_v9  ;;  %v13119_v33 = vpack.c.bf16 %v13096_v12, %v13094_v11  ;;  %10871 = vmatprep.subr.bf16.mxu1 %v13084_v5  ;;  %v619_v42 = vand.u32 4294901760, %v237_v13  ;;  %v13129_v45 = vsub.f32 %v236_v2, %v613_v23  ;;  %v621_v55 = vand.u32 4294901760, %v240_v26  ;;  %v247_v62 = vld [vmem:[%s17680_s2 + $0x100] sm:$0xff]  ;;  %p12799_p13 = pneg %p12798_p12 }
  0x28   : > { %18630 = vst [vmem:[#allocation33_spill] sm:$0xff] %v13094_v11  ;;  %18631 = vst [vmem:[#allocation34_spill] sm:$0xff] %v13096_v12  ;;  %v13127_v40 = vpack.c.bf16 %v617_v24, %v613_v23  ;;  %v13131_v48 = vsub.f32 %v238_v3, %v617_v24  ;;  %10361 = vmatpush1.bf16.msra.mxu0 %v13080_v4  ;;  %v13139_v50 = vpack.c.bf16 %v13121_v34, %v13106_v19  ;;  %v307_v12 = vld [vmem:[%s13441_s11 + $0x58] sm:$0xff]  ;;  %v13531_v11 = vld [vmem:[%s13441_s11] sm:$0xff] }
  0x29   : > { %18632 = vst [vmem:[#allocation35_spill] sm:$0xff] %v13104_v18  ;;  %18633 = vst [vmem:[#allocation36_spill] sm:$0xff] %v13106_v19  ;;  %v13141_v51 = vsub.f32 %v235_v8, %v615_v35  ;;  %v625_v56 = vand.u32 4294901760, %v242_v29  ;;  %10363 = vmatprep.subr.bf16.mxu0 %v13092_v9  ;;  %v13150_v0 = vpack.c.bf16 %v619_v42, %v615_v35  ;;  %v623_v3 = vand.u32 4294901760, %v239_v39  ;;  %v245_v35 = vld [vmem:[%s17680_s2 + $0xf0] sm:$0xff] }
  0x2a   : > { %18634 = vst [vmem:[#allocation37_spill] sm:$0xff] %v13115_v32  ;;  %18635 = vst [vmem:[#allocation38_spill] sm:$0xff] %v13119_v33  ;;  %v13154_v1 = vpack.c.bf16 %v13131_v48, %v13129_v45  ;;  %v13156_v2 = vsub.f32 %v237_v13, %v619_v42  ;;  %10873 = vmatpush1.bf16.msra.mxu1 %v13104_v18  ;;  %v627_v10 = vand.u32 4294901760, %v241_v49  ;;  %v629_v18 = vand.u32 4294901760, %v244_v58 }
  0x2b   : > { %18636 = vst [vmem:[#allocation39_spill] sm:$0xff] %v13121_v34  ;;  %18637 = vst [vmem:[#allocation40_spill] sm:$0xff] %v13127_v40  ;;  %v13162_v8 = vpack.c.bf16 %v625_v56, %v621_v55  ;;  %v13164_v23 = vsub.f32 %v240_v26, %v621_v55  ;;  %v13166_v24 = vsub.f32 %v242_v29, %v625_v56  ;;  %10875 = vmatprep.subr.bf16.mxu1 %v13119_v33  ;;  %v248_v26 = vld [vmem:[%s17680_s2 + $0x108] sm:$0xff]  ;;  %v250_v29 = vld [vmem:[%s17680_s2 + $0x118] sm:$0xff] }
  0x2c   : > { %18638 = vst [vmem:[#allocation41_spill] sm:$0xff] %v13129_v45  ;;  %18639 = vst [vmem:[#allocation42_spill] sm:$0xff] %v13131_v48  ;;  %v13174_v13 = vpack.c.bf16 %v13156_v2, %v13141_v51  ;;  %v13176_v42 = vsub.f32 %v239_v39, %v623_v3  ;;  %v633_v5 = vand.u32 4294901760, %v246_v61  ;;  %10365 = vmatpush1.bf16.msra.mxu0 %v13115_v32  ;;  %v631_v33 = vand.u32 4294901760, %v243_v7 }
  0x2d   : > { %18640 = vst [vmem:[#allocation43_spill] sm:$0xff] %v13139_v50  ;;  %18641 = vst [vmem:[#allocation44_spill] sm:$0xff] %v13141_v51  ;;  %v13185_v55 = vpack.c.bf16 %v627_v10, %v623_v3  ;;  %v13189_v56 = vpack.c.bf16 %v13166_v24, %v13164_v23  ;;  %v13191_v39 = vsub.f32 %v241_v49, %v627_v10  ;;  %10367 = vmatprep.subr.bf16.mxu0 %v13127_v40 }
  0x2e   : > { %18642 = vst [vmem:[#allocation45_spill] sm:$0xff] %v13150_v0  ;;  %18643 = vst [vmem:[#allocation46_spill] sm:$0xff] %v13154_v1  ;;  %v13197_v53 = vpack.c.bf16 %v633_v5, %v629_v18  ;;  %v635_v46 = vand.u32 4294901760, %v245_v35  ;;  %v13199_v37 = vsub.f32 %v244_v58, %v629_v18  ;;  %v13201_v3 = vsub.f32 %v246_v61, %v633_v5  ;;  %v252_v18 = vld [vmem:[%s17680_s2 + $0x128] sm:$0xff]  ;;  %v254_v5 = vld [vmem:[%s17680_s2 + $0x138] sm:$0xff] }
  0x2f   : > { %18644 = vst [vmem:[#allocation47_spill] sm:$0xff] %v13156_v2  ;;  %18645 = vst [vmem:[#allocation48_spill] sm:$0xff] %v13162_v8  ;;  %10877 = vmatpush1.bf16.msra.mxu1 %v13139_v50  ;;  %v13209_v49 = vpack.c.bf16 %v13191_v39, %v13176_v42  ;;  %v13211_v10 = vsub.f32 %v243_v7, %v631_v33  ;;  %v637_v25 = vand.u32 4294901760, %v248_v26  ;;  %v639_v50 = vand.u32 4294901760, %v247_v62 }
  0x30   : > { %18646 = vst [vmem:[#allocation49_spill] sm:$0xff] %v13164_v23  ;;  %18647 = vst [vmem:[#allocation50_spill] sm:$0xff] %v13166_v24  ;;  %v641_v24 = vand.u32 4294901760, %v250_v29  ;;  %10879 = vmatprep.subr.bf16.mxu1 %v13154_v1  ;;  %v13220_v58 = vpack.c.bf16 %v635_v46, %v631_v33  ;;  %v13224_v61 = vpack.c.bf16 %v13201_v3, %v13199_v37  ;;  %10369 = vmatpush1.bf16.msra.mxu0 %v13150_v0  ;;  %v253_v1 = vld [vmem:[%s17680_s2 + $0x130] sm:$0xff] }
  0x31   : > { %18648 = vst [vmem:[#allocation51_spill] sm:$0xff] %v13174_v13  ;;  %18649 = vst [vmem:[#allocation52_spill] sm:$0xff] %v13176_v42  ;;  %v13226_v7 = vsub.f32 %v245_v35, %v635_v46  ;;  %v643_v23 = vand.u32 4294901760, %v249_v30  ;;  %v13234_v2 = vsub.f32 %v248_v26, %v637_v25  ;;  %10371 = vmatprep.subr.bf16.mxu0 %v13162_v8  ;;  %v651_v0 = vand.u32 4294901760, %v253_v1 }
  0x32   : > { %18650 = vst [vmem:[#allocation53_spill] sm:$0xff] %v13185_v55  ;;  %18651 = vst [vmem:[#allocation54_spill] sm:$0xff] %v13189_v56  ;;  %v13232_v42 = vpack.c.bf16 %v641_v24, %v637_v25  ;;  %v13236_v33 = vsub.f32 %v250_v29, %v641_v24  ;;  %v13246_v35 = vsub.f32 %v247_v62, %v639_v50  ;;  %v256_v25 = vld [vmem:[%s17680_s2 + $0x148] sm:$0xff]  ;;  %v258_v24 = vld [vmem:[%s17680_s2 + $0x158] sm:$0xff] }
  0x33   : > { %18652 = vst [vmem:[#allocation55_spill] sm:$0xff] %v13191_v39  ;;  %18653 = vst [vmem:[#allocation56_spill] sm:$0xff] %v13197_v53  ;;  %v251_v39 = vld [vmem:[%s17680_s2 + $0x120] sm:$0xff]  ;;  %v13244_v46 = vpack.c.bf16 %v13226_v7, %v13211_v10  ;;  %10881 = vmatpush1.bf16.msra.mxu1 %v13174_v13  ;;  %v13255_v26 = vpack.c.bf16 %v643_v23, %v639_v50  ;;  %v13261_v62 = vsub.f32 %v249_v30, %v643_v23  ;;  %v257_v30 = vld [vmem:[%s17680_s2 + $0x150] sm:$0xff] }
  0x34   : > { %18654 = vst [vmem:[#allocation57_spill] sm:$0xff] %v13199_v37  ;;  %18655 = vst [vmem:[#allocation58_spill] sm:$0xff] %v13201_v3  ;;  %v645_v3 = vand.u32 4294901760, %v252_v18  ;;  %v649_v37 = vand.u32 4294901760, %v254_v5  ;;  %v13259_v29 = vpack.c.bf16 %v13236_v33, %v13234_v2  ;;  %10883 = vmatprep.subr.bf16.mxu1 %v13189_v56  ;;  %10373 = vmatpush1.bf16.msra.mxu0 %v13185_v55  ;;  %v653_v56 = vand.u32 4294901760, %v256_v25 }
  0x35   : > { %18656 = vst [vmem:[#allocation59_spill] sm:$0xff] %v13209_v49  ;;  %18657 = vst [vmem:[#allocation60_spill] sm:$0xff] %v13211_v10  ;;  %v255_v10 = vld [vmem:[%s17680_s2 + $0x140] sm:$0xff]  ;;  %v13279_v23 = vpack.c.bf16 %v13261_v62, %v13246_v35  ;;  %10375 = vmatprep.subr.bf16.mxu0 %v13197_v53  ;;  %v659_v55 = vand.u32 4294901760, %v257_v30 }
  0x36   : > { %18658 = vst [vmem:[#allocation61_spill] sm:$0xff] %v13220_v58  ;;  %18659 = vst [vmem:[#allocation62_spill] sm:$0xff] %v13224_v61  ;;  %v13267_v8 = vpack.c.bf16 %v649_v37, %v645_v3  ;;  %v13269_v51 = vsub.f32 %v252_v18, %v645_v3  ;;  %v13271_v50 = vsub.f32 %v254_v5, %v649_v37  ;;  %v260_v3 = vld [vmem:[%s17680_s2 + $0x168] sm:$0xff]  ;;  %v262_v37 = vld [vmem:[%s17680_s2 + $0x178] sm:$0xff] }
  0x37   : > { %18660 = vst [vmem:[#allocation63_spill] sm:$0xff] %v13226_v7  ;;  %18661 = vst [vmem:[#allocation64_spill] sm:$0xff] %v13232_v42  ;;  %v647_v7 = vand.u32 4294901760, %v251_v39  ;;  %10885 = vmatpush1.bf16.msra.mxu1 %v13209_v49  ;;  %v13305_v53 = vsub.f32 %v256_v25, %v653_v56  ;;  %v661_v49 = vand.u32 4294901760, %v260_v3 }
  0x38   : > { %18662 = vst [vmem:[#allocation65_spill] sm:$0xff] %v13234_v2  ;;  %18663 = vst [vmem:[#allocation66_spill] sm:$0xff] %v13236_v33  ;;  %v657_v33 = vand.u32 4294901760, %v258_v24  ;;  %v13294_v5 = vpack.c.bf16 %v13271_v50, %v13269_v51  ;;  %10887 = vmatprep.subr.bf16.mxu1 %v13224_v61  ;;  %10377 = vmatpush1.bf16.msra.mxu0 %v13220_v58 }
  0x39   : > { %18664 = vst [vmem:[#allocation67_spill] sm:$0xff] %v13244_v46  ;;  %18665 = vst [vmem:[#allocation68_spill] sm:$0xff] %v13246_v35  ;;  %v13281_v13 = vsub.f32 %v251_v39, %v647_v7  ;;  %v13290_v18 = vpack.c.bf16 %v651_v0, %v647_v7  ;;  %v13296_v39 = vsub.f32 %v253_v1, %v651_v0  ;;  %v259_v35 = vld [vmem:[%s17680_s2 + $0x160] sm:$0xff]  ;;  %v261_v0 = vld [vmem:[%s17680_s2 + $0x170] sm:$0xff]  ;;  %10379 = vmatprep.subr.bf16.mxu0 %v13232_v42 }
  0x3a   : > { %18666 = vst [vmem:[#allocation69_spill] sm:$0xff] %v13255_v26  ;;  %18667 = vst [vmem:[#allocation70_spill] sm:$0xff] %v13259_v29  ;;  %v13303_v2 = vpack.c.bf16 %v657_v33, %v653_v56  ;;  %v13307_v7 = vsub.f32 %v258_v24, %v657_v33  ;;  %v264_v56 = vld [vmem:[%s17680_s2 + $0x188] sm:$0xff]  ;;  %v266_v33 = vld [vmem:[%s17680_s2 + $0x198] sm:$0xff]  ;;  %v13332_v24 = vsub.f32 %v257_v30, %v659_v55  ;;  %v663_v61 = vand.u32 4294901760, %v259_v35 }
  0x3b   : > { %18668 = vst [vmem:[#allocation71_spill] sm:$0xff] %v13261_v62  ;;  %18669 = vst [vmem:[#allocation72_spill] sm:$0xff] %v13267_v8  ;;  %v655_v62 = vand.u32 4294901760, %v255_v10  ;;  %v13315_v1 = vpack.c.bf16 %v13296_v39, %v13281_v13  ;;  %v667_v40 = vand.u32 4294901760, %v261_v0  ;;  %v13340_v48 = vsub.f32 %v260_v3, %v661_v49  ;;  %10889 = vmatpush1.bf16.msra.mxu1 %v13244_v46  ;;  %v270_v3 = vld [vmem:[%s17680_s2 + $0x1b8] sm:$0xff] }
  0x3c   : > { %18670 = vst [vmem:[#allocation73_spill] sm:$0xff] %v13269_v51  ;;  %18671 = vst [vmem:[#allocation74_spill] sm:$0xff] %v13271_v50  ;;  %v665_v51 = vand.u32 4294901760, %v262_v37  ;;  %v13357_v30 = vsub.f32 %v259_v35, %v663_v61  ;;  %10891 = vmatprep.subr.bf16.mxu1 %v13259_v29  ;;  %10381 = vmatpush1.bf16.msra.mxu0 %v13255_v26  ;;  %v681_v26 = vand.u32 4294901760, %v270_v3 }
  0x3d   : > { %18672 = vst [vmem:[#allocation75_spill] sm:$0xff] %v13279_v23  ;;  %18673 = vst [vmem:[#allocation76_spill] sm:$0xff] %v13281_v13  ;;  %v13317_v50 = vsub.f32 %v255_v10, %v655_v62  ;;  %v13326_v25 = vpack.c.bf16 %v659_v55, %v655_v62  ;;  %v13330_v10 = vpack.c.bf16 %v13307_v7, %v13305_v53  ;;  %10383 = vmatprep.subr.bf16.mxu0 %v13267_v8 }
  0x3e   : > { %18674 = vst [vmem:[#allocation77_spill] sm:$0xff] %v13290_v18  ;;  %18675 = vst [vmem:[#allocation78_spill] sm:$0xff] %v13294_v5  ;;  %v13338_v13 = vpack.c.bf16 %v665_v51, %v661_v49  ;;  %v13342_v62 = vsub.f32 %v262_v37, %v665_v51  ;;  %v673_v49 = vand.u32 4294901760, %v266_v33  ;;  %v268_v51 = vld [vmem:[%s17680_s2 + $0x1a8] sm:$0xff]  ;;  %v13366_v37 = vpack.c.bf16 %v667_v40, %v663_v61 }
  0x3f   : > { %18676 = vst [vmem:[#allocation79_spill] sm:$0xff] %v13296_v39  ;;  %18677 = vst [vmem:[#allocation80_spill] sm:$0xff] %v13303_v2  ;;  %v263_v39 = vld [vmem:[%s17680_s2 + $0x180] sm:$0xff]  ;;  %v13355_v55 = vpack.c.bf16 %v13332_v24, %v13317_v50  ;;  %v13372_v35 = vsub.f32 %v261_v0, %v667_v40  ;;  %v269_v40 = vld [vmem:[%s17680_s2 + $0x1b0] sm:$0xff]  ;;  %10893 = vmatpush1.bf16.msra.mxu1 %v13279_v23 }
  0x40   : > { %18678 = vst [vmem:[#allocation81_spill] sm:$0xff] %v13305_v53  ;;  %18679 = vst [vmem:[#allocation82_spill] sm:$0xff] %v13307_v7  ;;  %v265_v7 = vld [vmem:[%s17680_s2 + $0x190] sm:$0xff]  ;;  %v669_v53 = vand.u32 4294901760, %v264_v56  ;;  %v13370_v46 = vpack.c.bf16 %v13342_v62, %v13340_v48  ;;  %v13382_v61 = vsub.f32 %v266_v33, %v673_v49  ;;  %10895 = vmatprep.subr.bf16.mxu1 %v13294_v5  ;;  %v683_v32 = vand.u32 4294901760, %v269_v40 }
  0x41   : > { %18680 = vst [vmem:[#allocation83_spill] sm:$0xff] %v13315_v1  ;;  %18681 = vst [vmem:[#allocation84_spill] sm:$0xff] %v13317_v50  ;;  %v267_v50 = vld [vmem:[%s17680_s2 + $0x1a0] sm:$0xff]  ;;  %v675_v58 = vand.u32 4294901760, %v265_v7  ;;  %v13390_v0 = vpack.c.bf16 %v13372_v35, %v13357_v30  ;;  %10385 = vmatpush1.bf16.msra.mxu0 %v13290_v18 }
  0x42   : > { %18682 = vst [vmem:[#allocation85_spill] sm:$0xff] %v13326_v25  ;;  %18683 = vst [vmem:[#allocation86_spill] sm:$0xff] %v13330_v10  ;;  %v13378_v42 = vpack.c.bf16 %v673_v49, %v669_v53  ;;  %v13380_v29 = vsub.f32 %v264_v56, %v669_v53  ;;  %v272_v53 = vld [vmem:[%s17680_s2 + $0x1c8] sm:$0xff]  ;;  %v274_v56 = vld [vmem:[%s17680_s2 + $0x1d8] sm:$0xff]  ;;  %10387 = vmatprep.subr.bf16.mxu0 %v13303_v2 }
  0x43   : > { %18684 = vst [vmem:[#allocation87_spill] sm:$0xff] %v13332_v24  ;;  %18685 = vst [vmem:[#allocation88_spill] sm:$0xff] %v13338_v13  ;;  %v671_v24 = vand.u32 4294901760, %v263_v39  ;;  %v13408_v49 = vsub.f32 %v265_v7, %v675_v58  ;;  %v685_v5 = vand.u32 4294901760, %v272_v53  ;;  %10897 = vmatpush1.bf16.msra.mxu1 %v13315_v1 }
  0x44   : > { %18686 = vst [vmem:[#allocation89_spill] sm:$0xff] %v13340_v48  ;;  %18687 = vst [vmem:[#allocation90_spill] sm:$0xff] %v13342_v62  ;;  %v677_v48 = vand.u32 4294901760, %v268_v51  ;;  %10899 = vmatprep.subr.bf16.mxu1 %v13330_v10 }
  0x45   : > { %18688 = vst [vmem:[#allocation91_spill] sm:$0xff] %v13355_v55  ;;  %18689 = vst [vmem:[#allocation92_spill] sm:$0xff] %v13357_v30  ;;  %v13392_v62 = vsub.f32 %v263_v39, %v671_v24  ;;  %v13402_v33 = vpack.c.bf16 %v675_v58, %v671_v24  ;;  %v13406_v39 = vpack.c.bf16 %v13382_v61, %v13380_v29  ;;  %v271_v30 = vld [vmem:[%s17680_s2 + $0x1c0] sm:$0xff]  ;;  %v273_v58 = vld [vmem:[%s17680_s2 + $0x1d0] sm:$0xff]  ;;  %10389 = vmatpush1.bf16.msra.mxu0 %v13326_v25 }
  0x46   : > { %18690 = vst [vmem:[#allocation93_spill] sm:$0xff] %v13366_v37  ;;  %18691 = vst [vmem:[#allocation94_spill] sm:$0xff] %v13370_v46  ;;  %v13414_v8 = vpack.c.bf16 %v681_v26, %v677_v48  ;;  %v13416_v23 = vsub.f32 %v268_v51, %v677_v48  ;;  %v13418_v24 = vsub.f32 %v270_v3, %v681_v26  ;;  %v276_v48 = vld [vmem:[%s17680_s2 + $0x1e8] sm:$0xff]  ;;  %v278_v26 = vld [vmem:[%s17680_s2 + $0x1f8] sm:$0xff]  ;;  %v691_v2 = vand.u32 4294901760, %v273_v58 }
  0x47   : > { %18692 = vst [vmem:[#allocation95_spill] sm:$0xff] %v13372_v35  ;;  %18693 = vst [vmem:[#allocation96_spill] sm:$0xff] %v13378_v42  ;;  %v679_v35 = vand.u32 4294901760, %v267_v50  ;;  %v13426_v7 = vpack.c.bf16 %v13408_v49, %v13392_v62  ;;  %v13450_v3 = vsub.f32 %v269_v40, %v683_v32  ;;  %v693_v1 = vand.u32 4294901760, %v276_v48  ;;  %10391 = vmatprep.subr.bf16.mxu0 %v13338_v13  ;;  %v305_v25 = vld [vmem:[%s13441_s11 + $0x48] sm:$0xff] }
  0x48   : > { %18694 = vst [vmem:[#allocation97_spill] sm:$0xff] %v13380_v29  ;;  %18695 = vst [vmem:[#allocation98_spill] sm:$0xff] %v13382_v61  ;;  %v689_v29 = vand.u32 4294901760, %v274_v56  ;;  %v13448_v51 = vpack.c.bf16 %v13418_v24, %v13416_v23  ;;  %v13481_v10 = vsub.f32 %v273_v58, %v691_v2  ;;  %10901 = vmatpush1.bf16.msra.mxu1 %v13355_v55 }
  0x49   : > { %18696 = vst [vmem:[#allocation99_spill] sm:$0xff] %v13390_v0  ;;  %18697 = vst [vmem:[#allocation100_spill] sm:$0xff] %v13392_v62  ;;  %v13428_v61 = vsub.f32 %v267_v50, %v679_v35  ;;  %v13444_v50 = vpack.c.bf16 %v683_v32, %v679_v35  ;;  %v275_v62 = vld [vmem:[%s17680_s2 + $0x1e0] sm:$0xff]  ;;  %v13458_v35 = vsub.f32 %v272_v53, %v685_v5  ;;  %v277_v32 = vld [vmem:[%s17680_s2 + $0x1f0] sm:$0xff]  ;;  %10903 = vmatprep.subr.bf16.mxu1 %v13370_v46 }
  0x4a   : > { %18698 = vst [vmem:[#allocation101_spill] sm:$0xff] %v13402_v33  ;;  %18699 = vst [vmem:[#allocation102_spill] sm:$0xff] %v13406_v39  ;;  %v13456_v18 = vpack.c.bf16 %v689_v29, %v685_v5  ;;  %v13460_v45 = vsub.f32 %v274_v56, %v689_v29  ;;  %v297_v5 = vld [vmem:[%s13441_s11 + $0x8] sm:$0xff]  ;;  %v299_v29 = vld [vmem:[%s13441_s11 + $0x18] sm:$0xff]  ;;  %v699_v34 = vand.u32 4294901760, %v277_v32  ;;  %v13487_v9 = vsub.f32 %v276_v48, %v693_v1 }
  0x4b   : > { %18700 = vst [vmem:[#allocation103_spill] sm:$0xff] %v13408_v49  ;;  %18701 = vst [vmem:[#allocation104_spill] sm:$0xff] %v13414_v8  ;;  %v687_v49 = vand.u32 4294901760, %v271_v30  ;;  %v13468_v40 = vpack.c.bf16 %v13450_v3, %v13428_v61  ;;  %v333_v13 = vrot.slane %v299_v29, 1  ;;  %10393 = vmatpush1.bf16.msra.mxu0 %v13366_v37 }
  0x4c   : > { %18702 = vst [vmem:[#allocation105_spill] sm:$0xff] %v13416_v23  ;;  %18703 = vst [vmem:[#allocation106_spill] sm:$0xff] %v13418_v24  ;;  %v697_v23 = vand.u32 4294901760, %v278_v26  ;;  %v13479_v56 = vpack.c.bf16 %v13460_v45, %v13458_v35  ;;  %v13511_v48 = vsub.f32 %v277_v32, %v699_v34  ;;  %10395 = vmatprep.subr.bf16.mxu0 %v13378_v42  ;;  %10905 = vmatpush1.bf16.msra.mxu1 %v13390_v0 }
  0x4d   : > { %18704 = vst [vmem:[#allocation107_spill] sm:$0xff] %v13426_v7  ;;  %18705 = vst [vmem:[#allocation108_spill] sm:$0xff] %v13428_v61  ;;  %v13470_v24 = vsub.f32 %v271_v30, %v687_v49  ;;  %v13475_v53 = vpack.c.bf16 %v691_v2, %v687_v49  ;;  %v695_v30 = vand.u32 4294901760, %v275_v62  ;;  %v303_v49 = vld [vmem:[%s13441_s11 + $0x38] sm:$0xff]  ;;  %10907 = vmatprep.subr.bf16.mxu1 %v13406_v39  ;;  %v13582_v39 = vld [vmem:[%s13441_s11 + $0x50] sm:$0xff] }
  0x4e   : > { %18706 = vst [vmem:[#allocation109_spill] sm:$0xff] %v13444_v50  ;;  %18707 = vst [vmem:[#allocation110_spill] sm:$0xff] %v13448_v51  ;;  %v13485_v61 = vpack.c.bf16 %v697_v23, %v693_v1  ;;  %v13489_v19 = vsub.f32 %v278_v26, %v697_v23  ;;  %v341_v55 = vrot.slane %v303_v49, 1 }
  0x4f   : > { %18708 = vst [vmem:[#allocation111_spill] sm:$0xff] %v13450_v3  ;;  %18709 = vst [vmem:[#allocation112_spill] sm:$0xff] %v13456_v18  ;;  %v301_v3 = vld [vmem:[%s13441_s11 + $0x28] sm:$0xff]  ;;  %v13497_v2 = vpack.c.bf16 %v13481_v10, %v13470_v24  ;;  %v13499_v58 = vsub.f32 %v275_v62, %v695_v30  ;;  %v13505_v1 = vpack.c.bf16 %v699_v34, %v695_v30  ;;  %10397 = vmatpush1.bf16.msra.mxu0 %v13402_v33 }
  0x50   : > { %18710 = vst [vmem:[#allocation113_spill] sm:$0xff] %v13458_v35  ;;  %18711 = vst [vmem:[#allocation114_spill] sm:$0xff] %v13460_v45  ;;  %v13502_v45 = vld [vmem:[%s13441_s11 + $0x68] sm:$0xff]  ;;  %v332_v35 = vrot.slane %v297_v5, 1  ;;  %v13509_v23 = vpack.c.bf16 %v13489_v19, %v13487_v9  ;;  %v337_v26 = vrot.slane %v301_v3, 1  ;;  %10399 = vmatprep.subr.bf16.mxu0 %v13414_v8  ;;  %10909 = vmatpush1.bf16.msra.mxu1 %v13426_v7  ;;  %v13741_v8 = vld [vmem:[%s13652_s28 + $0x50] sm:$0xff] }
  0x51   : > { %18712 = vst [vmem:[#allocation115_spill] sm:$0xff] %v13468_v40  ;;  %18713 = vst [vmem:[#allocation116_spill] sm:$0xff] %v13470_v24  ;;  %v349_v24 = vrot.slane %v307_v12, 1  ;;  %v13518_v30 = vpack.c.bf16 %v13511_v48, %v13499_v58  ;;  %v17859_v34 = vrot.slane %v13502_v45, 1  ;;  %10911 = vmatprep.subr.bf16.mxu1 %v13448_v51  ;;  %v13555_v51 = vld [vmem:[%s13441_s11 + $0x20] sm:$0xff] }
  0x52   : > { %18714 = vst [vmem:[#allocation117_spill] sm:$0xff] %v13475_v53  ;;  %18715 = vst [vmem:[#allocation118_spill] sm:$0xff] %v13479_v56  ;;  %v334_v62 = vsel %vm328_vm0, %v332_v35, %v333_v13  ;;  %v338_v46 = vsel %vm328_vm0, %v333_v13, %v337_v26 }
  0x53   : > { %18716 = vst [vmem:[#allocation119_spill] sm:$0xff] %v13481_v10  ;;  %18717 = vst [vmem:[#allocation120_spill] sm:$0xff] %v13485_v61  ;;  %v345_v10 = vrot.slane %v305_v25, 1  ;;  %v376_v32 = vadd.f32 %v334_v62, %v297_v5  ;;  %v378_v37 = vadd.f32 %v338_v46, %v299_v29  ;;  %10401 = vmatpush1.bf16.msra.mxu0 %v13444_v50 }
  0x54   : > { %18718 = vst [vmem:[#allocation121_spill] sm:$0xff] %v13487_v9  ;;  %18719 = vst [vmem:[#allocation122_spill] sm:$0xff] %v13489_v19  ;;  %v342_v19 = vsel %vm328_vm0, %v337_v26, %v341_v55  ;;  %10403 = vmatprep.subr.bf16.mxu0 %v13456_v18  ;;  %10913 = vmatpush1.bf16.msra.mxu1 %v13468_v40  ;;  %v13579_v40 = vld [vmem:[%s13441_s11 + $0x40] sm:$0xff] }
  0x55   : > { %18720 = vst [vmem:[#allocation123_spill] sm:$0xff] %v13497_v2  ;;  %18721 = vst [vmem:[#allocation124_spill] sm:$0xff] %v13499_v58  ;;  %v346_v35 = vsel %vm328_vm0, %v341_v55, %v345_v10  ;;  %v350_v9 = vsel %vm328_vm0, %v345_v10, %v349_v24  ;;  %v380_v58 = vadd.f32 %v342_v19, %v301_v3  ;;  %v411_v26 = vrot.slane %v376_v32, 2 }
  0x56   : > { %18722 = vst [vmem:[#allocation125_spill] sm:$0xff] %v13505_v1  ;;  %18723 = vst [vmem:[#allocation126_spill] sm:$0xff] %v13509_v23  ;;  %v382_v13 = vadd.f32 %v346_v35, %v303_v49  ;;  %v384_v42 = vadd.f32 %v350_v9, %v305_v25  ;;  %v412_v55 = vrot.slane %v378_v37, 2  ;;  %v329_v25 = vrot.slane %v13531_v11, 1  ;;  %v13548_v35 = vld [vmem:[%s13441_s11 + $0x10] sm:$0xff]  ;;  %10915 = vmatprep.subr.bf16.mxu1 %v13479_v56  ;;  %v13585_v56 = vld [vmem:[%s13441_s11 + $0x60] sm:$0xff] }
  0x57   : > { %18724 = vst [vmem:[#allocation127_spill] sm:$0xff] %v13511_v48  ;;  %18725 = vst [vmem:[#allocation128_spill] sm:$0xff] %v13518_v30  ;;  %v354_v48 = vsel %vm328_vm0, %v349_v24, %v17859_v34  ;;  %v416_v46 = vrot.slane %v380_v58, 2  ;;  %10405 = vmatpush1.bf16.msra.mxu0 %v13475_v53 }
  0x58   : > { %v13534_v5 = vadd.f32 %v354_v48, %v307_v12  ;;  %v420_v10 = vrot.slane %v382_v13, 2  ;;  %v424_v29 = vrot.slane %v384_v42, 2  ;;  %v413_v9 = vsel %vm407_vm1, %v411_v26, %v412_v55  ;;  %10407 = vmatprep.subr.bf16.mxu0 %v13485_v61  ;;  %10917 = vmatpush1.bf16.msra.mxu1 %v13497_v2 }
  0x59   : > { %v417_v3 = vsel %vm407_vm1, %v412_v55, %v416_v46  ;;  %v455_v62 = vadd.f32 %v413_v9, %v376_v32  ;;  %v18728_v32 = vand.u32 4294901760, %v12962_v15  ;;  %v18729_v9 = vand.u32 4294901760, %v12964_v16  ;;  %10919 = vmatprep.subr.bf16.mxu1 %v13509_v23 }
  0x5a   : > { %18726 = vst [vmem:[#allocation129_spill] sm:$0xff] %v13534_v5  ;;  %v17864_v19 = vrot.slane %v13534_v5, 2  ;;  %v421_v49 = vsel %vm407_vm1, %v416_v46, %v420_v10  ;;  %v425_v48 = vsel %vm407_vm1, %v420_v10, %v424_v29  ;;  %v457_v34 = vadd.f32 %v417_v3, %v378_v37 }
  0x5b   : > { %v459_v12 = vadd.f32 %v421_v49, %v380_v58  ;;  %v461_v24 = vadd.f32 %v425_v48, %v382_v13  ;;  %v490_v46 = vrot.slane %v455_v62, 4  ;;  %v785_v10 = vsub.f32 %v12962_v15, %v18728_v32  ;;  %v13571_v48 = vld [vmem:[%s13441_s11 + $0x30] sm:$0xff]  ;;  %10409 = vmatpush1.bf16.msra.mxu0 %v13505_v1 }
  0x5c   : > { %v429_v26 = vsel %vm407_vm1, %v424_v29, %v17864_v19  ;;  %v797_v7 = vsub.f32 %v12964_v16, %v18729_v9  ;;  %v491_v37 = vrot.slane %v457_v34, 4  ;;  %10921 = vmatpush1.bf16.msra.mxu1 %v13518_v30 }
  0x5d   : > { %v13558_v55 = vadd.f32 %v429_v26, %v384_v42  ;;  %v495_v58 = vrot.slane %v459_v12, 4  ;;  %v499_v13 = vrot.slane %v461_v24, 4  ;;  %v330_v42 = vrot.slane %v13548_v35, 1  ;;  %10923 = vmatprep.subr.bf16.mxu1 %v12960_v14 }
  0x5e   : > { %v786_v3 = vand.u32 4294901760, %v785_v10  ;;  %v798_v49 = vand.u32 4294901760, %v797_v7  ;;  %v335_v26 = vrot.slane %v13555_v51, 1  ;;  %v492_v32 = vsel %vm486_vm2, %v490_v46, %v491_v37 }
  0x5f   : > { %18727 = vst [vmem:[#allocation130_spill] sm:$0xff] %v13558_v55  ;;  %v17877_v29 = vrot.slane %v13558_v55, 4  ;;  %v496_v9 = vsel %vm486_vm2, %v491_v37, %v495_v58  ;;  %v500_v19 = vsel %vm486_vm2, %v495_v58, %v499_v13  ;;  %v331_v7 = vsel %vm328_vm0, %v329_v25, %v330_v42 }
  0x60   : > { %v534_v0 = vadd.f32 %v492_v32, %v455_v62  ;;  %v13592_v46 = vadd.f32 %v496_v9, %v457_v34  ;;  %v13594_v37 = vadd.f32 %v500_v19, %v459_v12  ;;  %v13599_v16 = vpack.c.bf16 %v798_v49, %v786_v3 }
  0x61   : > { %v504_v10 = vsel %vm486_vm2, %v499_v13, %v17877_v29  ;;  %v336_v15 = vsel %vm328_vm0, %v330_v42, %v335_v26  ;;  %v339_v25 = vrot.slane %v13571_v48, 1  ;;  %v343_v62 = vrot.slane %v13579_v40, 1 }
  0x62   : > { %v13597_v58 = vadd.f32 %v504_v10, %v461_v24  ;;  %18731 = vst [vmem:[#allocation132_spill] sm:$0xff] %v13599_v16  ;;  %v550_v61 = vadd.f32 %v13592_v46, %v534_v0  ;;  %v347_v34 = vrot.slane %v13582_v39, 1  ;;  %v17878_v19 = vrot.slane %v13585_v56, 1  ;;  %10411 = vmatprep.subr.bf16.mxu0 %v13599_v16 }
  0x63   : > { %v340_v12 = vsel %vm328_vm0, %v335_v26, %v339_v25  ;;  %v375_v13 = vadd.f32 %v331_v7, %v13531_v11  ;;  %v377_v42 = vadd.f32 %v336_v15, %v13548_v35  ;;  %v344_v0 = vsel %vm328_vm0, %v339_v25, %v343_v62 }
  0x64   : > { %18730 = vst [vmem:[#allocation131_spill] sm:$0xff] %v13597_v58  ;;  %v13611_v24 = vadd.f32 %v13597_v58, %v13594_v37  ;;  %v348_v3 = vsel %vm328_vm0, %v343_v62, %v347_v34  ;;  %v352_v49 = vsel %vm328_vm0, %v347_v34, %v17878_v19  ;;  %v379_v32 = vadd.f32 %v340_v12, %v13555_v51 }
  0x65   : > { %v381_v9 = vadd.f32 %v344_v0, %v13571_v48  ;;  %v383_v15 = vadd.f32 %v348_v3, %v13579_v40  ;;  %v13628_v7 = vadd.f32 %v352_v49, %v13582_v39  ;;  %v408_v10 = vrot.slane %v375_v13, 2 }
  0x66   : > { %18732 = vst [vmem:[#allocation133_spill] sm:$0xff] %v13611_v24  ;;  %v564_v26 = vadd.f32 %v13611_v24, %v550_v61  ;;  %v409_v25 = vrot.slane %v377_v42, 2  ;;  %v414_v62 = vrot.slane %v379_v32, 2 }
  0x67   : > { %18733 = vst [vmem:[#allocation134_spill] sm:$0xff] %v13628_v7  ;;  %v418_v34 = vrot.slane %v381_v9, 2  ;;  %v422_v12 = vrot.slane %v383_v15, 2  ;;  %v17898_v19 = vrot.slane %v13628_v7, 2 }
  0x68   : > { %v13631_v29 = vand.u32 4294901760, %v564_v26  ;;  %v410_v61 = vsel %vm407_vm1, %v408_v10, %v409_v25  ;;  %v415_v0 = vsel %vm407_vm1, %v409_v25, %v414_v62 }
  0x69   : > { %v419_v49 = vsel %vm407_vm1, %v414_v62, %v418_v34  ;;  %v423_v16 = vsel %vm407_vm1, %v418_v34, %v422_v12  ;;  %v427_v14 = vsel %vm407_vm1, %v422_v12, %v17898_v19  ;;  %v454_v30 = vadd.f32 %v410_v61, %v375_v13  ;;  %v2106_v12 = vld [vmem:[%s13652_s28 + $0x8] sm:$0xff]  ;;  %v2108_v61 = vld [vmem:[%s13652_s28 + $0x18] sm:$0xff] }
  0x6a   : > { %18734 = vst [vmem:[#allocation135_spill] sm:$0xff] %v13631_v29  ;;  %v13637_v3 = vsub.f32 %v564_v26, %v13631_v29  ;;  %v456_v23 = vadd.f32 %v415_v0, %v377_v42  ;;  %v458_v2 = vadd.f32 %v419_v49, %v379_v32  ;;  %v460_v24 = vadd.f32 %v423_v16, %v381_v9  ;;  %v2110_v0 = vld [vmem:[%s13652_s28 + $0x28] sm:$0xff] }
  0x6b   : > { %v13645_v1 = vadd.f32 %v427_v14, %v383_v15  ;;  %v487_v25 = vrot.slane %v454_v30, 4 }
  0x6c   : > { %18735 = vst [vmem:[#allocation136_spill] sm:$0xff] %v13637_v3  ;;  %v17896_v10 = vand.u32 4294901760, %v13637_v3  ;;  %v488_v53 = vrot.slane %v456_v23, 4  ;;  %v493_v26 = vrot.slane %v458_v2, 4  ;;  %v497_v29 = vrot.slane %v460_v24, 4 }
  0x6d   : > { %18736 = vst [vmem:[#allocation137_spill] sm:$0xff] %v13645_v1  ;;  %v17897_v16 = vrot.slane %v13645_v1, 4 }
  0x6e   : > { %v704_v14 = vsub.f32 %v13637_v3, %v17896_v10  ;;  %v489_v13 = vsel %vm486_vm2, %v487_v25, %v488_v53  ;;  %v494_v42 = vsel %vm486_vm2, %v488_v53, %v493_v26  ;;  %v498_v32 = vsel %vm486_vm2, %v493_v26, %v497_v29  ;;  %v2112_v53 = vld [vmem:[%s13652_s28 + $0x38] sm:$0xff]  ;;  %v2114_v10 = vld [vmem:[%s13652_s28 + $0x48] sm:$0xff] }
  0x6f   : > { %v502_v15 = vsel %vm486_vm2, %v497_v29, %v17897_v16  ;;  %v533_v62 = vadd.f32 %v489_v13, %v454_v30  ;;  %v13664_v34 = vadd.f32 %v494_v42, %v456_v23  ;;  %v13669_v49 = vadd.f32 %v498_v32, %v458_v2  ;;  %v2116_v30 = vld [vmem:[%s13652_s28 + $0x58] sm:$0xff] }
  0x70   : > { %v705_v9 = vand.u32 4294901760, %v704_v14  ;;  %v13671_v25 = vadd.f32 %v502_v15, %v460_v24  ;;  %v17905_v14 = vand.u32 4294901760, %v12966_v17  ;;  %v17907_v29 = vand.u32 4294901760, %v12976_v21 }
  0x71   : > { %v549_v26 = vadd.f32 %v13664_v34, %v533_v62  ;;  %v2140_v13 = vrot.slane %v2106_v12, 1  ;;  %v2141_v42 = vrot.slane %v2108_v61, 1  ;;  %v2145_v2 = vrot.slane %v2110_v0, 1 }
  0x72   : > { %18737 = vst [vmem:[#allocation138_spill] sm:$0xff] %v13671_v25  ;;  %706 = vmatprep.mubr.f32.mxu0 %v705_v9  ;;  %v13681_v23 = vadd.f32 %v13671_v25, %v13669_v49  ;;  %v791_v24 = vsub.f32 %v12966_v17, %v17905_v14  ;;  %v803_v32 = vsub.f32 %v12976_v21, %v17907_v29  ;;  %v13690_v9 = vld [vmem:[%s13652_s28 + $0x68] sm:$0xff]  ;;  %v2149_v15 = vrot.slane %v2112_v53, 1 }
  0x73   : > { %18739 = vst [vmem:[#allocation140_spill] sm:$0xff] %v13690_v9  ;;  %v2153_v62 = vrot.slane %v2114_v10, 1  ;;  %v2142_v19 = vsel %vm328_vm0, %v2140_v13, %v2141_v42  ;;  %v2146_v3 = vsel %vm328_vm0, %v2141_v42, %v2145_v2  ;;  %v2157_v25 = vrot.slane %v2116_v30, 1  ;;  %v13704_v42 = vld [vmem:[%s13652_s28] sm:$0xff] }
  0x74   : > { %18738 = vst [vmem:[#allocation139_spill] sm:$0xff] %v13681_v23  ;;  %v563_v16 = vadd.f32 %v13681_v23, %v549_v26  ;;  %v792_v1 = vand.u32 4294901760, %v791_v24  ;;  %v804_v58 = vand.u32 4294901760, %v803_v32  ;;  %v2150_v14 = vsel %vm328_vm0, %v2145_v2, %v2149_v15  ;;  %v13707_v24 = vld [vmem:[%s13652_s28 + $0x10] sm:$0xff] }
  0x75   : > { %v2154_v17 = vsel %vm328_vm0, %v2149_v15, %v2153_v62  ;;  %v2158_v21 = vsel %vm328_vm0, %v2153_v62, %v2157_v25  ;;  %v17918_v18 = vrot.slane %v13690_v9, 1  ;;  %v2184_v26 = vadd.f32 %v2142_v19, %v2106_v12 }
  0x76   : > { %v13697_v29 = vand.u32 4294901760, %v563_v16  ;;  %v13701_v23 = vpack.c.bf16 %v804_v58, %v792_v1  ;;  %v2186_v13 = vadd.f32 %v2146_v3, %v2108_v61  ;;  %v2188_v50 = vadd.f32 %v2150_v14, %v2110_v0 }
  0x77   : > { %v2190_v55 = vadd.f32 %v2154_v17, %v2112_v53  ;;  %v2162_v32 = vsel %vm328_vm0, %v2157_v25, %v17918_v18  ;;  %v2192_v15 = vadd.f32 %v2158_v21, %v2114_v10  ;;  %v2218_v62 = vrot.slane %v2184_v26, 2  ;;  %v13732_v18 = vld [vmem:[%s13652_s28 + $0x30] sm:$0xff] }
  0x78   : > { %18740 = vst [vmem:[#allocation141_spill] sm:$0xff] %v13697_v29  ;;  %18741 = vst [vmem:[#allocation142_spill] sm:$0xff] %v13701_v23  ;;  %v13710_v2 = vsub.f32 %v563_v16, %v13697_v29  ;;  %v13715_v7 = vadd.f32 %v2162_v32, %v2116_v30  ;;  %v2219_v1 = vrot.slane %v2186_v13, 2  ;;  %v2223_v58 = vrot.slane %v2188_v50, 2  ;;  %v13729_v32 = vld [vmem:[%s13652_s28 + $0x20] sm:$0xff] }
  0x79   : > { %v2227_v17 = vrot.slane %v2190_v55, 2  ;;  %v2231_v3 = vrot.slane %v2192_v15, 2  ;;  %v2137_v16 = vrot.slane %v13704_v42, 1  ;;  %v2138_v12 = vrot.slane %v13707_v24, 1  ;;  %v13738_v29 = vld [vmem:[%s13652_s28 + $0x40] sm:$0xff] }
  0x7a   : > { %18742 = vst [vmem:[#allocation143_spill] sm:$0xff] %v13710_v2  ;;  %18743 = vst [vmem:[#allocation144_spill] sm:$0xff] %v13715_v7  ;;  %v17923_v19 = vand.u32 4294901760, %v13710_v2  ;;  %v2220_v61 = vsel %vm407_vm1, %v2218_v62, %v2219_v1  ;;  %v2224_v21 = vsel %vm407_vm1, %v2219_v1, %v2223_v58  ;;  %v17928_v0 = vrot.slane %v13715_v7, 2 }
  0x7b   : > { %v2228_v10 = vsel %vm407_vm1, %v2223_v58, %v2227_v17  ;;  %v2232_v53 = vsel %vm407_vm1, %v2227_v17, %v2231_v3  ;;  %v2262_v14 = vadd.f32 %v2220_v61, %v2184_v26  ;;  %v2264_v30 = vadd.f32 %v2224_v21, %v2186_v13 }
  0x7c   : > { %v710_v25 = vsub.f32 %v13710_v2, %v17923_v19  ;;  %v2236_v62 = vsel %vm407_vm1, %v2231_v3, %v17928_v0  ;;  %v2266_v1 = vadd.f32 %v2228_v10, %v2188_v50  ;;  %v2268_v58 = vadd.f32 %v2232_v53, %v2190_v55  ;;  %v13751_v10 = vld [vmem:[%s13652_s28 + $0x60] sm:$0xff] }
  0x7d   : > { %v2139_v19 = vsel %vm328_vm0, %v2137_v16, %v2138_v12  ;;  %v13744_v26 = vadd.f32 %v2236_v62, %v2192_v15  ;;  %v2296_v13 = vrot.slane %v2262_v14, 4  ;;  %v2297_v61 = vrot.slane %v2264_v30, 4  ;;  %18745 = vst [vmem:[#allocation146_spill] sm:$0xff] %v13751_v10 }
  0x7e   : > { %v711_v17 = vand.u32 4294901760, %v710_v25  ;;  %v2301_v21 = vrot.slane %v2266_v1, 4  ;;  %v2305_v2 = vrot.slane %v2268_v58, 4  ;;  %v2143_v7 = vrot.slane %v13729_v32, 1 }
  0x7f   : > { %18744 = vst [vmem:[#allocation145_spill] sm:$0xff] %v13744_v26  ;;  %v2147_v3 = vrot.slane %v13732_v18, 1  ;;  %v2298_v50 = vsel %vm486_vm2, %v2296_v13, %v2297_v61  ;;  %v17937_v55 = vrot.slane %v13744_v26, 4  ;;  %v2151_v16 = vrot.slane %v13738_v29, 1 }
  0x80   : > { %712 = vmatmul.mubr.f32.vlgmr.msra.gmra.mrb[0].mxu0 %v711_v17  ;;  %v2155_v15 = vrot.slane %v13741_v8, 1  ;;  %v2302_v25 = vsel %vm486_vm2, %v2297_v61, %v2301_v21  ;;  %v2306_v53 = vsel %vm486_vm2, %v2301_v21, %v2305_v2  ;;  %v2340_v62 = vadd.f32 %v2298_v50, %v2262_v14 }
  0x81   : > { %10413 = vmatpush1.bf16.msra.mxu0 %v13701_v23  ;;  %v2144_v0 = vsel %vm328_vm0, %v2138_v12, %v2143_v7  ;;  %v2310_v17 = vsel %vm486_vm2, %v2305_v2, %v17937_v55  ;;  %v13762_v13 = vadd.f32 %v2302_v25, %v2264_v30  ;;  %v13764_v33 = vadd.f32 %v2306_v53, %v2266_v1 }
  0x82   : > { %v2148_v9 = vsel %vm328_vm0, %v2143_v7, %v2147_v3  ;;  %v13767_v5 = vadd.f32 %v2310_v17, %v2268_v58  ;;  %v2152_v23 = vsel %vm328_vm0, %v2147_v3, %v2151_v16  ;;  %v2156_v61 = vsel %vm328_vm0, %v2151_v16, %v2155_v15 }
  0x83   : > { %18746 = vst [vmem:[#allocation147_spill] sm:$0xff] %v13764_v33  ;;  %v17938_v14 = vrot.slane %v13751_v10, 1  ;;  %v2356_v12 = vadd.f32 %v13762_v13, %v2340_v62  ;;  %v2183_v21 = vadd.f32 %v2139_v19, %v13704_v42  ;;  %v2185_v2 = vadd.f32 %v2144_v0, %v13707_v24 }
  0x84   : > { %18747 = vst [vmem:[#allocation148_spill] sm:$0xff] %v13767_v5  ;;  %v2187_v30 = vadd.f32 %v2148_v9, %v13729_v32  ;;  %v13778_v1 = vadd.f32 %v13767_v5, %v13764_v33  ;;  %v2189_v58 = vadd.f32 %v2152_v23, %v13732_v18  ;;  %v2191_v3 = vadd.f32 %v2156_v61, %v13738_v29 }
  0x85   : > { %v2160_v7 = vsel %vm328_vm0, %v2155_v15, %v17938_v14  ;;  %v2215_v19 = vrot.slane %v2183_v21, 2  ;;  %v2216_v16 = vrot.slane %v2185_v2, 2  ;;  %v3911_v62 = vmul.f32 %v13704_v42, %v13531_v11 }
  0x86   : > { %18748 = vst [vmem:[#allocation149_spill] sm:$0xff] %v13778_v1  ;;  %v13786_v50 = vadd.f32 %v2160_v7, %v13741_v8  ;;  %v2221_v0 = vrot.slane %v2187_v30, 2  ;;  %v2370_v9 = vadd.f32 %v13778_v1, %v2356_v12  ;;  %v2225_v25 = vrot.slane %v2189_v58, 2 }
  0x87   : > { %v2229_v53 = vrot.slane %v2191_v3, 2  ;;  %v2217_v17 = vsel %vm407_vm1, %v2215_v19, %v2216_v16  ;;  %v3913_v61 = vmul.f32 %v13707_v24, %v13548_v35  ;;  %v3915_v10 = vmul.f32 %v13729_v32, %v13555_v51 }
  0x88   : > { %v2222_v15 = vsel %vm407_vm1, %v2216_v16, %v2221_v0  ;;  %v17946_v23 = vrot.slane %v13786_v50, 2  ;;  %v13796_v7 = vand.u32 4294901760, %v2370_v9  ;;  %v2226_v55 = vsel %vm407_vm1, %v2221_v0, %v2225_v25 }
  0x89   : > { %v2230_v12 = vsel %vm407_vm1, %v2225_v25, %v2229_v53  ;;  %v2261_v14 = vadd.f32 %v2217_v17, %v2183_v21  ;;  %v2263_v1 = vadd.f32 %v2222_v15, %v2185_v2  ;;  %v2265_v19 = vadd.f32 %v2226_v55, %v2187_v30 }
  0x8a   : > { %18749 = vst [vmem:[#allocation150_spill] sm:$0xff] %v13796_v7  ;;  %v2234_v11 = vsel %vm407_vm1, %v2229_v53, %v17946_v23  ;;  %v2267_v5 = vadd.f32 %v2230_v12, %v2189_v58  ;;  %v13804_v16 = vsub.f32 %v2370_v9, %v13796_v7  ;;  %v3917_v21 = vmul.f32 %v13732_v18, %v13571_v48 }
  0x8b   : > { %v13806_v26 = vadd.f32 %v2234_v11, %v2191_v3  ;;  %v2293_v35 = vrot.slane %v2261_v14, 4  ;;  %v2294_v0 = vrot.slane %v2263_v1, 4  ;;  %v2299_v33 = vrot.slane %v2265_v19, 4 }
  0x8c   : > { %18750 = vst [vmem:[#allocation151_spill] sm:$0xff] %v13804_v16  ;;  %v2303_v25 = vrot.slane %v2267_v5, 4  ;;  %3207 = vmatprep.mubr.f32.mxu1 %v13804_v16  ;;  %v3919_v2 = vmul.f32 %v13738_v29, %v13579_v40  ;;  %v13818_v30 = vmul.f32 %v13741_v8, %v13582_v39  ;;  %v3943_v9 = vrot.slane %v3911_v62, 1 }
  0x8d   : > { %v17953_v55 = vrot.slane %v13806_v26, 4  ;;  %v2295_v58 = vsel %vm486_vm2, %v2293_v35, %v2294_v0  ;;  %v2300_v51 = vsel %vm486_vm2, %v2294_v0, %v2299_v33  ;;  %v3944_v39 = vrot.slane %v3913_v61, 1 }
  0x8e   : > { %18751 = vst [vmem:[#allocation152_spill] sm:$0xff] %v13818_v30  ;;  %v2304_v3 = vsel %vm486_vm2, %v2299_v33, %v2303_v25  ;;  %v2339_v53 = vadd.f32 %v2295_v58, %v2261_v14  ;;  %v13826_v17 = vadd.f32 %v2300_v51, %v2263_v1  ;;  %v3949_v12 = vrot.slane %v3915_v10, 1 }
  0x8f   : > { %v2308_v48 = vsel %vm486_vm2, %v2303_v25, %v17953_v55  ;;  %v13828_v15 = vadd.f32 %v2304_v3, %v2265_v19  ;;  %v3953_v11 = vrot.slane %v3917_v21, 1  ;;  %v3957_v0 = vrot.slane %v3919_v2, 1 }
  0x90   : > { %v13830_v40 = vadd.f32 %v2308_v48, %v2267_v5  ;;  %v2355_v35 = vadd.f32 %v13826_v17, %v2339_v53  ;;  %v17947_v33 = vrot.slane %v13818_v30, 1  ;;  %v3945_v14 = vsel %vm328_vm0, %v3943_v9, %v3944_v39 }
  0x91   : > { %v3950_v1 = vsel %vm328_vm0, %v3944_v39, %v3949_v12  ;;  %v3954_v19 = vsel %vm328_vm0, %v3949_v12, %v3953_v11  ;;  %v3958_v5 = vsel %vm328_vm0, %v3953_v11, %v3957_v0  ;;  %v13845_v58 = vadd.f32 %v3945_v14, %v3911_v62 }
  0x92   : > { %v13836_v23 = vadd.f32 %v13830_v40, %v13828_v15  ;;  %v3962_v25 = vsel %vm328_vm0, %v3957_v0, %v17947_v33  ;;  %v13848_v3 = vadd.f32 %v3950_v1, %v3913_v61  ;;  %v13850_v48 = vadd.f32 %v3954_v19, %v3915_v10 }
  0x93   : > { %18752 = vst [vmem:[#allocation153_spill] sm:$0xff] %v13845_v58  ;;  %v13852_v53 = vadd.f32 %v3958_v5, %v3917_v21  ;;  %v13854_v9 = vadd.f32 %v3962_v25, %v3919_v2  ;;  %v5991_v39 = vmul.f32 %v13704_v42, %v13704_v42  ;;  %v5993_v11 = vmul.f32 %v13707_v24, %v13707_v24  ;;  %v18774_v58 = vld [vmem:[#allocation41_spill] sm:$0xff] }
  0x94   : > { %v2369_v51 = vadd.f32 %v13836_v23, %v2355_v35  ;;  %18753 = vst [vmem:[#allocation154_spill] sm:$0xff] %v13848_v3  ;;  %18754 = vst [vmem:[#allocation155_spill] sm:$0xff] %v13850_v48  ;;  %v5995_v62 = vmul.f32 %v13729_v32, %v13729_v32  ;;  %v5997_v61 = vmul.f32 %v13732_v18, %v13732_v18  ;;  %v17950_v18 = vand.u32 4294901760, %v12988_v27 }
  0x95   : > { %18755 = vst [vmem:[#allocation156_spill] sm:$0xff] %v13852_v53  ;;  %18756 = vst [vmem:[#allocation157_spill] sm:$0xff] %v13854_v9  ;;  %v5999_v10 = vmul.f32 %v13738_v29, %v13738_v29  ;;  %v13873_v42 = vmul.f32 %v13741_v8, %v13741_v8  ;;  %v6023_v2 = vrot.slane %v5991_v39, 1  ;;  %v6024_v35 = vrot.slane %v5993_v11, 1 }
  0x96   : > { %v13858_v12 = vand.u32 4294901760, %v2369_v51  ;;  %v6029_v0 = vrot.slane %v5995_v62, 1  ;;  %v6033_v24 = vrot.slane %v5997_v61, 1 }
  0x97   : > { %18759 = vst [vmem:[#allocation160_spill] sm:$0xff] %v13873_v42  ;;  %v6037_v14 = vrot.slane %v5999_v10, 1  ;;  %v17948_v32 = vrot.slane %v13873_v42, 1  ;;  %v6025_v29 = vsel %vm328_vm0, %v6023_v2, %v6024_v35 }
  0x98   : > { %18757 = vst [vmem:[#allocation158_spill] sm:$0xff] %v13858_v12  ;;  %v13869_v21 = vsub.f32 %v2369_v51, %v13858_v12  ;;  %v6030_v1 = vsel %vm328_vm0, %v6024_v35, %v6029_v0  ;;  %v6034_v19 = vsel %vm328_vm0, %v6029_v0, %v6033_v24  ;;  %v13886_v25 = vadd.f32 %v6025_v29, %v5991_v39 }
  0x99   : > { %v6038_v8 = vsel %vm328_vm0, %v6033_v24, %v6037_v14  ;;  %v6042_v5 = vsel %vm328_vm0, %v6037_v14, %v17948_v32  ;;  %v13889_v51 = vadd.f32 %v6030_v1, %v5993_v11  ;;  %v13891_v33 = vadd.f32 %v6034_v19, %v5995_v62 }
  0x9a   : > { %18758 = vst [vmem:[#allocation159_spill] sm:$0xff] %v13869_v21  ;;  %3210 = vmatmul.mubr.f32.vlgmr.msra.gmra.mrb[0].mxu1 %v13869_v21  ;;  %18760 = vst [vmem:[#allocation161_spill] sm:$0xff] %v13886_v25  ;;  %v13893_v2 = vadd.f32 %v6038_v8, %v5997_v61  ;;  %v13895_v35 = vadd.f32 %v6042_v5, %v5999_v10  ;;  %v809_v0 = vsub.f32 %v12988_v27, %v17950_v18 }
  0x9b   : > { %10925 = vmatpush1.bf16.msra.mxu1 %v12974_v20  ;;  %18761 = vst [vmem:[#allocation162_spill] sm:$0xff] %v13889_v51  ;;  %18762 = vst [vmem:[#allocation163_spill] sm:$0xff] %v13891_v33  ;;  %v17949_v24 = vand.u32 4294901760, %v12990_v28  ;;  %v17951_v14 = vand.u32 4294901760, %v13000_v31  ;;  %v17952_v11 = vand.u32 4294901760, %v13016_v38  ;;  %v17954_v62 = vand.u32 4294901760, %v13024_v43 }
  0x9c   : > { %10927 = vmatprep.subr.bf16.mxu1 %v12978_v22  ;;  %18763 = vst [vmem:[#allocation164_spill] sm:$0xff] %v13893_v2  ;;  %18764 = vst [vmem:[#allocation165_spill] sm:$0xff] %v13895_v35  ;;  %v810_v39 = vand.u32 4294901760, %v809_v0  ;;  %v17955_v10 = vand.u32 4294901760, %v13026_v44  ;;  %v17958_v29 = vand.u32 4294901760, %v13036_v47  ;;  %v17961_v1 = vand.u32 4294901760, %v13051_v54 }
  0x9d   : > { %v821_v61 = vsub.f32 %v12990_v28, %v17949_v24  ;;  %v815_v19 = vsub.f32 %v13000_v31, %v17951_v14  ;;  %v827_v8 = vsub.f32 %v13016_v38, %v17952_v11  ;;  %v833_v5 = vsub.f32 %v13024_v43, %v17954_v62  ;;  %v18796_v2 = vld [vmem:[#allocation53_spill] sm:$0xff]  ;;  %v18797_v33 = vld [vmem:[#allocation58_spill] sm:$0xff]  ;;  %v18800_v51 = vld [vmem:[#allocation63_spill] sm:$0xff] }
  0x9e   : > { %v17962_v0 = vand.u32 4294901760, %v13059_v59  ;;  %v845_v24 = vsub.f32 %v13026_v44, %v17955_v10  ;;  %v839_v18 = vsub.f32 %v13036_v47, %v17958_v29  ;;  %v851_v14 = vsub.f32 %v13051_v54, %v17961_v1 }
  0x9f   : > { %10929 = vmatpush1.bf16.msra.mxu1 %v13010_v36  ;;  %v822_v32 = vand.u32 4294901760, %v821_v61  ;;  %v816_v11 = vand.u32 4294901760, %v815_v19  ;;  %v828_v55 = vand.u32 4294901760, %v827_v8  ;;  %v834_v62 = vand.u32 4294901760, %v833_v5  ;;  %v18782_v36 = vld [vmem:[#allocation44_spill] sm:$0xff] }
  0xa0   : > { %10931 = vmatprep.subr.bf16.mxu1 %v13022_v41  ;;  %v857_v61 = vsub.f32 %v13059_v59, %v17962_v0  ;;  %v846_v9 = vand.u32 4294901760, %v845_v24  ;;  %v840_v53 = vand.u32 4294901760, %v839_v18  ;;  %v852_v29 = vand.u32 4294901760, %v851_v14 }
  0xa1   : > { %v13936_v10 = vpack.c.bf16 %v822_v32, %v810_v39  ;;  %v13938_v48 = vpack.c.bf16 %v828_v55, %v816_v11  ;;  %v17963_v1 = vand.u32 4294901760, %v13061_v60  ;;  %v17965_v19 = vand.u32 4294901760, %v13071_v63  ;;  %v18769_v32 = vld [vmem:[#allocation33_spill] sm:$0xff]  ;;  %v18772_v11 = vld [vmem:[#allocation32_spill] sm:$0xff] }
  0xa2   : > { %v858_v3 = vand.u32 4294901760, %v857_v61  ;;  %v13943_v8 = vpack.c.bf16 %v846_v9, %v834_v62  ;;  %v13945_v5 = vpack.c.bf16 %v852_v29, %v840_v53  ;;  %v17974_v0 = vand.u32 4294901760, %v13086_v6  ;;  %v18770_v9 = vld [vmem:[#allocation34_spill] sm:$0xff]  ;;  %v18771_v53 = vld [vmem:[#allocation36_spill] sm:$0xff]  ;;  %v18773_v61 = vld [vmem:[#allocation39_spill] sm:$0xff] }
  0xa3   : > { %10933 = vmatpush1.bf16.msra.mxu1 %v13045_v52  ;;  %18765 = vst [vmem:[#allocation166_spill] sm:$0xff] %v13936_v10  ;;  %18766 = vst [vmem:[#allocation167_spill] sm:$0xff] %v13938_v48  ;;  %10415 = vmatprep.subr.bf16.mxu0 %v13936_v10  ;;  %v17975_v18 = vand.u32 4294901760, %v18769_v32  ;;  %v869_v55 = vsub.f32 %v13061_v60, %v17963_v1  ;;  %v863_v24 = vsub.f32 %v13071_v63, %v17965_v19  ;;  %v18779_v52 = vld [vmem:[#allocation42_spill] sm:$0xff]  ;;  %v18910_v63 = vld [vmem:[#allocation139_spill] sm:$0xff] }
  0xa4   : > { %10935 = vmatprep.subr.bf16.mxu1 %v13057_v57  ;;  %18767 = vst [vmem:[#allocation168_spill] sm:$0xff] %v13943_v8  ;;  %18768 = vst [vmem:[#allocation169_spill] sm:$0xff] %v13945_v5  ;;  %10417 = vmatpush1.bf16.msra.mxu0 %v13938_v48  ;;  %v875_v62 = vsub.f32 %v13086_v6, %v17974_v0  ;;  %v17984_v1 = vand.u32 4294901760, %v18773_v61  ;;  %v17989_v19 = vand.u32 4294901760, %v18774_v58  ;;  %v18775_v14 = vand.u32 4294901760, %v18770_v9 }
  0xa5   : > { %10419 = vmatprep.subr.bf16.mxu0 %v13943_v8  ;;  %v881_v29 = vsub.f32 %v18769_v32, %v17975_v18  ;;  %v870_v30 = vand.u32 4294901760, %v869_v55  ;;  %v864_v39 = vand.u32 4294901760, %v863_v24  ;;  %v18776_v8 = vand.u32 4294901760, %v18771_v53 }
  0xa6   : > { %v893_v48 = vsub.f32 %v18770_v9, %v18775_v14  ;;  %v899_v18 = vsub.f32 %v18773_v61, %v17984_v1  ;;  %v905_v55 = vsub.f32 %v18774_v58, %v17989_v19  ;;  %v18022_v25 = vand.u32 4294901760, %v18800_v51  ;;  %v18891_v61 = vld [vmem:[#allocation148_spill] sm:$0xff] }
  0xa7   : > { %10937 = vmatpush1.bf16.msra.mxu1 %v13080_v4  ;;  %v887_v10 = vsub.f32 %v18771_v53, %v18776_v8  ;;  %v882_v0 = vand.u32 4294901760, %v881_v29  ;;  %v18777_v4 = vld [vmem:[#allocation37_spill] sm:$0xff]  ;;  %v13983_v24 = vpack.c.bf16 %v870_v30, %v858_v3  ;;  %v17994_v8 = vand.u32 4294901760, %v18779_v52  ;;  %v18784_v3 = vld [vmem:[#allocation47_spill] sm:$0xff] }
  0xa8   : > { %10939 = vmatprep.subr.bf16.mxu1 %v18772_v11  ;;  %v876_v11 = vand.u32 4294901760, %v875_v62  ;;  %10421 = vmatpush1.bf16.msra.mxu0 %v13945_v5  ;;  %v894_v14 = vand.u32 4294901760, %v893_v48  ;;  %v18780_v62 = vld [vmem:[#allocation40_spill] sm:$0xff]  ;;  %v900_v41 = vand.u32 4294901760, %v899_v18  ;;  %v906_v1 = vand.u32 4294901760, %v905_v55 }
  0xa9   : > { %18778 = vst [vmem:[#allocation170_spill] sm:$0xff] %v13983_v24  ;;  %v888_v57 = vand.u32 4294901760, %v887_v10  ;;  %10423 = vmatprep.subr.bf16.mxu0 %v13983_v24  ;;  %v917_v30 = vsub.f32 %v18779_v52, %v17994_v8  ;;  %v17998_v48 = vand.u32 4294901760, %v18784_v3  ;;  %v18785_v10 = vld [vmem:[#allocation49_spill] sm:$0xff] }
  0xaa   : > { %v13987_v29 = vpack.c.bf16 %v876_v11, %v864_v39  ;;  %v13991_v22 = vpack.c.bf16 %v894_v14, %v882_v0  ;;  %v18003_v19 = vand.u32 4294901760, %v18785_v10  ;;  %v18787_v39 = vld [vmem:[#allocation45_spill] sm:$0xff]  ;;  %v18788_v11 = vld [vmem:[#allocation50_spill] sm:$0xff]  ;;  %v18789_v0 = vld [vmem:[#allocation52_spill] sm:$0xff] }
  0xab   : > { %10941 = vmatpush1.bf16.msra.mxu1 %v18777_v4  ;;  %v17995_v4 = vand.u32 4294901760, %v18782_v36  ;;  %v13998_v5 = vpack.c.bf16 %v900_v41, %v888_v57  ;;  %v918_v24 = vand.u32 4294901760, %v917_v30  ;;  %v923_v8 = vsub.f32 %v18784_v3, %v17998_v48  ;;  %v18790_v57 = vld [vmem:[#allocation55_spill] sm:$0xff]  ;;  %v18794_v48 = vld [vmem:[#allocation57_spill] sm:$0xff]  ;;  %v18866_v3 = vld [vmem:[#allocation130_spill] sm:$0xff] }
  0xac   : > { %10943 = vmatprep.subr.bf16.mxu1 %v18780_v62  ;;  %18781 = vst [vmem:[#allocation171_spill] sm:$0xff] %v13987_v29  ;;  %18783 = vst [vmem:[#allocation172_spill] sm:$0xff] %v13991_v22  ;;  %10425 = vmatpush1.bf16.msra.mxu0 %v13987_v29  ;;  %v929_v41 = vsub.f32 %v18785_v10, %v18003_v19  ;;  %v18011_v62 = vand.u32 4294901760, %v18790_v57  ;;  %v18792_v14 = vand.u32 4294901760, %v18788_v11  ;;  %v18793_v30 = vand.u32 4294901760, %v18789_v0  ;;  %v18871_v10 = vld [vmem:[#allocation144_spill] sm:$0xff] }
  0xad   : > { %18786 = vst [vmem:[#allocation173_spill] sm:$0xff] %v13998_v5  ;;  %v911_v18 = vsub.f32 %v18782_v36, %v17995_v4  ;;  %v18791_v4 = vld [vmem:[#allocation48_spill] sm:$0xff]  ;;  %10427 = vmatprep.subr.bf16.mxu0 %v13991_v22  ;;  %v18012_v12 = vand.u32 4294901760, %v18794_v48  ;;  %v14023_v20 = vpack.c.bf16 %v918_v24, %v906_v1  ;;  %v924_v19 = vand.u32 4294901760, %v923_v8 }
  0xae   : > { %v941_v29 = vsub.f32 %v18788_v11, %v18792_v14  ;;  %v930_v35 = vand.u32 4294901760, %v929_v41  ;;  %v18799_v8 = vld [vmem:[#allocation60_spill] sm:$0xff]  ;;  %v18872_v36 = vrot.slane %v18871_v10, 2 }
  0xaf   : > { %10945 = vmatpush1.bf16.msra.mxu1 %v18787_v39  ;;  %v912_v55 = vand.u32 4294901760, %v911_v18  ;;  %v935_v39 = vsub.f32 %v18789_v0, %v18793_v30  ;;  %18795 = vst [vmem:[#allocation174_spill] sm:$0xff] %v14023_v20  ;;  %v953_v14 = vsub.f32 %v18794_v48, %v18012_v12  ;;  %v18017_v30 = vand.u32 4294901760, %v18797_v33 }
  0xb0   : > { %10947 = vmatprep.subr.bf16.mxu1 %v18791_v4  ;;  %v947_v4 = vsub.f32 %v18790_v57, %v18011_v62  ;;  %v942_v22 = vand.u32 4294901760, %v941_v29  ;;  %10429 = vmatpush1.bf16.msra.mxu0 %v13998_v5  ;;  %v18020_v41 = vand.u32 4294901760, %v18799_v8  ;;  %v18801_v62 = vld [vmem:[#allocation56_spill] sm:$0xff]  ;;  %v18836_v57 = vld [vmem:[#allocation85_spill] sm:$0xff] }
  0xb1   : > { %v936_v18 = vand.u32 4294901760, %v935_v39  ;;  %v14034_v1 = vpack.c.bf16 %v924_v19, %v912_v55  ;;  %10431 = vmatprep.subr.bf16.mxu0 %v14023_v20  ;;  %v954_v39 = vand.u32 4294901760, %v953_v14  ;;  %v965_v12 = vsub.f32 %v18797_v33, %v18017_v30  ;;  %v18805_v20 = vld [vmem:[#allocation66_spill] sm:$0xff]  ;;  %v18806_v14 = vld [vmem:[#allocation61_spill] sm:$0xff] }
  0xb2   : > { %v948_v24 = vand.u32 4294901760, %v947_v4  ;;  %v14040_v29 = vpack.c.bf16 %v942_v22, %v930_v35  ;;  %v959_v4 = vsub.f32 %v18799_v8, %v18020_v41  ;;  %v971_v55 = vsub.f32 %v18800_v51, %v18022_v25  ;;  %v18809_v51 = vld [vmem:[#allocation64_spill] sm:$0xff] }
  0xb3   : > { %10949 = vmatpush1.bf16.msra.mxu1 %v18796_v2  ;;  %18798 = vst [vmem:[#allocation175_spill] sm:$0xff] %v14034_v1  ;;  %v18803_v2 = vld [vmem:[#allocation65_spill] sm:$0xff]  ;;  %v18028_v22 = vand.u32 4294901760, %v18805_v20  ;;  %v966_v35 = vand.u32 4294901760, %v965_v12 }
  0xb4   : > { %10951 = vmatprep.subr.bf16.mxu1 %v18801_v62  ;;  %18802 = vst [vmem:[#allocation176_spill] sm:$0xff] %v14040_v29  ;;  %v18025_v5 = vand.u32 4294901760, %v18803_v2  ;;  %v14046_v19 = vpack.c.bf16 %v948_v24, %v936_v18  ;;  %v18807_v62 = vld [vmem:[#allocation68_spill] sm:$0xff]  ;;  %v18808_v24 = vld [vmem:[#allocation71_spill] sm:$0xff]  ;;  %10433 = vmatpush1.bf16.msra.mxu0 %v14034_v1  ;;  %v960_v41 = vand.u32 4294901760, %v959_v4  ;;  %v972_v8 = vand.u32 4294901760, %v971_v55 }
  0xb5   : > { %v18034_v18 = vand.u32 4294901760, %v18807_v62  ;;  %v989_v25 = vsub.f32 %v18805_v20, %v18028_v22  ;;  %v18810_v12 = vld [vmem:[#allocation73_spill] sm:$0xff]  ;;  %10435 = vmatprep.subr.bf16.mxu0 %v14040_v29  ;;  %v14068_v33 = vpack.c.bf16 %v966_v35, %v954_v39  ;;  %v18812_v4 = vand.u32 4294901760, %v18808_v24  ;;  %v18814_v20 = vld [vmem:[#allocation74_spill] sm:$0xff] }
  0xb6   : > { %18804 = vst [vmem:[#allocation177_spill] sm:$0xff] %v14046_v19  ;;  %v977_v30 = vsub.f32 %v18803_v2, %v18025_v5  ;;  %v14076_v1 = vpack.c.bf16 %v972_v8, %v960_v41  ;;  %v18039_v29 = vand.u32 4294901760, %v18814_v20  ;;  %v18816_v2 = vld [vmem:[#allocation76_spill] sm:$0xff] }
  0xb7   : > { %10953 = vmatpush1.bf16.msra.mxu1 %v18806_v14  ;;  %v18036_v14 = vand.u32 4294901760, %v18810_v12  ;;  %18811 = vst [vmem:[#allocation178_spill] sm:$0xff] %v14068_v33  ;;  %v983_v42 = vsub.f32 %v18807_v62, %v18034_v18  ;;  %v995_v55 = vsub.f32 %v18808_v24, %v18812_v4  ;;  %v990_v22 = vand.u32 4294901760, %v989_v25  ;;  %v18817_v18 = vld [vmem:[#allocation79_spill] sm:$0xff]  ;;  %v18819_v41 = vld [vmem:[#allocation72_spill] sm:$0xff]  ;;  %v18826_v24 = vld [vmem:[#allocation77_spill] sm:$0xff] }
  0xb8   : > { %10955 = vmatprep.subr.bf16.mxu1 %v18809_v51  ;;  %v978_v5 = vand.u32 4294901760, %v977_v30  ;;  %18813 = vst [vmem:[#allocation179_spill] sm:$0xff] %v14076_v1  ;;  %v18815_v30 = vld [vmem:[#allocation69_spill] sm:$0xff]  ;;  %v18045_v48 = vand.u32 4294901760, %v18816_v2  ;;  %10437 = vmatpush1.bf16.msra.mxu0 %v14046_v19  ;;  %v1013_v25 = vsub.f32 %v18814_v20, %v18039_v29 }
  0xb9   : > { %v1001_v51 = vsub.f32 %v18810_v12, %v18036_v14  ;;  %v984_v39 = vand.u32 4294901760, %v983_v42  ;;  %v996_v35 = vand.u32 4294901760, %v995_v55  ;;  %v18820_v14 = vld [vmem:[#allocation81_spill] sm:$0xff]  ;;  %10439 = vmatprep.subr.bf16.mxu0 %v14068_v33 }
  0xba   : > { %v14086_v4 = vpack.c.bf16 %v990_v22, %v978_v5  ;;  %v18048_v42 = vand.u32 4294901760, %v18820_v14  ;;  %v1007_v62 = vsub.f32 %v18816_v2, %v18045_v48  ;;  %v18822_v5 = vand.u32 4294901760, %v18817_v18  ;;  %v18823_v22 = vld [vmem:[#allocation82_spill] sm:$0xff]  ;;  %v18827_v48 = vld [vmem:[#allocation89_spill] sm:$0xff] }
  0xbb   : > { %10957 = vmatpush1.bf16.msra.mxu1 %v18815_v30  ;;  %v1002_v8 = vand.u32 4294901760, %v1001_v51  ;;  %v14094_v55 = vpack.c.bf16 %v996_v35, %v984_v39  ;;  %v18049_v19 = vand.u32 4294901760, %v18823_v22  ;;  %v1014_v29 = vand.u32 4294901760, %v1013_v25  ;;  %v18824_v30 = vld [vmem:[#allocation84_spill] sm:$0xff]  ;;  %v18825_v39 = vld [vmem:[#allocation87_spill] sm:$0xff] }
  0xbc   : > { %18818 = vst [vmem:[#allocation180_spill] sm:$0xff] %v14086_v4  ;;  %10959 = vmatprep.subr.bf16.mxu1 %v18819_v41  ;;  %v1019_v51 = vsub.f32 %v18817_v18, %v18822_v5  ;;  %v1025_v41 = vsub.f32 %v18820_v14, %v18048_v42  ;;  %v18052_v33 = vand.u32 4294901760, %v18824_v30  ;;  %v18055_v35 = vand.u32 4294901760, %v18825_v39  ;;  %10441 = vmatpush1.bf16.msra.mxu0 %v14076_v1 }
  0xbd   : > { %18821 = vst [vmem:[#allocation181_spill] sm:$0xff] %v14094_v55  ;;  %v1008_v20 = vand.u32 4294901760, %v1007_v62  ;;  %v1037_v5 = vsub.f32 %v18823_v22, %v18049_v19  ;;  %v14114_v25 = vpack.c.bf16 %v1014_v29, %v1002_v8  ;;  %10443 = vmatprep.subr.bf16.mxu0 %v14086_v4  ;;  %v18831_v29 = vand.u32 4294901760, %v18827_v48  ;;  %v18833_v22 = vld [vmem:[#allocation92_spill] sm:$0xff]  ;;  %v18841_v4 = vld [vmem:[#allocation98_spill] sm:$0xff] }
  0xbe   : > { %v1020_v12 = vand.u32 4294901760, %v1019_v51  ;;  %v1026_v2 = vand.u32 4294901760, %v1025_v41  ;;  %v1031_v42 = vsub.f32 %v18824_v30, %v18052_v33  ;;  %v1043_v62 = vsub.f32 %v18825_v39, %v18055_v35  ;;  %v18829_v51 = vld [vmem:[#allocation80_spill] sm:$0xff]  ;;  %v18832_v41 = vld [vmem:[#allocation90_spill] sm:$0xff]  ;;  %v18834_v39 = vld [vmem:[#allocation95_spill] sm:$0xff] }
  0xbf   : > { %10961 = vmatpush1.bf16.msra.mxu1 %v18826_v24  ;;  %18828 = vst [vmem:[#allocation182_spill] sm:$0xff] %v14114_v25  ;;  %v14124_v24 = vld [vmem:[%s13441_s11 + $0x78] sm:$0xff]  ;;  %v1038_v18 = vand.u32 4294901760, %v1037_v5  ;;  %v1049_v8 = vsub.f32 %v18827_v48, %v18831_v29  ;;  %v18059_v1 = vand.u32 4294901760, %v18832_v41  ;;  %v18062_v35 = vand.u32 4294901760, %v18833_v22  ;;  %v18839_v29 = vld [vmem:[#allocation97_spill] sm:$0xff] }
  0xc0   : > { %10963 = vmatprep.subr.bf16.mxu1 %v18829_v51  ;;  %v14127_v19 = vpack.c.bf16 %v1020_v12, %v1008_v20  ;;  %v1032_v33 = vand.u32 4294901760, %v1031_v42  ;;  %v1044_v30 = vand.u32 4294901760, %v1043_v62  ;;  %v18065_v51 = vand.u32 4294901760, %v18834_v39  ;;  %10445 = vmatpush1.bf16.msra.mxu0 %v14094_v55  ;;  %v18838_v62 = vld [vmem:[#allocation88_spill] sm:$0xff] }
  0xc1   : > { %v14135_v14 = vpack.c.bf16 %v1038_v18, %v1026_v2  ;;  %v1050_v20 = vand.u32 4294901760, %v1049_v8  ;;  %v1061_v12 = vsub.f32 %v18832_v41, %v18059_v1  ;;  %v357_v5 = vrot.slane %v14124_v24, 1  ;;  %v14154_v1 = vld [vmem:[%s13441_s11 + $0x70] sm:$0xff]  ;;  %10447 = vmatprep.subr.bf16.mxu0 %v14114_v25 }
  0xc2   : > { %18830 = vst [vmem:[#allocation183_spill] sm:$0xff] %v14127_v19  ;;  %v14143_v42 = vpack.c.bf16 %v1044_v30, %v1032_v33  ;;  %v1055_v2 = vsub.f32 %v18833_v22, %v18062_v35  ;;  %v1067_v18 = vsub.f32 %v18834_v39, %v18065_v51  ;;  %v18070_v8 = vand.u32 4294901760, %v18839_v29 }
  0xc3   : > { %18835 = vst [vmem:[#allocation184_spill] sm:$0xff] %v14135_v14  ;;  %10965 = vmatpush1.bf16.msra.mxu1 %v18836_v57  ;;  %v1062_v55 = vand.u32 4294901760, %v1061_v12  ;;  %v18840_v33 = vrot.slane %v13502_v45, 1  ;;  %v14162_v35 = vadd.f32 %v13594_v37, %v13592_v46  ;;  %v18071_v57 = vand.u32 4294901760, %v18841_v4  ;;  %v14172_v12 = vld [vmem:[%s13652_s28 + $0x78] sm:$0xff] }
  0xc4   : > { %18837 = vst [vmem:[#allocation185_spill] sm:$0xff] %v14143_v42  ;;  %10967 = vmatprep.subr.bf16.mxu1 %v18838_v62  ;;  %v1056_v51 = vand.u32 4294901760, %v1055_v2  ;;  %v1068_v39 = vand.u32 4294901760, %v1067_v18  ;;  %v12760_v62 = vld [vmem:[%s13441_s11 + $0x68] sm:$0xff]  ;;  %v1073_v25 = vsub.f32 %v18839_v29, %v18070_v8  ;;  %v355_v37 = vrot.slane %v14154_v1, 1  ;;  %10449 = vmatpush1.bf16.msra.mxu0 %v14127_v19  ;;  %v18846_v8 = vld [vmem:[#allocation96_spill] sm:$0xff] }
  0xc5   : > { %v358_v30 = vsel %vm328_vm0, %v18840_v33, %v357_v5  ;;  %v14174_v45 = vpack.c.bf16 %v1062_v55, %v1050_v20  ;;  %v18843_v33 = vld [vmem:[#allocation93_spill] sm:$0xff]  ;;  %v1085_v46 = vsub.f32 %v18841_v4, %v18071_v57  ;;  %v14183_v2 = vadd.f32 %v13669_v49, %v13664_v34  ;;  %10451 = vmatprep.subr.bf16.mxu0 %v14135_v14  ;;  %v18848_v34 = vld [vmem:[#allocation103_spill] sm:$0xff] }
  0xc6   : > { %v14166_v22 = vadd.f32 %v12760_v62, %v358_v30  ;;  %v14186_v18 = vpack.c.bf16 %v1068_v39, %v1056_v51  ;;  %v1074_v20 = vand.u32 4294901760, %v1073_v25  ;;  %v18845_v62 = vld [vmem:[#allocation100_spill] sm:$0xff]  ;;  %v14198_v39 = vld [vmem:[%s13652_s28 + $0x70] sm:$0xff]  ;;  %v18850_v51 = vld [vmem:[#allocation129_spill] sm:$0xff]  ;;  %v18855_v0 = vand.u32 4294901760, %v18848_v34 }
  0xc7   : > { %18842 = vst [vmem:[#allocation97_spill] sm:$0xff] %v14174_v45  ;;  %10969 = vmatpush1.bf16.msra.mxu1 %v18843_v33  ;;  %v1086_v57 = vand.u32 4294901760, %v1085_v46  ;;  %v18847_v33 = vrot.slane %v13585_v56, 1  ;;  %18849 = vst [vmem:[#allocation100_spill] sm:$0xff] %v14198_v39  ;;  %v18851_v48 = vrot.slane %v18850_v51, 2  ;;  %v18852_v14 = vand.u32 4294901760, %v18845_v62 }
  0xc8   : > { %18844 = vst [vmem:[#allocation98_spill] sm:$0xff] %v14186_v18  ;;  %v432_v55 = vrot.slane %v14166_v22, 2  ;;  %10971 = vmatprep.subr.bf16.mxu1 %v18846_v8  ;;  %v18853_v8 = vld [vmem:[#allocation147_spill] sm:$0xff]  ;;  %10453 = vmatpush1.bf16.msra.mxu0 %v14143_v42 }
  0xc9   : > { %v356_v41 = vsel %vm328_vm0, %v18847_v33, %v355_v37  ;;  %v1079_v46 = vsub.f32 %v18845_v62, %v18852_v14  ;;  %v14211_v33 = vadd.f32 %v18853_v8, %v13762_v13  ;;  %v14216_v19 = vpack.c.bf16 %v1086_v57, %v1074_v20  ;;  %v18859_v14 = vld [vmem:[#allocation101_spill] sm:$0xff]  ;;  %10455 = vmatprep.subr.bf16.mxu0 %v14174_v45 }
  0xca   : > { %v433_v25 = vsel %vm407_vm1, %v18851_v48, %v432_v55  ;;  %v14204_v30 = vadd.f32 %v356_v41, %v13585_v56  ;;  %v1091_v48 = vsub.f32 %v18848_v34, %v18855_v0  ;;  %v18856_v56 = vrot.slane %v14172_v12, 1  ;;  %v18857_v41 = vld [vmem:[#allocation140_spill] sm:$0xff] }
  0xcb   : > { %v14214_v49 = vadd.f32 %v433_v25, %v18850_v51  ;;  %18854 = vst [vmem:[#allocation103_spill] sm:$0xff] %v14216_v19  ;;  %v18858_v7 = vrot.slane %v18857_v41, 1  ;;  %10973 = vmatpush1.bf16.msra.mxu1 %v18859_v14  ;;  %v1080_v8 = vand.u32 4294901760, %v1079_v46  ;;  %v18088_v20 = vrot.slane %v14198_v39, 1  ;;  %v18860_v51 = vld [vmem:[#allocation104_spill] sm:$0xff]  ;;  %v18861_v46 = vld [vmem:[#allocation134_spill] sm:$0xff] }
  0xcc   : > { %v430_v13 = vrot.slane %v14204_v30, 2  ;;  %10975 = vmatprep.subr.bf16.mxu1 %v18860_v51  ;;  %v1092_v25 = vand.u32 4294901760, %v1091_v48  ;;  %v18862_v42 = vrot.slane %v18861_v46, 2  ;;  %v18863_v51 = vld [vmem:[#allocation146_spill] sm:$0xff]  ;;  %v18865_v48 = vld [vmem:[#allocation105_spill] sm:$0xff]  ;;  %10457 = vmatpush1.bf16.msra.mxu0 %v14186_v18  ;;  %v18879_v18 = vrot.slane %v13786_v50, 2 }
  0xcd   : > { %v2166_v11 = vsel %vm328_vm0, %v18858_v7, %v18856_v56  ;;  %v507_v0 = vrot.slane %v14214_v49, 4  ;;  %v14238_v7 = vadd.f32 %v13828_v15, %v13826_v17  ;;  %v14241_v56 = vadd.f32 %v357_v5, %v14124_v24  ;;  %10459 = vmatprep.subr.bf16.mxu0 %v14216_v19  ;;  %v18877_v19 = vld [vmem:[#allocation137_spill] sm:$0xff] }
  0xce   : > { %v14230_v57 = vadd.f32 %v2166_v11, %v18857_v41  ;;  %v431_v11 = vsel %vm407_vm1, %v18862_v42, %v430_v13  ;;  %v18864_v45 = vrot.slane %v18863_v51, 1  ;;  %v18867_v17 = vrot.slane %v18866_v3, 4  ;;  %v18869_v41 = vld [vmem:[#allocation109_spill] sm:$0xff] }
  0xcf   : > { %v14257_v24 = vadd.f32 %v431_v11, %v18861_v46  ;;  %v14259_v5 = vpack.c.bf16 %v1092_v25, %v1080_v8  ;;  %10977 = vmatpush1.bf16.msra.mxu1 %v18869_v41  ;;  %v18096_v46 = vrot.slane %v14241_v56, 2  ;;  %v18873_v8 = vand.u32 4294901760, %v18865_v48 }
  0xd0   : > { %v2164_v14 = vsel %vm328_vm0, %v18864_v45, %v18088_v20  ;;  %v508_v15 = vsel %vm486_vm2, %v18867_v17, %v507_v0  ;;  %v18870_v20 = vrot.slane %v14230_v57, 2  ;;  %v18878_v52 = vrot.slane %v18877_v19, 4 }
  0xd1   : > { %18868 = vst [vmem:[#allocation129_spill] sm:$0xff] %v14259_v5  ;;  %v14262_v42 = vadd.f32 %v2164_v14, %v18863_v51  ;;  %v542_v45 = vadd.f32 %v508_v15, %v18866_v3  ;;  %v1097_v25 = vsub.f32 %v18865_v48, %v18873_v8  ;;  %v18874_v14 = vld [vmem:[#allocation112_spill] sm:$0xff]  ;;  %v505_v51 = vrot.slane %v14257_v24, 4  ;;  %v18875_v15 = vld [vmem:[#allocation106_spill] sm:$0xff]  ;;  %10461 = vmatpush1.bf16.msra.mxu0 %v14259_v5 }
  0xd2   : > { %v2240_v17 = vsel %vm407_vm1, %v18872_v36, %v18870_v20  ;;  %10979 = vmatprep.subr.bf16.mxu1 %v18874_v14  ;;  %v18876_v36 = vld [vmem:[#allocation131_spill] sm:$0xff]  ;;  %v437_v8 = vsel %vm407_vm1, %v432_v55, %v18096_v46  ;;  %v14291_v14 = vadd.f32 %v355_v37, %v14154_v1  ;;  %v18880_v55 = vld [vmem:[#allocation117_spill] sm:$0xff]  ;;  %v18885_v5 = vld [vmem:[#allocation120_spill] sm:$0xff] }
  0xd3   : > { %v14280_v3 = vadd.f32 %v2240_v17, %v18871_v10  ;;  %v18097_v11 = vrot.slane %v14262_v42, 2  ;;  %v14285_v20 = vadd.f32 %v542_v45, %v18876_v36  ;;  %v1098_v41 = vand.u32 4294901760, %v1097_v25  ;;  %10981 = vmatpush1.bf16.msra.mxu1 %v18880_v55 }
  0xd4   : > { %v506_v10 = vsel %vm486_vm2, %v18878_v52, %v505_v51  ;;  %v14303_v58 = vadd.f32 %v437_v8, %v14166_v22  ;;  %v18881_v25 = vand.u32 4294901760, %v18875_v15  ;;  %v18882_v22 = vld [vmem:[#allocation145_spill] sm:$0xff]  ;;  %10983 = vmatprep.subr.bf16.mxu1 %v18885_v5 }
  0xd5   : > { %v18101_v17 = vrot.slane %v14280_v3, 4  ;;  %v2238_v36 = vsel %vm407_vm1, %v18879_v18, %v18097_v11  ;;  %v566_v1 = vadd.f32 %v14285_v20, %v14162_v35  ;;  %v541_v37 = vadd.f32 %v506_v10, %v18877_v19  ;;  %v18884_v19 = vld [vmem:[#allocation108_spill] sm:$0xff] }
  0xd6   : > { %v14311_v52 = vadd.f32 %v2238_v36, %v13786_v50  ;;  %v1109_v46 = vsub.f32 %v18875_v15, %v18881_v25  ;;  %v18883_v18 = vrot.slane %v18882_v22, 4  ;;  %v18103_v11 = vrot.slane %v14303_v58, 4  ;;  %v18887_v36 = vld [vmem:[#allocation138_spill] sm:$0xff] }
  0xd7   : > { %v18104_v35 = vrot.slane %v14291_v14, 2  ;;  %v14325_v50 = vand.u32 4294901760, %v566_v1  ;;  %v14328_v55 = vadd.f32 %v541_v37, %v18887_v36  ;;  %v18888_v5 = vand.u32 4294901760, %v18884_v19  ;;  %v18889_v36 = vld [vmem:[#allocation125_spill] sm:$0xff] }
  0xd8   : > { %v2314_v8 = vsel %vm486_vm2, %v18883_v18, %v18101_v17  ;;  %v512_v18 = vsel %vm486_vm2, %v507_v0, %v18103_v11  ;;  %v1110_v17 = vand.u32 4294901760, %v1109_v46  ;;  %10985 = vmatpush1.bf16.msra.mxu1 %v18889_v36  ;;  %v18892_v46 = vrot.slane %v14311_v52, 4 }
  0xd9   : > { %18886 = vst [vmem:[#allocation147_spill] sm:$0xff] %v14325_v50  ;;  %v14331_v25 = vadd.f32 %v2314_v8, %v18882_v22  ;;  %v435_v10 = vsel %vm407_vm1, %v430_v13, %v18104_v35  ;;  %v1103_v53 = vsub.f32 %v18884_v19, %v18888_v5  ;;  %v14345_v22 = vsub.f32 %v566_v1, %v14325_v50 }
  0xda   : > { %v565_v8 = vadd.f32 %v14328_v55, %v14183_v2  ;;  %v18893_v13 = vrot.slane %v13806_v26, 4  ;;  %v14362_v35 = vadd.f32 %v512_v18, %v14214_v49  ;;  %v14364_v1 = vpack.c.bf16 %v1110_v17, %v1098_v41  ;;  %v18896_v41 = vld [vmem:[#allocation111_spill] sm:$0xff]  ;;  %v18900_v18 = vld [vmem:[#allocation133_spill] sm:$0xff] }
  0xdb   : > { %18890 = vst [vmem:[#allocation140_spill] sm:$0xff] %v14345_v22  ;;  %v14351_v0 = vadd.f32 %v14331_v25, %v18891_v61  ;;  %v14367_v2 = vadd.f32 %v435_v10, %v14204_v30  ;;  %v18107_v61 = vand.u32 4294901760, %v14345_v22  ;;  %v1104_v32 = vand.u32 4294901760, %v1103_v53 }
  0xdc   : > { %v2312_v11 = vsel %vm486_vm2, %v18893_v13, %v18892_v46  ;;  %18894 = vst [vmem:[#allocation134_spill] sm:$0xff] %v14364_v1  ;;  %v14370_v36 = vand.u32 4294901760, %v565_v8  ;;  %v14379_v49 = vadd.f32 %v14362_v35, %v542_v45  ;;  %10463 = vmatprep.subr.bf16.mxu0 %v14364_v1  ;;  %v18919_v59 = vrot.slane %v14280_v3, 4 }
  0xdd   : > { %v14359_v5 = vadd.f32 %v2312_v11, %v13806_v26  ;;  %v2372_v9 = vadd.f32 %v14351_v0, %v14211_v33  ;;  %v509_v30 = vrot.slane %v14367_v2, 4  ;;  %v18113_v11 = vand.u32 4294901760, %v18896_v41 }
  0xde   : > { %18895 = vst [vmem:[#allocation146_spill] sm:$0xff] %v14370_v36  ;;  %v720_v17 = vsub.f32 %v14345_v22, %v18107_v61  ;;  %v14388_v33 = vsub.f32 %v565_v8, %v14370_v36  ;;  %v568_v46 = vadd.f32 %v14379_v49, %v18900_v18  ;;  %v18923_v36 = vld [vmem:[#allocation116_spill] sm:$0xff] }
  0xdf   : > { %v14376_v26 = vadd.f32 %v14359_v5, %v13830_v40  ;;  %v14390_v53 = vand.u32 4294901760, %v2372_v9  ;;  %v18899_v40 = vrot.slane %v14172_v12, 1  ;;  %v510_v13 = vsel %vm486_vm2, %v505_v51, %v509_v30 }
  0xe0   : > { %18897 = vst [vmem:[#allocation105_spill] sm:$0xff] %v14388_v33  ;;  %v1115_v8 = vsub.f32 %v18896_v41, %v18113_v11  ;;  %v721_v61 = vand.u32 4294901760, %v720_v17  ;;  %v18116_v1 = vand.u32 4294901760, %v14388_v33  ;;  %v18143_v50 = vand.u32 4294901760, %v18923_v36 }
  0xe1   : > { %18898 = vst [vmem:[#allocation130_spill] sm:$0xff] %v14390_v53  ;;  %v14395_v45 = vadd.f32 %v18899_v40, %v14172_v12  ;;  %v2371_v10 = vadd.f32 %v14376_v26, %v14238_v7  ;;  %v14407_v22 = vsub.f32 %v2372_v9, %v14390_v53  ;;  %v543_v12 = vadd.f32 %v510_v13, %v14257_v24  ;;  %v18905_v13 = vld [vmem:[#allocation113_spill] sm:$0xff] }
  0xe2   : > { %v14412_v7 = vand.u32 4294901760, %v568_v46  ;;  %v1116_v6 = vand.u32 4294901760, %v1115_v8  ;;  %722 = vmatprep.mubr.f32.mxu0 %v721_v61  ;;  %v726_v51 = vsub.f32 %v14388_v33, %v18116_v1  ;;  %v18904_v9 = vrot.slane %v14198_v39, 1 }
  0xe3   : > { %18901 = vst [vmem:[#allocation144_spill] sm:$0xff] %v14407_v22  ;;  %v14410_v40 = vand.u32 4294901760, %v2371_v10  ;;  %v2243_v18 = vrot.slane %v14395_v45, 2  ;;  %3217 = vmatprep.mubr.f32.mxu1 %v14407_v22  ;;  %v14419_v17 = vadd.f32 %v543_v12, %v541_v37  ;;  %v18909_v1 = vrot.slane %v14230_v57, 2 }
  0xe4   : > { %18903 = vst [vmem:[#allocation131_spill] sm:$0xff] %v14412_v7  ;;  %v14424_v24 = vadd.f32 %v18904_v9, %v14198_v39  ;;  %v14431_v61 = vsub.f32 %v568_v46, %v14412_v7  ;;  %v14433_v53 = vpack.c.bf16 %v1116_v6, %v1104_v32  ;;  %v727_v33 = vand.u32 4294901760, %v726_v51 }
  0xe5   : > { %18902 = vst [vmem:[#allocation106_spill] sm:$0xff] %v14410_v40  ;;  %v14428_v8 = vsub.f32 %v2371_v10, %v14410_v40  ;;  %v2244_v37 = vsel %vm407_vm1, %v18909_v1, %v2243_v18  ;;  %v567_v60 = vadd.f32 %v14419_v17, %v18910_v63  ;;  %v18911_v6 = vrot.slane %v14241_v56, 2  ;;  %v18913_v63 = vld [vmem:[#allocation114_spill] sm:$0xff] }
  0xe6   : > { %18907 = vst [vmem:[#allocation145_spill] sm:$0xff] %v14431_v61  ;;  %18908 = vst [vmem:[#allocation108_spill] sm:$0xff] %v14433_v53  ;;  %v14441_v9 = vadd.f32 %v2244_v37, %v14230_v57  ;;  %v2241_v11 = vrot.slane %v14424_v24, 2  ;;  %10465 = vmatpush1.bf16.msra.mxu0 %v14433_v53  ;;  %v18912_v1 = vand.u32 4294901760, %v18905_v13  ;;  %v18915_v39 = vrot.slane %v14262_v42, 2 }
  0xe7   : > { %18906 = vst [vmem:[#allocation137_spill] sm:$0xff] %v14428_v8  ;;  %3220 = vmatmul.mubr.f32.gmra.mrb[2].mxu1 %v14428_v8  ;;  %v469_v32 = vadd.f32 %v18911_v6, %v14241_v56  ;;  %728 = vmatmul.mubr.f32.gmra.mrb[2].mxu0 %v727_v33  ;;  %v14454_v57 = vand.u32 4294901760, %v567_v60  ;;  %v18916_v53 = vrot.slane %v14291_v14, 2  ;;  %v18917_v56 = vand.u32 4294901760, %v14431_v61 }
  0xe8   : > { %v1121_v46 = vsub.f32 %v18905_v13, %v18912_v1  ;;  %v2317_v37 = vrot.slane %v14441_v9, 4  ;;  %v2242_v10 = vsel %vm407_vm1, %v18915_v39, %v2241_v11  ;;  %v18920_v54 = vand.u32 4294901760, %v18913_v63 }
  0xe9   : > { %18914 = vst [vmem:[#allocation138_spill] sm:$0xff] %v14454_v57  ;;  %v14463_v40 = vadd.f32 %v18916_v53, %v14291_v14  ;;  %v736_v6 = vsub.f32 %v14431_v61, %v18917_v56  ;;  %v2273_v1 = vadd.f32 %v2242_v10, %v14262_v42  ;;  %v515_v33 = vrot.slane %v469_v32, 4 }
  0xea   : > { %v1122_v51 = vand.u32 4294901760, %v1121_v46  ;;  %v14470_v7 = vsub.f32 %v567_v60, %v14454_v57  ;;  %v2318_v39 = vsel %vm486_vm2, %v18919_v59, %v2317_v37  ;;  %v1133_v14 = vsub.f32 %v18913_v63, %v18920_v54 }
  0xeb   : > { %v513_v53 = vrot.slane %v14463_v40, 4  ;;  %v737_v47 = vand.u32 4294901760, %v736_v6  ;;  %v2350_v56 = vadd.f32 %v2318_v39, %v14280_v3  ;;  %v2315_v61 = vrot.slane %v2273_v1, 4 }
  0xec   : > { %18918 = vst [vmem:[#allocation148_spill] sm:$0xff] %v14470_v7  ;;  %v18921_v42 = vrot.slane %v14303_v58, 4  ;;  %v18141_v60 = vand.u32 4294901760, %v14470_v7  ;;  %v1134_v57 = vand.u32 4294901760, %v1133_v14  ;;  %v18922_v6 = vrot.slane %v14311_v52, 4 }
  0xed   : > { %v514_v59 = vsel %vm486_vm2, %v509_v30, %v513_v53  ;;  %738 = vmatprep.mubr.f32.mxu0 %v737_v47  ;;  %v14487_v54 = vadd.f32 %v2350_v56, %v14331_v25  ;;  %v18925_v25 = vld [vmem:[#allocation149_spill] sm:$0xff] }
  0xee   : > { %v516_v10 = vsel %vm486_vm2, %v18921_v42, %v515_v33  ;;  %v2316_v3 = vsel %vm486_vm2, %v18922_v6, %v2315_v61  ;;  %v545_v39 = vadd.f32 %v514_v59, %v14367_v2  ;;  %v742_v42 = vsub.f32 %v14470_v7, %v18141_v60  ;;  %v18926_v59 = vld [vmem:[#allocation119_spill] sm:$0xff] }
  0xef   : > { %v546_v46 = vadd.f32 %v516_v10, %v14303_v58  ;;  %v2349_v58 = vadd.f32 %v2316_v3, %v14311_v52  ;;  %v14499_v47 = vpack.c.bf16 %v1134_v57, %v1122_v51  ;;  %v2374_v14 = vadd.f32 %v14487_v54, %v18925_v25 }
  0xf0   : > { %v559_v10 = vadd.f32 %v545_v39, %v543_v12  ;;  %v1127_v2 = vsub.f32 %v18923_v36, %v18143_v50  ;;  %v18142_v6 = vand.u32 4294901760, %v18926_v59  ;;  %v743_v44 = vand.u32 4294901760, %v742_v42 }
  0xf1   : > { %v560_v30 = vadd.f32 %v546_v46, %v14362_v35  ;;  %18924 = vst [vmem:[#allocation111_spill] sm:$0xff] %v14499_v47  ;;  %v14508_v43 = vadd.f32 %v2349_v58, %v14359_v5  ;;  %10467 = vmatprep.subr.bf16.mxu0 %v14499_v47  ;;  %v2276_v35 = vadd.f32 %v2243_v18, %v14395_v45  ;;  %v14513_v51 = vand.u32 4294901760, %v2374_v14  ;;  %v18951_v47 = vld [vmem:[#allocation7_spill] sm:$0xff] }
  0xf2   : > { %v569_v12 = vadd.f32 %v559_v10, %v14328_v55  ;;  %v1128_v57 = vand.u32 4294901760, %v1127_v2  ;;  %v1139_v3 = vsub.f32 %v18926_v59, %v18142_v6  ;;  %744 = vmatmul.mubr.f32.gmra.mrb[4].mxu0 %v743_v44  ;;  %v548_v25 = vadd.f32 %v515_v33, %v469_v32 }
  0xf3   : > { %v570_v52 = vadd.f32 %v560_v30, %v14285_v20  ;;  %18927 = vst [vmem:[#allocation133_spill] sm:$0xff] %v14513_v51  ;;  %v2373_v5 = vadd.f32 %v14508_v43, %v13836_v23  ;;  %v2321_v20 = vrot.slane %v2276_v35, 4  ;;  %v2275_v30 = vadd.f32 %v2241_v11, %v14424_v24 }
  0xf4   : > { %v14525_v45 = vsub.f32 %v2374_v14, %v14513_v51  ;;  %v14527_v18 = vand.u32 4294901760, %v569_v12  ;;  %v1140_v55 = vand.u32 4294901760, %v1139_v3  ;;  %v562_v14 = vadd.f32 %v548_v25, %v546_v46  ;;  %v18936_v3 = vld [vmem:[#allocation121_spill] sm:$0xff]  ;;  %v18937_v46 = vld [vmem:[#allocation122_spill] sm:$0xff] }
  0xf5   : > { %v14521_v42 = vand.u32 4294901760, %v570_v52  ;;  %v14529_v10 = vand.u32 4294901760, %v2373_v5  ;;  %v2322_v44 = vsel %vm486_vm2, %v2317_v37, %v2321_v20  ;;  %v2319_v23 = vrot.slane %v2275_v30, 4 }
  0xf6   : > { %18929 = vst [vmem:[#allocation139_spill] sm:$0xff] %v14525_v45  ;;  %18930 = vst [vmem:[#allocation114_spill] sm:$0xff] %v14527_v18  ;;  %3227 = vmatprep.mubr.f32.mxu1 %v14525_v45  ;;  %v14537_v60 = vsub.f32 %v569_v12, %v14527_v18  ;;  %v14539_v11 = vpack.c.bf16 %v1140_v55, %v1128_v57  ;;  %v2352_v24 = vadd.f32 %v2322_v44, %v14441_v9 }
  0xf7   : > { %18928 = vst [vmem:[#allocation113_spill] sm:$0xff] %v14521_v42  ;;  %18931 = vst [vmem:[#allocation116_spill] sm:$0xff] %v14529_v10  ;;  %v14532_v2 = vsub.f32 %v570_v52, %v14521_v42  ;;  %v14543_v32 = vsub.f32 %v2373_v5, %v14529_v10  ;;  %v2320_v52 = vsel %vm486_vm2, %v2315_v61, %v2319_v23  ;;  %v18145_v37 = vand.u32 4294901760, %v18936_v3 }
  0xf8   : > { %18933 = vst [vmem:[#allocation119_spill] sm:$0xff] %v14537_v60  ;;  %18934 = vst [vmem:[#allocation186_spill] sm:$0xff] %v14539_v11  ;;  %v18148_v6 = vand.u32 4294901760, %v14537_v60  ;;  %10469 = vmatpush1.bf16.msra.mxu0 %v14539_v11  ;;  %v2366_v12 = vadd.f32 %v2352_v24, %v2350_v56  ;;  %v2351_v50 = vadd.f32 %v2320_v52, %v2273_v1  ;;  %v18149_v5 = vand.u32 4294901760, %v18937_v46 }
  0xf9   : > { %18932 = vst [vmem:[#allocation149_spill] sm:$0xff] %v14532_v2  ;;  %18935 = vst [vmem:[#allocation187_spill] sm:$0xff] %v14543_v32  ;;  %v18144_v33 = vand.u32 4294901760, %v14532_v2  ;;  %v572_v57 = vadd.f32 %v562_v14, %v14379_v49  ;;  %3230 = vmatmul.mubr.f32.gmra.mrb[4].mxu1 %v14543_v32  ;;  %v1145_v61 = vsub.f32 %v18936_v3, %v18145_v37 }
  0xfa   : > { %v547_v55 = vadd.f32 %v513_v53, %v14463_v40  ;;  %v758_v1 = vsub.f32 %v14537_v60, %v18148_v6  ;;  %v2376_v49 = vadd.f32 %v2366_v12, %v14351_v0  ;;  %v2365_v56 = vadd.f32 %v2351_v50, %v2349_v58  ;;  %v18941_v12 = vld [vmem:[#allocation124_spill] sm:$0xff] }
  0xfb   : > { %v752_v9 = vsub.f32 %v14532_v2, %v18144_v33  ;;  %v14564_v25 = vand.u32 4294901760, %v572_v57  ;;  %v1146_v14 = vand.u32 4294901760, %v1145_v61  ;;  %v1157_v52 = vsub.f32 %v18937_v46, %v18149_v5  ;;  %v18942_v61 = vld [vmem:[#allocation127_spill] sm:$0xff] }
  0xfc   : > { %v561_v33 = vadd.f32 %v547_v55, %v545_v39  ;;  %v759_v37 = vand.u32 4294901760, %v758_v1  ;;  %v14569_v11 = vand.u32 4294901760, %v2376_v49  ;;  %v2375_v40 = vadd.f32 %v2365_v56, %v14376_v26 }
  0xfd   : > { %18938 = vst [vmem:[#allocation121_spill] sm:$0xff] %v14564_v25  ;;  %v753_v44 = vand.u32 4294901760, %v752_v9  ;;  %v14573_v53 = vsub.f32 %v572_v57, %v14564_v25  ;;  %v1158_v0 = vand.u32 4294901760, %v1157_v52  ;;  %v1150_v9 = vand.u32 4294901760, %v18941_v12 }
  0xfe   : > { %18939 = vst [vmem:[#allocation122_spill] sm:$0xff] %v14569_v11  ;;  %v571_v58 = vadd.f32 %v561_v33, %v14419_v17  ;;  %v1162_v6 = vand.u32 4294901760, %v18942_v61  ;;  %v14579_v5 = vsub.f32 %v2376_v49, %v14569_v11  ;;  %v14581_v39 = vand.u32 4294901760, %v2375_v40 }
  0xff   : > { %18940 = vst [vmem:[#allocation188_spill] sm:$0xff] %v14573_v53  ;;  %754 = vmatprep.mubr.f32.mxu0 %v753_v44  ;;  %v18154_v55 = vand.u32 4294901760, %v14573_v53  ;;  %v2354_v26 = vadd.f32 %v2321_v20, %v2276_v35  ;;  %v14584_v1 = vpack.c.bf16 %v1158_v0, %v1146_v14  ;;  %v1151_v56 = vsub.f32 %v18941_v12, %v1150_v9  ;;  %v18949_v12 = vld [vmem:[#allocation6_spill] sm:$0xff] }
 0x100   : > { %760 = vmatmul.mubr.f32.gmra.mrb[6].mxu0 %v759_v37  ;;  %18943 = vst [vmem:[#allocation124_spill] sm:$0xff] %v14579_v5  ;;  %18944 = vst [vmem:[#allocation127_spill] sm:$0xff] %v14581_v39  ;;  %v14586_v57 = vand.u32 4294901760, %v571_v58  ;;  %v1163_v17 = vsub.f32 %v18942_v61, %v1162_v6  ;;  %3237 = vmatprep.mubr.f32.mxu1 %v14579_v5  ;;  %v14592_v33 = vsub.f32 %v2375_v40, %v14581_v39 }
 0x101   : > { %18945 = vst [vmem:[#allocation189_spill] sm:$0xff] %v14584_v1  ;;  %v768_v37 = vsub.f32 %v14573_v53, %v18154_v55  ;;  %v2368_v49 = vadd.f32 %v2354_v26, %v2352_v24  ;;  %v2353_v44 = vadd.f32 %v2319_v23, %v2275_v30  ;;  %10471 = vmatprep.subr.bf16.mxu0 %v14584_v1  ;;  %v1152_v20 = vand.u32 4294901760, %v1151_v56 }
 0x102   : > { %18946 = vst [vmem:[#allocation190_spill] sm:$0xff] %v14586_v57  ;;  %18947 = vst [vmem:[#allocation191_spill] sm:$0xff] %v14592_v33  ;;  %v14599_v35 = vsub.f32 %v571_v58, %v14586_v57  ;;  %v1164_v14 = vand.u32 4294901760, %v1163_v17  ;;  %3240 = vmatmul.mubr.f32.gmra.mrb[6].mxu1 %v14592_v33  ;;  %v18950_v61 = vand.u32 4294901760, %v18949_v12  ;;  %v18952_v39 = vand.u32 4294901760, %v18951_v47 }
 0x103   : > { %v769_v52 = vand.u32 4294901760, %v768_v37  ;;  %v2378_v0 = vadd.f32 %v2368_v49, %v14487_v54  ;;  %v2367_v40 = vadd.f32 %v2353_v44, %v2351_v50  ;;  %v18155_v56 = vand.u32 4294901760, %v13804_v16  ;;  %v18960_v37 = vld [vmem:[#allocation135_spill] sm:$0xff]  ;;  %v18961_v49 = vld [vmem:[#allocation8_spill] sm:$0xff] }
 0x104   : > { %18948 = vst [vmem:[#allocation192_spill] sm:$0xff] %v14599_v35  ;;  %v14607_v55 = vpack.c.bf16 %v18952_v39, %v18950_v61  ;;  %v18160_v30 = vand.u32 4294901760, %v14599_v35  ;;  %v14610_v23 = vpack.c.bf16 %v1164_v14, %v1152_v20  ;;  %v18958_v39 = vld [vmem:[#allocation12_spill] sm:$0xff]  ;;  %v18158_v17 = vand.u32 4294901760, %v13869_v21  ;;  %v18963_v20 = vld [vmem:[#allocation10_spill] sm:$0xff]  ;;  %v19074_v16 = vld [vmem:[#allocation63_spill] sm:$0xff] }
 0x105   : > { %770 = vmatprep.mubr.f32.mxu0 %v769_v52  ;;  %v14612_v24 = vand.u32 4294901760, %v2378_v0  ;;  %v2377_v58 = vadd.f32 %v2367_v40, %v14508_v43  ;;  %v18962_v44 = vand.u32 4294901760, %v18961_v49  ;;  %v18964_v14 = vand.u32 4294901760, %v18963_v20 }
 0x106   : > { %18953 = vst [vmem:[#allocation6_spill] sm:$0xff] %v14607_v55  ;;  %18954 = vst [vmem:[#allocation7_spill] sm:$0xff] %v14610_v23  ;;  %10987 = vmatprep.subr.bf16.mxu1 %v14607_v55  ;;  %v774_v50 = vsub.f32 %v14599_v35, %v18160_v30  ;;  %10473 = vmatpush1.bf16.msra.mxu0 %v14610_v23  ;;  %v18967_v40 = vand.u32 4294901760, %v18841_v4  ;;  %v18969_v61 = vand.u32 4294901760, %v18845_v62  ;;  %v18973_v49 = vand.u32 4294901760, %v12990_v28 }
 0x107   : > { %18955 = vst [vmem:[#allocation193_spill] sm:$0xff] %v14612_v24  ;;  %v14621_v54 = vsub.f32 %v2378_v0, %v14612_v24  ;;  %v14623_v47 = vand.u32 4294901760, %v2377_v58  ;;  %10475 = vmatprep.subr.bf16.mxu0 %v18958_v39  ;;  %v14640_v52 = vpack.c.bf16 %v18964_v14, %v18962_v44  ;;  %v18966_v0 = vand.u32 4294901760, %v18839_v29 }
 0x108   : > { %v775_v26 = vand.u32 4294901760, %v774_v50  ;;  %v18975_v44 = vand.u32 4294901760, %v18865_v48  ;;  %v18976_v29 = vand.u32 4294901760, %v18875_v15  ;;  %v18978_v4 = vand.u32 4294901760, %v18884_v19  ;;  %v18988_v19 = vld [vmem:[#allocation13_spill] sm:$0xff] }
 0x109   : > { %18956 = vst [vmem:[#allocation194_spill] sm:$0xff] %v14621_v54  ;;  %18957 = vst [vmem:[#allocation195_spill] sm:$0xff] %v14623_v47  ;;  %3247 = vmatprep.mubr.f32.mxu1 %v14621_v54  ;;  %v14629_v43 = vsub.f32 %v2377_v58, %v14623_v47  ;;  %v14646_v12 = vpack.c.bf16 %v18967_v40, %v18966_v0  ;;  %v18970_v58 = vand.u32 4294901760, %v18848_v34  ;;  %v18979_v62 = vand.u32 4294901760, %v18896_v41  ;;  %v18981_v34 = vld [vmem:[#allocation141_spill] sm:$0xff] }
 0x10a   : > { %776 = vmatmul.mubr.f32.gmra.mrb[8].mxu0 %v775_v26  ;;  %18965 = vst [vmem:[#allocation8_spill] sm:$0xff] %v14640_v52  ;;  %v18972_v26 = vand.u32 4294901760, %v12988_v27  ;;  %v14664_v20 = vpack.c.bf16 %v18976_v29, %v18975_v44  ;;  %v18157_v27 = vand.u32 4294901760, %v14407_v22  ;;  %v18982_v28 = vand.u32 4294901760, %v18905_v13  ;;  %v18997_v29 = vld [vmem:[#allocation17_spill] sm:$0xff] }
 0x10b   : > { %18959 = vst [vmem:[#allocation196_spill] sm:$0xff] %v14629_v43  ;;  %3250 = vmatmul.mubr.f32.gmra.mrb[8].mxu1 %v14629_v43  ;;  %1167 = vmatprep.mubr.f32.mxu0 %v18960_v37  ;;  %18968 = vst [vmem:[#allocation10_spill] sm:$0xff] %v14646_v12  ;;  %v14652_v50 = vpack.c.bf16 %v18970_v58, %v18969_v61  ;;  %v14670_v14 = vpack.c.bf16 %v18979_v62, %v18978_v4  ;;  %v18983_v0 = vand.u32 4294901760, %v18913_v63  ;;  %v18999_v4 = vld [vmem:[#allocation18_spill] sm:$0xff]  ;;  %v12767_v37 = vld [vmem:[%s13652_s28 + $0x58] sm:$0xff] }
 0x10c   : > { %3387 = vmatprep.mubr.f32.mxu1 %v18155_v56  ;;  %v14658_v56 = vpack.c.bf16 %v18973_v49, %v18972_v26  ;;  %18977 = vst [vmem:[#allocation199_spill] sm:$0xff] %v14664_v20  ;;  %v18985_v48 = vand.u32 4294901760, %v18923_v36  ;;  %v18986_v15 = vand.u32 4294901760, %v18926_v59  ;;  %v18156_v41 = vand.u32 4294901760, %v14428_v8  ;;  %v18993_v36 = vld [vmem:[#allocation15_spill] sm:$0xff] }
 0x10d   : > { %18971 = vst [vmem:[#allocation197_spill] sm:$0xff] %v14652_v50  ;;  %18980 = vst [vmem:[#allocation200_spill] sm:$0xff] %v14670_v14  ;;  %v14678_v40 = vpack.c.bf16 %v18983_v0, %v18982_v28  ;;  %v18989_v58 = vand.u32 4294901760, %v18936_v3  ;;  %v18990_v13 = vand.u32 4294901760, %v18937_v46  ;;  %v14696_v26 = vpack.c.bf16 %v1162_v6, %v1150_v9  ;;  %v19002_v6 = vld [vmem:[#allocation147_spill] sm:$0xff]  ;;  %v19003_v9 = vld [vmem:[#allocation146_spill] sm:$0xff] }
 0x10e   : > { %18974 = vst [vmem:[#allocation198_spill] sm:$0xff] %v14658_v56  ;;  %1169 = vmatmul.mubr.f32.vlgmr.msra.gmra.mrb[0].mxu0 %v18981_v34  ;;  %v14684_v61 = vpack.c.bf16 %v18986_v15, %v18985_v48  ;;  %v18994_v59 = vand.u32 4294901760, %v13000_v31  ;;  %v18995_v49 = vand.u32 4294901760, %v13016_v38  ;;  %v18998_v3 = vand.u32 4294901760, %v18997_v29  ;;  %v19004_v38 = vld [vmem:[#allocation19_spill] sm:$0xff]  ;;  %v19005_v0 = vld [vmem:[#allocation22_spill] sm:$0xff] }
 0x10f   : > { %18984 = vst [vmem:[#allocation201_spill] sm:$0xff] %v14678_v40  ;;  %10477 = vmatpush1.bf16.msra.mxu0 %v18988_v19  ;;  %3391 = vmatmul.mubr.f32.vlgmr.msra.gmra.mrb[0].mxu1 %v18158_v17  ;;  %v14694_v63 = vpack.c.bf16 %v18990_v13, %v18989_v58  ;;  %18992 = vst [vmem:[#allocation204_spill] sm:$0xff] %v14696_v26  ;;  %v19000_v46 = vand.u32 4294901760, %v18999_v4  ;;  %v18159_v31 = vand.u32 4294901760, %v14525_v45  ;;  %v18165_v28 = vand.u32 4294901760, %v14543_v32  ;;  %v19006_v48 = vld [vmem:[#allocation20_spill] sm:$0xff] }
 0x110   : > { %18987 = vst [vmem:[#allocation202_spill] sm:$0xff] %v14684_v61  ;;  %10989 = vmatpush1.bf16.msra.mxu1 %v14640_v52  ;;  %10479 = vmatprep.subr.bf16.mxu0 %v18993_v36  ;;  %v14704_v44 = vpack.c.bf16 %v18995_v49, %v18994_v59  ;;  %v19007_v15 = vand.u32 4294901760, %v19006_v48  ;;  %v19008_v58 = vld [vmem:[#allocation23_spill] sm:$0xff]  ;;  %v19011_v49 = vld [vmem:[#allocation25_spill] sm:$0xff]  ;;  %v19027_v48 = vld [vmem:[#allocation34_spill] sm:$0xff] }
 0x111   : > { %18991 = vst [vmem:[#allocation203_spill] sm:$0xff] %v14694_v63  ;;  %10991 = vmatprep.subr.bf16.mxu1 %v14658_v56  ;;  %v14711_v62 = vpack.c.bf16 %v19000_v46, %v18998_v3  ;;  %1175 = vmatprep.mubr.f32.mxu0 %v19002_v6  ;;  %v19009_v13 = vand.u32 4294901760, %v19008_v58  ;;  %v19012_v29 = vand.u32 4294901760, %v19011_v49  ;;  %v19013_v3 = vld [vmem:[#allocation26_spill] sm:$0xff]  ;;  %v19018_v58 = vld [vmem:[#allocation27_spill] sm:$0xff]  ;;  %v19020_v49 = vld [vmem:[#allocation28_spill] sm:$0xff] }
 0x112   : > { %18996 = vst [vmem:[#allocation205_spill] sm:$0xff] %v14704_v44  ;;  %1177 = vmatmul.mubr.f32.gmra.mrb[2].mxu0 %v19003_v9  ;;  %3399 = vmatprep.mubr.f32.mxu1 %v18157_v27  ;;  %v19014_v4 = vand.u32 4294901760, %v19013_v3  ;;  %v19017_v27 = vld [vmem:[#allocation138_spill] sm:$0xff]  ;;  %v19022_v3 = vld [vmem:[#allocation31_spill] sm:$0xff]  ;;  %v19028_v45 = vand.u32 4294901760, %v19027_v48  ;;  %v19132_v9 = vld [vmem:[#allocation165_spill] sm:$0xff] }
 0x113   : > { %19001 = vst [vmem:[#allocation17_spill] sm:$0xff] %v14711_v62  ;;  %10481 = vmatpush1.bf16.msra.mxu0 %v19004_v38  ;;  %3403 = vmatmul.mubr.f32.gmra.mrb[2].mxu1 %v18156_v41  ;;  %v14728_v59 = vpack.c.bf16 %v19009_v13, %v19007_v15  ;;  %v19016_v41 = vld [vmem:[#allocation131_spill] sm:$0xff]  ;;  %v18174_v15 = vand.u32 4294901760, %v14592_v33  ;;  %v19019_v13 = vld [vmem:[#allocation30_spill] sm:$0xff] }
 0x114   : > { %10993 = vmatpush1.bf16.msra.mxu1 %v14704_v44  ;;  %10483 = vmatprep.subr.bf16.mxu0 %v19005_v0  ;;  %v14735_v46 = vpack.c.bf16 %v19014_v4, %v19012_v29  ;;  %v19021_v29 = vand.u32 4294901760, %v19020_v49  ;;  %v19023_v4 = vand.u32 4294901760, %v19022_v3  ;;  %v19031_v3 = vld [vmem:[#allocation35_spill] sm:$0xff]  ;;  %v19079_v0 = vld [vmem:[#allocation66_spill] sm:$0xff] }
 0x115   : > { %19010 = vst [vmem:[#allocation18_spill] sm:$0xff] %v14728_v59  ;;  %10995 = vmatprep.subr.bf16.mxu1 %v14711_v62  ;;  %1183 = vmatprep.mubr.f32.mxu0 %v19016_v41  ;;  %v19086_v38 = vld [vmem:[#allocation71_spill] sm:$0xff] }
 0x116   : > { %19015 = vst [vmem:[#allocation20_spill] sm:$0xff] %v14735_v46  ;;  %1185 = vmatmul.mubr.f32.gmra.mrb[4].mxu0 %v19017_v27  ;;  %3411 = vmatprep.mubr.f32.mxu1 %v18159_v31  ;;  %v14752_v17 = vpack.c.bf16 %v19023_v4, %v19021_v29  ;;  %v19025_v31 = vld [vmem:[#allocation33_spill] sm:$0xff]  ;;  %v19035_v29 = vld [vmem:[#allocation39_spill] sm:$0xff] }
 0x117   : > { %10485 = vmatpush1.bf16.msra.mxu0 %v19018_v58  ;;  %3415 = vmatmul.mubr.f32.gmra.mrb[4].mxu1 %v18165_v28  ;;  %v19026_v30 = vand.u32 4294901760, %v19025_v31  ;;  %v19030_v28 = vand.u32 4294901760, %v14579_v5  ;;  %v18181_v31 = vand.u32 4294901760, %v14629_v43  ;;  %v19036_v4 = vand.u32 4294901760, %v19035_v29  ;;  %v19040_v5 = vld [vmem:[#allocation42_spill] sm:$0xff]  ;;  %v19046_v29 = vld [vmem:[#allocation44_spill] sm:$0xff] }
 0x118   : > { %10997 = vmatpush1.bf16.msra.mxu1 %v14728_v59  ;;  %10487 = vmatprep.subr.bf16.mxu0 %v19019_v13  ;;  %19024 = vst [vmem:[#allocation23_spill] sm:$0xff] %v14752_v17  ;;  %v19041_v22 = vand.u32 4294901760, %v19040_v5  ;;  %v19047_v5 = vand.u32 4294901760, %v19046_v29  ;;  %v19056_v43 = vld [vmem:[#allocation136_spill] sm:$0xff]  ;;  %v19059_v29 = vld [vmem:[#allocation54_spill] sm:$0xff]  ;;  %v19094_v19 = vld [vmem:[#allocation75_spill] sm:$0xff] }
 0x119   : > { %10999 = vmatprep.subr.bf16.mxu1 %v14735_v46  ;;  %v14759_v32 = vpack.c.bf16 %v19028_v45, %v19026_v30  ;;  %1191 = vmatprep.mubr.f32.mxu0 %v14521_v42  ;;  %v19032_v45 = vld [vmem:[#allocation38_spill] sm:$0xff]  ;;  %v19033_v30 = vld [vmem:[#allocation36_spill] sm:$0xff]  ;;  %v19131_v41 = vld [vmem:[#allocation99_spill] sm:$0xff] }
 0x11a   : > { %1193 = vmatmul.mubr.f32.gmra.mrb[6].mxu0 %v14527_v18  ;;  %3423 = vmatprep.mubr.f32.mxu1 %v19030_v28  ;;  %v19034_v48 = vand.u32 4294901760, %v19033_v30  ;;  %v19038_v28 = vld [vmem:[#allocation41_spill] sm:$0xff]  ;;  %v19044_v30 = vld [vmem:[#allocation43_spill] sm:$0xff]  ;;  %v19071_v58 = vld [vmem:[#allocation62_spill] sm:$0xff] }
 0x11b   : > { %19029 = vst [vmem:[#allocation25_spill] sm:$0xff] %v14759_v32  ;;  %10489 = vmatpush1.bf16.msra.mxu0 %v19031_v3  ;;  %3427 = vmatmul.mubr.f32.gmra.mrb[6].mxu1 %v18174_v15  ;;  %v19039_v49 = vand.u32 4294901760, %v19038_v28  ;;  %v19043_v15 = vand.u32 4294901760, %v14621_v54  ;;  %v19051_v28 = vld [vmem:[#allocation49_spill] sm:$0xff]  ;;  %v19134_v34 = vld [vmem:[#allocation107_spill] sm:$0xff] }
 0x11c   : > { %11001 = vmatpush1.bf16.msra.mxu1 %v14752_v17  ;;  %10491 = vmatprep.subr.bf16.mxu0 %v19032_v45  ;;  %v14776_v8 = vpack.c.bf16 %v19036_v4, %v19034_v48  ;;  %v19045_v48 = vld [vmem:[#allocation46_spill] sm:$0xff]  ;;  %v19052_v54 = vand.u32 4294901760, %v19051_v28  ;;  %v19058_v45 = vld [vmem:[#allocation51_spill] sm:$0xff] }
 0x11d   : > { %11003 = vmatprep.subr.bf16.mxu1 %v14759_v32  ;;  %v14783_v33 = vpack.c.bf16 %v19041_v22, %v19039_v49  ;;  %1199 = vmatprep.mubr.f32.mxu0 %v14564_v25  ;;  %v19048_v22 = vld [vmem:[#allocation47_spill] sm:$0xff] }
 0x11e   : > { %19037 = vst [vmem:[#allocation26_spill] sm:$0xff] %v14776_v8  ;;  %1201 = vmatmul.mubr.f32.gmra.mrb[8].mxu0 %v14586_v57  ;;  %3435 = vmatprep.mubr.f32.mxu1 %v19043_v15  ;;  %v19049_v49 = vand.u32 4294901760, %v19048_v22  ;;  %v19053_v15 = vld [vmem:[#allocation50_spill] sm:$0xff]  ;;  %v19113_v57 = vld [vmem:[#allocation160_spill] sm:$0xff] }
 0x11f   : > { %19042 = vst [vmem:[#allocation28_spill] sm:$0xff] %v14783_v33  ;;  %10493 = vmatpush1.bf16.msra.mxu0 %v19044_v30  ;;  %3439 = vmatmul.mubr.f32.gmra.mrb[8].mxu1 %v18181_v31  ;;  %v19054_v21 = vand.u32 4294901760, %v19053_v15  ;;  %v19057_v31 = vld [vmem:[#allocation150_spill] sm:$0xff] }
 0x120   : > { %11005 = vmatpush1.bf16.msra.mxu1 %v14776_v8  ;;  %10495 = vmatprep.subr.bf16.mxu0 %v19045_v48  ;;  %v14798_v4 = vpack.c.bf16 %v19049_v49, %v19047_v5  ;;  %v19060_v5 = vld [vmem:[#allocation52_spill] sm:$0xff]  ;;  %v19062_v49 = vld [vmem:[#allocation55_spill] sm:$0xff]  ;;  %v19067_v15 = vld [vmem:[#allocation58_spill] sm:$0xff] }
 0x121   : > { %11007 = vmatprep.subr.bf16.mxu1 %v14783_v33  ;;  %v14805_v30 = vpack.c.bf16 %v19054_v21, %v19052_v54  ;;  %1401 = vmatprep.mubr.f32.mxu0 %v19056_v43  ;;  %v19061_v22 = vand.u32 4294901760, %v19060_v5  ;;  %v19063_v48 = vand.u32 4294901760, %v19062_v49  ;;  %v19065_v21 = vld [vmem:[#allocation57_spill] sm:$0xff]  ;;  %v19068_v3 = vand.u32 4294901760, %v19067_v15 }
 0x122   : > { %19050 = vst [vmem:[#allocation31_spill] sm:$0xff] %v14798_v4  ;;  %3702 = vmatprep.mubr.f32.mxu1 %v19057_v31  ;;  %v19066_v54 = vand.u32 4294901760, %v19065_v21  ;;  %v19075_v49 = vand.u32 4294901760, %v19074_v16  ;;  %v19080_v15 = vand.u32 4294901760, %v19079_v0  ;;  %v19087_v16 = vand.u32 4294901760, %v19086_v38  ;;  %v19089_v0 = vld [vmem:[#allocation73_spill] sm:$0xff] }
 0x123   : > { %19055 = vst [vmem:[#allocation33_spill] sm:$0xff] %v14805_v30  ;;  %10497 = vmatpush1.bf16.msra.mxu0 %v19058_v45  ;;  %v14816_v28 = vpack.c.bf16 %v19063_v48, %v19061_v22  ;;  %v19070_v45 = vld [vmem:[#allocation59_spill] sm:$0xff]  ;;  %v19077_v22 = vld [vmem:[#allocation65_spill] sm:$0xff]  ;;  %v19096_v38 = vld [vmem:[#allocation76_spill] sm:$0xff] }
 0x124   : > { %11009 = vmatpush1.bf16.msra.mxu1 %v14798_v4  ;;  %10499 = vmatprep.subr.bf16.mxu0 %v19059_v29  ;;  %v14823_v13 = vpack.c.bf16 %v19068_v3, %v19066_v54  ;;  %v19072_v29 = vld [vmem:[#allocation60_spill] sm:$0xff]  ;;  %v19078_v21 = vand.u32 4294901760, %v19077_v22  ;;  %v19082_v54 = vld [vmem:[#allocation67_spill] sm:$0xff]  ;;  %v19090_v22 = vand.u32 4294901760, %v19089_v0  ;;  %v19101_v0 = vld [vmem:[#allocation81_spill] sm:$0xff] }
 0x125   : > { %19064 = vst [vmem:[#allocation34_spill] sm:$0xff] %v14816_v28  ;;  %11011 = vmatprep.subr.bf16.mxu1 %v14805_v30  ;;  %v19073_v5 = vand.u32 4294901760, %v19072_v29  ;;  %v19163_v30 = vld [vmem:[#allocation45_spill] sm:$0xff]  ;;  %v19164_v4 = vld [vmem:[#allocation48_spill] sm:$0xff] }
 0x126   : > { %19069 = vst [vmem:[#allocation36_spill] sm:$0xff] %v14823_v13  ;;  %v14839_v3 = vpack.c.bf16 %v19080_v15, %v19078_v21  ;;  %v19091_v21 = vld [vmem:[#allocation74_spill] sm:$0xff] }
 0x127   : > { %10501 = vmatpush1.bf16.msra.mxu0 %v19070_v45  ;;  %v14832_v48 = vpack.c.bf16 %v19075_v49, %v19073_v5  ;;  %v19083_v45 = vld [vmem:[#allocation70_spill] sm:$0xff]  ;;  %v12761_v49 = vld [vmem:[%s13652_s28 + $0x60] sm:$0xff]  ;;  %v19092_v15 = vand.u32 4294901760, %v19091_v21  ;;  %v19102_v21 = vand.u32 4294901760, %v19101_v0  ;;  %v19114_v0 = vrot.slane %v19113_v57, 1 }
 0x128   : > { %11013 = vmatpush1.bf16.msra.mxu1 %v14816_v28  ;;  %10503 = vmatprep.subr.bf16.mxu0 %v19071_v58  ;;  %19081 = vst [vmem:[#allocation41_spill] sm:$0xff] %v14839_v3  ;;  %v19084_v58 = vld [vmem:[#allocation68_spill] sm:$0xff]  ;;  %v14851_v36 = vmul.f32 %v12761_v49, %v12761_v49  ;;  %v6002_v28 = vmul.f32 %v12767_v37, %v12767_v37 }
 0x129   : > { %19076 = vst [vmem:[#allocation39_spill] sm:$0xff] %v14832_v48  ;;  %11015 = vmatprep.subr.bf16.mxu1 %v14823_v13  ;;  %v19085_v29 = vand.u32 4294901760, %v19084_v58  ;;  %v19095_v58 = vld [vmem:[#allocation78_spill] sm:$0xff]  ;;  %v19161_v13 = vand.u32 4294901760, %v19056_v43 }
 0x12a   : > { %v18194_v39 = vrot.slane %v14851_v36, 1 }
 0x12b   : > { %10505 = vmatpush1.bf16.msra.mxu0 %v19082_v54  ;;  %v14848_v5 = vpack.c.bf16 %v19087_v16, %v19085_v29  ;;  %v14858_v54 = vpack.c.bf16 %v19092_v15, %v19090_v22  ;;  %v19097_v29 = vand.u32 4294901760, %v19096_v38  ;;  %v19098_v16 = vld [vmem:[#allocation79_spill] sm:$0xff]  ;;  %v19103_v22 = vld [vmem:[#allocation82_spill] sm:$0xff]  ;;  %v19108_v38 = vld [vmem:[#allocation84_spill] sm:$0xff] }
 0x12c   : > { %11017 = vmatpush1.bf16.msra.mxu1 %v14832_v48  ;;  %10507 = vmatprep.subr.bf16.mxu0 %v19083_v45  ;;  %v19099_v45 = vand.u32 4294901760, %v19098_v16  ;;  %v19104_v15 = vand.u32 4294901760, %v19103_v22  ;;  %v19109_v16 = vand.u32 4294901760, %v19108_v38  ;;  %v6046_v22 = vsel %vm328_vm0, %v19114_v0, %v18194_v39  ;;  %v19124_v0 = vld [vmem:[#allocation95_spill] sm:$0xff] }
 0x12d   : > { %19088 = vst [vmem:[#allocation42_spill] sm:$0xff] %v14848_v5  ;;  %11019 = vmatprep.subr.bf16.mxu1 %v14839_v3  ;;  %19093 = vst [vmem:[#allocation44_spill] sm:$0xff] %v14858_v54  ;;  %v14900_v38 = vadd.f32 %v6046_v22, %v19113_v57  ;;  %v19125_v39 = vand.u32 4294901760, %v19124_v0  ;;  %v19130_v57 = vld [vmem:[#allocation164_spill] sm:$0xff]  ;;  %v12766_v3 = vld [vmem:[%s13652_s28 + $0x48] sm:$0xff] }
 0x12e   : > { %v14867_v49 = vpack.c.bf16 %v19099_v45, %v19097_v29  ;;  %v14875_v23 = vpack.c.bf16 %v19104_v15, %v19102_v21  ;;  %v19110_v45 = vld [vmem:[#allocation87_spill] sm:$0xff]  ;;  %v19115_v21 = vld [vmem:[#allocation89_spill] sm:$0xff]  ;;  %v6111_v22 = vrot.slane %v19130_v57, 2  ;;  %v6000_v48 = vmul.f32 %v12766_v3, %v12766_v3 }
 0x12f   : > { %10509 = vmatpush1.bf16.msra.mxu0 %v19094_v19  ;;  %v19106_v19 = vld [vmem:[#allocation83_spill] sm:$0xff]  ;;  %v19111_v29 = vand.u32 4294901760, %v19110_v45  ;;  %v19116_v15 = vand.u32 4294901760, %v19115_v21  ;;  %v19122_v45 = vld [vmem:[#allocation92_spill] sm:$0xff]  ;;  %v19127_v21 = vld [vmem:[#allocation161_spill] sm:$0xff] }
 0x130   : > { %11021 = vmatpush1.bf16.msra.mxu1 %v14848_v5  ;;  %10511 = vmatprep.subr.bf16.mxu0 %v19095_v58  ;;  %19100 = vst [vmem:[#allocation47_spill] sm:$0xff] %v14867_v49  ;;  %19105 = vst [vmem:[#allocation49_spill] sm:$0xff] %v14875_v23  ;;  %v19107_v58 = vld [vmem:[#allocation86_spill] sm:$0xff]  ;;  %v6101_v27 = vrot.slane %v19127_v21, 2 }
 0x131   : > { %11023 = vmatprep.subr.bf16.mxu1 %v14858_v54  ;;  %v14884_v1 = vpack.c.bf16 %v19111_v29, %v19109_v16  ;;  %v19121_v16 = vld [vmem:[#allocation94_spill] sm:$0xff]  ;;  %v19123_v29 = vand.u32 4294901760, %v19122_v45  ;;  %v12765_v54 = vld [vmem:[%s13652_s28 + $0x38] sm:$0xff] }
 0x132   : > { %v19133_v45 = vld [vmem:[#allocation102_spill] sm:$0xff]  ;;  %v5998_v5 = vmul.f32 %v12765_v54, %v12765_v54 }
 0x133   : > { %10513 = vmatpush1.bf16.msra.mxu0 %v19106_v19  ;;  %19112 = vst [vmem:[#allocation50_spill] sm:$0xff] %v14884_v1  ;;  %v19117_v19 = vld [vmem:[#allocation90_spill] sm:$0xff]  ;;  %v14908_v42 = vpack.c.bf16 %v19125_v39, %v19123_v29  ;;  %v18203_v39 = vrot.slane %v14900_v38, 2 }
 0x134   : > { %11025 = vmatpush1.bf16.msra.mxu1 %v14867_v49  ;;  %10515 = vmatprep.subr.bf16.mxu0 %v19107_v58  ;;  %v19118_v25 = vand.u32 4294901760, %v19117_v19  ;;  %v19120_v58 = vld [vmem:[#allocation91_spill] sm:$0xff]  ;;  %v19128_v19 = vld [vmem:[#allocation162_spill] sm:$0xff]  ;;  %v19160_v49 = vld [vmem:[#allocation40_spill] sm:$0xff]  ;;  %v6035_v43 = vrot.slane %v5998_v5, 1 }
 0x135   : > { %11027 = vmatprep.subr.bf16.mxu1 %v14875_v23  ;;  %19126 = vst [vmem:[#allocation52_spill] sm:$0xff] %v14908_v42 }
 0x136   : > { %v14896_v18 = vpack.c.bf16 %v19118_v25, %v19116_v15  ;;  %v6102_v25 = vrot.slane %v19128_v19, 2  ;;  %v19129_v15 = vld [vmem:[#allocation163_spill] sm:$0xff] }
 0x137   : > { %10517 = vmatpush1.bf16.msra.mxu0 %v19120_v58  ;;  %v6107_v58 = vrot.slane %v19129_v15, 2 }
 0x138   : > { %19119 = vst [vmem:[#allocation136_spill] sm:$0xff] %v14896_v18  ;;  %11029 = vmatpush1.bf16.msra.mxu1 %v14884_v1  ;;  %10519 = vmatprep.subr.bf16.mxu0 %v19121_v16  ;;  %v6115_v16 = vrot.slane %v19132_v9, 2  ;;  %v6103_v29 = vsel %vm407_vm1, %v6101_v27, %v6102_v25  ;;  %v12764_v1 = vld [vmem:[%s13652_s28 + $0x28] sm:$0xff] }
 0x139   : > { %11031 = vmatprep.subr.bf16.mxu1 %v14896_v18  ;;  %v6108_v0 = vsel %vm407_vm1, %v6102_v25, %v6107_v58  ;;  %v6112_v6 = vsel %vm407_vm1, %v6107_v58, %v6111_v22  ;;  %v19135_v18 = vld [vmem:[#allocation110_spill] sm:$0xff]  ;;  %v19136_v25 = vld [vmem:[#allocation115_spill] sm:$0xff]  ;;  %v5996_v23 = vmul.f32 %v12764_v1, %v12764_v1  ;;  %v19162_v1 = vld [vmem:[#allocation100_spill] sm:$0xff] }
 0x13a   : > { %v6149_v27 = vadd.f32 %v6108_v0, %v19128_v19  ;;  %v6151_v58 = vadd.f32 %v6112_v6, %v19129_v15  ;;  %v19138_v6 = vld [vmem:[#allocation123_spill] sm:$0xff] }
 0x13b   : > { %10521 = vmatpush1.bf16.msra.mxu0 %v19131_v41  ;;  %v6116_v41 = vsel %vm407_vm1, %v6111_v22, %v6115_v16  ;;  %v6031_v3 = vrot.slane %v5996_v23, 1 }
 0x13c   : > { %11033 = vmatpush1.bf16.msra.mxu1 %v14908_v42  ;;  %10523 = vmatprep.subr.bf16.mxu0 %v19133_v45  ;;  %v6120_v45 = vsel %vm407_vm1, %v6115_v16, %v18203_v39  ;;  %v6153_v22 = vadd.f32 %v6116_v41, %v19130_v57  ;;  %v6180_v16 = vrot.slane %v6149_v27, 4 }
 0x13d   : > { %11035 = vmatprep.subr.bf16.mxu1 %v14646_v12  ;;  %v6147_v12 = vadd.f32 %v6103_v29, %v19127_v21  ;;  %v6185_v21 = vrot.slane %v6151_v58, 4 }
 0x13e   : > { %v6189_v29 = vrot.slane %v6153_v22, 4 }
 0x13f   : > { %10525 = vmatpush1.bf16.msra.mxu0 %v19134_v34  ;;  %v14938_v34 = vadd.f32 %v6120_v45, %v19132_v9  ;;  %v6186_v41 = vsel %vm486_vm2, %v6180_v16, %v6185_v21  ;;  %v19139_v45 = vld [vmem:[#allocation126_spill] sm:$0xff] }
 0x140   : > { %11037 = vmatpush1.bf16.msra.mxu1 %v14652_v50  ;;  %10527 = vmatprep.subr.bf16.mxu0 %v19135_v18  ;;  %v6179_v18 = vrot.slane %v6147_v12, 4  ;;  %v19137_v50 = vld [vmem:[#allocation118_spill] sm:$0xff]  ;;  %v6190_v9 = vsel %vm486_vm2, %v6185_v21, %v6189_v29  ;;  %v14953_v39 = vadd.f32 %v6186_v41, %v6149_v27  ;;  %v19146_v41 = vld [vmem:[#allocation11_spill] sm:$0xff] }
 0x141   : > { %11039 = vmatprep.subr.bf16.mxu1 %v14664_v20  ;;  %v18204_v19 = vrot.slane %v14938_v34, 4 }
 0x142   : > { %v6181_v0 = vsel %vm486_vm2, %v6179_v18, %v6180_v16 }
 0x143   : > { %10529 = vmatpush1.bf16.msra.mxu0 %v19136_v25  ;;  %v6194_v15 = vsel %vm486_vm2, %v6189_v29, %v18204_v19  ;;  %v6225_v57 = vadd.f32 %v6181_v0, %v6147_v12  ;;  %v19140_v29 = vld [vmem:[#allocation128_spill] sm:$0xff]  ;;  %v19141_v12 = vld [vmem:[#allocation5_spill] sm:$0xff]  ;;  %v19145_v0 = vld [vmem:[#allocation158_spill] sm:$0xff] }
 0x144   : > { %11041 = vmatpush1.bf16.msra.mxu1 %v14670_v14  ;;  %10531 = vmatprep.subr.bf16.mxu0 %v19137_v50  ;;  %v14955_v50 = vadd.f32 %v6190_v9, %v6151_v58  ;;  %v14957_v18 = vadd.f32 %v6194_v15, %v6153_v22  ;;  %v19143_v58 = vld [vmem:[#allocation143_spill] sm:$0xff]  ;;  %v19144_v22 = vld [vmem:[#allocation9_spill] sm:$0xff]  ;;  %v19147_v9 = vld [vmem:[#allocation140_spill] sm:$0xff] }
 0x145   : > { %11043 = vmatprep.subr.bf16.mxu1 %v14678_v40  ;;  %v6241_v16 = vadd.f32 %v14953_v39, %v6225_v57  ;;  %v19148_v15 = vld [vmem:[#allocation105_spill] sm:$0xff]  ;;  %v19149_v57 = vld [vmem:[#allocation130_spill] sm:$0xff]  ;;  %v19155_v25 = vld [vmem:[#allocation24_spill] sm:$0xff] }
 0x146   : > { %v14963_v21 = vadd.f32 %v14957_v18, %v14955_v50  ;;  %v19151_v19 = vld [vmem:[#allocation106_spill] sm:$0xff]  ;;  %v19159_v40 = vld [vmem:[#allocation37_spill] sm:$0xff] }
 0x147   : > { %10533 = vmatpush1.bf16.msra.mxu0 %v19138_v6  ;;  %v19154_v6 = vld [vmem:[#allocation21_spill] sm:$0xff] }
 0x148   : > { %11045 = vmatpush1.bf16.msra.mxu1 %v14684_v61  ;;  %10535 = vmatprep.subr.bf16.mxu0 %v19139_v45  ;;  %v14969_v27 = vadd.f32 %v14963_v21, %v6241_v16  ;;  %v19150_v16 = vld [vmem:[#allocation14_spill] sm:$0xff]  ;;  %v19153_v45 = vld [vmem:[#allocation145_spill] sm:$0xff]  ;;  %v19158_v61 = vld [vmem:[#allocation32_spill] sm:$0xff] }
 0x149   : > { %11047 = vmatprep.subr.bf16.mxu1 %v14694_v63  ;;  %v19157_v63 = vld [vmem:[#allocation127_spill] sm:$0xff]  ;;  %v12762_v14 = vld [vmem:[%s13652_s28 + $0x8] sm:$0xff] }
 0x14a   : > { %19142 = vst [vmem:[#allocation55_spill] sm:$0xff] %v14969_v27  ;;  %v5992_v20 = vmul.f32 %v12762_v14, %v12762_v14  ;;  %v12763_v27 = vld [vmem:[%s13652_s28 + $0x18] sm:$0xff]  ;;  %v12768_v14 = vld [vmem:[%s13652_s28 + $0x68] sm:$0xff] }
 0x14b   : > { %10537 = vmatpush1.bf16.msra.mxu0 %v19140_v29  ;;  %v19152_v29 = vld [vmem:[#allocation16_spill] sm:$0xff]  ;;  %v5994_v42 = vmul.f32 %v12763_v27, %v12763_v27  ;;  %v6005_v27 = vmul.f32 %v19162_v1, %v19162_v1 }
 0x14c   : > { %11049 = vmatpush1.bf16.msra.mxu1 %v14696_v26  ;;  %10539 = vmatprep.subr.bf16.mxu0 %v19141_v12  ;;  %v19156_v26 = vld [vmem:[#allocation29_spill] sm:$0xff]  ;;  %v6026_v54 = vrot.slane %v5992_v20, 1 }
 0x14d   : > { %11051 = vmatprep.subr.bf16.mxu1 %v19141_v12  ;;  %v6049_v37 = vrot.slane %v6005_v27, 1 }
 0x14e   : > { %1404 = vmatmul.mubr.f32.vlgmr.msra.gmra.mrb[0].mxu0 %v19143_v58 }
 0x14f   : > { %10541 = vmatpush1.bf16.msra.mxu0 %v19144_v22  ;;  %3704 = vmatmul.mubr.f32.vlgmr.msra.gmra.mrb[0].mxu1 %v19145_v0 }
 0x150   : > { %11053 = vmatpush1.bf16.msra.mxu1 %v19144_v22  ;;  %10543 = vmatprep.subr.bf16.mxu0 %v19146_v41 }
 0x151   : > { %11055 = vmatprep.subr.bf16.mxu1 %v19146_v41  ;;  %1411 = vmatprep.mubr.f32.mxu0 %v19147_v9 }
 0x152   : > { %1414 = vmatmul.mubr.f32.gmra.mrb[2].mxu0 %v19148_v15  ;;  %3710 = vmatprep.mubr.f32.mxu1 %v19149_v57 }
 0x153   : > { %10545 = vmatpush1.bf16.msra.mxu0 %v19150_v16  ;;  %3712 = vmatmul.mubr.f32.gmra.mrb[2].mxu1 %v19151_v19 }
 0x154   : > { %11057 = vmatpush1.bf16.msra.mxu1 %v19150_v16  ;;  %10547 = vmatprep.subr.bf16.mxu0 %v19152_v29 }
 0x155   : > { %11059 = vmatprep.subr.bf16.mxu1 %v19152_v29  ;;  %1421 = vmatprep.mubr.f32.mxu0 %v19153_v45 }
 0x156   : > { %1424 = vmatmul.mubr.f32.gmra.mrb[4].mxu0 %v14470_v7  ;;  %3718 = vmatprep.mubr.f32.mxu1 %v14513_v51 }
 0x157   : > { %10549 = vmatpush1.bf16.msra.mxu0 %v19154_v6  ;;  %3720 = vmatmul.mubr.f32.gmra.mrb[4].mxu1 %v14529_v10 }
 0x158   : > { %11061 = vmatpush1.bf16.msra.mxu1 %v19154_v6  ;;  %10551 = vmatprep.subr.bf16.mxu0 %v19155_v25 }
 0x159   : > { %11063 = vmatprep.subr.bf16.mxu1 %v19155_v25  ;;  %1431 = vmatprep.mubr.f32.mxu0 %v14532_v2  ;;  %v19166_v2 = vld [vmem:[#allocation53_spill] sm:$0xff] }
 0x15a   : > { %1434 = vmatmul.mubr.f32.gmra.mrb[6].mxu0 %v14537_v60  ;;  %3726 = vmatprep.mubr.f32.mxu1 %v14569_v11  ;;  %v19165_v60 = vrot.slane %v14851_v36, 1 }
 0x15b   : > { %10553 = vmatpush1.bf16.msra.mxu0 %v19156_v26  ;;  %3728 = vmatmul.mubr.f32.gmra.mrb[6].mxu1 %v19157_v63 }
 0x15c   : > { %11065 = vmatpush1.bf16.msra.mxu1 %v19156_v26  ;;  %10555 = vmatprep.subr.bf16.mxu0 %v19158_v61  ;;  %v6050_v1 = vsel %vm328_vm0, %v19165_v60, %v6049_v37 }
 0x15d   : > { %11067 = vmatprep.subr.bf16.mxu1 %v19158_v61  ;;  %1441 = vmatprep.mubr.f32.mxu0 %v14573_v53  ;;  %v6027_v53 = vrot.slane %v5994_v42, 1  ;;  %v6081_v33 = vadd.f32 %v6050_v1, %v14851_v36  ;;  %v19169_v36 = vld [vmem:[#allocation61_spill] sm:$0xff]  ;;  %v19170_v61 = vrot.slane %v14900_v38, 2 }
 0x15e   : > { %1444 = vmatmul.mubr.f32.gmra.mrb[8].mxu0 %v14599_v35  ;;  %3734 = vmatprep.mubr.f32.mxu1 %v14612_v24  ;;  %v15019_v35 = vmul.f32 %v12768_v14, %v12768_v14  ;;  %v6043_v14 = vrot.slane %v6002_v28, 1 }
 0x15f   : > { %10557 = vmatpush1.bf16.msra.mxu0 %v19159_v40  ;;  %3736 = vmatmul.mubr.f32.gmra.mrb[8].mxu1 %v14623_v47  ;;  %v6123_v8 = vrot.slane %v6081_v33, 2 }
 0x160   : > { %11069 = vmatpush1.bf16.msra.mxu1 %v19159_v40  ;;  %10559 = vmatprep.subr.bf16.mxu0 %v19160_v49  ;;  %v19167_v40 = vld [vmem:[#allocation56_spill] sm:$0xff]  ;;  %v19168_v47 = vrot.slane %v15019_v35, 1 }
 0x161   : > { %11071 = vmatprep.subr.bf16.mxu1 %v19160_v49  ;;  %1581 = vmatprep.mubr.f32.mxu0 %v19161_v13  ;;  %v6039_v13 = vrot.slane %v6000_v48, 1  ;;  %v6028_v49 = vsel %vm328_vm0, %v6026_v54, %v6027_v53 }
 0x162   : > { %3871 = vmatprep.mubr.f32.mxu1 %v19057_v31  ;;  %v6048_v54 = vsel %vm328_vm0, %v6043_v14, %v19168_v47 }
 0x163   : > { %10561 = vmatpush1.bf16.msra.mxu0 %v19163_v30  ;;  %v6040_v31 = vsel %vm328_vm0, %v6035_v43, %v6039_v13  ;;  %v6044_v60 = vsel %vm328_vm0, %v6039_v13, %v6043_v14  ;;  %v15051_v24 = vadd.f32 %v6048_v54, %v6002_v28 }
 0x164   : > { %11073 = vmatpush1.bf16.msra.mxu1 %v19163_v30  ;;  %10563 = vmatprep.subr.bf16.mxu0 %v19164_v4  ;;  %v6032_v30 = vsel %vm328_vm0, %v6027_v53, %v6031_v3  ;;  %v6070_v53 = vadd.f32 %v6028_v49, %v5992_v20  ;;  %v6078_v13 = vadd.f32 %v6044_v60, %v6000_v48  ;;  %v19173_v49 = vld [vmem:[#allocation72_spill] sm:$0xff] }
 0x165   : > { %11075 = vmatprep.subr.bf16.mxu1 %v19164_v4  ;;  %v6036_v4 = vsel %vm328_vm0, %v6031_v3, %v6035_v43  ;;  %v6072_v7 = vadd.f32 %v6032_v30, %v5994_v42  ;;  %v6124_v3 = vsel %vm407_vm1, %v19170_v61, %v6123_v8  ;;  %v6083_v43 = vadd.f32 %v6049_v37, %v6005_v27  ;;  %v19172_v30 = vld [vmem:[#allocation69_spill] sm:$0xff] }
 0x166   : > { %v6074_v1 = vadd.f32 %v6036_v4, %v5996_v23  ;;  %v6157_v47 = vadd.f32 %v6124_v3, %v14900_v38  ;;  %v6104_v20 = vrot.slane %v6070_v53, 2  ;;  %v6117_v28 = vrot.slane %v6078_v13, 2 }
 0x167   : > { %10565 = vmatpush1.bf16.msra.mxu0 %v19166_v2  ;;  %v6127_v42 = vrot.slane %v6083_v43, 2  ;;  %v6105_v23 = vrot.slane %v6072_v7, 2  ;;  %v19174_v38 = vrot.slane %v14938_v34, 4  ;;  %v6243_v48 = vadd.f32 %v14955_v50, %v14953_v39 }
 0x168   : > { %11077 = vmatpush1.bf16.msra.mxu1 %v19166_v2  ;;  %10567 = vmatprep.subr.bf16.mxu0 %v19167_v40  ;;  %v6076_v2 = vadd.f32 %v6040_v31, %v5998_v5  ;;  %v6197_v31 = vrot.slane %v6157_v47, 4  ;;  %v6109_v4 = vrot.slane %v6074_v1, 2 }
 0x169   : > { %11079 = vmatprep.subr.bf16.mxu1 %v19167_v40  ;;  %v19171_v40 = vld [vmem:[#allocation64_spill] sm:$0xff]  ;;  %v6128_v5 = vsel %vm407_vm1, %v6123_v8, %v6127_v42  ;;  %v6106_v60 = vsel %vm407_vm1, %v6104_v20, %v6105_v23  ;;  %v19175_v8 = vld [vmem:[#allocation77_spill] sm:$0xff]  ;;  %v19177_v20 = vrot.slane %v15051_v24, 2  ;;  %v15082_v50 = vadd.f32 %v6127_v42, %v6083_v43 }
 0x16a   : > { %v6113_v61 = vrot.slane %v6076_v2, 2  ;;  %v6198_v27 = vsel %vm486_vm2, %v19174_v38, %v6197_v31  ;;  %v6159_v37 = vadd.f32 %v6128_v5, %v6081_v33  ;;  %v6110_v3 = vsel %vm407_vm1, %v6105_v23, %v6109_v4  ;;  %v19176_v33 = vld [vmem:[#allocation80_spill] sm:$0xff] }
 0x16b   : > { %10569 = vmatpush1.bf16.msra.mxu0 %v19169_v36  ;;  %v6233_v14 = vadd.f32 %v6198_v27, %v14938_v34  ;;  %v6122_v5 = vsel %vm407_vm1, %v6117_v28, %v19177_v20  ;;  %v6148_v39 = vadd.f32 %v6106_v60, %v6070_v53  ;;  %v19182_v60 = vld [vmem:[#allocation101_spill] sm:$0xff]  ;;  %v19183_v20 = vld [vmem:[#allocation104_spill] sm:$0xff] }
 0x16c   : > { %11081 = vmatpush1.bf16.msra.mxu1 %v19169_v36  ;;  %10571 = vmatprep.subr.bf16.mxu0 %v19171_v40  ;;  %v6201_v54 = vrot.slane %v6159_v37, 4  ;;  %v6118_v34 = vsel %vm407_vm1, %v6113_v61, %v6117_v28  ;;  %v18268_v28 = vrot.slane %v15082_v50, 4 }
 0x16d   : > { %11083 = vmatprep.subr.bf16.mxu1 %v19171_v40  ;;  %v6247_v40 = vadd.f32 %v6233_v14, %v14957_v18  ;;  %v6150_v18 = vadd.f32 %v6110_v3, %v6072_v7 }
 0x16e   : > { %v6202_v38 = vsel %vm486_vm2, %v6197_v31, %v6201_v54  ;;  %v19179_v31 = vld [vmem:[#allocation88_spill] sm:$0xff]  ;;  %v6206_v7 = vsel %vm486_vm2, %v6201_v54, %v18268_v28  ;;  %v19200_v28 = vld [vmem:[#allocation26_spill] sm:$0xff] }
 0x16f   : > { %10573 = vmatpush1.bf16.msra.mxu0 %v19172_v30  ;;  %v15080_v23 = vadd.f32 %v6247_v40, %v6243_v48  ;;  %v15100_v43 = vadd.f32 %v6206_v7, %v6159_v37  ;;  %v19181_v48 = vld [vmem:[#allocation96_spill] sm:$0xff] }
 0x170   : > { %11085 = vmatpush1.bf16.msra.mxu1 %v19172_v30  ;;  %10575 = vmatprep.subr.bf16.mxu0 %v19173_v49  ;;  %v6114_v30 = vsel %vm407_vm1, %v6109_v4, %v6113_v61  ;;  %v6235_v4 = vadd.f32 %v6202_v38, %v6157_v47  ;;  %v15085_v61 = vadd.f32 %v6122_v5, %v6078_v13  ;;  %v19180_v13 = vld [vmem:[#allocation93_spill] sm:$0xff] }
 0x171   : > { %11087 = vmatprep.subr.bf16.mxu1 %v19173_v49  ;;  %v6152_v27 = vadd.f32 %v6114_v30, %v6074_v1  ;;  %v6154_v49 = vadd.f32 %v6118_v34, %v6076_v2  ;;  %v6182_v2 = vrot.slane %v6148_v39, 4  ;;  %v6183_v1 = vrot.slane %v6150_v18, 4 }
 0x172   : > { %v15087_v36 = vadd.f32 %v6235_v4, %v6233_v14  ;;  %v18270_v30 = vrot.slane %v15085_v61, 4 }
 0x173   : > { %10577 = vmatpush1.bf16.msra.mxu0 %v19175_v8  ;;  %v6187_v47 = vrot.slane %v6152_v27, 4  ;;  %v6191_v42 = vrot.slane %v6154_v49, 4  ;;  %v6184_v14 = vsel %vm486_vm2, %v6182_v2, %v6183_v1  ;;  %v19184_v2 = vld [vmem:[#allocation109_spill] sm:$0xff] }
 0x174   : > { %11089 = vmatpush1.bf16.msra.mxu1 %v19175_v8  ;;  %10579 = vmatprep.subr.bf16.mxu0 %v19176_v33  ;;  %v19178_v8 = vld [vmem:[#allocation85_spill] sm:$0xff]  ;;  %v15095_v53 = vadd.f32 %v15087_v36, %v14963_v21  ;;  %v6251_v21 = vadd.f32 %v15100_v43, %v6235_v4  ;;  %v6226_v5 = vadd.f32 %v6184_v14, %v6148_v39  ;;  %v12769_v14 = vld [vmem:[%s13652_s28 + $0x78] sm:$0xff] }
 0x175   : > { %11091 = vmatprep.subr.bf16.mxu1 %v19176_v33  ;;  %v6188_v37 = vsel %vm486_vm2, %v6183_v1, %v6187_v47  ;;  %v6192_v54 = vsel %vm486_vm2, %v6187_v47, %v6191_v42  ;;  %v6196_v3 = vsel %vm486_vm2, %v6191_v42, %v18270_v30  ;;  %v19185_v1 = vld [vmem:[#allocation112_spill] sm:$0xff]  ;;  %v19186_v39 = vld [vmem:[#allocation117_spill] sm:$0xff]  ;;  %v19189_v42 = vand.u32 4294901760, %v19143_v58 }
 0x176   : > { %v15115_v34 = vadd.f32 %v6251_v21, %v6247_v40  ;;  %v15120_v38 = vadd.f32 %v6188_v37, %v6150_v18  ;;  %v15122_v4 = vadd.f32 %v6192_v54, %v6152_v27  ;;  %v15124_v7 = vadd.f32 %v6196_v3, %v6154_v49  ;;  %v19187_v49 = vld [vmem:[#allocation120_spill] sm:$0xff]  ;;  %v19188_v27 = vld [vmem:[#allocation125_spill] sm:$0xff] }
 0x177   : > { %10581 = vmatpush1.bf16.msra.mxu0 %v19178_v8  ;;  %v6006_v37 = vmul.f32 %v12769_v14, %v12769_v14  ;;  %v19191_v54 = vand.u32 4294901760, %v19147_v9  ;;  %v19202_v30 = vld [vmem:[#allocation37_spill] sm:$0xff] }
 0x178   : > { %11093 = vmatpush1.bf16.msra.mxu1 %v19178_v8  ;;  %10583 = vmatprep.subr.bf16.mxu0 %v19179_v31  ;;  %v6242_v40 = vadd.f32 %v15120_v38, %v6226_v5  ;;  %v15133_v47 = vadd.f32 %v15124_v7, %v15122_v4  ;;  %v19193_v5 = vand.u32 4294901760, %v19148_v15  ;;  %v19195_v15 = vand.u32 4294901760, %v19153_v45  ;;  %v19198_v45 = vld [vmem:[#allocation148_spill] sm:$0xff] }
 0x179   : > { %11095 = vmatprep.subr.bf16.mxu1 %v19179_v31  ;;  %v6051_v3 = vrot.slane %v6006_v37, 1 }
 0x17a   : > { %v6256_v18 = vadd.f32 %v15133_v47, %v6242_v40  ;;  %v19194_v40 = vrot.slane %v15019_v35, 1 }
 0x17b   : > { %10585 = vmatpush1.bf16.msra.mxu0 %v19180_v13 }
 0x17c   : > { %11097 = vmatpush1.bf16.msra.mxu1 %v19180_v13  ;;  %10587 = vmatprep.subr.bf16.mxu0 %v19181_v48  ;;  %v15146_v21 = vand.u32 4294901760, %v6256_v18 }
 0x17d   : > { %11099 = vmatprep.subr.bf16.mxu1 %v19181_v48 }
 0x17e   : > { %19190 = vst [vmem:[#allocation57_spill] sm:$0xff] %v15146_v21  ;;  %v15158_v58 = vsub.f32 %v6256_v18, %v15146_v21  ;;  %v6052_v18 = vsel %vm328_vm0, %v19194_v40, %v6051_v3  ;;  %v19199_v40 = vand.u32 4294901760, %v19198_v45  ;;  %v19210_v45 = vld [vmem:[#allocation188_spill] sm:$0xff] }
 0x17f   : > { %10589 = vmatpush1.bf16.msra.mxu0 %v19182_v60  ;;  %v6082_v14 = vadd.f32 %v6052_v18, %v15019_v35  ;;  %v19205_v35 = vld [vmem:[#allocation149_spill] sm:$0xff] }
 0x180   : > { %11101 = vmatpush1.bf16.msra.mxu1 %v19182_v60  ;;  %10591 = vmatprep.subr.bf16.mxu0 %v19183_v20  ;;  %19192 = vst [vmem:[#allocation58_spill] sm:$0xff] %v15158_v58  ;;  %v18269_v9 = vand.u32 4294901760, %v15158_v58  ;;  %v19206_v18 = vand.u32 4294901760, %v19205_v35  ;;  %v19215_v35 = vld [vmem:[#allocation48_spill] sm:$0xff] }
 0x181   : > { %11103 = vmatprep.subr.bf16.mxu1 %v19183_v20 }
 0x183   : > { %10593 = vmatpush1.bf16.msra.mxu0 %v19184_v2 }
 0x184   : > { %11105 = vmatpush1.bf16.msra.mxu1 %v19184_v2  ;;  %10595 = vmatprep.subr.bf16.mxu0 %v19185_v1 }
 0x185   : > { %11107 = vmatprep.subr.bf16.mxu1 %v19185_v1 }
 0x187   : > { %10597 = vmatpush1.bf16.msra.mxu0 %v19186_v39 }
 0x188   : > { %11109 = vmatpush1.bf16.msra.mxu1 %v19186_v39  ;;  %10599 = vmatprep.subr.bf16.mxu0 %v19187_v49 }
 0x189   : > { %11111 = vmatprep.subr.bf16.mxu1 %v19187_v49 }
 0x18b   : > { %10601 = vmatpush1.bf16.msra.mxu0 %v19188_v27 }
 0x18c   : > { %11113 = vmatpush1.bf16.msra.mxu1 %v19188_v27  ;;  %10603 = vmatprep.subr.bf16.mxu0 %v14607_v55  ;;  %v19238_v55 = vld [vmem:[#allocation55_spill] sm:$0xff] }
 0x18d   : > { %11499 = vmatprep.subr.bf16.mxu1 %v19141_v12 }
 0x18e   : > { %1585 = vmatmul.mubr.f32.vlgmr.msra.gmra.mrb[0].mxu0 %v19189_v42  ;;  %v6396_v42 = vsub.f32 %v15158_v58, %v18269_v9  ;;  %v19201_v9 = vld [vmem:[#allocation195_spill] sm:$0xff]  ;;  %v19283_v58 = vld [vmem:[#allocation113_spill] sm:$0xff] }
 0x18f   : > { %10605 = vmatpush1.bf16.msra.mxu0 %v14640_v52  ;;  %3873 = vmatmul.mubr.f32.vlgmr.msra.gmra.mrb[0].mxu1 %v19145_v0  ;;  %v19234_v52 = vld [vmem:[#allocation49_spill] sm:$0xff] }
 0x190   : > { %11501 = vmatpush1.bf16.msra.mxu1 %v19144_v22  ;;  %10607 = vmatprep.subr.bf16.mxu0 %v14658_v56  ;;  %v19230_v56 = vld [vmem:[#allocation44_spill] sm:$0xff] }
 0x191   : > { %3879 = vmatprep.mubr.f32.mxu1 %v19149_v57  ;;  %11503 = vmatprep.subr.bf16.mxu1 %v19146_v41  ;;  %v19237_v57 = vld [vmem:[#allocation52_spill] sm:$0xff] }
 0x192   : > { %1593 = vmatprep.mubr.f32.mxu0 %v19191_v54  ;;  %v19196_v54 = vld [vmem:[#allocation193_spill] sm:$0xff] }
 0x193   : > { %10609 = vmatpush1.bf16.msra.mxu0 %v14704_v44  ;;  %3881 = vmatmul.mubr.f32.gmra.mrb[2].mxu1 %v19151_v19  ;;  %v19227_v44 = vld [vmem:[#allocation42_spill] sm:$0xff] }
 0x194   : > { %11505 = vmatpush1.bf16.msra.mxu1 %v19150_v16  ;;  %10611 = vmatprep.subr.bf16.mxu0 %v14711_v62 }
 0x195   : > { %3887 = vmatprep.mubr.f32.mxu1 %v14513_v51  ;;  %11507 = vmatprep.subr.bf16.mxu1 %v19152_v29  ;;  %v19229_v51 = vld [vmem:[#allocation69_spill] sm:$0xff] }
 0x196   : > { %1597 = vmatmul.mubr.f32.gmra.mrb[2].mxu0 %v19193_v5  ;;  %v19197_v5 = vld [vmem:[#allocation32_spill] sm:$0xff] }
 0x197   : > { %10613 = vmatpush1.bf16.msra.mxu0 %v14728_v59  ;;  %3889 = vmatmul.mubr.f32.gmra.mrb[4].mxu1 %v14529_v10 }
 0x198   : > { %11509 = vmatpush1.bf16.msra.mxu1 %v19154_v6  ;;  %10615 = vmatprep.subr.bf16.mxu0 %v14735_v46  ;;  %v6125_v46 = vrot.slane %v6082_v14, 2 }
 0x199   : > { %3895 = vmatprep.mubr.f32.mxu1 %v14569_v11  ;;  %11511 = vmatprep.subr.bf16.mxu1 %v19155_v25  ;;  %v19222_v11 = vld [vmem:[#allocation56_spill] sm:$0xff] }
 0x19a   : > { %1605 = vmatprep.mubr.f32.mxu0 %v19195_v15  ;;  %v6397_v15 = vand.u32 4294901760, %v6396_v42  ;;  %v19209_v42 = vld [vmem:[#allocation31_spill] sm:$0xff] }
 0x19b   : > { %10617 = vmatpush1.bf16.msra.mxu0 %v14752_v17  ;;  %3897 = vmatmul.mubr.f32.gmra.mrb[6].mxu1 %v19157_v63  ;;  %v19203_v17 = vld [vmem:[#allocation28_spill] sm:$0xff] }
 0x19c   : > { %11513 = vmatpush1.bf16.msra.mxu1 %v19156_v26  ;;  %10619 = vmatprep.subr.bf16.mxu0 %v14759_v32  ;;  %v6084_v32 = vadd.f32 %v6051_v3, %v6006_v37  ;;  %v19204_v63 = vld [vmem:[#allocation40_spill] sm:$0xff]  ;;  %v19214_v37 = vrot.slane %v15051_v24, 2 }
 0x19d   : > { %3903 = vmatprep.mubr.f32.mxu1 %v19196_v54  ;;  %11515 = vmatprep.subr.bf16.mxu1 %v19197_v5  ;;  %v19207_v54 = vld [vmem:[#allocation119_spill] sm:$0xff] }
 0x19e   : > { %1609 = vmatmul.mubr.f32.gmra.mrb[4].mxu0 %v19199_v40  ;;  %v19208_v59 = vand.u32 4294901760, %v19207_v54  ;;  %v19211_v40 = vand.u32 4294901760, %v19210_v45  ;;  %v6126_v3 = vsel %vm407_vm1, %v19214_v37, %v6125_v46  ;;  %v19223_v37 = vld [vmem:[#allocation39_spill] sm:$0xff] }
 0x19f   : > { %10621 = vmatpush1.bf16.msra.mxu0 %v19200_v28  ;;  %3905 = vmatmul.mubr.f32.gmra.mrb[8].mxu1 %v19201_v9  ;;  %v19212_v28 = vld [vmem:[#allocation45_spill] sm:$0xff]  ;;  %v6158_v45 = vadd.f32 %v6126_v3, %v15051_v24  ;;  %v19228_v24 = vrot.slane %v15085_v61, 4 }
 0x1a0   : > { %11517 = vmatpush1.bf16.msra.mxu1 %v19202_v30  ;;  %10623 = vmatprep.subr.bf16.mxu0 %v19203_v17  ;;  %v19213_v9 = vld [vmem:[#allocation33_spill] sm:$0xff]  ;;  %v6129_v17 = vrot.slane %v6084_v32, 2 }
 0x1a1   : > { %11519 = vmatprep.subr.bf16.mxu1 %v19204_v63  ;;  %1617 = vmatprep.mubr.f32.mxu0 %v19206_v18  ;;  %v19216_v18 = vld [vmem:[#allocation192_spill] sm:$0xff]  ;;  %v6199_v62 = vrot.slane %v6158_v45, 4 }
 0x1a2   : > { %1621 = vmatmul.mubr.f32.gmra.mrb[6].mxu0 %v19208_v59  ;;  %6398 = vmatprep.mubr.f32.mxu1 %v6397_v15  ;;  %v19217_v54 = vand.u32 4294901760, %v19216_v18  ;;  %v19218_v59 = vld [vmem:[#allocation34_spill] sm:$0xff]  ;;  %v19219_v15 = vld [vmem:[#allocation135_spill] sm:$0xff]  ;;  %v19224_v18 = vld [vmem:[#allocation61_spill] sm:$0xff] }
 0x1a3   : > { %10625 = vmatpush1.bf16.msra.mxu0 %v19209_v42  ;;  %1629 = vmatprep.mubr.f32.mxu0 %v19211_v40  ;;  %v19220_v40 = vld [vmem:[#allocation53_spill] sm:$0xff]  ;;  %v19221_v42 = vld [vmem:[#allocation36_spill] sm:$0xff]  ;;  %v6200_v3 = vsel %vm486_vm2, %v19228_v24, %v6199_v62 }
 0x1a4   : > { %11521 = vmatpush1.bf16.msra.mxu1 %v19212_v28  ;;  %10627 = vmatprep.subr.bf16.mxu0 %v19213_v9  ;;  %v6130_v9 = vsel %vm407_vm1, %v6125_v46, %v6129_v17  ;;  %v6162_v46 = vadd.f32 %v6129_v17, %v6084_v32  ;;  %v6244_v32 = vadd.f32 %v15122_v4, %v15120_v38  ;;  %v15246_v38 = vand.u32 4294901760, %v19238_v55  ;;  %v19240_v4 = vld [vmem:[#allocation10_spill] sm:$0xff] }
 0x1a5   : > { %11523 = vmatprep.subr.bf16.mxu1 %v19215_v35  ;;  %v6160_v10 = vadd.f32 %v6130_v9, %v6082_v14  ;;  %v6234_v9 = vadd.f32 %v6200_v3, %v15085_v61  ;;  %v19232_v14 = vld [vmem:[#allocation47_spill] sm:$0xff] }
 0x1a6   : > { %1633 = vmatmul.mubr.f32.gmra.mrb[8].mxu0 %v19217_v54  ;;  %v19225_v54 = vld [vmem:[#allocation41_spill] sm:$0xff]  ;;  %v6207_v19 = vrot.slane %v6162_v46, 4  ;;  %19239 = vst [vmem:[#allocation60_spill] sm:$0xff] %v15246_v38 }
 0x1a7   : > { %10629 = vmatpush1.bf16.msra.mxu0 %v19218_v59  ;;  %1896 = vmatprep.mubr.f32.mxu0 %v19219_v15  ;;  %v19226_v59 = vld [vmem:[#allocation64_spill] sm:$0xff]  ;;  %v6248_v17 = vadd.f32 %v6234_v9, %v15124_v7 }
 0x1a8   : > { %11525 = vmatpush1.bf16.msra.mxu1 %v19220_v40  ;;  %10631 = vmatprep.subr.bf16.mxu0 %v19221_v42  ;;  %v6203_v42 = vrot.slane %v6160_v10, 4 }
 0x1a9   : > { %11527 = vmatprep.subr.bf16.mxu1 %v19222_v11  ;;  %v6258_v3 = vadd.f32 %v6248_v17, %v6244_v32  ;;  %v19242_v32 = vld [vmem:[#allocation197_spill] sm:$0xff] }
 0x1aa   : > { %v6208_v61 = vsel %vm486_vm2, %v6203_v42, %v6207_v19 }
 0x1ab   : > { %10633 = vmatpush1.bf16.msra.mxu0 %v19223_v37  ;;  %v19231_v37 = vld [vmem:[#allocation72_spill] sm:$0xff]  ;;  %v15251_v7 = vand.u32 4294901760, %v6258_v3 }
 0x1ac   : > { %11529 = vmatpush1.bf16.msra.mxu1 %v19224_v18  ;;  %10635 = vmatprep.subr.bf16.mxu0 %v19225_v54  ;;  %v6204_v54 = vsel %vm486_vm2, %v6199_v62, %v6203_v42  ;;  %v19236_v62 = vld [vmem:[#allocation136_spill] sm:$0xff] }
 0x1ad   : > { %11531 = vmatprep.subr.bf16.mxu1 %v19226_v59  ;;  %v6236_v24 = vadd.f32 %v6204_v54, %v6158_v45  ;;  %19241 = vst [vmem:[#allocation63_spill] sm:$0xff] %v15251_v7  ;;  %v6240_v54 = vadd.f32 %v6207_v19, %v6162_v46  ;;  %v15269_v19 = vsub.f32 %v6258_v3, %v15251_v7  ;;  %v15283_v3 = vand.u32 4294901760, %v15095_v53 }
 0x1af   : > { %10637 = vmatpush1.bf16.msra.mxu0 %v19227_v44  ;;  %v19233_v44 = vld [vmem:[#allocation77_spill] sm:$0xff]  ;;  %19247 = vst [vmem:[#allocation68_spill] sm:$0xff] %v15269_v19  ;;  %19252 = vst [vmem:[#allocation74_spill] sm:$0xff] %v15283_v3 }
 0x1b0   : > { %11533 = vmatpush1.bf16.msra.mxu1 %v19229_v51  ;;  %10639 = vmatprep.subr.bf16.mxu0 %v19230_v56  ;;  %v19235_v56 = vld [vmem:[#allocation50_spill] sm:$0xff] }
 0x1b1   : > { %11535 = vmatprep.subr.bf16.mxu1 %v19231_v37 }
 0x1b3   : > { %10641 = vmatpush1.bf16.msra.mxu0 %v19232_v14  ;;  %v6238_v14 = vadd.f32 %v6208_v61, %v6160_v10  ;;  %v15257_v10 = vsub.f32 %v19238_v55, %v15246_v38  ;;  %v15263_v61 = vand.u32 4294901760, %v15080_v23 }
 0x1b4   : > { %11537 = vmatpush1.bf16.msra.mxu1 %v19233_v44  ;;  %10643 = vmatprep.subr.bf16.mxu0 %v19234_v52  ;;  %v6250_v52 = vadd.f32 %v6236_v24, %v6234_v9  ;;  %v19244_v9 = vld [vmem:[#allocation199_spill] sm:$0xff] }
 0x1b5   : > { %11539 = vmatprep.subr.bf16.mxu1 %v19176_v33  ;;  %v6252_v45 = vadd.f32 %v6238_v14, %v6236_v24  ;;  %19243 = vst [vmem:[#allocation65_spill] sm:$0xff] %v15257_v10  ;;  %19245 = vst [vmem:[#allocation66_spill] sm:$0xff] %v15263_v61 }
 0x1b6   : > { %v6260_v42 = vadd.f32 %v6250_v52, %v15133_v47  ;;  %v19246_v47 = vrot.slane %v15082_v50, 4 }
 0x1b7   : > { %10645 = vmatpush1.bf16.msra.mxu0 %v19235_v56  ;;  %v6262_v55 = vadd.f32 %v6252_v45, %v6248_v17 }
 0x1b8   : > { %11541 = vmatpush1.bf16.msra.mxu1 %v19178_v8  ;;  %10647 = vmatprep.subr.bf16.mxu0 %v19236_v62  ;;  %v6239_v24 = vadd.f32 %v19246_v47, %v15082_v50  ;;  %v15271_v46 = vand.u32 4294901760, %v6260_v42  ;;  %v15280_v50 = vsub.f32 %v15080_v23, %v15263_v61  ;;  %v19263_v62 = vld [vmem:[#allocation132_spill] sm:$0xff] }
 0x1b9   : > { %11543 = vmatprep.subr.bf16.mxu1 %v19179_v31 }
 0x1ba   : > { %19248 = vst [vmem:[#allocation71_spill] sm:$0xff] %v15271_v46  ;;  %19251 = vst [vmem:[#allocation73_spill] sm:$0xff] %v15280_v50  ;;  %v6253_v17 = vadd.f32 %v6239_v24, %v15100_v43  ;;  %v15288_v45 = vsub.f32 %v6260_v42, %v15271_v46  ;;  %v15302_v42 = vsub.f32 %v15095_v53, %v15283_v3  ;;  %v19262_v43 = vld [vmem:[#allocation204_spill] sm:$0xff] }
 0x1bb   : > { %10649 = vmatpush1.bf16.msra.mxu0 %v19237_v57  ;;  %v19250_v57 = vld [vmem:[#allocation201_spill] sm:$0xff] }
 0x1bc   : > { %11545 = vmatpush1.bf16.msra.mxu1 %v19180_v13  ;;  %10651 = vmatprep.subr.bf16.mxu0 %v19240_v4  ;;  %v19249_v4 = vld [vmem:[#allocation200_spill] sm:$0xff]  ;;  %19253 = vst [vmem:[#allocation76_spill] sm:$0xff] %v15288_v45  ;;  %19258 = vst [vmem:[#allocation81_spill] sm:$0xff] %v15302_v42  ;;  %v19268_v56 = vand.u32 4294901760, %v15288_v45 }
 0x1bd   : > { %11547 = vmatprep.subr.bf16.mxu1 %v19181_v48 }
 0x1be   : > { %v6428_v0 = vsub.f32 %v15288_v45, %v19268_v56  ;;  %v19275_v45 = vld [vmem:[#allocation146_spill] sm:$0xff] }
 0x1bf   : > { %10653 = vmatpush1.bf16.msra.mxu0 %v19242_v32  ;;  %v6254_v32 = vadd.f32 %v6240_v54, %v6238_v14  ;;  %v18295_v14 = vand.u32 4294901760, %v15269_v19  ;;  %v15290_v54 = vand.u32 4294901760, %v6262_v55 }
 0x1c0   : > { %11549 = vmatpush1.bf16.msra.mxu1 %v19182_v60  ;;  %10655 = vmatprep.subr.bf16.mxu0 %v19244_v9  ;;  %v19255_v9 = vld [vmem:[#allocation202_spill] sm:$0xff] }
 0x1c1   : > { %11551 = vmatprep.subr.bf16.mxu1 %v19183_v20  ;;  %19254 = vst [vmem:[#allocation79_spill] sm:$0xff] %v15290_v54  ;;  %v6264_v47 = vadd.f32 %v6254_v32, %v6250_v52  ;;  %v15305_v52 = vand.u32 4294901760, %v15115_v34  ;;  %v6263_v32 = vadd.f32 %v6253_v17, %v15087_v36  ;;  %v19264_v36 = vand.u32 4294901760, %v15280_v50 }
 0x1c3   : > { %10657 = vmatpush1.bf16.msra.mxu0 %v19249_v4  ;;  %v19257_v4 = vld [vmem:[#allocation203_spill] sm:$0xff]  ;;  %19259 = vst [vmem:[#allocation82_spill] sm:$0xff] %v15305_v52  ;;  %v6418_v17 = vsub.f32 %v15280_v50, %v19264_v36  ;;  %v15329_v24 = vand.u32 4294901760, %v6263_v32  ;;  %v19270_v36 = vld [vmem:[#allocation142_spill] sm:$0xff]  ;;  %v19273_v50 = vand.u32 4294901760, %v15302_v42 }
 0x1c4   : > { %11553 = vmatpush1.bf16.msra.mxu1 %v19184_v2  ;;  %10659 = vmatprep.subr.bf16.mxu0 %v19250_v57  ;;  %v19256_v57 = vand.u32 4294901760, %v15257_v10 }
 0x1c5   : > { %11555 = vmatprep.subr.bf16.mxu1 %v19185_v1  ;;  %19266 = vst [vmem:[#allocation89_spill] sm:$0xff] %v15329_v24  ;;  %v6434_v56 = vsub.f32 %v15302_v42, %v19273_v50  ;;  %v19278_v50 = vld [vmem:[#allocation167_spill] sm:$0xff] }
 0x1c6   : > { %v6402_v23 = vsub.f32 %v15257_v10, %v19256_v57  ;;  %v6412_v57 = vsub.f32 %v15269_v19, %v18295_v14  ;;  %v19272_v14 = vld [vmem:[#allocation147_spill] sm:$0xff] }
 0x1c7   : > { %10661 = vmatpush1.bf16.msra.mxu0 %v19255_v9  ;;  %v15315_v9 = vand.u32 4294901760, %v6264_v47  ;;  %v6435_v19 = vand.u32 4294901760, %v6434_v56  ;;  %v19285_v56 = vld [vmem:[#allocation170_spill] sm:$0xff] }
 0x1c8   : > { %11557 = vmatpush1.bf16.msra.mxu1 %v19186_v39  ;;  %10663 = vmatprep.subr.bf16.mxu0 %v19257_v4  ;;  %v15313_v4 = vsub.f32 %v6262_v55, %v15290_v54  ;;  %v6403_v53 = vand.u32 4294901760, %v6402_v23  ;;  %v15327_v55 = vsub.f32 %v15115_v34, %v15305_v52  ;;  %v6413_v23 = vand.u32 4294901760, %v6412_v57  ;;  %v19271_v34 = vld [vmem:[#allocation166_spill] sm:$0xff] }
 0x1c9   : > { %11559 = vmatprep.subr.bf16.mxu1 %v19187_v49  ;;  %19261 = vst [vmem:[#allocation87_spill] sm:$0xff] %v15315_v9  ;;  %v15337_v10 = vsub.f32 %v6264_v47, %v15315_v9  ;;  %v6419_v57 = vand.u32 4294901760, %v6418_v17  ;;  %v15349_v47 = vsub.f32 %v6263_v32, %v15329_v24  ;;  %v19277_v17 = vld [vmem:[#allocation131_spill] sm:$0xff]  ;;  %v19279_v32 = vld [vmem:[#allocation168_spill] sm:$0xff] }
 0x1ca   : > { %19260 = vst [vmem:[#allocation84_spill] sm:$0xff] %v15313_v4  ;;  %19265 = vst [vmem:[#allocation160_spill] sm:$0xff] %v15327_v55 }
 0x1cb   : > { %10665 = vmatpush1.bf16.msra.mxu0 %v19262_v43  ;;  %v19267_v43 = vld [vmem:[#allocation141_spill] sm:$0xff]  ;;  %19269 = vst [vmem:[#allocation90_spill] sm:$0xff] %v15337_v10  ;;  %19274 = vst [vmem:[#allocation92_spill] sm:$0xff] %v15349_v47  ;;  %v19282_v42 = vand.u32 4294901760, %v15337_v10 }
 0x1cc   : > { %11561 = vmatpush1.bf16.msra.mxu1 %v19188_v27  ;;  %10667 = vmatprep.subr.bf16.mxu0 %v19141_v12 }
 0x1cd   : > { %11563 = vmatprep.subr.bf16.mxu1 %v19263_v62 }
 0x1ce   : > { %1898 = vmatmul.mubr.f32.vlgmr.msra.gmra.mrb[0].mxu0 %v19267_v43 }
 0x1cf   : > { %10669 = vmatpush1.bf16.msra.mxu0 %v19144_v22  ;;  %6404 = vmatmul.mubr.f32.vlgmr.msra.gmra.mrb[10].mxu1 %v6403_v53  ;;  %v6429_v53 = vand.u32 4294901760, %v6428_v0  ;;  %v19280_v0 = vand.u32 4294901760, %v15327_v55 }
 0x1d0   : > { %11565 = vmatpush1.bf16.msra.mxu1 %v19270_v36  ;;  %10671 = vmatprep.subr.bf16.mxu0 %v19146_v41  ;;  %v19276_v36 = vand.u32 4294901760, %v15313_v4 }
 0x1d1   : > { %11567 = vmatprep.subr.bf16.mxu1 %v19271_v34  ;;  %1904 = vmatprep.mubr.f32.mxu0 %v19272_v14 }
 0x1d2   : > { %1906 = vmatmul.mubr.f32.gmra.mrb[2].mxu0 %v19275_v45  ;;  %6414 = vmatprep.mubr.f32.mxu1 %v6413_v23  ;;  %v6444_v34 = vsub.f32 %v15313_v4, %v19276_v36  ;;  %v6450_v23 = vsub.f32 %v15327_v55, %v19280_v0  ;;  %v18315_v36 = vand.u32 4294901760, %v15349_v47  ;;  %v19281_v4 = vld [vmem:[#allocation138_spill] sm:$0xff]  ;;  %v19288_v55 = vld [vmem:[#allocation171_spill] sm:$0xff] }
 0x1d3   : > { %10673 = vmatpush1.bf16.msra.mxu0 %v19150_v16  ;;  %1912 = vmatprep.mubr.f32.mxu0 %v19277_v17 }
 0x1d4   : > { %11569 = vmatpush1.bf16.msra.mxu1 %v19278_v50  ;;  %10675 = vmatprep.subr.bf16.mxu0 %v19152_v29  ;;  %v6445_v62 = vand.u32 4294901760, %v6444_v34  ;;  %v6460_v50 = vsub.f32 %v15337_v10, %v19282_v42  ;;  %v6451_v0 = vand.u32 4294901760, %v6450_v23  ;;  %v6466_v34 = vsub.f32 %v15349_v47, %v18315_v36  ;;  %v19287_v10 = vld [vmem:[#allocation121_spill] sm:$0xff]  ;;  %v19290_v23 = vld [vmem:[#allocation190_spill] sm:$0xff]  ;;  %v19298_v36 = vld [vmem:[#allocation180_spill] sm:$0xff] }
 0x1d5   : > { %11571 = vmatprep.subr.bf16.mxu1 %v19279_v32  ;;  %6420 = vmatmul.mubr.f32.gmra.mrb[12].mxu1 %v6419_v57  ;;  %v19284_v57 = vld [vmem:[#allocation169_spill] sm:$0xff] }
 0x1d6   : > { %1914 = vmatmul.mubr.f32.gmra.mrb[4].mxu0 %v19281_v4  ;;  %6430 = vmatprep.mubr.f32.mxu1 %v6429_v53  ;;  %v19286_v53 = vld [vmem:[#allocation114_spill] sm:$0xff]  ;;  %v6461_v42 = vand.u32 4294901760, %v6460_v50 }
 0x1d7   : > { %10677 = vmatpush1.bf16.msra.mxu0 %v19154_v6  ;;  %1920 = vmatprep.mubr.f32.mxu0 %v19283_v58  ;;  %v19292_v50 = vld [vmem:[#allocation174_spill] sm:$0xff] }
 0x1d8   : > { %11573 = vmatpush1.bf16.msra.mxu1 %v19284_v57  ;;  %10679 = vmatprep.subr.bf16.mxu0 %v19155_v25  ;;  %v19289_v57 = vld [vmem:[#allocation172_spill] sm:$0xff] }
 0x1d9   : > { %11575 = vmatprep.subr.bf16.mxu1 %v19285_v56  ;;  %6436 = vmatmul.mubr.f32.gmra.mrb[14].mxu1 %v6435_v19  ;;  %v6467_v19 = vand.u32 4294901760, %v6466_v34  ;;  %v19294_v34 = vld [vmem:[#allocation176_spill] sm:$0xff] }
 0x1da   : > { %1922 = vmatmul.mubr.f32.gmra.mrb[6].mxu0 %v19286_v53  ;;  %6446 = vmatprep.mubr.f32.mxu1 %v6445_v62  ;;  %v19291_v62 = vld [vmem:[#allocation173_spill] sm:$0xff] }
 0x1db   : > { %10681 = vmatpush1.bf16.msra.mxu0 %v19156_v26  ;;  %1928 = vmatprep.mubr.f32.mxu0 %v19287_v10 }
 0x1dc   : > { %11577 = vmatpush1.bf16.msra.mxu1 %v19288_v55  ;;  %10683 = vmatprep.subr.bf16.mxu0 %v19197_v5 }
 0x1dd   : > { %11579 = vmatprep.subr.bf16.mxu1 %v19289_v57  ;;  %6452 = vmatmul.mubr.f32.gmra.mrb[16].mxu1 %v6451_v0  ;;  %v19293_v0 = vld [vmem:[#allocation175_spill] sm:$0xff] }
 0x1de   : > { %1930 = vmatmul.mubr.f32.gmra.mrb[8].mxu0 %v19290_v23  ;;  %6462 = vmatprep.mubr.f32.mxu1 %v6461_v42  ;;  %v19296_v42 = vld [vmem:[#allocation178_spill] sm:$0xff] }
 0x1df   : > { %10685 = vmatpush1.bf16.msra.mxu0 %v19202_v30  ;;  %2065 = vmatprep.mubr.f32.mxu0 %v19219_v15  ;;  %v19295_v15 = vld [vmem:[#allocation177_spill] sm:$0xff] }
 0x1e0   : > { %11581 = vmatpush1.bf16.msra.mxu1 %v19291_v62  ;;  %10687 = vmatprep.subr.bf16.mxu0 %v19204_v63 }
 0x1e1   : > { %11583 = vmatprep.subr.bf16.mxu1 %v19292_v50  ;;  %6468 = vmatmul.mubr.f32.gmra.mrb[18].mxu1 %v6467_v19  ;;  %v19297_v19 = vld [vmem:[#allocation179_spill] sm:$0xff] }
 0x1e2   : > { %6859 = vmatprep.mubr.f32.mxu1 %v15146_v21  ;;  %v19299_v21 = vld [vmem:[#allocation181_spill] sm:$0xff] }
 0x1e3   : > { %10689 = vmatpush1.bf16.msra.mxu0 %v19212_v28 }
 0x1e4   : > { %11585 = vmatpush1.bf16.msra.mxu1 %v19293_v0  ;;  %10691 = vmatprep.subr.bf16.mxu0 %v19215_v35 }
 0x1e5   : > { %11587 = vmatprep.subr.bf16.mxu1 %v19294_v34  ;;  %v19300_v34 = vld [vmem:[#allocation182_spill] sm:$0xff] }
 0x1e7   : > { %10693 = vmatpush1.bf16.msra.mxu0 %v19220_v40 }
 0x1e8   : > { %11589 = vmatpush1.bf16.msra.mxu1 %v19295_v15  ;;  %10695 = vmatprep.subr.bf16.mxu0 %v19222_v11  ;;  %v19301_v15 = vld [vmem:[#allocation183_spill] sm:$0xff] }
 0x1e9   : > { %11591 = vmatprep.subr.bf16.mxu1 %v19296_v42  ;;  %v19302_v42 = vld [vmem:[#allocation184_spill] sm:$0xff] }
 0x1eb   : > { %10697 = vmatpush1.bf16.msra.mxu0 %v19224_v18 }
 0x1ec   : > { %11593 = vmatpush1.bf16.msra.mxu1 %v19297_v19  ;;  %10699 = vmatprep.subr.bf16.mxu0 %v19226_v59  ;;  %v19303_v19 = vld [vmem:[#allocation185_spill] sm:$0xff] }
 0x1ed   : > { %11595 = vmatprep.subr.bf16.mxu1 %v19298_v36  ;;  %v19304_v36 = vld [vmem:[#allocation97_spill] sm:$0xff] }
 0x1ef   : > { %10701 = vmatpush1.bf16.msra.mxu0 %v19229_v51 }
 0x1f0   : > { %11597 = vmatpush1.bf16.msra.mxu1 %v19299_v21  ;;  %10703 = vmatprep.subr.bf16.mxu0 %v19231_v37  ;;  %v19305_v21 = vld [vmem:[#allocation98_spill] sm:$0xff] }
 0x1f1   : > { %11599 = vmatprep.subr.bf16.mxu1 %v19300_v34  ;;  %v19306_v34 = vld [vmem:[#allocation103_spill] sm:$0xff] }
 0x1f3   : > { %10705 = vmatpush1.bf16.msra.mxu0 %v19233_v44 }
 0x1f4   : > { %11601 = vmatpush1.bf16.msra.mxu1 %v19301_v15  ;;  %10707 = vmatprep.subr.bf16.mxu0 %v19176_v33  ;;  %v19307_v15 = vld [vmem:[#allocation129_spill] sm:$0xff] }
 0x1f5   : > { %11603 = vmatprep.subr.bf16.mxu1 %v19302_v42  ;;  %v19308_v42 = vld [vmem:[#allocation134_spill] sm:$0xff] }
 0x1f7   : > { %10709 = vmatpush1.bf16.msra.mxu0 %v19178_v8 }
 0x1f8   : > { %11605 = vmatpush1.bf16.msra.mxu1 %v19303_v19  ;;  %10711 = vmatprep.subr.bf16.mxu0 %v19179_v31  ;;  %v19309_v19 = vld [vmem:[#allocation108_spill] sm:$0xff] }
 0x1f9   : > { %11607 = vmatprep.subr.bf16.mxu1 %v19304_v36  ;;  %v19310_v36 = vld [vmem:[#allocation111_spill] sm:$0xff] }
 0x1fb   : > { %10713 = vmatpush1.bf16.msra.mxu0 %v19180_v13 }
 0x1fc   : > { %11609 = vmatpush1.bf16.msra.mxu1 %v19305_v21  ;;  %10715 = vmatprep.subr.bf16.mxu0 %v19181_v48  ;;  %v19311_v21 = vld [vmem:[#allocation186_spill] sm:$0xff] }
 0x1fd   : > { %11611 = vmatprep.subr.bf16.mxu1 %v19306_v34  ;;  %v19312_v34 = vld [vmem:[#allocation189_spill] sm:$0xff] }
 0x1ff   : > { %10717 = vmatpush1.bf16.msra.mxu0 %v19182_v60 }
 0x200   : > { %11613 = vmatpush1.bf16.msra.mxu1 %v19307_v15  ;;  %10719 = vmatprep.subr.bf16.mxu0 %v19183_v20  ;;  %v19313_v15 = vld [vmem:[#allocation7_spill] sm:$0xff] }
 0x201   : > { %11615 = vmatprep.subr.bf16.mxu1 %v19308_v42  ;;  %v19314_v42 = vld [vmem:[#allocation12_spill] sm:$0xff] }
 0x203   : > { %10721 = vmatpush1.bf16.msra.mxu0 %v19184_v2 }
 0x204   : > { %11617 = vmatpush1.bf16.msra.mxu1 %v19309_v19  ;;  %10723 = vmatprep.subr.bf16.mxu0 %v19185_v1 }
 0x205   : > { %11619 = vmatprep.subr.bf16.mxu1 %v19310_v36 }
 0x207   : > { %10725 = vmatpush1.bf16.msra.mxu0 %v19186_v39 }
 0x208   : > { %11621 = vmatpush1.bf16.msra.mxu1 %v19311_v21  ;;  %10727 = vmatprep.subr.bf16.mxu0 %v19187_v49  ;;  %v19315_v21 = vld [vmem:[#allocation13_spill] sm:$0xff] }
 0x209   : > { %11623 = vmatprep.subr.bf16.mxu1 %v19312_v34  ;;  %v19349_v34 = vld [vmem:[#allocation102_spill] sm:$0xff] }
 0x20b   : > { %10729 = vmatpush1.bf16.msra.mxu0 %v19188_v27 }
 0x20c   : > { %11625 = vmatpush1.bf16.msra.mxu1 %v19313_v15  ;;  %10731 = vmatprep.subr.bf16.mxu0 %v19141_v12  ;;  %v19316_v15 = vld [vmem:[#allocation15_spill] sm:$0xff] }
 0x20d   : > { %11627 = vmatprep.subr.bf16.mxu1 %v19314_v42  ;;  %v19340_v42 = vld [vmem:[#allocation86_spill] sm:$0xff] }
 0x20e   : > { %2067 = vmatmul.mubr.f32.vlgmr.msra.gmra.mrb[0].mxu0 %v19267_v43  ;;  %v19318_v43 = vld [vmem:[#allocation22_spill] sm:$0xff] }
 0x20f   : > { %10733 = vmatpush1.bf16.msra.mxu0 %v19144_v22  ;;  %2073 = vmatprep.mubr.f32.mxu0 %v19272_v14  ;;  %v19317_v14 = vld [vmem:[#allocation19_spill] sm:$0xff] }
 0x210   : > { %6861 = vmatmul.mubr.f32.vlgmr.msra.gmra.mrb[10].mxu1 %v15246_v38  ;;  %10735 = vmatprep.subr.bf16.mxu0 %v19146_v41  ;;  %v19348_v38 = vld [vmem:[#allocation99_spill] sm:$0xff] }
 0x211   : > { %11629 = vmatpush1.bf16.msra.mxu1 %v19315_v21  ;;  %6867 = vmatprep.mubr.f32.mxu1 %v15251_v7  ;;  %v19321_v21 = vld [vmem:[#allocation27_spill] sm:$0xff] }
 0x212   : > { %2075 = vmatmul.mubr.f32.gmra.mrb[2].mxu0 %v19275_v45  ;;  %11631 = vmatprep.subr.bf16.mxu1 %v19316_v15  ;;  %v19319_v45 = vld [vmem:[#allocation151_spill] sm:$0xff] }
 0x213   : > { %10737 = vmatpush1.bf16.msra.mxu0 %v19150_v16  ;;  %2081 = vmatprep.mubr.f32.mxu0 %v19277_v17  ;;  %v19320_v15 = vand.u32 4294901760, %v19319_v45 }
 0x214   : > { %10739 = vmatprep.subr.bf16.mxu0 %v19152_v29  ;;  %6869 = vmatmul.mubr.f32.gmra.mrb[12].mxu1 %v15263_v61 }
 0x215   : > { %11633 = vmatpush1.bf16.msra.mxu1 %v19317_v14  ;;  %6875 = vmatprep.mubr.f32.mxu1 %v15271_v46  ;;  %v2510_v17 = vsub.f32 %v19319_v45, %v19320_v15  ;;  %v19323_v15 = vld [vmem:[#allocation35_spill] sm:$0xff]  ;;  %v19324_v45 = vld [vmem:[#allocation38_spill] sm:$0xff] }
 0x216   : > { %2083 = vmatmul.mubr.f32.gmra.mrb[4].mxu0 %v19281_v4  ;;  %11635 = vmatprep.subr.bf16.mxu1 %v19318_v43  ;;  %v19322_v4 = vld [vmem:[#allocation30_spill] sm:$0xff] }
 0x217   : > { %10741 = vmatpush1.bf16.msra.mxu0 %v19154_v6  ;;  %2089 = vmatprep.mubr.f32.mxu0 %v19283_v58  ;;  %v2511_v58 = vand.u32 4294901760, %v2510_v17  ;;  %v19327_v17 = vld [vmem:[#allocation46_spill] sm:$0xff] }
 0x218   : > { %10743 = vmatprep.subr.bf16.mxu0 %v19155_v25  ;;  %6877 = vmatmul.mubr.f32.gmra.mrb[14].mxu1 %v15283_v3  ;;  %v19338_v14 = vld [vmem:[#allocation78_spill] sm:$0xff] }
 0x219   : > { %11637 = vmatpush1.bf16.msra.mxu1 %v19321_v21  ;;  %6883 = vmatprep.mubr.f32.mxu1 %v15290_v54  ;;  %v19334_v21 = vld [vmem:[#allocation70_spill] sm:$0xff]  ;;  %v19343_v54 = vld [vmem:[#allocation155_spill] sm:$0xff] }
 0x21a   : > { %2091 = vmatmul.mubr.f32.gmra.mrb[6].mxu0 %v19286_v53  ;;  %11639 = vmatprep.subr.bf16.mxu1 %v19322_v4  ;;  %v19326_v53 = vld [vmem:[#allocation58_spill] sm:$0xff]  ;;  %v4027_v3 = vrot.slane %v19343_v54, 2 }
 0x21b   : > { %10745 = vmatpush1.bf16.msra.mxu0 %v19156_v26  ;;  %2097 = vmatprep.mubr.f32.mxu0 %v19287_v10  ;;  %v19325_v10 = vld [vmem:[#allocation43_spill] sm:$0xff]  ;;  %v19347_v46 = vld [vmem:[#allocation94_spill] sm:$0xff] }
 0x21c   : > { %10747 = vmatprep.subr.bf16.mxu0 %v19197_v5  ;;  %6885 = vmatmul.mubr.f32.gmra.mrb[16].mxu1 %v15305_v52 }
 0x21d   : > { %11641 = vmatpush1.bf16.msra.mxu1 %v19323_v15  ;;  %6891 = vmatprep.mubr.f32.mxu1 %v15315_v9  ;;  %v15484_v15 = vld [vmem:[%s13441_s11 + $0x60] sm:$0xff]  ;;  %v19342_v9 = vld [vmem:[#allocation154_spill] sm:$0xff] }
 0x21e   : > { %2099 = vmatmul.mubr.f32.gmra.mrb[8].mxu0 %v19290_v23  ;;  %11643 = vmatprep.subr.bf16.mxu1 %v19324_v45  ;;  %v19328_v23 = vld [vmem:[#allocation51_spill] sm:$0xff]  ;;  %v19329_v45 = vld [vmem:[#allocation54_spill] sm:$0xff]  ;;  %19331 = vst [vmem:[#allocation95_spill] sm:$0xff] %v15484_v15  ;;  %v4022_v52 = vrot.slane %v19342_v9, 2 }
 0x21f   : > { %10749 = vmatpush1.bf16.msra.mxu0 %v19202_v30  ;;  %2512 = vmatprep.mubr.f32.mxu0 %v2511_v58  ;;  %v19330_v58 = vld [vmem:[#allocation59_spill] sm:$0xff] }
 0x220   : > { %10751 = vmatprep.subr.bf16.mxu0 %v19204_v63  ;;  %6893 = vmatmul.mubr.f32.gmra.mrb[18].mxu1 %v15329_v24  ;;  %v4028_v61 = vsel %vm407_vm1, %v4022_v52, %v4027_v3 }
 0x221   : > { %11645 = vmatpush1.bf16.msra.mxu1 %v19325_v10  ;;  %7093 = vmatprep.mubr.f32.mxu1 %v19326_v53  ;;  %v12771_v10 = vld [vmem:[%s13652_s28 + $0x60] sm:$0xff] }
 0x222   : > { %11647 = vmatprep.subr.bf16.mxu1 %v19327_v17  ;;  %v15488_v4 = vmul.f32 %v12771_v10, %v15484_v15  ;;  %v19332_v17 = vld [vmem:[#allocation62_spill] sm:$0xff]  ;;  %v19336_v10 = vld [vmem:[#allocation152_spill] sm:$0xff] }
 0x223   : > { %10753 = vmatpush1.bf16.msra.mxu0 %v19212_v28 }
 0x224   : > { %10755 = vmatprep.subr.bf16.mxu0 %v19215_v35 }
 0x225   : > { %11649 = vmatpush1.bf16.msra.mxu1 %v19328_v23  ;;  %v19333_v23 = vld [vmem:[#allocation67_spill] sm:$0xff] }
 0x226   : > { %11651 = vmatprep.subr.bf16.mxu1 %v19329_v45  ;;  %v18328_v45 = vrot.slane %v15488_v4, 1 }
 0x227   : > { %10757 = vmatpush1.bf16.msra.mxu0 %v19220_v40 }
 0x228   : > { %10759 = vmatprep.subr.bf16.mxu0 %v19222_v11 }
 0x229   : > { %11653 = vmatpush1.bf16.msra.mxu1 %v19330_v58  ;;  %v19335_v58 = vld [vmem:[#allocation75_spill] sm:$0xff] }
 0x22a   : > { %11655 = vmatprep.subr.bf16.mxu1 %v19332_v17  ;;  %v19337_v17 = vrot.slane %v19336_v10, 1 }
 0x22b   : > { %10761 = vmatpush1.bf16.msra.mxu0 %v19224_v18 }
 0x22c   : > { %10763 = vmatprep.subr.bf16.mxu0 %v19226_v59  ;;  %v3966_v43 = vsel %vm328_vm0, %v19337_v17, %v18328_v45  ;;  %v19344_v17 = vld [vmem:[#allocation156_spill] sm:$0xff] }
 0x22d   : > { %11657 = vmatpush1.bf16.msra.mxu1 %v19333_v23  ;;  %v19339_v23 = vld [vmem:[#allocation83_spill] sm:$0xff]  ;;  %v4031_v45 = vrot.slane %v19344_v17, 2 }
 0x22e   : > { %11659 = vmatprep.subr.bf16.mxu1 %v19334_v21  ;;  %v15508_v21 = vadd.f32 %v3966_v43, %v19336_v10  ;;  %v19346_v43 = vld [vmem:[#allocation157_spill] sm:$0xff] }
 0x22f   : > { %10765 = vmatpush1.bf16.msra.mxu0 %v19229_v51  ;;  %v4035_v10 = vrot.slane %v19346_v43, 2  ;;  %v4032_v7 = vsel %vm407_vm1, %v4027_v3, %v4031_v45 }
 0x230   : > { %10767 = vmatprep.subr.bf16.mxu0 %v19231_v37  ;;  %v4071_v3 = vadd.f32 %v4032_v7, %v19343_v54 }
 0x231   : > { %11661 = vmatpush1.bf16.msra.mxu1 %v19335_v58  ;;  %v19341_v58 = vld [vmem:[#allocation153_spill] sm:$0xff] }
 0x232   : > { %11663 = vmatprep.subr.bf16.mxu1 %v19338_v14  ;;  %v4021_v24 = vrot.slane %v19341_v58, 2  ;;  %v19345_v14 = vld [vmem:[#allocation91_spill] sm:$0xff] }
 0x233   : > { %10769 = vmatpush1.bf16.msra.mxu0 %v19233_v44 }
 0x234   : > { %10771 = vmatprep.subr.bf16.mxu0 %v19176_v33 }
 0x235   : > { %11665 = vmatpush1.bf16.msra.mxu1 %v19339_v23  ;;  %v18338_v23 = vrot.slane %v15508_v21, 2 }
 0x236   : > { %11667 = vmatprep.subr.bf16.mxu1 %v19340_v42  ;;  %v4023_v42 = vsel %vm407_vm1, %v4021_v24, %v4022_v52  ;;  %v4069_v24 = vadd.f32 %v4028_v61, %v19342_v9 }
 0x237   : > { %10773 = vmatpush1.bf16.msra.mxu0 %v19178_v8  ;;  %v4040_v15 = vsel %vm407_vm1, %v4035_v10, %v18338_v23 }
 0x238   : > { %10775 = vmatprep.subr.bf16.mxu0 %v19179_v31  ;;  %v4100_v23 = vrot.slane %v4069_v24, 4 }
 0x239   : > { %11669 = vmatpush1.bf16.msra.mxu1 %v19345_v14  ;;  %v4036_v14 = vsel %vm407_vm1, %v4031_v45, %v4035_v10  ;;  %v15541_v45 = vadd.f32 %v4040_v15, %v19346_v43  ;;  %v19352_v15 = vld [vmem:[#allocation115_spill] sm:$0xff] }
 0x23a   : > { %11671 = vmatprep.subr.bf16.mxu1 %v19347_v46  ;;  %v4067_v46 = vadd.f32 %v4023_v42, %v19341_v58  ;;  %v4073_v52 = vadd.f32 %v4036_v14, %v19344_v17  ;;  %v4105_v42 = vrot.slane %v4071_v3, 4 }
 0x23b   : > { %10777 = vmatpush1.bf16.msra.mxu0 %v19180_v13  ;;  %v18341_v61 = vrot.slane %v15541_v45, 4 }
 0x23c   : > { %10779 = vmatprep.subr.bf16.mxu0 %v19181_v48  ;;  %v4099_v10 = vrot.slane %v4067_v46, 4  ;;  %v4109_v58 = vrot.slane %v4073_v52, 4  ;;  %v4106_v7 = vsel %vm486_vm2, %v4100_v23, %v4105_v42 }
 0x23d   : > { %11673 = vmatpush1.bf16.msra.mxu1 %v19348_v38  ;;  %v19350_v38 = vld [vmem:[#allocation107_spill] sm:$0xff]  ;;  %v15554_v43 = vadd.f32 %v4106_v7, %v4069_v24  ;;  %v19359_v7 = vld [vmem:[#allocation126_spill] sm:$0xff] }
 0x23e   : > { %11675 = vmatprep.subr.bf16.mxu1 %v19349_v34  ;;  %v19351_v34 = vld [vmem:[#allocation110_spill] sm:$0xff]  ;;  %v4101_v9 = vsel %vm486_vm2, %v4099_v10, %v4100_v23  ;;  %v4110_v54 = vsel %vm486_vm2, %v4105_v42, %v4109_v58  ;;  %v4114_v17 = vsel %vm486_vm2, %v4109_v58, %v18341_v61  ;;  %v19353_v10 = vld [vmem:[#allocation159_spill] sm:$0xff] }
 0x23f   : > { %10781 = vmatpush1.bf16.msra.mxu0 %v19182_v60  ;;  %v4145_v14 = vadd.f32 %v4101_v9, %v4067_v46  ;;  %v15562_v23 = vadd.f32 %v4114_v17, %v4073_v52  ;;  %v19356_v46 = vld [vmem:[#allocation144_spill] sm:$0xff]  ;;  %v19360_v52 = vld [vmem:[#allocation137_spill] sm:$0xff] }
 0x240   : > { %10783 = vmatprep.subr.bf16.mxu0 %v19183_v20  ;;  %v19357_v42 = vand.u32 4294901760, %v19356_v46 }
 0x241   : > { %11677 = vmatpush1.bf16.msra.mxu1 %v19350_v38  ;;  %v19354_v38 = vand.u32 4294901760, %v19353_v10  ;;  %v4161_v58 = vadd.f32 %v15554_v43, %v4145_v14 }
 0x242   : > { %11679 = vmatprep.subr.bf16.mxu1 %v19351_v34  ;;  %v15556_v34 = vadd.f32 %v4110_v54, %v4071_v3  ;;  %v2526_v9 = vsub.f32 %v19356_v46, %v19357_v42  ;;  %v19358_v3 = vld [vmem:[#allocation123_spill] sm:$0xff]  ;;  %v19361_v54 = vand.u32 4294901760, %v19360_v52 }
 0x243   : > { %10785 = vmatpush1.bf16.msra.mxu0 %v19184_v2  ;;  %v2516_v2 = vsub.f32 %v19353_v10, %v19354_v38  ;;  %v19363_v46 = vld [vmem:[#allocation139_spill] sm:$0xff] }
 0x244   : > { %10787 = vmatprep.subr.bf16.mxu0 %v19185_v1  ;;  %v19355_v1 = vld [vmem:[#allocation118_spill] sm:$0xff]  ;;  %v15572_v24 = vadd.f32 %v15562_v23, %v15556_v34  ;;  %v2532_v17 = vsub.f32 %v19360_v52, %v19361_v54  ;;  %v2527_v14 = vand.u32 4294901760, %v2526_v9  ;;  %v19364_v42 = vand.u32 4294901760, %v19363_v46 }
 0x245   : > { %11681 = vmatpush1.bf16.msra.mxu1 %v19352_v15  ;;  %v2517_v38 = vand.u32 4294901760, %v2516_v2  ;;  %v19369_v54 = vld [vmem:[#allocation142_spill] sm:$0xff]  ;;  %v19370_v15 = vld [vmem:[#allocation124_spill] sm:$0xff] }
 0x246   : > { %11683 = vmatprep.subr.bf16.mxu1 %v19355_v1  ;;  %v15580_v10 = vadd.f32 %v15572_v24, %v4161_v58  ;;  %v2542_v61 = vsub.f32 %v19363_v46, %v19364_v42  ;;  %v19365_v1 = vld [vmem:[#allocation132_spill] sm:$0xff]  ;;  %v2533_v2 = vand.u32 4294901760, %v2532_v17  ;;  %v19372_v42 = vld [vmem:[#allocation65_spill] sm:$0xff]  ;;  %v19375_v17 = vld [vmem:[#allocation191_spill] sm:$0xff] }
 0x247   : > { %10789 = vmatpush1.bf16.msra.mxu0 %v19186_v39 }
 0x248   : > { %10791 = vmatprep.subr.bf16.mxu0 %v19187_v49  ;;  %19362 = vst [vmem:[#allocation161_spill] sm:$0xff] %v15580_v10  ;;  %v2543_v9 = vand.u32 4294901760, %v2542_v61  ;;  %v19371_v10 = vand.u32 4294901760, %v19370_v15 }
 0x249   : > { %11685 = vmatpush1.bf16.msra.mxu1 %v19358_v3  ;;  %v19366_v3 = vld [vmem:[#allocation128_spill] sm:$0xff] }
 0x24a   : > { %11687 = vmatprep.subr.bf16.mxu1 %v19359_v7  ;;  %v19367_v7 = vld [vmem:[#allocation187_spill] sm:$0xff]  ;;  %v2558_v46 = vsub.f32 %v19370_v15, %v19371_v10  ;;  %v19378_v10 = vld [vmem:[#allocation194_spill] sm:$0xff] }
 0x24b   : > { %10793 = vmatpush1.bf16.msra.mxu0 %v19188_v27  ;;  %v19368_v52 = vand.u32 4294901760, %v19367_v7 }
 0x24c   : > { %10795 = vmatprep.subr.bf16.mxu0 %v19365_v1  ;;  %v19373_v1 = vld [vmem:[#allocation166_spill] sm:$0xff]  ;;  %v2559_v15 = vand.u32 4294901760, %v2558_v46  ;;  %v19384_v46 = vld [vmem:[#allocation169_spill] sm:$0xff] }
 0x24d   : > { %11689 = vmatpush1.bf16.msra.mxu1 %v19366_v3  ;;  %v2548_v58 = vsub.f32 %v19367_v7, %v19368_v52  ;;  %v19376_v52 = vand.u32 4294901760, %v19375_v17  ;;  %v19379_v3 = vand.u32 4294901760, %v19378_v10 }
 0x24e   : > { %2518 = vmatmul.mubr.f32.vlgmr.msra.gmra.mrb[10].mxu0 %v2517_v38  ;;  %11691 = vmatprep.subr.bf16.mxu1 %v19141_v12  ;;  %v19374_v38 = vld [vmem:[#allocation68_spill] sm:$0xff] }
 0x24f   : > { %10797 = vmatpush1.bf16.msra.mxu0 %v19369_v54  ;;  %2528 = vmatprep.mubr.f32.mxu0 %v2527_v14  ;;  %v2549_v7 = vand.u32 4294901760, %v2548_v58  ;;  %v2564_v61 = vsub.f32 %v19375_v17, %v19376_v52  ;;  %v19377_v14 = vld [vmem:[#allocation167_spill] sm:$0xff]  ;;  %v19380_v54 = vld [vmem:[#allocation73_spill] sm:$0xff]  ;;  %v19382_v17 = vld [vmem:[#allocation196_spill] sm:$0xff] }
 0x250   : > { %7096 = vmatmul.mubr.f32.vlgmr.msra.gmra.mrb[10].mxu1 %v19372_v42  ;;  %10799 = vmatprep.subr.bf16.mxu0 %v19373_v1  ;;  %v2574_v1 = vsub.f32 %v19378_v10, %v19379_v3  ;;  %v19383_v52 = vand.u32 4294901760, %v19382_v17  ;;  %v19385_v10 = vld [vmem:[#allocation81_spill] sm:$0xff] }
 0x251   : > { %11693 = vmatpush1.bf16.msra.mxu1 %v19144_v22  ;;  %7103 = vmatprep.mubr.f32.mxu1 %v19374_v38  ;;  %v2565_v58 = vand.u32 4294901760, %v2564_v61 }
 0x252   : > { %11695 = vmatprep.subr.bf16.mxu1 %v19146_v41  ;;  %2534 = vmatmul.mubr.f32.gmra.mrb[12].mxu0 %v2533_v2  ;;  %v19381_v2 = vld [vmem:[#allocation76_spill] sm:$0xff]  ;;  %v2575_v3 = vand.u32 4294901760, %v2574_v1 }
 0x253   : > { %10801 = vmatpush1.bf16.msra.mxu0 %v19377_v14  ;;  %2544 = vmatprep.mubr.f32.mxu0 %v2543_v9  ;;  %v2580_v9 = vsub.f32 %v19382_v17, %v19383_v52  ;;  %v19387_v1 = vld [vmem:[#allocation160_spill] sm:$0xff]  ;;  %v12773_v17 = vld [vmem:[%s13652_s28 + $0x8] sm:$0xff] }
 0x254   : > { %10803 = vmatprep.subr.bf16.mxu0 %v19279_v32  ;;  %7106 = vmatmul.mubr.f32.gmra.mrb[12].mxu1 %v19380_v54  ;;  %v15643_v32 = vld [vmem:[%s13441_s11 + $0x38] sm:$0xff]  ;;  %v15648_v14 = vld [vmem:[%s13441_s11 + $0x48] sm:$0xff] }
 0x255   : > { %11697 = vmatpush1.bf16.msra.mxu1 %v19150_v16  ;;  %7113 = vmatprep.mubr.f32.mxu1 %v19381_v2  ;;  %v2581_v61 = vand.u32 4294901760, %v2580_v9  ;;  %19392 = vst [vmem:[#allocation165_spill] sm:$0xff] %v15643_v32  ;;  %19393 = vst [vmem:[#allocation143_spill] sm:$0xff] %v15648_v14 }
 0x256   : > { %11699 = vmatprep.subr.bf16.mxu1 %v19152_v29  ;;  %2550 = vmatmul.mubr.f32.gmra.mrb[14].mxu0 %v2549_v7  ;;  %v19386_v7 = vld [vmem:[#allocation84_spill] sm:$0xff] }
 0x257   : > { %10805 = vmatpush1.bf16.msra.mxu0 %v19384_v46  ;;  %2560 = vmatprep.mubr.f32.mxu0 %v2559_v15  ;;  %v15626_v15 = vld [vmem:[%s13441_s11 + $0x8] sm:$0xff] }
 0x258   : > { %10807 = vmatprep.subr.bf16.mxu0 %v19285_v56  ;;  %7116 = vmatmul.mubr.f32.gmra.mrb[14].mxu1 %v19385_v10  ;;  %19388 = vst [vmem:[#allocation162_spill] sm:$0xff] %v15626_v15  ;;  %v3912_v52 = vmul.f32 %v12773_v17, %v15626_v15  ;;  %v15631_v56 = vld [vmem:[%s13441_s11 + $0x18] sm:$0xff] }
 0x259   : > { %11701 = vmatpush1.bf16.msra.mxu1 %v19154_v6  ;;  %7123 = vmatprep.mubr.f32.mxu1 %v19386_v7  ;;  %19389 = vst [vmem:[#allocation163_spill] sm:$0xff] %v15631_v56  ;;  %v12779_v17 = vld [vmem:[%s13652_s28 + $0x38] sm:$0xff] }
 0x25a   : > { %11703 = vmatprep.subr.bf16.mxu1 %v19155_v25  ;;  %2566 = vmatmul.mubr.f32.gmra.mrb[16].mxu0 %v2565_v58  ;;  %v12775_v58 = vld [vmem:[%s13652_s28 + $0x18] sm:$0xff]  ;;  %v3918_v15 = vmul.f32 %v12779_v17, %v15643_v32  ;;  %v19396_v32 = vld [vmem:[#allocation150_spill] sm:$0xff] }
 0x25b   : > { %10809 = vmatpush1.bf16.msra.mxu0 %v19288_v55  ;;  %2576 = vmatprep.mubr.f32.mxu0 %v2575_v3  ;;  %v3914_v9 = vmul.f32 %v12775_v58, %v15631_v56  ;;  %v19390_v3 = vld [vmem:[#allocation90_spill] sm:$0xff]  ;;  %v15654_v56 = vld [vmem:[%s13441_s11 + $0x58] sm:$0xff] }
 0x25c   : > { %10811 = vmatprep.subr.bf16.mxu0 %v19289_v57  ;;  %7126 = vmatmul.mubr.f32.gmra.mrb[16].mxu1 %v19387_v1  ;;  %v15638_v57 = vld [vmem:[%s13441_s11 + $0x28] sm:$0xff]  ;;  %19394 = vst [vmem:[#allocation140_spill] sm:$0xff] %v15654_v56 }
 0x25d   : > { %11705 = vmatpush1.bf16.msra.mxu1 %v19156_v26  ;;  %7133 = vmatprep.mubr.f32.mxu1 %v19390_v3  ;;  %19391 = vst [vmem:[#allocation164_spill] sm:$0xff] %v15638_v57  ;;  %v12777_v55 = vld [vmem:[%s13652_s28 + $0x28] sm:$0xff]  ;;  %v12783_v3 = vld [vmem:[%s13652_s28 + $0x58] sm:$0xff] }
 0x25e   : > { %v3916_v46 = vmul.f32 %v12777_v55, %v15638_v57  ;;  %v12781_v1 = vld [vmem:[%s13652_s28 + $0x48] sm:$0xff]  ;;  %11707 = vmatprep.subr.bf16.mxu1 %v19197_v5  ;;  %2582 = vmatmul.mubr.f32.gmra.mrb[18].mxu0 %v2581_v61  ;;  %v3922_v55 = vmul.f32 %v12783_v3, %v15654_v56  ;;  %v3946_v61 = vrot.slane %v3912_v52, 1  ;;  %v12787_v5 = vld [vmem:[%s13652_s28 + $0x70] sm:$0xff]  ;;  %v3955_v56 = vrot.slane %v3918_v15, 1 }
 0x25f   : > { %v3920_v58 = vmul.f32 %v12781_v1, %v15648_v14  ;;  %v15659_v57 = vld [vmem:[%s13441_s11 + $0x68] sm:$0xff]  ;;  %10813 = vmatpush1.bf16.msra.mxu0 %v19291_v62  ;;  %2973 = vmatprep.mubr.f32.mxu0 %v19396_v32  ;;  %v3947_v1 = vrot.slane %v3914_v9, 1  ;;  %v15670_v14 = vld [vmem:[%s13441_s11 + $0x70] sm:$0xff] }
 0x260   : > { %19395 = vst [vmem:[#allocation105_spill] sm:$0xff] %v15659_v57  ;;  %v12785_v26 = vld [vmem:[%s13652_s28 + $0x68] sm:$0xff]  ;;  %10815 = vmatprep.subr.bf16.mxu0 %v19292_v50  ;;  %7136 = vmatmul.mubr.f32.gmra.mrb[18].mxu1 %v15349_v47  ;;  %19397 = vst [vmem:[#allocation145_spill] sm:$0xff] %v15670_v14  ;;  %v3925_v3 = vmul.f32 %v12787_v5, %v15670_v14  ;;  %v3963_v50 = vrot.slane %v3922_v55, 1  ;;  %v19401_v5 = vld [vmem:[#allocation176_spill] sm:$0xff] }
 0x261   : > { %v15663_v17 = vmul.f32 %v12785_v26, %v15659_v57  ;;  %11709 = vmatpush1.bf16.msra.mxu1 %v19202_v30  ;;  %v19398_v26 = vand.u32 4294901760, %v19326_v53  ;;  %v3951_v57 = vrot.slane %v3916_v46, 1  ;;  %v3959_v62 = vrot.slane %v3920_v58, 1  ;;  %v19407_v25 = vld [vmem:[#allocation178_spill] sm:$0xff] }
 0x262   : > { %v15677_v32 = vpop.f32.mrb[0].mxu1  ;;  %11711 = vmatprep.subr.bf16.mxu1 %v19204_v63  ;;  %v3969_v7 = vrot.slane %v3925_v3, 1  ;;  %v3948_v53 = vsel %vm328_vm0, %v3946_v61, %v3947_v1 }
 0x263   : > { %7273 = vmatprep.mubr.f32.mxu1 %v19398_v26  ;;  %19399 = vst [vmem:[#allocation100_spill] sm:$0xff] %v15677_v32  ;;  %10817 = vmatpush1.bf16.msra.mxu0 %v19293_v0  ;;  %v15682_v10 = vpop.f32.mrb[1].mxu1  ;;  %v19402_v26 = vrot.slane %v15488_v4, 1  ;;  %v3952_v32 = vsel %vm328_vm0, %v3947_v1, %v3951_v57  ;;  %v3956_v63 = vsel %vm328_vm0, %v3951_v57, %v3955_v56 }
 0x264   : > { %19400 = vst [vmem:[#allocation85_spill] sm:$0xff] %v15682_v10  ;;  %10819 = vmatprep.subr.bf16.mxu0 %v19401_v5  ;;  %v3960_v47 = vsel %vm328_vm0, %v3955_v56, %v3959_v62  ;;  %v3964_v61 = vsel %vm328_vm0, %v3959_v62, %v3963_v50  ;;  %v19404_v10 = vrot.slane %v15663_v17, 1  ;;  %v19405_v5 = vld [vmem:[#allocation177_spill] sm:$0xff]  ;;  %v3990_v1 = vadd.f32 %v3948_v53, %v3912_v52  ;;  %v19410_v53 = vld [vmem:[#allocation179_spill] sm:$0xff] }
 0x265   : > { %v3970_v14 = vsel %vm328_vm0, %v19402_v26, %v3969_v7  ;;  %11713 = vmatpush1.bf16.msra.mxu1 %v19212_v28  ;;  %v3992_v56 = vadd.f32 %v3952_v32, %v3914_v9  ;;  %v19408_v62 = vrot.slane %v15508_v21, 2 }
 0x266   : > { %v4001_v0 = vadd.f32 %v3970_v14, %v15488_v4  ;;  %v15694_v30 = vpop.f32.mrb[2].mxu1  ;;  %11715 = vmatprep.subr.bf16.mxu1 %v19215_v35  ;;  %v3968_v26 = vsel %vm328_vm0, %v3963_v50, %v19404_v10  ;;  %v3994_v4 = vadd.f32 %v3956_v63, %v3916_v46  ;;  %v3996_v14 = vadd.f32 %v3960_v47, %v3918_v15  ;;  %v19412_v15 = vld [vmem:[#allocation180_spill] sm:$0xff] }
 0x267   : > { %19403 = vst [vmem:[#allocation93_spill] sm:$0xff] %v15694_v30  ;;  %10821 = vmatpush1.bf16.msra.mxu0 %v19405_v5  ;;  %v15702_v28 = vpop.f32.mrb[3].mxu1  ;;  %v3998_v30 = vadd.f32 %v3964_v61, %v3920_v58  ;;  %v15706_v35 = vadd.f32 %v3968_v26, %v3922_v55  ;;  %v4003_v10 = vadd.f32 %v3969_v7, %v3925_v3  ;;  %v4024_v47 = vrot.slane %v3990_v1, 2 }
 0x268   : > { %19406 = vst [vmem:[#allocation101_spill] sm:$0xff] %v15702_v28  ;;  %v4043_v57 = vrot.slane %v4001_v0, 2  ;;  %10823 = vmatprep.subr.bf16.mxu0 %v19407_v25  ;;  %v4025_v9 = vrot.slane %v3992_v56, 2  ;;  %v4029_v58 = vrot.slane %v3994_v4, 2  ;;  %v4033_v55 = vrot.slane %v3996_v14, 2 }
 0x269   : > { %11717 = vmatpush1.bf16.msra.mxu1 %v19220_v40  ;;  %v4047_v46 = vrot.slane %v4003_v10, 2  ;;  %v4037_v7 = vrot.slane %v3998_v30, 2  ;;  %v19414_v26 = vrot.slane %v15541_v45, 4 }
 0x26a   : > { %v4044_v50 = vsel %vm407_vm1, %v19408_v62, %v4043_v57  ;;  %v15711_v5 = vpop.f32.mrb[4].mxu1  ;;  %11719 = vmatprep.subr.bf16.mxu1 %v19222_v11  ;;  %v4026_v3 = vsel %vm407_vm1, %v4024_v47, %v4025_v9 }
 0x26b   : > { %19409 = vst [vmem:[#allocation104_spill] sm:$0xff] %v15711_v5  ;;  %v4077_v52 = vadd.f32 %v4044_v50, %v15508_v21  ;;  %10825 = vmatpush1.bf16.msra.mxu0 %v19410_v53  ;;  %v15716_v63 = vpop.f32.mrb[5].mxu1  ;;  %v4048_v61 = vsel %vm407_vm1, %v4043_v57, %v4047_v46  ;;  %v4030_v57 = vsel %vm407_vm1, %v4025_v9, %v4029_v58 }
 0x26c   : > { %19411 = vst [vmem:[#allocation117_spill] sm:$0xff] %v15716_v63  ;;  %10827 = vmatprep.subr.bf16.mxu0 %v19412_v15  ;;  %v4079_v50 = vadd.f32 %v4048_v61, %v4001_v0  ;;  %v19415_v63 = vld [vmem:[#allocation181_spill] sm:$0xff]  ;;  %v19417_v15 = vld [vmem:[#allocation182_spill] sm:$0xff]  ;;  %v19418_v0 = vrot.slane %v15706_v35, 2  ;;  %v15748_v9 = vadd.f32 %v4047_v46, %v4003_v10 }
 0x26d   : > { %v4117_v32 = vrot.slane %v4077_v52, 4  ;;  %11721 = vmatpush1.bf16.msra.mxu1 %v19224_v18 }
 0x26e   : > { %v15722_v21 = vpop.f32.mrb[6].mxu1  ;;  %11723 = vmatprep.subr.bf16.mxu1 %v19226_v59  ;;  %v4121_v53 = vrot.slane %v4079_v50, 4  ;;  %v4042_v61 = vsel %vm407_vm1, %v4037_v7, %v19418_v0  ;;  %v18366_v25 = vrot.slane %v15748_v9, 4 }
 0x26f   : > { %19413 = vst [vmem:[#allocation120_spill] sm:$0xff] %v15722_v21  ;;  %v4118_v62 = vsel %vm486_vm2, %v19414_v26, %v4117_v32  ;;  %10829 = vmatpush1.bf16.msra.mxu0 %v19415_v63  ;;  %v15729_v5 = vpop.f32.mrb[7].mxu1  ;;  %v4034_v21 = vsel %vm407_vm1, %v4029_v58, %v4033_v55  ;;  %v4038_v26 = vsel %vm407_vm1, %v4033_v55, %v4037_v7  ;;  %v19420_v58 = vld [vmem:[#allocation183_spill] sm:$0xff] }
 0x270   : > { %19416 = vst [vmem:[#allocation125_spill] sm:$0xff] %v15729_v5  ;;  %v4153_v28 = vadd.f32 %v4118_v62, %v15541_v45  ;;  %10831 = vmatprep.subr.bf16.mxu0 %v19417_v15  ;;  %v4163_v45 = vadd.f32 %v15556_v34, %v15554_v43  ;;  %v4122_v47 = vsel %vm486_vm2, %v4117_v32, %v4121_v53  ;;  %v19422_v34 = vld [vmem:[#allocation184_spill] sm:$0xff] }
 0x271   : > { %11725 = vmatpush1.bf16.msra.mxu1 %v19229_v51  ;;  %v4068_v15 = vadd.f32 %v4026_v3, %v3990_v1  ;;  %v4070_v63 = vadd.f32 %v4030_v57, %v3992_v56  ;;  %v4155_v0 = vadd.f32 %v4122_v47, %v4077_v52  ;;  %v4072_v43 = vadd.f32 %v4034_v21, %v3994_v4  ;;  %v19423_v56 = vld [vmem:[#allocation185_spill] sm:$0xff]  ;;  %v19425_v21 = vld [vmem:[#allocation98_spill] sm:$0xff] }
 0x272   : > { %v4167_v62 = vadd.f32 %v4153_v28, %v15562_v23  ;;  %v15744_v5 = vpop.f32.mrb[8].mxu1  ;;  %11727 = vmatprep.subr.bf16.mxu1 %v19231_v37  ;;  %v4074_v23 = vadd.f32 %v4038_v26, %v3996_v14  ;;  %v4126_v1 = vsel %vm486_vm2, %v4121_v53, %v18366_v25  ;;  %v19424_v14 = vld [vmem:[#allocation97_spill] sm:$0xff] }
 0x273   : > { %19419 = vst [vmem:[#allocation148_spill] sm:$0xff] %v15744_v5  ;;  %10833 = vmatpush1.bf16.msra.mxu0 %v19420_v58  ;;  %v15751_v55 = vpop.f32.mrb[9].mxu1  ;;  %v15756_v5 = vadd.f32 %v4042_v61, %v3998_v30  ;;  %v15760_v10 = vadd.f32 %v4155_v0, %v4153_v28  ;;  %v4102_v52 = vrot.slane %v4068_v15, 4  ;;  %v15771_v30 = vadd.f32 %v4126_v1, %v4079_v50  ;;  %v19427_v47 = vld [vmem:[#allocation129_spill] sm:$0xff] }
 0x274   : > { %19421 = vst [vmem:[#allocation149_spill] sm:$0xff] %v15751_v55  ;;  %v15753_v7 = vadd.f32 %v4167_v62, %v4163_v45  ;;  %10835 = vmatprep.subr.bf16.mxu0 %v19422_v34  ;;  %v4103_v46 = vrot.slane %v4070_v63, 4  ;;  %v4107_v28 = vrot.slane %v4072_v43, 4  ;;  %v4111_v32 = vrot.slane %v4074_v23, 4  ;;  %v12793_v34 = vld [vmem:[%s13441_s11 + $0x30] sm:$0xff]  ;;  %v12794_v58 = vld [vmem:[%s13441_s11 + $0x40] sm:$0xff] }
 0x275   : > { %11729 = vmatpush1.bf16.msra.mxu1 %v19233_v44  ;;  %v15769_v4 = vadd.f32 %v15760_v10, %v15572_v24  ;;  %v18367_v3 = vrot.slane %v15756_v5, 4  ;;  %v4171_v53 = vadd.f32 %v15771_v30, %v4155_v0  ;;  %v19426_v24 = vld [vmem:[#allocation103_spill] sm:$0xff] }
 0x276   : > { %11731 = vmatprep.subr.bf16.mxu1 %v19176_v33  ;;  %v4104_v50 = vsel %vm486_vm2, %v4102_v52, %v4103_v46  ;;  %v4108_v26 = vsel %vm486_vm2, %v4103_v46, %v4107_v28  ;;  %v4112_v61 = vsel %vm486_vm2, %v4107_v28, %v4111_v32  ;;  %v19428_v46 = vld [vmem:[#allocation134_spill] sm:$0xff] }
 0x277   : > { %10837 = vmatpush1.bf16.msra.mxu0 %v19423_v56  ;;  %v15779_v57 = vadd.f32 %v4171_v53, %v4167_v62  ;;  %v4116_v45 = vsel %vm486_vm2, %v4111_v32, %v18367_v3  ;;  %v4146_v62 = vadd.f32 %v4104_v50, %v4068_v15  ;;  %v15791_v0 = vadd.f32 %v4108_v26, %v4070_v63  ;;  %v19429_v63 = vld [vmem:[#allocation109_spill] sm:$0xff]  ;;  %v15812_v53 = vld [vmem:[%s13441_s11 + $0x78] sm:$0xff]  ;;  %v19437_v3 = vld [vmem:[#allocation6_spill] sm:$0xff] }
 0x278   : > { %10839 = vmatprep.subr.bf16.mxu0 %v19424_v14  ;;  %v15793_v1 = vadd.f32 %v4112_v61, %v4072_v43  ;;  %v15795_v52 = vadd.f32 %v4116_v45, %v4074_v23  ;;  %v19430_v43 = vld [vmem:[#allocation112_spill] sm:$0xff]  ;;  %v19431_v23 = vld [vmem:[#allocation186_spill] sm:$0xff]  ;;  %19432 = vst [vmem:[#allocation119_spill] sm:$0xff] %v15812_v53  ;;  %v19433_v61 = vld [vmem:[#allocation189_spill] sm:$0xff] }
 0x279   : > { %11733 = vmatpush1.bf16.msra.mxu1 %v19178_v8  ;;  %v4162_v28 = vadd.f32 %v15791_v0, %v4146_v62  ;;  %v12789_v50 = vld [vmem:[%s13652_s28 + $0x78] sm:$0xff]  ;;  %v12792_v14 = vld [vmem:[%s13441_s11 + $0x20] sm:$0xff]  ;;  %v19490_v56 = vld [vmem:[#allocation42_spill] sm:$0xff] }
 0x27a   : > { %11735 = vmatprep.subr.bf16.mxu1 %v19179_v31  ;;  %v15804_v15 = vadd.f32 %v15795_v52, %v15793_v1  ;;  %v3926_v26 = vmul.f32 %v12789_v50, %v15812_v53  ;;  %v19434_v45 = vld [vmem:[#allocation7_spill] sm:$0xff]  ;;  %v19438_v50 = vld [vmem:[#allocation130_spill] sm:$0xff]  ;;  %v19440_v53 = vrot.slane %v15663_v17, 1 }
 0x27b   : > { %10841 = vmatpush1.bf16.msra.mxu0 %v19425_v21 }
 0x27c   : > { %10843 = vmatprep.subr.bf16.mxu0 %v19426_v24  ;;  %v4176_v32 = vadd.f32 %v15804_v15, %v4162_v28  ;;  %v3971_v25 = vrot.slane %v3926_v26, 1  ;;  %v19436_v28 = vld [vmem:[#allocation158_spill] sm:$0xff]  ;;  %v19482_v24 = vrot.slane %v15756_v5, 4 }
 0x27d   : > { %11737 = vmatpush1.bf16.msra.mxu1 %v19180_v13 }
 0x27e   : > { %11739 = vmatprep.subr.bf16.mxu1 %v19181_v48  ;;  %v15820_v62 = vand.u32 4294901760, %v4176_v32 }
 0x27f   : > { %10845 = vmatpush1.bf16.msra.mxu0 %v19427_v47  ;;  %v19472_v47 = vld [vmem:[#allocation37_spill] sm:$0xff] }
 0x280   : > { %10847 = vmatprep.subr.bf16.mxu0 %v19428_v46  ;;  %19435 = vst [vmem:[#allocation188_spill] sm:$0xff] %v15820_v62  ;;  %v15829_v55 = vsub.f32 %v4176_v32, %v15820_v62 }
 0x281   : > { %11741 = vmatpush1.bf16.msra.mxu1 %v19182_v60 }
 0x282   : > { %11743 = vmatprep.subr.bf16.mxu1 %v19183_v20  ;;  %19439 = vst [vmem:[#allocation192_spill] sm:$0xff] %v15829_v55 }
 0x283   : > { %10849 = vmatpush1.bf16.msra.mxu0 %v19309_v19 }
 0x284   : > { %10851 = vmatprep.subr.bf16.mxu0 %v19310_v36  ;;  %v19446_v36 = vld [vmem:[#allocation133_spill] sm:$0xff] }
 0x285   : > { %11745 = vmatpush1.bf16.msra.mxu1 %v19429_v63 }
 0x286   : > { %11747 = vmatprep.subr.bf16.mxu1 %v19430_v43 }
 0x287   : > { %10853 = vmatpush1.bf16.msra.mxu0 %v19431_v23  ;;  %v19442_v23 = vld [vmem:[#allocation8_spill] sm:$0xff] }
 0x288   : > { %10855 = vmatprep.subr.bf16.mxu0 %v19433_v61  ;;  %v19441_v61 = vand.u32 4294901760, %v19372_v42  ;;  %v18371_v42 = vand.u32 4294901760, %v15829_v55 }
 0x289   : > { %11749 = vmatpush1.bf16.msra.mxu1 %v19186_v39 }
 0x28a   : > { %11751 = vmatprep.subr.bf16.mxu1 %v19187_v49 }
 0x28b   : > { %10857 = vmatpush1.bf16.msra.mxu0 %v19434_v45  ;;  %v3972_v45 = vsel %vm328_vm0, %v19440_v53, %v3971_v25  ;;  %v19447_v53 = vand.u32 4294901760, %v19380_v54  ;;  %v19453_v54 = vld [vmem:[#allocation24_spill] sm:$0xff] }
 0x28c   : > { %11115 = vmatprep.subr.bf16.mxu0 %v19141_v12  ;;  %v4002_v32 = vadd.f32 %v3972_v45, %v15663_v17  ;;  %v4316_v45 = vsub.f32 %v15829_v55, %v18371_v42  ;;  %v19462_v42 = vld [vmem:[#allocation29_spill] sm:$0xff] }
 0x28d   : > { %11753 = vmatpush1.bf16.msra.mxu1 %v19188_v27  ;;  %v19463_v55 = vld [vmem:[#allocation193_spill] sm:$0xff] }
 0x28e   : > { %2975 = vmatmul.mubr.f32.vlgmr.msra.gmra.mrb[10].mxu0 %v19436_v28  ;;  %11755 = vmatprep.subr.bf16.mxu1 %v19437_v3  ;;  %v19443_v28 = vand.u32 4294901760, %v19374_v38  ;;  %v19444_v3 = vld [vmem:[#allocation106_spill] sm:$0xff]  ;;  %v19449_v38 = vand.u32 4294901760, %v19381_v2  ;;  %v4045_v17 = vrot.slane %v4002_v32, 2 }
 0x28f   : > { %11117 = vmatpush1.bf16.msra.mxu0 %v19144_v22  ;;  %2981 = vmatprep.mubr.f32.mxu0 %v19438_v50  ;;  %v19445_v50 = vld [vmem:[#allocation198_spill] sm:$0xff] }
 0x290   : > { %7277 = vmatmul.mubr.f32.vlgmr.msra.gmra.mrb[10].mxu1 %v19441_v61  ;;  %11119 = vmatprep.subr.bf16.mxu0 %v19146_v41  ;;  %v19448_v61 = vld [vmem:[#allocation205_spill] sm:$0xff]  ;;  %v19456_v2 = vld [vmem:[#allocation18_spill] sm:$0xff] }
 0x291   : > { %11757 = vmatpush1.bf16.msra.mxu1 %v19442_v23  ;;  %7285 = vmatprep.mubr.f32.mxu1 %v19443_v28  ;;  %v19451_v28 = vld [vmem:[#allocation17_spill] sm:$0xff]  ;;  %v19460_v23 = vld [vmem:[#allocation20_spill] sm:$0xff] }
 0x292   : > { %2983 = vmatmul.mubr.f32.gmra.mrb[12].mxu0 %v19444_v3  ;;  %11759 = vmatprep.subr.bf16.mxu1 %v19445_v50  ;;  %v19450_v3 = vld [vmem:[#allocation116_spill] sm:$0xff]  ;;  %v19459_v50 = vld [vmem:[#allocation127_spill] sm:$0xff] }
 0x293   : > { %11121 = vmatpush1.bf16.msra.mxu0 %v19150_v16  ;;  %2989 = vmatprep.mubr.f32.mxu0 %v19446_v36  ;;  %v19452_v36 = vld [vmem:[#allocation122_spill] sm:$0xff] }
 0x294   : > { %11123 = vmatprep.subr.bf16.mxu0 %v19152_v29  ;;  %7289 = vmatmul.mubr.f32.gmra.mrb[12].mxu1 %v19447_v53  ;;  %v19454_v53 = vld [vmem:[#allocation81_spill] sm:$0xff] }
 0x295   : > { %11761 = vmatpush1.bf16.msra.mxu1 %v19448_v61  ;;  %7297 = vmatprep.mubr.f32.mxu1 %v19449_v38  ;;  %v19455_v61 = vand.u32 4294901760, %v19454_v53  ;;  %v19457_v38 = vld [vmem:[#allocation84_spill] sm:$0xff]  ;;  %v4317_v53 = vand.u32 4294901760, %v4316_v45 }
 0x296   : > { %2991 = vmatmul.mubr.f32.gmra.mrb[14].mxu0 %v19450_v3  ;;  %11763 = vmatprep.subr.bf16.mxu1 %v19451_v28  ;;  %v19458_v3 = vand.u32 4294901760, %v19457_v38  ;;  %v4004_v28 = vadd.f32 %v3971_v25, %v3926_v26  ;;  %v19467_v38 = vld [vmem:[#allocation23_spill] sm:$0xff]  ;;  %v19468_v25 = vld [vmem:[#allocation90_spill] sm:$0xff]  ;;  %v19474_v45 = vld [vmem:[#allocation92_spill] sm:$0xff] }
 0x297   : > { %11125 = vmatpush1.bf16.msra.mxu0 %v19154_v6  ;;  %2997 = vmatprep.mubr.f32.mxu0 %v19452_v36  ;;  %v19461_v36 = vrot.slane %v15706_v35, 2  ;;  %v19469_v26 = vand.u32 4294901760, %v19468_v25 }
 0x298   : > { %11127 = vmatprep.subr.bf16.mxu0 %v19453_v54  ;;  %7301 = vmatmul.mubr.f32.gmra.mrb[14].mxu1 %v19455_v61  ;;  %v19464_v61 = vld [vmem:[#allocation32_spill] sm:$0xff] }
 0x299   : > { %11765 = vmatpush1.bf16.msra.mxu1 %v19456_v2  ;;  %7309 = vmatprep.mubr.f32.mxu1 %v19458_v3  ;;  %v4046_v19 = vsel %vm407_vm1, %v19461_v36, %v4045_v17  ;;  %v19465_v2 = vld [vmem:[#allocation160_spill] sm:$0xff]  ;;  %v4049_v3 = vrot.slane %v4004_v28, 2  ;;  %v19471_v36 = vld [vmem:[#allocation25_spill] sm:$0xff] }
 0x29a   : > { %2999 = vmatmul.mubr.f32.gmra.mrb[16].mxu0 %v19459_v50  ;;  %11767 = vmatprep.subr.bf16.mxu1 %v19460_v23  ;;  %v19466_v46 = vand.u32 4294901760, %v19465_v2  ;;  %v4078_v50 = vadd.f32 %v4046_v19, %v15706_v35  ;;  %v19470_v23 = vld [vmem:[#allocation195_spill] sm:$0xff]  ;;  %v19475_v2 = vand.u32 4294901760, %v19474_v45  ;;  %v19478_v19 = vld [vmem:[#allocation28_spill] sm:$0xff] }
 0x29b   : > { %11129 = vmatpush1.bf16.msra.mxu0 %v19462_v42  ;;  %3005 = vmatprep.mubr.f32.mxu0 %v19463_v55  ;;  %v19473_v55 = vld [vmem:[#allocation40_spill] sm:$0xff]  ;;  %v4050_v35 = vsel %vm407_vm1, %v4045_v17, %v4049_v3 }
 0x29c   : > { %11131 = vmatprep.subr.bf16.mxu0 %v19464_v61  ;;  %7313 = vmatmul.mubr.f32.gmra.mrb[16].mxu1 %v19466_v46  ;;  %v19476_v46 = vld [vmem:[#allocation26_spill] sm:$0xff]  ;;  %v4119_v25 = vrot.slane %v4078_v50, 4 }
 0x29d   : > { %11769 = vmatpush1.bf16.msra.mxu1 %v19467_v38  ;;  %7321 = vmatprep.mubr.f32.mxu1 %v19469_v26  ;;  %v19477_v38 = vld [vmem:[#allocation57_spill] sm:$0xff]  ;;  %v19480_v26 = vld [vmem:[#allocation48_spill] sm:$0xff] }
 0x29e   : > { %3007 = vmatmul.mubr.f32.gmra.mrb[18].mxu0 %v19470_v23  ;;  %11771 = vmatprep.subr.bf16.mxu1 %v19471_v36  ;;  %v19479_v23 = vld [vmem:[#allocation45_spill] sm:$0xff]  ;;  %v4080_v36 = vadd.f32 %v4050_v35, %v4002_v32  ;;  %v4120_v45 = vsel %vm486_vm2, %v19482_v24, %v4119_v25  ;;  %v4082_v32 = vadd.f32 %v4049_v3, %v4004_v28  ;;  %v19485_v35 = vld [vmem:[#allocation36_spill] sm:$0xff] }
 0x29f   : > { %11133 = vmatpush1.bf16.msra.mxu0 %v19472_v47  ;;  %4318 = vmatprep.mubr.f32.mxu0 %v4317_v53  ;;  %v19481_v53 = vld [vmem:[#allocation31_spill] sm:$0xff]  ;;  %v4154_v17 = vadd.f32 %v4120_v45, %v15756_v5  ;;  %v4164_v24 = vadd.f32 %v15793_v1, %v15791_v0  ;;  %v12790_v28 = vld [vmem:[%s13441_s11] sm:$0xff] }
 0x2a0   : > { %11135 = vmatprep.subr.bf16.mxu0 %v19473_v55  ;;  %7325 = vmatmul.mubr.f32.gmra.mrb[18].mxu1 %v19475_v2  ;;  %v19483_v2 = vld [vmem:[#allocation33_spill] sm:$0xff]  ;;  %v19486_v5 = vld [vmem:[#allocation39_spill] sm:$0xff]  ;;  %v4127_v45 = vrot.slane %v4082_v32, 4  ;;  %v5717_v3 = vmul.f32 %v12790_v28, %v12790_v28  ;;  %v5723_v28 = vmul.f32 %v12793_v34, %v12793_v34 }
 0x2a1   : > { %11773 = vmatpush1.bf16.msra.mxu1 %v19476_v46  ;;  %7588 = vmatprep.mubr.f32.mxu1 %v19477_v38  ;;  %v19484_v46 = vld [vmem:[#allocation34_spill] sm:$0xff] }
 0x2a2   : > { %11775 = vmatprep.subr.bf16.mxu1 %v19478_v19  ;;  %v4123_v19 = vrot.slane %v4080_v36, 4  ;;  %v12791_v1 = vld [vmem:[%s13441_s11 + $0x10] sm:$0xff] }
 0x2a3   : > { %11137 = vmatpush1.bf16.msra.mxu0 %v19479_v23 }
 0x2a4   : > { %11139 = vmatprep.subr.bf16.mxu0 %v19480_v26 }
 0x2a5   : > { %11777 = vmatpush1.bf16.msra.mxu1 %v19481_v53  ;;  %v4124_v53 = vsel %vm486_vm2, %v4119_v25, %v4123_v19  ;;  %v5721_v25 = vmul.f32 %v12792_v14, %v12792_v14 }
 0x2a6   : > { %11779 = vmatprep.subr.bf16.mxu1 %v19483_v2  ;;  %v4168_v2 = vadd.f32 %v4154_v17, %v15795_v52  ;;  %v4156_v0 = vadd.f32 %v4124_v53, %v4078_v50  ;;  %v5719_v52 = vmul.f32 %v12791_v1, %v12791_v1  ;;  %v5749_v50 = vrot.slane %v5717_v3, 1 }
 0x2a7   : > { %11141 = vmatpush1.bf16.msra.mxu0 %v19220_v40  ;;  %v5755_v1 = vrot.slane %v5721_v25, 1  ;;  %v19499_v40 = vld [vmem:[#allocation50_spill] sm:$0xff] }
 0x2a8   : > { %11143 = vmatprep.subr.bf16.mxu0 %v19222_v11  ;;  %v19491_v11 = vld [vmem:[#allocation44_spill] sm:$0xff]  ;;  %v4170_v53 = vadd.f32 %v4156_v0, %v4154_v17 }
 0x2a9   : > { %11781 = vmatpush1.bf16.msra.mxu1 %v19484_v46  ;;  %v19487_v46 = vld [vmem:[#allocation41_spill] sm:$0xff] }
 0x2aa   : > { %11783 = vmatprep.subr.bf16.mxu1 %v19485_v35  ;;  %v19488_v35 = vld [vmem:[#allocation161_spill] sm:$0xff] }
 0x2ab   : > { %11145 = vmatpush1.bf16.msra.mxu0 %v19224_v18  ;;  %v15912_v21 = vand.u32 4294901760, %v19488_v35 }
 0x2ac   : > { %11147 = vmatprep.subr.bf16.mxu0 %v19226_v59  ;;  %v5725_v59 = vmul.f32 %v12794_v58, %v12794_v58 }
 0x2ad   : > { %11785 = vmatpush1.bf16.msra.mxu1 %v19486_v5  ;;  %19489 = vst [vmem:[#allocation135_spill] sm:$0xff] %v15912_v21  ;;  %v4178_v5 = vadd.f32 %v4168_v2, %v4164_v24  ;;  %v15928_v14 = vsub.f32 %v19488_v35, %v15912_v21  ;;  %v5750_v24 = vrot.slane %v5719_v52, 1  ;;  %v4180_v21 = vadd.f32 %v4170_v53, %v15804_v15  ;;  %v19501_v15 = vld [vmem:[#allocation136_spill] sm:$0xff] }
 0x2ae   : > { %11787 = vmatprep.subr.bf16.mxu1 %v19487_v46  ;;  %v4128_v46 = vsel %vm486_vm2, %v4123_v19, %v4127_v45  ;;  %v19494_v19 = vld [vmem:[#allocation47_spill] sm:$0xff] }
 0x2af   : > { %11149 = vmatpush1.bf16.msra.mxu0 %v19229_v51  ;;  %v12795_v51 = vld [vmem:[%s13441_s11 + $0x50] sm:$0xff]  ;;  %19492 = vst [vmem:[#allocation55_spill] sm:$0xff] %v15928_v14  ;;  %v15931_v34 = vand.u32 4294901760, %v4178_v5  ;;  %v4158_v58 = vadd.f32 %v4128_v46, %v4080_v36  ;;  %s12800_s11 = sshll.u32 %s12862_s19, 4  ;;  %s12801_s11 = int_to_ptr.vmem [resolvable:$false] %s12800_s11 }
 0x2b0   : > { %11151 = vmatprep.subr.bf16.mxu0 %v19231_v37  ;;  %v15922_v18 = vmul.f32 %v12795_v51, %v12795_v51  ;;  %v15935_v51 = vand.u32 4294901760, %v15753_v7  ;;  %s12802_s12 = scalar_lea.vmem %s12801_s11, 32  ;;  %p12803_p0 = scmp.lt.s32.totalorder %s17637_s5, %s12801_s11 }
 0x2b1   : > { %11789 = vmatpush1.bf16.msra.mxu1 %v19490_v56  ;;  %19493 = vst [vmem:[#allocation141_spill] sm:$0xff] %v15931_v34  ;;  %v19496_v56 = vld [vmem:[#allocation49_spill] sm:$0xff]  ;;  %v15944_v36 = vsub.f32 %v4178_v5, %v15931_v34  ;;  %v4172_v46 = vadd.f32 %v4158_v58, %v4156_v0  ;;  %v19506_v34 = vld [vmem:[#allocation10_spill] sm:$0xff]  ;;  %p12804_p1 = scmp.lt.s32.totalorder %s12802_s12, %s12796_s10 }
 0x2b2   : > { %11791 = vmatprep.subr.bf16.mxu1 %v19491_v11  ;;  %19495 = vst [vmem:[#allocation147_spill] sm:$0xff] %v15935_v51  ;;  %v5759_v11 = vrot.slane %v5723_v28, 1  ;;  %v5767_v35 = vrot.slane %v15922_v18, 1  ;;  %v15955_v17 = vsub.f32 %v15753_v7, %v15935_v51 }
 0x2b3   : > { %11153 = vmatpush1.bf16.msra.mxu0 %v19233_v44  ;;  %v5763_v44 = vrot.slane %v5725_v59, 1  ;;  %19497 = vst [vmem:[#allocation146_spill] sm:$0xff] %v15944_v36  ;;  %p12805_p2 = por %p12804_p1, %p12803_p0 }
 0x2b4   : > { %11155 = vmatprep.subr.bf16.mxu0 %v19176_v33  ;;  %v5756_v33 = vsel %vm328_vm0, %v5750_v24, %v5755_v1  ;;  %19500 = vst [vmem:[#allocation131_spill] sm:$0xff] %v15955_v17  ;;  %v5760_v5 = vsel %vm328_vm0, %v5755_v1, %v5759_v11 }
 0x2b5   : > { %11793 = vmatpush1.bf16.msra.mxu1 %v19494_v19  ;;  %v5751_v19 = vsel %vm328_vm0, %v5749_v50, %v5750_v24  ;;  %v5764_v0 = vsel %vm328_vm0, %v5759_v11, %v5763_v44  ;;  %v5768_v50 = vsel %vm328_vm0, %v5763_v44, %v5767_v35  ;;  %v15962_v24 = vand.u32 4294901760, %v4180_v21  ;;  %v19510_v11 = vld [vmem:[#allocation197_spill] sm:$0xff]  ;;  %p12806_p3 = pnand %p12805_p2, %p12799_p13 }
 0x2b6   : > { %11795 = vmatprep.subr.bf16.mxu1 %v19496_v56  ;;  %v19498_v56 = vld [vmem:[#allocation95_spill] sm:$0xff]  ;;  %v19505_v44 = vrot.slane %v15748_v9, 4  ;;  %v5795_v51 = vadd.f32 %v5751_v19, %v5717_v3  ;;  %v5801_v19 = vadd.f32 %v5764_v0, %v5723_v28  ;;  %v19517_v0 = vld [vmem:[#allocation201_spill] sm:$0xff] }
 0x2b7   : > { %11157 = vmatpush1.bf16.msra.mxu0 %v19178_v8  ;;  %v15950_v37 = vmul.f32 %v19498_v56, %v19498_v56  ;;  %19502 = vst [vmem:[#allocation138_spill] sm:$0xff] %v15962_v24  ;;  %v19503_v56 = vand.u32 4294901760, %v15928_v14 }
 0x2b8   : > { %11159 = vmatprep.subr.bf16.mxu0 %v19179_v31  ;;  %v4160_v31 = vadd.f32 %v4127_v45, %v4082_v32  ;;  %v4182_v32 = vadd.f32 %v4172_v46, %v4168_v2  ;;  %v19504_v45 = vld [vmem:[#allocation52_spill] sm:$0xff]  ;;  %v4159_v1 = vadd.f32 %v19505_v44, %v15748_v9  ;;  %v15983_v2 = vsub.f32 %v4180_v21, %v15962_v24 }
 0x2b9   : > { %11797 = vmatpush1.bf16.msra.mxu1 %v19499_v40  ;;  %v15968_v7 = vsub.f32 %v15928_v14, %v19503_v56  ;;  %v18393_v40 = vrot.slane %v15950_v37, 1  ;;  %v5797_v14 = vadd.f32 %v5756_v33, %v5719_v52  ;;  %v5799_v9 = vadd.f32 %v5760_v5, %v5721_v25 }
 0x2ba   : > { %11799 = vmatprep.subr.bf16.mxu1 %v19501_v15  ;;  %v18392_v15 = vand.u32 4294901760, %v15944_v36  ;;  %v4174_v56 = vadd.f32 %v4160_v31, %v4158_v58  ;;  %19508 = vst [vmem:[#allocation114_spill] sm:$0xff] %v15983_v2  ;;  %v15989_v3 = vand.u32 4294901760, %v4182_v32  ;;  %v5803_v44 = vadd.f32 %v5768_v50, %v5725_v59  ;;  %v19512_v58 = vld [vmem:[#allocation199_spill] sm:$0xff] }
 0x2bb   : > { %11161 = vmatpush1.bf16.msra.mxu0 %v19180_v13  ;;  %v5772_v46 = vsel %vm328_vm0, %v5767_v35, %v18393_v40  ;;  %v4323_v33 = vand.u32 4294901760, %v15968_v7  ;;  %v19511_v21 = vand.u32 4294901760, %v15955_v17  ;;  %v4173_v25 = vadd.f32 %v4159_v1, %v15771_v30  ;;  %v19516_v1 = vld [vmem:[#allocation200_spill] sm:$0xff] }
 0x2bc   : > { %11163 = vmatprep.subr.bf16.mxu0 %v19181_v48  ;;  %v15979_v48 = vand.u32 4294901760, %v15769_v4  ;;  %19509 = vst [vmem:[#allocation121_spill] sm:$0xff] %v15989_v3  ;;  %v15996_v31 = vsub.f32 %v15944_v36, %v18392_v15  ;;  %v4184_v28 = vadd.f32 %v4174_v56, %v4170_v53  ;;  %v16010_v35 = vadd.f32 %v5772_v46, %v15922_v18 }
 0x2bd   : > { %11801 = vmatpush1.bf16.msra.mxu1 %v19504_v45  ;;  %v16001_v52 = vsub.f32 %v15955_v17, %v19511_v21  ;;  %v5827_v5 = vrot.slane %v5795_v51, 2  ;;  %v5828_v50 = vrot.slane %v5797_v14, 2  ;;  %v5833_v7 = vrot.slane %v5799_v9, 2  ;;  %v19556_v17 = vld [vmem:[#allocation105_spill] sm:$0xff] }
 0x2be   : > { %11803 = vmatprep.subr.bf16.mxu1 %v19506_v34  ;;  %19507 = vst [vmem:[#allocation113_spill] sm:$0xff] %v15979_v48  ;;  %v16007_v59 = vsub.f32 %v15769_v4, %v15979_v48  ;;  %v5837_v21 = vrot.slane %v5801_v19, 2  ;;  %v16016_v30 = vsub.f32 %v4182_v32, %v15989_v3  ;;  %v16019_v4 = vand.u32 4294901760, %v15779_v57 }
 0x2bf   : > { %11165 = vmatpush1.bf16.msra.mxu0 %v19182_v60  ;;  %v5841_v53 = vrot.slane %v5803_v44, 2  ;;  %v18394_v18 = vrot.slane %v16010_v35, 2  ;;  %v4183_v56 = vadd.f32 %v4173_v25, %v15760_v10  ;;  %v5829_v46 = vsel %vm407_vm1, %v5827_v5, %v5828_v50 }
 0x2c0   : > { %11167 = vmatprep.subr.bf16.mxu0 %v19183_v20  ;;  %19513 = vst [vmem:[#allocation190_spill] sm:$0xff] %v16007_v59  ;;  %19514 = vst [vmem:[#allocation151_spill] sm:$0xff] %v16016_v30  ;;  %v5834_v15 = vsel %vm407_vm1, %v5828_v50, %v5833_v7  ;;  %v5838_v40 = vsel %vm407_vm1, %v5833_v7, %v5837_v21  ;;  %v16028_v32 = vand.u32 4294901760, %v4184_v28  ;;  %v4333_v50 = vand.u32 4294901760, %v15996_v31 }
 0x2c1   : > { %11805 = vmatpush1.bf16.msra.mxu1 %v19510_v11  ;;  %19515 = vst [vmem:[#allocation58_spill] sm:$0xff] %v16019_v4  ;;  %v5846_v11 = vsel %vm407_vm1, %v5841_v53, %v18394_v18  ;;  %v5873_v34 = vadd.f32 %v5829_v46, %v5795_v51  ;;  %v5875_v10 = vadd.f32 %v5834_v15, %v5797_v14  ;;  %v19519_v7 = vand.u32 4294901760, %v15983_v2  ;;  %v19521_v15 = vld [vmem:[#allocation203_spill] sm:$0xff] }
 0x2c2   : > { %11807 = vmatprep.subr.bf16.mxu1 %v19512_v58  ;;  %19518 = vst [vmem:[#allocation152_spill] sm:$0xff] %v16028_v32  ;;  %v5842_v58 = vsel %vm407_vm1, %v5837_v21, %v5841_v53  ;;  %v5877_v25 = vadd.f32 %v5838_v40, %v5799_v9  ;;  %v19520_v53 = vld [vmem:[#allocation202_spill] sm:$0xff]  ;;  %v16049_v9 = vsub.f32 %v15779_v57, %v16019_v4 }
 0x2c3   : > { %11169 = vmatpush1.bf16.msra.mxu0 %v19429_v63  ;;  %v5879_v5 = vadd.f32 %v5842_v58, %v5801_v19  ;;  %v4348_v21 = vsub.f32 %v15983_v2, %v19519_v7  ;;  %v5905_v45 = vrot.slane %v5873_v34, 4  ;;  %v5906_v51 = vrot.slane %v5875_v10, 4  ;;  %v19554_v2 = vld [vmem:[#allocation89_spill] sm:$0xff] }
 0x2c4   : > { %11171 = vmatprep.subr.bf16.mxu0 %v19430_v43  ;;  %v5911_v46 = vrot.slane %v5877_v25, 4  ;;  %19522 = vst [vmem:[#allocation153_spill] sm:$0xff] %v16049_v9  ;;  %v16052_v19 = vsub.f32 %v4184_v28, %v16028_v32 }
 0x2c5   : > { %11809 = vmatpush1.bf16.msra.mxu1 %v19516_v1  ;;  %v16035_v1 = vadd.f32 %v5846_v11, %v5803_v44  ;;  %v5915_v14 = vrot.slane %v5879_v5, 4  ;;  %v16054_v44 = vand.u32 4294901760, %v4183_v56  ;;  %v5907_v31 = vsel %vm486_vm2, %v5905_v45, %v5906_v51  ;;  %v19525_v11 = vld [vmem:[#allocation132_spill] sm:$0xff] }
 0x2c6   : > { %11811 = vmatprep.subr.bf16.mxu1 %v19517_v0  ;;  %19523 = vst [vmem:[#allocation154_spill] sm:$0xff] %v16052_v19  ;;  %v5912_v58 = vsel %vm486_vm2, %v5906_v51, %v5911_v46  ;;  %v5951_v57 = vadd.f32 %v5907_v31, %v5873_v34  ;;  %v19527_v51 = vand.u32 4294901760, %v16007_v59 }
 0x2c7   : > { %11173 = vmatpush1.bf16.msra.mxu0 %v19186_v39  ;;  %v18395_v40 = vrot.slane %v16035_v1, 4  ;;  %19524 = vst [vmem:[#allocation155_spill] sm:$0xff] %v16054_v44  ;;  %v5916_v7 = vsel %vm486_vm2, %v5911_v46, %v5915_v14  ;;  %v16064_v0 = vadd.f32 %v5912_v58, %v5875_v10  ;;  %v16078_v34 = vsub.f32 %v4183_v56, %v16054_v44  ;;  %v19531_v58 = vld [vmem:[#allocation60_spill] sm:$0xff]  ;;  %v19532_v56 = vld [vmem:[#allocation166_spill] sm:$0xff] }
 0x2c8   : > { %11175 = vmatprep.subr.bf16.mxu0 %v19187_v49  ;;  %v16066_v28 = vadd.f32 %v5916_v7, %v5877_v25  ;;  %v4354_v46 = vsub.f32 %v16007_v59, %v19527_v51  ;;  %v19529_v25 = vld [vmem:[#allocation142_spill] sm:$0xff]  ;;  %v19533_v7 = vld [vmem:[#allocation63_spill] sm:$0xff] }
 0x2c9   : > { %11813 = vmatpush1.bf16.msra.mxu1 %v19520_v53  ;;  %v5920_v18 = vsel %vm486_vm2, %v5915_v14, %v18395_v40  ;;  %v4339_v53 = vand.u32 4294901760, %v16001_v52  ;;  %v18399_v14 = vand.u32 4294901760, %v16049_v9  ;;  %19528 = vst [vmem:[#allocation156_spill] sm:$0xff] %v16078_v34  ;;  %v5967_v10 = vadd.f32 %v16064_v0, %v5951_v57  ;;  %v19566_v44 = vld [vmem:[#allocation178_spill] sm:$0xff] }
 0x2ca   : > { %11815 = vmatprep.subr.bf16.mxu1 %v19521_v15  ;;  %v19526_v15 = vld [vmem:[#allocation204_spill] sm:$0xff]  ;;  %v16070_v45 = vadd.f32 %v5920_v18, %v5879_v5  ;;  %v4349_v52 = vand.u32 4294901760, %v4348_v21  ;;  %v19530_v18 = vand.u32 4294901760, %v16016_v30  ;;  %v18398_v5 = vand.u32 4294901760, %v16052_v19 }
 0x2cb   : > { %11177 = vmatpush1.bf16.msra.mxu0 %v19188_v27  ;;  %v4355_v21 = vand.u32 4294901760, %v4354_v46  ;;  %v4370_v57 = vsub.f32 %v16049_v9, %v18399_v14  ;;  %v18404_v51 = vand.u32 4294901760, %v16078_v34  ;;  %v19540_v14 = vld [vmem:[#allocation170_spill] sm:$0xff]  ;;  %v19542_v9 = vld [vmem:[#allocation79_spill] sm:$0xff] }
 0x2cc   : > { %11179 = vmatprep.subr.bf16.mxu0 %v19525_v11  ;;  %v16088_v31 = vadd.f32 %v16070_v45, %v16066_v28  ;;  %v19561_v11 = vld [vmem:[#allocation176_spill] sm:$0xff] }
 0x2cd   : > { %11817 = vmatpush1.bf16.msra.mxu1 %v19526_v15  ;;  %v4380_v15 = vsub.f32 %v16052_v19, %v18398_v5  ;;  %v4371_v46 = vand.u32 4294901760, %v4370_v57  ;;  %v19541_v19 = vld [vmem:[#allocation74_spill] sm:$0xff]  ;;  %v19543_v57 = vld [vmem:[#allocation171_spill] sm:$0xff] }
 0x2ce   : > { %4324 = vmatmul.mubr.f32.vlgmr.msra.gmra.mrb[20].mxu0 %v4323_v33  ;;  %11819 = vmatprep.subr.bf16.mxu1 %v19141_v12  ;;  %v4364_v33 = vsub.f32 %v16016_v30, %v19530_v18  ;;  %v19535_v18 = vld [vmem:[#allocation167_spill] sm:$0xff]  ;;  %v19537_v30 = vld [vmem:[#allocation66_spill] sm:$0xff] }
 0x2cf   : > { %11181 = vmatpush1.bf16.msra.mxu0 %v19529_v25  ;;  %4334 = vmatprep.mubr.f32.mxu0 %v4333_v50  ;;  %v16095_v50 = vadd.f32 %v16088_v31, %v5967_v10  ;;  %v19536_v10 = vld [vmem:[#allocation168_spill] sm:$0xff]  ;;  %v4381_v5 = vand.u32 4294901760, %v4380_v15  ;;  %v19547_v15 = vld [vmem:[#allocation162_spill] sm:$0xff]  ;;  %v19560_v25 = vld [vmem:[#allocation175_spill] sm:$0xff] }
 0x2d0   : > { %7590 = vmatmul.mubr.f32.vlgmr.msra.gmra.mrb[10].mxu1 %v19531_v58  ;;  %11183 = vmatprep.subr.bf16.mxu0 %v19532_v56  ;;  %v4365_v40 = vand.u32 4294901760, %v4364_v33  ;;  %v19539_v33 = vld [vmem:[#allocation169_spill] sm:$0xff] }
 0x2d1   : > { %11821 = vmatpush1.bf16.msra.mxu1 %v19144_v22  ;;  %7596 = vmatprep.mubr.f32.mxu1 %v19533_v7  ;;  %19534 = vst [vmem:[#allocation157_spill] sm:$0xff] %v16095_v50  ;;  %v19559_v56 = vld [vmem:[#allocation145_spill] sm:$0xff] }
 0x2d2   : > { %11823 = vmatprep.subr.bf16.mxu1 %v19146_v41  ;;  %4340 = vmatmul.mubr.f32.gmra.mrb[22].mxu0 %v4339_v53  ;;  %v19538_v53 = vld [vmem:[#allocation71_spill] sm:$0xff] }
 0x2d3   : > { %11185 = vmatpush1.bf16.msra.mxu0 %v19535_v18  ;;  %4350 = vmatprep.mubr.f32.mxu0 %v4349_v52  ;;  %v4386_v52 = vsub.f32 %v16078_v34, %v18404_v51  ;;  %v19544_v51 = vld [vmem:[#allocation172_spill] sm:$0xff]  ;;  %v19545_v34 = vld [vmem:[#allocation82_spill] sm:$0xff] }
 0x2d4   : > { %11187 = vmatprep.subr.bf16.mxu0 %v19536_v10  ;;  %7598 = vmatmul.mubr.f32.gmra.mrb[12].mxu1 %v19537_v30  ;;  %v19552_v10 = vld [vmem:[#allocation143_spill] sm:$0xff] }
 0x2d5   : > { %11825 = vmatpush1.bf16.msra.mxu1 %v19150_v16  ;;  %7604 = vmatprep.mubr.f32.mxu1 %v19538_v53  ;;  %v5726_v18 = vmul.f32 %v19552_v10, %v19552_v10 }
 0x2d6   : > { %11827 = vmatprep.subr.bf16.mxu1 %v19152_v29  ;;  %4356 = vmatmul.mubr.f32.gmra.mrb[24].mxu0 %v4355_v21  ;;  %v4387_v21 = vand.u32 4294901760, %v4386_v52  ;;  %v19549_v52 = vld [vmem:[#allocation164_spill] sm:$0xff] }
 0x2d7   : > { %11189 = vmatpush1.bf16.msra.mxu0 %v19539_v33  ;;  %4366 = vmatprep.mubr.f32.mxu0 %v4365_v40  ;;  %v19546_v40 = vld [vmem:[#allocation87_spill] sm:$0xff]  ;;  %v5765_v36 = vrot.slane %v5726_v18, 1 }
 0x2d8   : > { %11191 = vmatprep.subr.bf16.mxu0 %v19540_v14  ;;  %7606 = vmatmul.mubr.f32.gmra.mrb[14].mxu1 %v19541_v19  ;;  %v5718_v14 = vmul.f32 %v19547_v15, %v19547_v15  ;;  %v19548_v33 = vld [vmem:[#allocation163_spill] sm:$0xff]  ;;  %v19555_v15 = vld [vmem:[#allocation140_spill] sm:$0xff] }
 0x2d9   : > { %11829 = vmatpush1.bf16.msra.mxu1 %v19154_v6  ;;  %7612 = vmatprep.mubr.f32.mxu1 %v19542_v9 }
 0x2da   : > { %11831 = vmatprep.subr.bf16.mxu1 %v19453_v54  ;;  %4372 = vmatmul.mubr.f32.gmra.mrb[26].mxu0 %v4371_v46  ;;  %v5720_v46 = vmul.f32 %v19548_v33, %v19548_v33  ;;  %v5728_v33 = vmul.f32 %v19555_v15, %v19555_v15  ;;  %v5752_v10 = vrot.slane %v5718_v14, 1  ;;  %v5731_v15 = vmul.f32 %v19559_v56, %v19559_v56 }
 0x2db   : > { %11193 = vmatpush1.bf16.msra.mxu0 %v19543_v57  ;;  %4382 = vmatprep.mubr.f32.mxu0 %v4381_v5  ;;  %v5722_v5 = vmul.f32 %v19549_v52, %v19549_v52  ;;  %v19550_v57 = vld [vmem:[#allocation173_spill] sm:$0xff]  ;;  %v16144_v52 = vmul.f32 %v19556_v17, %v19556_v17 }
 0x2dc   : > { %11195 = vmatprep.subr.bf16.mxu0 %v19544_v51  ;;  %7614 = vmatmul.mubr.f32.gmra.mrb[16].mxu1 %v19545_v34  ;;  %v19551_v51 = vld [vmem:[#allocation165_spill] sm:$0xff] }
 0x2dd   : > { %11833 = vmatpush1.bf16.msra.mxu1 %v19462_v42  ;;  %7620 = vmatprep.mubr.f32.mxu1 %v19546_v40  ;;  %v5724_v59 = vmul.f32 %v19551_v51, %v19551_v51 }
 0x2de   : > { %11835 = vmatprep.subr.bf16.mxu1 %v19464_v61  ;;  %4388 = vmatmul.mubr.f32.gmra.mrb[28].mxu0 %v4387_v21  ;;  %v19553_v21 = vld [vmem:[#allocation174_spill] sm:$0xff]  ;;  %v19569_v61 = vld [vmem:[#allocation53_spill] sm:$0xff] }
 0x2df   : > { %11197 = vmatpush1.bf16.msra.mxu0 %v19550_v57  ;;  %4779 = vmatprep.mubr.f32.mxu0 %v15820_v62  ;;  %v5753_v62 = vrot.slane %v5720_v46, 1  ;;  %v5761_v17 = vrot.slane %v5724_v59, 1 }
 0x2e0   : > { %11199 = vmatprep.subr.bf16.mxu0 %v19553_v21  ;;  %7622 = vmatmul.mubr.f32.gmra.mrb[18].mxu1 %v19554_v2  ;;  %v5757_v21 = vrot.slane %v5722_v5, 1  ;;  %v19565_v2 = vld [vmem:[#allocation177_spill] sm:$0xff] }
 0x2e1   : > { %v16146_v57 = vpop.f32.mrb[0].mxu0  ;;  %11837 = vmatpush1.bf16.msra.mxu1 %v19472_v47  ;;  %7757 = vmatprep.mubr.f32.mxu1 %v19477_v38  ;;  %v5775_v38 = vrot.slane %v5731_v15, 1  ;;  %v5754_v56 = vsel %vm328_vm0, %v5752_v10, %v5753_v62  ;;  %v19567_v10 = vrot.slane %v16144_v52, 1 }
 0x2e2   : > { %19557 = vst [vmem:[#allocation159_spill] sm:$0xff] %v16146_v57  ;;  %v16150_v51 = vpop.f32.mrb[1].mxu0  ;;  %11839 = vmatprep.subr.bf16.mxu1 %v19473_v55  ;;  %v5769_v57 = vrot.slane %v5728_v33, 1  ;;  %v19564_v55 = vrot.slane %v15950_v37, 1  ;;  %v5762_v50 = vsel %vm328_vm0, %v5757_v21, %v5761_v17 }
 0x2e3   : > { %19558 = vst [vmem:[#allocation144_spill] sm:$0xff] %v16150_v51  ;;  %11201 = vmatpush1.bf16.msra.mxu0 %v19560_v25  ;;  %v5758_v25 = vsel %vm328_vm0, %v5753_v62, %v5757_v21 }
 0x2e4   : > { %11203 = vmatprep.subr.bf16.mxu0 %v19561_v11  ;;  %v5776_v11 = vsel %vm328_vm0, %v19564_v55, %v5775_v38  ;;  %v5774_v62 = vsel %vm328_vm0, %v5769_v57, %v19567_v10  ;;  %v5796_v55 = vadd.f32 %v5754_v56, %v5718_v14 }
 0x2e5   : > { %v16158_v47 = vpop.f32.mrb[2].mxu0  ;;  %11841 = vmatpush1.bf16.msra.mxu1 %v19479_v23  ;;  %v5807_v23 = vadd.f32 %v5776_v11, %v15950_v37  ;;  %v5800_v37 = vadd.f32 %v5762_v50, %v5722_v5  ;;  %v16185_v42 = vadd.f32 %v5774_v62, %v5728_v33  ;;  %v19579_v62 = vld [vmem:[#allocation181_spill] sm:$0xff] }
 0x2e6   : > { %19562 = vst [vmem:[#allocation137_spill] sm:$0xff] %v16158_v47  ;;  %v16161_v51 = vpop.f32.mrb[3].mxu0  ;;  %11843 = vmatprep.subr.bf16.mxu1 %v19480_v26  ;;  %v5766_v47 = vsel %vm328_vm0, %v5761_v17, %v5765_v36  ;;  %v19571_v17 = vld [vmem:[#allocation56_spill] sm:$0xff]  ;;  %v5830_v50 = vrot.slane %v5796_v55, 2 }
 0x2e7   : > { %19563 = vst [vmem:[#allocation139_spill] sm:$0xff] %v16161_v51  ;;  %11205 = vmatpush1.bf16.msra.mxu0 %v19565_v2  ;;  %v5770_v51 = vsel %vm328_vm0, %v5765_v36, %v5769_v57  ;;  %v5798_v2 = vadd.f32 %v5758_v25, %v5720_v46  ;;  %v5849_v40 = vrot.slane %v5807_v23, 2  ;;  %v5802_v11 = vadd.f32 %v5766_v47, %v5724_v59  ;;  %v19576_v46 = vld [vmem:[#allocation61_spill] sm:$0xff] }
 0x2e8   : > { %11207 = vmatprep.subr.bf16.mxu0 %v19566_v44  ;;  %v19572_v44 = vld [vmem:[#allocation179_spill] sm:$0xff]  ;;  %v5804_v36 = vadd.f32 %v5770_v51, %v5726_v18  ;;  %v19573_v57 = vrot.slane %v16010_v35, 2  ;;  %v19578_v18 = vld [vmem:[#allocation64_spill] sm:$0xff]  ;;  %v5835_v33 = vrot.slane %v5800_v37, 2 }
 0x2e9   : > { %v16178_v26 = vpop.f32.mrb[4].mxu0  ;;  %11845 = vmatpush1.bf16.msra.mxu1 %v19569_v61  ;;  %v19574_v61 = vld [vmem:[#allocation180_spill] sm:$0xff]  ;;  %v5831_v47 = vrot.slane %v5798_v2, 2  ;;  %v5839_v51 = vrot.slane %v5802_v11, 2 }
 0x2ea   : > { %19568 = vst [vmem:[#allocation187_spill] sm:$0xff] %v16178_v26  ;;  %v16181_v21 = vpop.f32.mrb[5].mxu0  ;;  %11847 = vmatprep.subr.bf16.mxu1 %v19571_v17  ;;  %v5850_v10 = vsel %vm407_vm1, %v19573_v57, %v5849_v40  ;;  %v5809_v26 = vadd.f32 %v5775_v38, %v5731_v15  ;;  %v5843_v15 = vrot.slane %v5804_v36, 2  ;;  %v19580_v57 = vld [vmem:[#allocation182_spill] sm:$0xff]  ;;  %v19585_v38 = vld [vmem:[#allocation72_spill] sm:$0xff]  ;;  %v19586_v17 = vld [vmem:[#allocation183_spill] sm:$0xff] }
 0x2eb   : > { %19570 = vst [vmem:[#allocation124_spill] sm:$0xff] %v16181_v21  ;;  %11209 = vmatpush1.bf16.msra.mxu0 %v19572_v44  ;;  %v5883_v14 = vadd.f32 %v5850_v10, %v16010_v35  ;;  %v19581_v10 = vrot.slane %v16035_v1, 4  ;;  %v19583_v44 = vld [vmem:[#allocation69_spill] sm:$0xff]  ;;  %v5832_v21 = vsel %vm407_vm1, %v5830_v50, %v5831_v47  ;;  %v19588_v50 = vld [vmem:[#allocation184_spill] sm:$0xff] }
 0x2ec   : > { %11211 = vmatprep.subr.bf16.mxu0 %v19574_v61  ;;  %v5853_v59 = vrot.slane %v5809_v26, 2 }
 0x2ed   : > { %v16192_v25 = vpop.f32.mrb[6].mxu0  ;;  %11849 = vmatpush1.bf16.msra.mxu1 %v19576_v46  ;;  %v5923_v56 = vrot.slane %v5883_v14, 4 }
 0x2ee   : > { %19575 = vst [vmem:[#allocation65_spill] sm:$0xff] %v16192_v25  ;;  %v16195_v5 = vpop.f32.mrb[7].mxu0  ;;  %11851 = vmatprep.subr.bf16.mxu1 %v19578_v18  ;;  %v5854_v35 = vsel %vm407_vm1, %v5849_v40, %v5853_v59  ;;  %v5836_v40 = vsel %vm407_vm1, %v5831_v47, %v5835_v33 }
 0x2ef   : > { %19577 = vst [vmem:[#allocation68_spill] sm:$0xff] %v16195_v5  ;;  %11213 = vmatpush1.bf16.msra.mxu0 %v19579_v62  ;;  %v5924_v25 = vsel %vm486_vm2, %v19581_v10, %v5923_v56  ;;  %v5885_v61 = vadd.f32 %v5854_v35, %v5807_v23  ;;  %v5844_v23 = vsel %vm407_vm1, %v5839_v51, %v5843_v15  ;;  %v19587_v35 = vrot.slane %v16185_v42, 2 }
 0x2f0   : > { %11215 = vmatprep.subr.bf16.mxu0 %v19580_v57  ;;  %v5959_v62 = vadd.f32 %v5924_v25, %v16035_v1  ;;  %v5840_v57 = vsel %vm407_vm1, %v5835_v33, %v5839_v51  ;;  %v5969_v1 = vadd.f32 %v16066_v28, %v16064_v0  ;;  %v19589_v33 = vld [vmem:[#allocation77_spill] sm:$0xff] }
 0x2f1   : > { %v16205_v5 = vpop.f32.mrb[8].mxu0  ;;  %11853 = vmatpush1.bf16.msra.mxu1 %v19583_v44  ;;  %v5927_v46 = vrot.slane %v5885_v61, 4  ;;  %v5848_v10 = vsel %vm407_vm1, %v5843_v15, %v19587_v35  ;;  %v19590_v44 = vld [vmem:[#allocation80_spill] sm:$0xff]  ;;  %v5878_v15 = vadd.f32 %v5840_v57, %v5800_v37  ;;  %v5880_v35 = vadd.f32 %v5844_v23, %v5802_v11  ;;  %v19591_v28 = vld [vmem:[#allocation185_spill] sm:$0xff]  ;;  %v19594_v57 = vld [vmem:[#allocation98_spill] sm:$0xff] }
 0x2f2   : > { %19582 = vst [vmem:[#allocation191_spill] sm:$0xff] %v16205_v5  ;;  %v16210_v18 = vpop.f32.mrb[9].mxu0  ;;  %11855 = vmatprep.subr.bf16.mxu1 %v19585_v38  ;;  %v5973_v25 = vadd.f32 %v5959_v62, %v16070_v45  ;;  %v5876_v5 = vadd.f32 %v5836_v40, %v5798_v2  ;;  %v16228_v38 = vadd.f32 %v5853_v59, %v5809_v26  ;;  %v19593_v11 = vld [vmem:[#allocation88_spill] sm:$0xff]  ;;  %v19595_v40 = vld [vmem:[#allocation103_spill] sm:$0xff] }
 0x2f3   : > { %19584 = vst [vmem:[#allocation194_spill] sm:$0xff] %v16210_v18  ;;  %11217 = vmatpush1.bf16.msra.mxu0 %v19586_v17  ;;  %v5874_v18 = vadd.f32 %v5832_v21, %v5796_v55  ;;  %v5928_v47 = vsel %vm486_vm2, %v5923_v56, %v5927_v46  ;;  %v16231_v0 = vadd.f32 %v5848_v10, %v5804_v36  ;;  %v19592_v21 = vld [vmem:[#allocation97_spill] sm:$0xff]  ;;  %v5913_v36 = vrot.slane %v5878_v15, 4  ;;  %v19596_v10 = vld [vmem:[#allocation96_spill] sm:$0xff] }
 0x2f4   : > { %11219 = vmatprep.subr.bf16.mxu0 %v19588_v50  ;;  %v16226_v17 = vadd.f32 %v5973_v25, %v5969_v1  ;;  %v5961_v51 = vadd.f32 %v5928_v47, %v5883_v14  ;;  %v18436_v55 = vrot.slane %v16228_v38, 4  ;;  %v5909_v14 = vrot.slane %v5876_v5, 4 }
 0x2f5   : > { %11857 = vmatpush1.bf16.msra.mxu1 %v19589_v33  ;;  %v5908_v2 = vrot.slane %v5874_v18, 4  ;;  %v5917_v59 = vrot.slane %v5880_v35, 4  ;;  %v18437_v56 = vrot.slane %v16231_v0, 4 }
 0x2f6   : > { %11859 = vmatprep.subr.bf16.mxu1 %v19590_v44  ;;  %v16234_v45 = vadd.f32 %v5961_v51, %v5959_v62  ;;  %v5932_v37 = vsel %vm486_vm2, %v5927_v46, %v18436_v55  ;;  %v5914_v46 = vsel %vm486_vm2, %v5909_v14, %v5913_v36  ;;  %v19598_v55 = vld [vmem:[#allocation134_spill] sm:$0xff] }
 0x2f7   : > { %11221 = vmatpush1.bf16.msra.mxu0 %v19591_v28  ;;  %v16248_v62 = vadd.f32 %v5932_v37, %v5885_v61  ;;  %v5918_v1 = vsel %vm486_vm2, %v5913_v36, %v5917_v59  ;;  %v5922_v61 = vsel %vm486_vm2, %v5917_v59, %v18437_v56  ;;  %v19597_v37 = vld [vmem:[#allocation129_spill] sm:$0xff]  ;;  %v19599_v36 = vld [vmem:[#allocation108_spill] sm:$0xff]  ;;  %v19600_v59 = vld [vmem:[#allocation111_spill] sm:$0xff] }
 0x2f8   : > { %11223 = vmatprep.subr.bf16.mxu0 %v19592_v21  ;;  %v16241_v26 = vadd.f32 %v16234_v45, %v16088_v31  ;;  %v5910_v31 = vsel %vm486_vm2, %v5908_v2, %v5909_v14  ;;  %v16266_v2 = vadd.f32 %v5914_v46, %v5876_v5  ;;  %v16270_v14 = vadd.f32 %v5922_v61, %v5880_v35  ;;  %v19601_v5 = vld [vmem:[#allocation186_spill] sm:$0xff]  ;;  %v19603_v35 = vld [vmem:[#allocation7_spill] sm:$0xff]  ;;  %v19607_v61 = vld [vmem:[#allocation13_spill] sm:$0xff] }
 0x2f9   : > { %11861 = vmatpush1.bf16.msra.mxu1 %v19178_v8  ;;  %v5977_v23 = vadd.f32 %v16248_v62, %v5961_v51  ;;  %v5952_v51 = vadd.f32 %v5910_v31, %v5874_v18  ;;  %v19602_v18 = vld [vmem:[#allocation189_spill] sm:$0xff]  ;;  %v19604_v31 = vld [vmem:[#allocation12_spill] sm:$0xff]  ;;  %v19610_v56 = vld [vmem:[#allocation119_spill] sm:$0xff] }
 0x2fa   : > { %11863 = vmatprep.subr.bf16.mxu1 %v19593_v11 }
 0x2fb   : > { %11225 = vmatpush1.bf16.msra.mxu0 %v19594_v57  ;;  %v16261_v47 = vadd.f32 %v5977_v23, %v5973_v25  ;;  %v5968_v25 = vadd.f32 %v16266_v2, %v5952_v51  ;;  %v19608_v51 = vld [vmem:[#allocation141_spill] sm:$0xff]  ;;  %v19649_v57 = vld [vmem:[#allocation86_spill] sm:$0xff] }
 0x2fc   : > { %11227 = vmatprep.subr.bf16.mxu0 %v19595_v40  ;;  %v16268_v40 = vadd.f32 %v5918_v1, %v5878_v15  ;;  %v19606_v1 = vld [vmem:[#allocation135_spill] sm:$0xff] }
 0x2fd   : > { %11865 = vmatpush1.bf16.msra.mxu1 %v19180_v13 }
 0x2fe   : > { %11867 = vmatprep.subr.bf16.mxu1 %v19596_v10  ;;  %v16279_v23 = vadd.f32 %v16270_v14, %v16268_v40 }
 0x2ff   : > { %11229 = vmatpush1.bf16.msra.mxu0 %v19597_v37  ;;  %v19648_v37 = vld [vmem:[#allocation83_spill] sm:$0xff] }
 0x300   : > { %11231 = vmatprep.subr.bf16.mxu0 %v19598_v55  ;;  %v5982_v15 = vadd.f32 %v16279_v23, %v5968_v25  ;;  %v19609_v25 = vld [vmem:[#allocation15_spill] sm:$0xff]  ;;  %v19646_v55 = vld [vmem:[#allocation69_spill] sm:$0xff] }
 0x301   : > { %11869 = vmatpush1.bf16.msra.mxu1 %v19182_v60 }
 0x302   : > { %11871 = vmatprep.subr.bf16.mxu1 %v19183_v20  ;;  %v16290_v46 = vand.u32 4294901760, %v5982_v15 }
 0x303   : > { %11233 = vmatpush1.bf16.msra.mxu0 %v19599_v36  ;;  %v19645_v36 = vld [vmem:[#allocation78_spill] sm:$0xff] }
 0x304   : > { %11235 = vmatprep.subr.bf16.mxu0 %v19600_v59  ;;  %19605 = vst [vmem:[#allocation73_spill] sm:$0xff] %v16290_v46  ;;  %v19642_v59 = vld [vmem:[#allocation64_spill] sm:$0xff] }
 0x305   : > { %11873 = vmatpush1.bf16.msra.mxu1 %v19429_v63 }
 0x306   : > { %11875 = vmatprep.subr.bf16.mxu1 %v19430_v43 }
 0x307   : > { %11237 = vmatpush1.bf16.msra.mxu0 %v19601_v5  ;;  %v19641_v5 = vld [vmem:[#allocation61_spill] sm:$0xff] }
 0x308   : > { %11239 = vmatprep.subr.bf16.mxu0 %v19602_v18  ;;  %v19639_v18 = vld [vmem:[#allocation67_spill] sm:$0xff] }
 0x309   : > { %11877 = vmatpush1.bf16.msra.mxu1 %v19186_v39 }
 0x30a   : > { %11879 = vmatprep.subr.bf16.mxu1 %v19187_v49 }
 0x30b   : > { %11241 = vmatpush1.bf16.msra.mxu0 %v19603_v35  ;;  %v5732_v35 = vmul.f32 %v19610_v56, %v19610_v56 }
 0x30c   : > { %11243 = vmatprep.subr.bf16.mxu0 %v19604_v31  ;;  %v16303_v31 = vsub.f32 %v5982_v15, %v16290_v46  ;;  %v19615_v15 = vld [vmem:[#allocation27_spill] sm:$0xff] }
 0x30d   : > { %11881 = vmatpush1.bf16.msra.mxu1 %v19188_v27  ;;  %v5777_v56 = vrot.slane %v5732_v35, 1 }
 0x30e   : > { %4781 = vmatmul.mubr.f32.vlgmr.msra.gmra.mrb[20].mxu0 %v19606_v1  ;;  %11883 = vmatprep.subr.bf16.mxu1 %v19141_v12  ;;  %19611 = vst [vmem:[#allocation76_spill] sm:$0xff] %v16303_v31  ;;  %v19612_v1 = vld [vmem:[#allocation147_spill] sm:$0xff] }
 0x30f   : > { %11245 = vmatpush1.bf16.msra.mxu0 %v19607_v61  ;;  %4787 = vmatprep.mubr.f32.mxu0 %v19608_v51  ;;  %v19613_v61 = vld [vmem:[#allocation19_spill] sm:$0xff] }
 0x310   : > { %7759 = vmatmul.mubr.f32.vlgmr.msra.gmra.mrb[10].mxu1 %v19531_v58  ;;  %11247 = vmatprep.subr.bf16.mxu0 %v19609_v25  ;;  %v19614_v58 = vld [vmem:[#allocation22_spill] sm:$0xff] }
 0x311   : > { %11885 = vmatpush1.bf16.msra.mxu1 %v19144_v22  ;;  %7765 = vmatprep.mubr.f32.mxu1 %v19533_v7  ;;  %v18444_v7 = vand.u32 4294901760, %v16303_v31 }
 0x312   : > { %11887 = vmatprep.subr.bf16.mxu1 %v19146_v41  ;;  %4789 = vmatmul.mubr.f32.gmra.mrb[22].mxu0 %v19612_v1 }
 0x313   : > { %11249 = vmatpush1.bf16.msra.mxu0 %v19613_v61  ;;  %4795 = vmatprep.mubr.f32.mxu0 %v15962_v24  ;;  %v19616_v24 = vld [vmem:[#allocation30_spill] sm:$0xff]  ;;  %v19638_v61 = vld [vmem:[#allocation56_spill] sm:$0xff] }
 0x314   : > { %11251 = vmatprep.subr.bf16.mxu0 %v19614_v58  ;;  %7767 = vmatmul.mubr.f32.gmra.mrb[12].mxu1 %v19537_v30  ;;  %v19617_v30 = vrot.slane %v16144_v52, 1  ;;  %v19633_v58 = vld [vmem:[#allocation45_spill] sm:$0xff] }
 0x315   : > { %11889 = vmatpush1.bf16.msra.mxu1 %v19150_v16  ;;  %7773 = vmatprep.mubr.f32.mxu1 %v19538_v53  ;;  %v8008_v53 = vsub.f32 %v16303_v31, %v18444_v7  ;;  %v19622_v7 = vld [vmem:[#allocation32_spill] sm:$0xff]  ;;  %v19623_v31 = vld [vmem:[#allocation155_spill] sm:$0xff] }
 0x316   : > { %11891 = vmatprep.subr.bf16.mxu1 %v19152_v29  ;;  %4797 = vmatmul.mubr.f32.gmra.mrb[24].mxu0 %v15979_v48  ;;  %v5778_v1 = vsel %vm328_vm0, %v19617_v30, %v5777_v56  ;;  %v19619_v48 = vld [vmem:[#allocation38_spill] sm:$0xff]  ;;  %v19620_v30 = vld [vmem:[#allocation29_spill] sm:$0xff] }
 0x317   : > { %11253 = vmatpush1.bf16.msra.mxu0 %v19615_v15  ;;  %4803 = vmatprep.mubr.f32.mxu0 %v15989_v3  ;;  %v19618_v3 = vld [vmem:[#allocation35_spill] sm:$0xff]  ;;  %v8009_v51 = vand.u32 4294901760, %v8008_v53  ;;  %v19632_v15 = vld [vmem:[#allocation54_spill] sm:$0xff] }
 0x318   : > { %11255 = vmatprep.subr.bf16.mxu0 %v19616_v24  ;;  %7775 = vmatmul.mubr.f32.gmra.mrb[14].mxu1 %v19541_v19  ;;  %v5808_v19 = vadd.f32 %v5778_v1, %v16144_v52  ;;  %v5810_v24 = vadd.f32 %v5777_v56, %v5732_v35  ;;  %v19626_v52 = vld [vmem:[#allocation46_spill] sm:$0xff]  ;;  %v19627_v1 = vld [vmem:[#allocation89_spill] sm:$0xff]  ;;  %v19630_v53 = vld [vmem:[#allocation51_spill] sm:$0xff] }
 0x319   : > { %11893 = vmatpush1.bf16.msra.mxu1 %v19154_v6  ;;  %7781 = vmatprep.mubr.f32.mxu1 %v19542_v9  ;;  %v19621_v9 = vld [vmem:[#allocation87_spill] sm:$0xff]  ;;  %v19634_v35 = vld [vmem:[#allocation48_spill] sm:$0xff] }
 0x31a   : > { %11895 = vmatprep.subr.bf16.mxu1 %v19453_v54  ;;  %4805 = vmatmul.mubr.f32.gmra.mrb[26].mxu0 %v16019_v4  ;;  %v19624_v4 = vld [vmem:[#allocation43_spill] sm:$0xff] }
 0x31b   : > { %11257 = vmatpush1.bf16.msra.mxu0 %v19618_v3  ;;  %4811 = vmatprep.mubr.f32.mxu0 %v16028_v32  ;;  %v19625_v3 = vld [vmem:[#allocation192_spill] sm:$0xff]  ;;  %v5851_v32 = vrot.slane %v5808_v19, 2 }
 0x31c   : > { %11259 = vmatprep.subr.bf16.mxu0 %v19619_v48  ;;  %7783 = vmatmul.mubr.f32.gmra.mrb[16].mxu1 %v19545_v34  ;;  %v19628_v34 = vld [vmem:[#allocation37_spill] sm:$0xff]  ;;  %v19629_v48 = vld [vmem:[#allocation40_spill] sm:$0xff] }
 0x31d   : > { %11897 = vmatpush1.bf16.msra.mxu1 %v19620_v30  ;;  %7789 = vmatprep.mubr.f32.mxu1 %v19621_v9  ;;  %v19631_v9 = vrot.slane %v16185_v42, 2 }
 0x31e   : > { %11899 = vmatprep.subr.bf16.mxu1 %v19622_v7  ;;  %4813 = vmatmul.mubr.f32.gmra.mrb[28].mxu0 %v19623_v31 }
 0x31f   : > { %11261 = vmatpush1.bf16.msra.mxu0 %v19624_v4  ;;  %5013 = vmatprep.mubr.f32.mxu0 %v19625_v3  ;;  %v5852_v31 = vsel %vm407_vm1, %v19631_v9, %v5851_v32  ;;  %v5855_v4 = vrot.slane %v5810_v24, 2 }
 0x320   : > { %11263 = vmatprep.subr.bf16.mxu0 %v19626_v52  ;;  %7791 = vmatmul.mubr.f32.gmra.mrb[18].mxu1 %v19627_v1  ;;  %v5884_v56 = vadd.f32 %v5852_v31, %v16185_v42  ;;  %v19635_v1 = vld [vmem:[#allocation59_spill] sm:$0xff]  ;;  %v19636_v52 = vld [vmem:[#allocation62_spill] sm:$0xff]  ;;  %v19643_v42 = vrot.slane %v16231_v0, 4 }
 0x321   : > { %11901 = vmatpush1.bf16.msra.mxu1 %v19628_v34  ;;  %8010 = vmatprep.mubr.f32.mxu1 %v8009_v51  ;;  %v5856_v51 = vsel %vm407_vm1, %v5851_v32, %v5855_v4 }
 0x322   : > { %11903 = vmatprep.subr.bf16.mxu1 %v19629_v48  ;;  %v5925_v9 = vrot.slane %v5884_v56, 4  ;;  %v5886_v25 = vadd.f32 %v5856_v51, %v5808_v19  ;;  %v19647_v51 = vld [vmem:[#allocation72_spill] sm:$0xff] }
 0x323   : > { %11265 = vmatpush1.bf16.msra.mxu0 %v19630_v53  ;;  %v19637_v53 = vld [vmem:[#allocation53_spill] sm:$0xff] }
 0x324   : > { %11267 = vmatprep.subr.bf16.mxu0 %v19632_v15  ;;  %v19640_v15 = vld [vmem:[#allocation70_spill] sm:$0xff]  ;;  %v5926_v32 = vsel %vm486_vm2, %v19643_v42, %v5925_v9  ;;  %v5929_v31 = vrot.slane %v5886_v25, 4 }
 0x325   : > { %11905 = vmatpush1.bf16.msra.mxu1 %v19633_v58  ;;  %v5960_v19 = vadd.f32 %v5926_v32, %v16231_v0  ;;  %v19650_v32 = vld [vmem:[#allocation91_spill] sm:$0xff] }
 0x326   : > { %11907 = vmatprep.subr.bf16.mxu1 %v19634_v35 }
 0x327   : > { %11269 = vmatpush1.bf16.msra.mxu0 %v19635_v1  ;;  %v19644_v1 = vld [vmem:[#allocation75_spill] sm:$0xff] }
 0x328   : > { %11271 = vmatprep.subr.bf16.mxu0 %v19636_v52  ;;  %v5888_v52 = vadd.f32 %v5855_v4, %v5810_v24  ;;  %v5970_v24 = vadd.f32 %v16268_v40, %v16266_v2  ;;  %v5974_v4 = vadd.f32 %v5960_v19, %v16270_v14  ;;  %v19653_v40 = vld [vmem:[#allocation157_spill] sm:$0xff]  ;;  %v19655_v14 = vld [vmem:[#allocation102_spill] sm:$0xff] }
 0x329   : > { %11909 = vmatpush1.bf16.msra.mxu1 %v19637_v53  ;;  %v16385_v2 = vand.u32 4294901760, %v19653_v40 }
 0x32a   : > { %11911 = vmatprep.subr.bf16.mxu1 %v19638_v61 }
 0x32b   : > { %11273 = vmatpush1.bf16.msra.mxu0 %v19639_v18  ;;  %v5933_v18 = vrot.slane %v5888_v52, 4  ;;  %19654 = vst [vmem:[#allocation196_spill] sm:$0xff] %v16385_v2 }
 0x32c   : > { %11275 = vmatprep.subr.bf16.mxu0 %v19640_v15  ;;  %v5930_v15 = vsel %vm486_vm2, %v5925_v9, %v5929_v31  ;;  %v19651_v9 = vld [vmem:[#allocation94_spill] sm:$0xff] }
 0x32d   : > { %11913 = vmatpush1.bf16.msra.mxu1 %v19641_v5  ;;  %v5962_v42 = vadd.f32 %v5930_v15, %v5884_v56  ;;  %v5934_v0 = vsel %vm486_vm2, %v5929_v31, %v5933_v18 }
 0x32e   : > { %11915 = vmatprep.subr.bf16.mxu1 %v19642_v59 }
 0x32f   : > { %11277 = vmatpush1.bf16.msra.mxu0 %v19644_v1  ;;  %v19652_v1 = vld [vmem:[#allocation99_spill] sm:$0xff] }
 0x330   : > { %11279 = vmatprep.subr.bf16.mxu0 %v19645_v36  ;;  %v5964_v36 = vadd.f32 %v5934_v0, %v5886_v25  ;;  %v19657_v25 = vld [vmem:[#allocation107_spill] sm:$0xff]  ;;  %v16400_v0 = vand.u32 4294901760, %v16226_v17 }
 0x331   : > { %11917 = vmatpush1.bf16.msra.mxu1 %v19646_v55 }
 0x332   : > { %11919 = vmatprep.subr.bf16.mxu1 %v19647_v51  ;;  %v5978_v31 = vadd.f32 %v5964_v36, %v5962_v42  ;;  %19660 = vst [vmem:[#allocation130_spill] sm:$0xff] %v16400_v0 }
 0x333   : > { %11281 = vmatpush1.bf16.msra.mxu0 %v19648_v37  ;;  %v5984_v37 = vadd.f32 %v5974_v4, %v5970_v24  ;;  %v19659_v24 = vld [vmem:[#allocation110_spill] sm:$0xff] }
 0x334   : > { %11283 = vmatprep.subr.bf16.mxu0 %v19649_v57  ;;  %v5976_v57 = vadd.f32 %v5962_v42, %v5960_v19  ;;  %v16396_v19 = vsub.f32 %v19653_v40, %v16385_v2  ;;  %v19664_v40 = vld [vmem:[#allocation115_spill] sm:$0xff] }
 0x335   : > { %11921 = vmatpush1.bf16.msra.mxu1 %v19589_v33  ;;  %v16389_v15 = vand.u32 4294901760, %v5984_v37 }
 0x336   : > { %11923 = vmatprep.subr.bf16.mxu1 %v19590_v44  ;;  %v5986_v56 = vadd.f32 %v5976_v57, %v16279_v23  ;;  %19658 = vst [vmem:[#allocation158_spill] sm:$0xff] %v16396_v19 }
 0x337   : > { %11285 = vmatpush1.bf16.msra.mxu0 %v19650_v32  ;;  %19656 = vst [vmem:[#allocation150_spill] sm:$0xff] %v16389_v15  ;;  %v16407_v23 = vsub.f32 %v5984_v37, %v16389_v15  ;;  %v19691_v32 = vld [vmem:[#allocation131_spill] sm:$0xff] }
 0x338   : > { %11287 = vmatprep.subr.bf16.mxu0 %v19651_v9  ;;  %v5966_v9 = vadd.f32 %v5933_v18, %v5888_v52  ;;  %v16409_v18 = vand.u32 4294901760, %v5986_v56  ;;  %v5988_v52 = vadd.f32 %v5978_v31, %v5974_v4 }
 0x339   : > { %11925 = vmatpush1.bf16.msra.mxu1 %v19178_v8  ;;  %19662 = vst [vmem:[#allocation106_spill] sm:$0xff] %v16407_v23 }
 0x33a   : > { %11927 = vmatprep.subr.bf16.mxu1 %v19593_v11  ;;  %19663 = vst [vmem:[#allocation133_spill] sm:$0xff] %v16409_v18  ;;  %v5980_v42 = vadd.f32 %v5966_v9, %v5964_v36  ;;  %v18453_v36 = vand.u32 4294901760, %v16407_v23  ;;  %v16426_v4 = vsub.f32 %v5986_v56, %v16409_v18  ;;  %v16428_v9 = vand.u32 4294901760, %v5988_v52 }
 0x33b   : > { %11289 = vmatpush1.bf16.msra.mxu0 %v19652_v1  ;;  %v16442_v56 = vand.u32 4294901760, %v16261_v47 }
 0x33c   : > { %11291 = vmatprep.subr.bf16.mxu0 %v19655_v14  ;;  %v19661_v14 = vrot.slane %v16228_v38, 4  ;;  %19668 = vst [vmem:[#allocation81_spill] sm:$0xff] %v16426_v4  ;;  %19669 = vst [vmem:[#allocation84_spill] sm:$0xff] %v16428_v9  ;;  %v5990_v31 = vadd.f32 %v5980_v42, %v5976_v57  ;;  %v8024_v42 = vsub.f32 %v16407_v23, %v18453_v36  ;;  %v19684_v36 = vld [vmem:[#allocation132_spill] sm:$0xff] }
 0x33d   : > { %11929 = vmatpush1.bf16.msra.mxu1 %v19180_v13  ;;  %19674 = vst [vmem:[#allocation193_spill] sm:$0xff] %v16442_v56 }
 0x33e   : > { %11931 = vmatprep.subr.bf16.mxu1 %v19596_v10  ;;  %v5965_v1 = vadd.f32 %v19661_v14, %v16228_v38  ;;  %v16417_v38 = vsub.f32 %v16226_v17, %v16400_v0  ;;  %v16420_v14 = vand.u32 4294901760, %v16241_v26  ;;  %v19671_v17 = vand.u32 4294901760, %v16396_v19 }
 0x33f   : > { %11293 = vmatpush1.bf16.msra.mxu0 %v19657_v25  ;;  %v19665_v25 = vld [vmem:[#allocation118_spill] sm:$0xff]  ;;  %v8025_v23 = vand.u32 4294901760, %v8024_v42 }
 0x340   : > { %11295 = vmatprep.subr.bf16.mxu0 %v19659_v24  ;;  %19666 = vst [vmem:[#allocation116_spill] sm:$0xff] %v16417_v38  ;;  %19667 = vst [vmem:[#allocation122_spill] sm:$0xff] %v16420_v14  ;;  %v5979_v37 = vadd.f32 %v5965_v1, %v16248_v62  ;;  %v19670_v24 = vld [vmem:[#allocation123_spill] sm:$0xff]  ;;  %v16439_v1 = vsub.f32 %v16241_v26, %v16420_v14  ;;  %v16453_v62 = vand.u32 4294901760, %v5990_v31  ;;  %v19677_v26 = vld [vmem:[#allocation128_spill] sm:$0xff] }
 0x341   : > { %11933 = vmatpush1.bf16.msra.mxu1 %v19182_v60 }
 0x342   : > { %11935 = vmatprep.subr.bf16.mxu1 %v19183_v20  ;;  %19673 = vst [vmem:[#allocation127_spill] sm:$0xff] %v16439_v1  ;;  %v5989_v57 = vadd.f32 %v5979_v37, %v16234_v45  ;;  %19676 = vst [vmem:[#allocation90_spill] sm:$0xff] %v16453_v62  ;;  %v19678_v45 = vand.u32 4294901760, %v16417_v38 }
 0x343   : > { %11297 = vmatpush1.bf16.msra.mxu0 %v19664_v40  ;;  %v19672_v40 = vld [vmem:[#allocation126_spill] sm:$0xff] }
 0x344   : > { %11299 = vmatprep.subr.bf16.mxu0 %v19665_v25  ;;  %v8014_v25 = vsub.f32 %v16396_v19, %v19671_v17  ;;  %v16451_v19 = vsub.f32 %v5988_v52, %v16428_v9  ;;  %v8030_v37 = vsub.f32 %v16417_v38, %v19678_v45  ;;  %v16464_v17 = vsub.f32 %v16261_v47, %v16442_v56  ;;  %v19683_v45 = vld [vmem:[#allocation55_spill] sm:$0xff]  ;;  %v19685_v47 = vld [vmem:[#allocation146_spill] sm:$0xff] }
 0x345   : > { %11937 = vmatpush1.bf16.msra.mxu1 %v19429_v63  ;;  %v16466_v52 = vand.u32 4294901760, %v5989_v57  ;;  %v19686_v38 = vand.u32 4294901760, %v16439_v1 }
 0x346   : > { %11939 = vmatprep.subr.bf16.mxu1 %v19430_v43  ;;  %19675 = vst [vmem:[#allocation160_spill] sm:$0xff] %v16451_v19  ;;  %19679 = vst [vmem:[#allocation195_spill] sm:$0xff] %v16464_v17  ;;  %v8031_v42 = vand.u32 4294901760, %v8030_v37  ;;  %v19690_v37 = vld [vmem:[#allocation166_spill] sm:$0xff] }
 0x347   : > { %11301 = vmatpush1.bf16.msra.mxu0 %v19670_v24  ;;  %19680 = vst [vmem:[#allocation92_spill] sm:$0xff] %v16466_v52  ;;  %v16474_v24 = vsub.f32 %v5990_v31, %v16453_v62  ;;  %v16486_v31 = vsub.f32 %v5989_v57, %v16466_v52  ;;  %v19693_v57 = vld [vmem:[#allocation167_spill] sm:$0xff] }
 0x348   : > { %11303 = vmatprep.subr.bf16.mxu0 %v19672_v40  ;;  %v8015_v40 = vand.u32 4294901760, %v8014_v25 }
 0x349   : > { %11941 = vmatpush1.bf16.msra.mxu1 %v19186_v39  ;;  %19682 = vst [vmem:[#allocation57_spill] sm:$0xff] %v16474_v24  ;;  %19687 = vst [vmem:[#allocation161_spill] sm:$0xff] %v16486_v31 }
 0x34a   : > { %11943 = vmatprep.subr.bf16.mxu1 %v19187_v49 }
 0x34b   : > { %11305 = vmatpush1.bf16.msra.mxu0 %v19677_v26  ;;  %v19681_v26 = vand.u32 4294901760, %v16426_v4 }
 0x34c   : > { %11307 = vmatprep.subr.bf16.mxu0 %v19141_v12  ;;  %v18468_v12 = vand.u32 4294901760, %v16464_v17 }
 0x34d   : > { %11945 = vmatpush1.bf16.msra.mxu1 %v19188_v27  ;;  %v8040_v25 = vsub.f32 %v16426_v4, %v19681_v26  ;;  %v8046_v26 = vsub.f32 %v16439_v1, %v19686_v38  ;;  %v19688_v4 = vld [vmem:[#allocation142_spill] sm:$0xff] }
 0x34e   : > { %5016 = vmatmul.mubr.f32.vlgmr.msra.gmra.mrb[20].mxu0 %v19683_v45  ;;  %11947 = vmatprep.subr.bf16.mxu1 %v19684_v36  ;;  %v19692_v38 = vld [vmem:[#allocation114_spill] sm:$0xff] }
 0x34f   : > { %11309 = vmatpush1.bf16.msra.mxu0 %v19144_v22  ;;  %5023 = vmatprep.mubr.f32.mxu0 %v19685_v47  ;;  %v8041_v36 = vand.u32 4294901760, %v8040_v25  ;;  %v19689_v22 = vand.u32 4294901760, %v16451_v19  ;;  %v19695_v1 = vld [vmem:[#allocation190_spill] sm:$0xff] }
 0x350   : > { %8016 = vmatmul.mubr.f32.vlgmr.msra.gmra.mrb[10].mxu1 %v8015_v40  ;;  %11311 = vmatprep.subr.bf16.mxu0 %v19146_v41  ;;  %v18467_v41 = vand.u32 4294901760, %v16474_v24 }
 0x351   : > { %11949 = vmatpush1.bf16.msra.mxu1 %v19688_v4  ;;  %8026 = vmatprep.mubr.f32.mxu1 %v8025_v23  ;;  %v8056_v40 = vsub.f32 %v16451_v19, %v19689_v22  ;;  %v8047_v4 = vand.u32 4294901760, %v8046_v26  ;;  %v8062_v23 = vsub.f32 %v16464_v17, %v18468_v12  ;;  %v18469_v22 = vand.u32 4294901760, %v16486_v31  ;;  %v19694_v19 = vld [vmem:[#allocation168_spill] sm:$0xff]  ;;  %v19700_v12 = vld [vmem:[#allocation154_spill] sm:$0xff] }
 0x352   : > { %11951 = vmatprep.subr.bf16.mxu1 %v19690_v37  ;;  %5026 = vmatmul.mubr.f32.gmra.mrb[22].mxu0 %v19691_v32  ;;  %v8072_v37 = vsub.f32 %v16474_v24, %v18467_v41  ;;  %v19698_v41 = vld [vmem:[#allocation170_spill] sm:$0xff] }
 0x353   : > { %11313 = vmatpush1.bf16.msra.mxu0 %v19150_v16  ;;  %5033 = vmatprep.mubr.f32.mxu0 %v19692_v38  ;;  %v8057_v25 = vand.u32 4294901760, %v8056_v40  ;;  %v8063_v26 = vand.u32 4294901760, %v8062_v23  ;;  %v19697_v40 = vld [vmem:[#allocation169_spill] sm:$0xff]  ;;  %v19701_v23 = vld [vmem:[#allocation171_spill] sm:$0xff] }
 0x354   : > { %11315 = vmatprep.subr.bf16.mxu0 %v19152_v29  ;;  %8032 = vmatmul.mubr.f32.gmra.mrb[12].mxu1 %v8031_v42  ;;  %v19696_v42 = vld [vmem:[#allocation151_spill] sm:$0xff] }
 0x355   : > { %11953 = vmatpush1.bf16.msra.mxu1 %v19693_v57  ;;  %8042 = vmatprep.mubr.f32.mxu1 %v8041_v36  ;;  %v8078_v36 = vsub.f32 %v16486_v31, %v18469_v22  ;;  %v8073_v57 = vand.u32 4294901760, %v8072_v37  ;;  %v19702_v22 = vld [vmem:[#allocation172_spill] sm:$0xff]  ;;  %v19705_v37 = vld [vmem:[#allocation173_spill] sm:$0xff] }
 0x356   : > { %11955 = vmatprep.subr.bf16.mxu1 %v19694_v19  ;;  %5036 = vmatmul.mubr.f32.gmra.mrb[24].mxu0 %v19695_v1  ;;  %v19699_v19 = vld [vmem:[#allocation153_spill] sm:$0xff] }
 0x357   : > { %11317 = vmatpush1.bf16.msra.mxu0 %v19154_v6  ;;  %5043 = vmatprep.mubr.f32.mxu0 %v19696_v42 }
 0x358   : > { %11319 = vmatprep.subr.bf16.mxu0 %v19453_v54  ;;  %8048 = vmatmul.mubr.f32.gmra.mrb[14].mxu1 %v8047_v4  ;;  %v8079_v4 = vand.u32 4294901760, %v8078_v36 }
 0x359   : > { %11957 = vmatpush1.bf16.msra.mxu1 %v19697_v40  ;;  %8058 = vmatprep.mubr.f32.mxu1 %v8057_v25  ;;  %v19703_v40 = vld [vmem:[#allocation156_spill] sm:$0xff] }
 0x35a   : > { %11959 = vmatprep.subr.bf16.mxu1 %v19698_v41  ;;  %5046 = vmatmul.mubr.f32.gmra.mrb[26].mxu0 %v19699_v19  ;;  %v19704_v41 = vand.u32 4294901760, %v19625_v3 }
 0x35b   : > { %11321 = vmatpush1.bf16.msra.mxu0 %v19620_v30  ;;  %5053 = vmatprep.mubr.f32.mxu0 %v19700_v12 }
 0x35c   : > { %11323 = vmatprep.subr.bf16.mxu0 %v19622_v7  ;;  %8064 = vmatmul.mubr.f32.gmra.mrb[16].mxu1 %v8063_v26  ;;  %v19706_v26 = vld [vmem:[#allocation100_spill] sm:$0xff]  ;;  %v19719_v7 = vld [vmem:[#allocation137_spill] sm:$0xff] }
 0x35d   : > { %11961 = vmatpush1.bf16.msra.mxu1 %v19701_v23  ;;  %8074 = vmatprep.mubr.f32.mxu1 %v8073_v57  ;;  %v19707_v23 = vld [vmem:[#allocation174_spill] sm:$0xff] }
 0x35e   : > { %11963 = vmatprep.subr.bf16.mxu1 %v19702_v22  ;;  %5056 = vmatmul.mubr.f32.gmra.mrb[28].mxu0 %v19703_v40  ;;  %v19708_v22 = vld [vmem:[#allocation85_spill] sm:$0xff] }
 0x35f   : > { %11325 = vmatpush1.bf16.msra.mxu0 %v19628_v34  ;;  %5193 = vmatprep.mubr.f32.mxu0 %v19704_v41  ;;  %v19709_v34 = vld [vmem:[#allocation159_spill] sm:$0xff] }
 0x360   : > { %11327 = vmatprep.subr.bf16.mxu0 %v19629_v48  ;;  %8080 = vmatmul.mubr.f32.gmra.mrb[18].mxu1 %v8079_v4  ;;  %v7807_v3 = vmul.f32 %v19709_v34, %v19709_v34 }
 0x361   : > { %v2976_v25 = vpop.f32.mrb[10].mxu0  ;;  %11965 = vmatpush1.bf16.msra.mxu1 %v19705_v37  ;;  %8471 = vmatprep.mubr.f32.mxu1 %v16290_v46  ;;  %v19711_v37 = vld [vmem:[#allocation144_spill] sm:$0xff] }
 0x362   : > { %v12410_v36 = vadd.f32 %v19706_v26, %v2976_v25  ;;  %v2978_v57 = vpop.f32.mrb[11].mxu0  ;;  %11967 = vmatprep.subr.bf16.mxu1 %v19707_v23  ;;  %v7808_v46 = vmul.f32 %v19711_v37, %v19711_v37 }
 0x363   : > { %v12411_v31 = vadd.f32 %v19708_v22, %v2978_v57  ;;  %11329 = vmatpush1.bf16.msra.mxu0 %v19633_v58  ;;  %v19713_v57 = vld [vmem:[#allocation175_spill] sm:$0xff]  ;;  %v19715_v58 = vld [vmem:[#allocation93_spill] sm:$0xff] }
 0x364   : > { %v16536_v41 = vmul.f32 %v12410_v36, %v19709_v34  ;;  %v7817_v4 = vmul.f32 %v12410_v36, %v12410_v36  ;;  %11331 = vmatprep.subr.bf16.mxu0 %v19634_v35  ;;  %v19716_v34 = vld [vmem:[#allocation176_spill] sm:$0xff]  ;;  %v19718_v35 = vld [vmem:[#allocation101_spill] sm:$0xff] }
 0x365   : > { %v16542_v25 = vmul.f32 %v12411_v31, %v19711_v37  ;;  %v7818_v26 = vmul.f32 %v12411_v31, %v12411_v31  ;;  %v2984_v23 = vpop.f32.mrb[12].mxu0  ;;  %11969 = vmatpush1.bf16.msra.mxu1 %v19713_v57  ;;  %v7809_v37 = vmul.f32 %v19719_v7, %v19719_v7  ;;  %v19725_v57 = vld [vmem:[#allocation104_spill] sm:$0xff] }
 0x366   : > { %19710 = vst [vmem:[#allocation95_spill] sm:$0xff] %v16536_v41  ;;  %v16545_v22 = vadd.f32 %v7817_v4, %v7807_v3  ;;  %v12412_v48 = vadd.f32 %v19715_v58, %v2984_v23  ;;  %v2986_v24 = vpop.f32.mrb[13].mxu0  ;;  %11971 = vmatprep.subr.bf16.mxu1 %v19716_v34  ;;  %v19721_v58 = vld [vmem:[#allocation139_spill] sm:$0xff] }
 0x367   : > { %19712 = vst [vmem:[#allocation60_spill] sm:$0xff] %v16542_v25  ;;  %v16549_v36 = vadd.f32 %v7818_v26, %v7808_v46  ;;  %v12413_v17 = vadd.f32 %v19718_v35, %v2986_v24  ;;  %11333 = vmatpush1.bf16.msra.mxu0 %v19637_v53  ;;  %v7810_v4 = vmul.f32 %v19721_v58, %v19721_v58  ;;  %v19723_v26 = vld [vmem:[#allocation177_spill] sm:$0xff] }
 0x368   : > { %19714 = vst [vmem:[#allocation63_spill] sm:$0xff] %v16545_v22  ;;  %12720 = vrcp.f32 %v16545_v22  ;;  %v16557_v31 = vmul.f32 %v12412_v48, %v19719_v7  ;;  %v7819_v3 = vmul.f32 %v12412_v48, %v12412_v48  ;;  %11335 = vmatprep.subr.bf16.mxu0 %v19638_v61  ;;  %v19726_v48 = vld [vmem:[#allocation178_spill] sm:$0xff]  ;;  %v19728_v61 = vld [vmem:[#allocation117_spill] sm:$0xff] }
 0x369   : > { %19717 = vst [vmem:[#allocation66_spill] sm:$0xff] %v16549_v36  ;;  %12722 = vrcp.f32 %v16549_v36  ;;  %v16564_v46 = vmul.f32 %v12413_v17, %v19721_v58  ;;  %v7820_v35 = vmul.f32 %v12413_v17, %v12413_v17  ;;  %v2992_v24 = vpop.f32.mrb[14].mxu0  ;;  %11973 = vmatpush1.bf16.msra.mxu1 %v19723_v26  ;;  %v19729_v36 = vld [vmem:[#allocation187_spill] sm:$0xff] }
 0x36a   : > { %19720 = vst [vmem:[#allocation71_spill] sm:$0xff] %v16557_v31  ;;  %v16567_v23 = vadd.f32 %v7819_v3, %v7809_v37  ;;  %v12414_v7 = vadd.f32 %v19725_v57, %v2992_v24  ;;  %v2994_v34 = vpop.f32.mrb[15].mxu0  ;;  %11975 = vmatprep.subr.bf16.mxu1 %v19726_v48  ;;  %v7811_v58 = vmul.f32 %v19729_v36, %v19729_v36  ;;  %v19731_v3 = vld [vmem:[#allocation124_spill] sm:$0xff]  ;;  %v19733_v26 = vld [vmem:[#allocation179_spill] sm:$0xff] }
 0x36b   : > { %19722 = vst [vmem:[#allocation74_spill] sm:$0xff] %v16564_v46  ;;  %v16571_v22 = vadd.f32 %v7820_v35, %v7810_v4  ;;  %v12415_v53 = vadd.f32 %v19728_v61, %v2994_v34  ;;  %11337 = vmatpush1.bf16.msra.mxu0 %v19641_v5  ;;  %v7812_v24 = vmul.f32 %v19731_v3, %v19731_v3  ;;  %v19735_v34 = vld [vmem:[#allocation120_spill] sm:$0xff] }
 0x36c   : > { %19724 = vst [vmem:[#allocation79_spill] sm:$0xff] %v16567_v23  ;;  %12724 = vrcp.f32 %v16567_v23  ;;  %v16579_v17 = vmul.f32 %v12414_v7, %v19729_v36  ;;  %v7821_v37 = vmul.f32 %v12414_v7, %v12414_v7  ;;  %11339 = vmatprep.subr.bf16.mxu0 %v19642_v59  ;;  %v19736_v7 = vld [vmem:[#allocation180_spill] sm:$0xff]  ;;  %v19737_v23 = vld [vmem:[#allocation65_spill] sm:$0xff] }
 0x36d   : > { %19727 = vst [vmem:[#allocation82_spill] sm:$0xff] %v16571_v22  ;;  %12726 = vrcp.f32 %v16571_v22  ;;  %v16586_v61 = vmul.f32 %v12415_v53, %v19731_v3  ;;  %v7822_v4 = vmul.f32 %v12415_v53, %v12415_v53  ;;  %v3000_v35 = vpop.f32.mrb[16].mxu0  ;;  %11977 = vmatpush1.bf16.msra.mxu1 %v19733_v26  ;;  %v7813_v59 = vmul.f32 %v19737_v23, %v19737_v23  ;;  %v19739_v22 = vld [vmem:[#allocation125_spill] sm:$0xff]  ;;  %v19740_v53 = vld [vmem:[#allocation68_spill] sm:$0xff] }
 0x36e   : > { %19730 = vst [vmem:[#allocation162_spill] sm:$0xff] %v16579_v17  ;;  %v16589_v57 = vadd.f32 %v7821_v37, %v7811_v58  ;;  %v12416_v36 = vadd.f32 %v19735_v34, %v3000_v35  ;;  %v3002_v48 = vpop.f32.mrb[17].mxu0  ;;  %11979 = vmatprep.subr.bf16.mxu1 %v19736_v7  ;;  %v7814_v3 = vmul.f32 %v19740_v53, %v19740_v53  ;;  %v9469_v35 = vmul.f32 2.0, %v16536_v41  ;;  %v19743_v26 = vld [vmem:[#allocation181_spill] sm:$0xff] }
 0x36f   : > { %19732 = vst [vmem:[#allocation163_spill] sm:$0xff] %v16586_v61  ;;  %v16595_v5 = vadd.f32 %v7822_v4, %v7812_v24  ;;  %v12417_v30 = vadd.f32 %v19739_v22, %v3002_v48  ;;  %11341 = vmatpush1.bf16.msra.mxu0 %v19646_v55  ;;  %v19744_v48 = vld [vmem:[#allocation191_spill] sm:$0xff]  ;;  %v19747_v55 = vld [vmem:[#allocation182_spill] sm:$0xff] }
 0x370   : > { %19734 = vst [vmem:[#allocation164_spill] sm:$0xff] %v16589_v57  ;;  %12728 = vrcp.f32 %v16589_v57  ;;  %v16603_v58 = vmul.f32 %v12416_v36, %v19737_v23  ;;  %v7823_v37 = vmul.f32 %v12416_v36, %v12416_v36  ;;  %11343 = vmatprep.subr.bf16.mxu0 %v19647_v51  ;;  %v7815_v7 = vmul.f32 %v19744_v48, %v19744_v48  ;;  %v19746_v57 = vld [vmem:[#allocation148_spill] sm:$0xff] }
 0x371   : > { %19738 = vst [vmem:[#allocation165_spill] sm:$0xff] %v16595_v5  ;;  %12730 = vrcp.f32 %v16595_v5  ;;  %v16609_v24 = vmul.f32 %v12417_v30, %v19740_v53  ;;  %v7824_v22 = vmul.f32 %v12417_v30, %v12417_v30  ;;  %v3008_v4 = vpop.f32.mrb[18].mxu0  ;;  %11981 = vmatpush1.bf16.msra.mxu1 %v19743_v26  ;;  %v9470_v23 = vmul.f32 2.0, %v16542_v25  ;;  %v19748_v53 = vld [vmem:[#allocation194_spill] sm:$0xff]  ;;  %v19750_v26 = vld [vmem:[#allocation149_spill] sm:$0xff]  ;;  %v19851_v25 = vld [vmem:[#allocation135_spill] sm:$0xff] }
 0x372   : > { %19741 = vst [vmem:[#allocation143_spill] sm:$0xff] %v16603_v58  ;;  %v12721_v34 = vpop.eup %12720  ;;  %v16615_v36 = vadd.f32 %v7823_v37, %v7813_v59  ;;  %v12418_v51 = vadd.f32 %v19746_v57, %v3008_v4  ;;  %v3010_v41 = vpop.f32.mrb[19].mxu0  ;;  %11983 = vmatprep.subr.bf16.mxu1 %v19747_v55  ;;  %v7816_v30 = vmul.f32 %v19748_v53, %v19748_v53  ;;  %v9471_v37 = vmul.f32 2.0, %v16557_v31  ;;  %v19848_v31 = vld [vmem:[#allocation204_spill] sm:$0xff] }
 0x373   : > { %19742 = vst [vmem:[#allocation140_spill] sm:$0xff] %v16609_v24  ;;  %v12723_v5 = vpop.eup %12722  ;;  %v16621_v54 = vadd.f32 %v7824_v22, %v7814_v3  ;;  %v12419_v6 = vadd.f32 %v19750_v26, %v3010_v41  ;;  %11345 = vmatpush1.bf16.msra.mxu0 %v19589_v33  ;;  %v16625_v29 = vmul.f32 %v12721_v34, %v9469_v35  ;;  %v19755_v35 = vld [vmem:[#allocation183_spill] sm:$0xff]  ;;  %v9472_v4 = vmul.f32 2.0, %v16564_v46  ;;  %v19847_v46 = vld [vmem:[#allocation126_spill] sm:$0xff] }
 0x374   : > { %19745 = vst [vmem:[#allocation105_spill] sm:$0xff] %v16615_v36  ;;  %12732 = vrcp.f32 %v16615_v36  ;;  %v16629_v59 = vmul.f32 %v12418_v51, %v19744_v48  ;;  %v7825_v57 = vmul.f32 %v12418_v51, %v12418_v51  ;;  %11347 = vmatprep.subr.bf16.mxu0 %v19590_v44  ;;  %v16632_v55 = vmul.f32 %v12723_v5, %v9470_v23  ;;  %v19823_v36 = vld [vmem:[#allocation78_spill] sm:$0xff] }
 0x375   : > { %19749 = vst [vmem:[#allocation145_spill] sm:$0xff] %v16621_v54  ;;  %19751 = vst [vmem:[#allocation184_spill] sm:$0xff] %v16625_v29  ;;  %12734 = vrcp.f32 %v16621_v54  ;;  %v16637_v41 = vmul.f32 %v12419_v6, %v19748_v53  ;;  %v7826_v3 = vmul.f32 %v12419_v6, %v12419_v6  ;;  %11985 = vmatpush1.bf16.msra.mxu1 %v19755_v35  ;;  %v9473_v23 = vmul.f32 2.0, %v16579_v17  ;;  %v19763_v35 = vld [vmem:[#allocation103_spill] sm:$0xff]  ;;  %v19819_v54 = vld [vmem:[#allocation70_spill] sm:$0xff] }
 0x376   : > { %19752 = vst [vmem:[#allocation77_spill] sm:$0xff] %v16629_v59  ;;  %19753 = vst [vmem:[#allocation80_spill] sm:$0xff] %v16632_v55  ;;  %v12725_v22 = vpop.eup %12724  ;;  %v16641_v34 = vadd.f32 %v7825_v57, %v7815_v7  ;;  %11987 = vmatprep.subr.bf16.mxu1 %v19588_v50  ;;  %v9474_v7 = vmul.f32 2.0, %v16586_v61  ;;  %v9475_v57 = vmul.f32 2.0, %v16603_v58  ;;  %v19831_v55 = vld [vmem:[#allocation94_spill] sm:$0xff]  ;;  %v19832_v29 = vld [vmem:[#allocation52_spill] sm:$0xff] }
 0x377   : > { %19754 = vst [vmem:[#allocation185_spill] sm:$0xff] %v16637_v41  ;;  %v12727_v51 = vpop.eup %12726  ;;  %v16644_v5 = vadd.f32 %v7826_v3, %v7816_v30  ;;  %11349 = vmatpush1.bf16.msra.mxu0 %v19178_v8  ;;  %v16647_v48 = vmul.f32 %v12725_v22, %v9471_v37  ;;  %v19762_v37 = vld [vmem:[#allocation98_spill] sm:$0xff]  ;;  %v19840_v58 = vld [vmem:[#allocation200_spill] sm:$0xff] }
 0x378   : > { %19756 = vst [vmem:[#allocation97_spill] sm:$0xff] %v16641_v34  ;;  %12736 = vrcp.f32 %v16641_v34  ;;  %11351 = vmatprep.subr.bf16.mxu0 %v19593_v11  ;;  %v16651_v6 = vmul.f32 %v12727_v51, %v9472_v4  ;;  %v9477_v51 = vmul.f32 2.0, %v16629_v59  ;;  %v19814_v34 = vld [vmem:[#allocation59_spill] sm:$0xff]  ;;  %v19836_v59 = vld [vmem:[#allocation197_spill] sm:$0xff]  ;;  %v19843_v61 = vld [vmem:[#allocation118_spill] sm:$0xff] }
 0x379   : > { %19757 = vst [vmem:[#allocation88_spill] sm:$0xff] %v16644_v5  ;;  %19758 = vst [vmem:[#allocation96_spill] sm:$0xff] %v16647_v48  ;;  %12738 = vrcp.f32 %v16644_v5  ;;  %11989 = vmatpush1.bf16.msra.mxu1 %v19591_v28  ;;  %v9476_v28 = vmul.f32 2.0, %v16609_v24  ;;  %v19813_v5 = vld [vmem:[#allocation36_spill] sm:$0xff]  ;;  %v19828_v48 = vld [vmem:[#allocation50_spill] sm:$0xff] }
 0x37a   : > { %19759 = vst [vmem:[#allocation119_spill] sm:$0xff] %v16651_v6  ;;  %v12729_v50 = vpop.eup %12728  ;;  %11991 = vmatprep.subr.bf16.mxu1 %v19592_v21  ;;  %v19827_v6 = vld [vmem:[#allocation86_spill] sm:$0xff] }
 0x37b   : > { %v12731_v53 = vpop.eup %12730  ;;  %11353 = vmatpush1.bf16.msra.mxu0 %v19180_v13  ;;  %v16659_v30 = vmul.f32 %v12729_v50, %v9473_v23  ;;  %v19766_v23 = vld [vmem:[#allocation129_spill] sm:$0xff]  ;;  %v19839_v24 = vld [vmem:[#allocation110_spill] sm:$0xff] }
 0x37c   : > { %11355 = vmatprep.subr.bf16.mxu0 %v19596_v10  ;;  %v16662_v26 = vmul.f32 %v12731_v53, %v9474_v7  ;;  %v9478_v7 = vmul.f32 2.0, %v16637_v41  ;;  %v19767_v53 = vld [vmem:[#allocation134_spill] sm:$0xff] }
 0x37d   : > { %19760 = vst [vmem:[#allocation87_spill] sm:$0xff] %v16659_v30  ;;  %11993 = vmatpush1.bf16.msra.mxu1 %v19762_v37  ;;  %v19824_v30 = vld [vmem:[#allocation47_spill] sm:$0xff]  ;;  %v19835_v41 = vld [vmem:[#allocation102_spill] sm:$0xff] }
 0x37e   : > { %19761 = vst [vmem:[#allocation192_spill] sm:$0xff] %v16662_v26  ;;  %v12733_v3 = vpop.eup %12732  ;;  %11995 = vmatprep.subr.bf16.mxu1 %v19763_v35  ;;  %v19820_v26 = vld [vmem:[#allocation42_spill] sm:$0xff] }
 0x37f   : > { %v12735_v22 = vpop.eup %12734  ;;  %11357 = vmatpush1.bf16.msra.mxu0 %v19182_v60  ;;  %v16669_v21 = vmul.f32 %v12733_v3, %v9475_v57  ;;  %v19770_v3 = vld [vmem:[#allocation108_spill] sm:$0xff]  ;;  %v19844_v17 = vld [vmem:[#allocation202_spill] sm:$0xff] }
 0x380   : > { %11359 = vmatprep.subr.bf16.mxu0 %v19183_v20  ;;  %v16672_v4 = vmul.f32 %v12735_v22, %v9476_v28  ;;  %v19771_v28 = vld [vmem:[#allocation111_spill] sm:$0xff]  ;;  %v19772_v22 = vld [vmem:[#allocation186_spill] sm:$0xff] }
 0x381   : > { %19764 = vst [vmem:[#allocation89_spill] sm:$0xff] %v16669_v21  ;;  %11997 = vmatpush1.bf16.msra.mxu1 %v19766_v23  ;;  %v19773_v23 = vld [vmem:[#allocation189_spill] sm:$0xff] }
 0x382   : > { %19765 = vst [vmem:[#allocation157_spill] sm:$0xff] %v16672_v4  ;;  %v12737_v50 = vpop.eup %12736  ;;  %11999 = vmatprep.subr.bf16.mxu1 %v19767_v53  ;;  %v19777_v53 = vld [vmem:[#allocation12_spill] sm:$0xff]  ;;  %v19815_v4 = vld [vmem:[#allocation62_spill] sm:$0xff]  ;;  %v19817_v21 = vld [vmem:[#allocation41_spill] sm:$0xff] }
 0x383   : > { %v12739_v37 = vpop.eup %12738  ;;  %11361 = vmatpush1.bf16.msra.mxu0 %v19429_v63  ;;  %v16679_v35 = vmul.f32 %v12737_v50, %v9477_v51  ;;  %v19774_v51 = vld [vmem:[#allocation6_spill] sm:$0xff]  ;;  %v19775_v50 = vld [vmem:[#allocation7_spill] sm:$0xff] }
 0x384   : > { %11363 = vmatprep.subr.bf16.mxu0 %v19430_v43  ;;  %v16682_v57 = vmul.f32 %v12739_v37, %v9478_v7  ;;  %v19776_v7 = vand.u32 4294901760, %v19683_v45  ;;  %v19778_v37 = vld [vmem:[#allocation8_spill] sm:$0xff]  ;;  %v19783_v45 = vand.u32 4294901760, %v19691_v32  ;;  %v19790_v32 = vld [vmem:[#allocation18_spill] sm:$0xff] }
 0x385   : > { %19768 = vst [vmem:[#allocation55_spill] sm:$0xff] %v16679_v35  ;;  %12001 = vmatpush1.bf16.msra.mxu1 %v19770_v3  ;;  %v19779_v3 = vand.u32 4294901760, %v19685_v47  ;;  %v19786_v47 = vld [vmem:[#allocation17_spill] sm:$0xff]  ;;  %v19812_v35 = vld [vmem:[#allocation34_spill] sm:$0xff] }
 0x386   : > { %19769 = vst [vmem:[#allocation132_spill] sm:$0xff] %v16682_v57  ;;  %12003 = vmatprep.subr.bf16.mxu1 %v19771_v28  ;;  %v19780_v28 = vld [vmem:[#allocation198_spill] sm:$0xff]  ;;  %v19808_v57 = vld [vmem:[#allocation31_spill] sm:$0xff] }
 0x387   : > { %11365 = vmatpush1.bf16.msra.mxu0 %v19186_v39 }
 0x388   : > { %11367 = vmatprep.subr.bf16.mxu0 %v19187_v49 }
 0x389   : > { %12005 = vmatpush1.bf16.msra.mxu1 %v19772_v22  ;;  %v19781_v22 = vld [vmem:[#allocation13_spill] sm:$0xff] }
 0x38a   : > { %12007 = vmatprep.subr.bf16.mxu1 %v19773_v23  ;;  %v19782_v23 = vld [vmem:[#allocation15_spill] sm:$0xff] }
 0x38b   : > { %11369 = vmatpush1.bf16.msra.mxu0 %v19188_v27 }
 0x38c   : > { %11371 = vmatprep.subr.bf16.mxu0 %v19774_v51 }
 0x38d   : > { %12009 = vmatpush1.bf16.msra.mxu1 %v19775_v50  ;;  %v19784_v50 = vld [vmem:[#allocation205_spill] sm:$0xff] }
 0x38e   : > { %5197 = vmatmul.mubr.f32.vlgmr.msra.gmra.mrb[20].mxu0 %v19776_v7  ;;  %12011 = vmatprep.subr.bf16.mxu1 %v19777_v53  ;;  %v19785_v7 = vand.u32 4294901760, %v19692_v38  ;;  %v19787_v53 = vld [vmem:[#allocation19_spill] sm:$0xff]  ;;  %v19792_v38 = vld [vmem:[#allocation20_spill] sm:$0xff] }
 0x38f   : > { %11373 = vmatpush1.bf16.msra.mxu0 %v19778_v37  ;;  %5205 = vmatprep.mubr.f32.mxu0 %v19779_v3  ;;  %v19788_v3 = vld [vmem:[#allocation22_spill] sm:$0xff] }
 0x390   : > { %8473 = vmatmul.mubr.f32.vlgmr.msra.gmra.mrb[10].mxu1 %v16385_v2  ;;  %11375 = vmatprep.subr.bf16.mxu0 %v19780_v28  ;;  %v19867_v2 = vld [vmem:[#allocation160_spill] sm:$0xff] }
 0x391   : > { %12013 = vmatpush1.bf16.msra.mxu1 %v19781_v22  ;;  %8479 = vmatprep.mubr.f32.mxu1 %v16389_v15  ;;  %v19789_v22 = vand.u32 4294901760, %v19695_v1  ;;  %v19796_v1 = vld [vmem:[#allocation23_spill] sm:$0xff]  ;;  %v19865_v15 = vld [vmem:[#allocation24_spill] sm:$0xff] }
 0x392   : > { %12015 = vmatprep.subr.bf16.mxu1 %v19782_v23  ;;  %5209 = vmatmul.mubr.f32.gmra.mrb[22].mxu0 %v19783_v45  ;;  %v19791_v23 = vand.u32 4294901760, %v19696_v42  ;;  %v19793_v45 = vld [vmem:[#allocation27_spill] sm:$0xff]  ;;  %v19798_v42 = vld [vmem:[#allocation25_spill] sm:$0xff] }
 0x393   : > { %11377 = vmatpush1.bf16.msra.mxu0 %v19784_v50  ;;  %5217 = vmatprep.mubr.f32.mxu0 %v19785_v7  ;;  %v19794_v7 = vld [vmem:[#allocation30_spill] sm:$0xff] }
 0x394   : > { %11379 = vmatprep.subr.bf16.mxu0 %v19786_v47  ;;  %8481 = vmatmul.mubr.f32.gmra.mrb[12].mxu1 %v16400_v0  ;;  %v19863_v0 = vld [vmem:[#allocation21_spill] sm:$0xff] }
 0x395   : > { %12017 = vmatpush1.bf16.msra.mxu1 %v19787_v53  ;;  %8487 = vmatprep.mubr.f32.mxu1 %v16409_v18  ;;  %v19795_v53 = vand.u32 4294901760, %v19699_v19  ;;  %v19802_v19 = vld [vmem:[#allocation26_spill] sm:$0xff]  ;;  %v19862_v18 = vld [vmem:[#allocation113_spill] sm:$0xff] }
 0x396   : > { %12019 = vmatprep.subr.bf16.mxu1 %v19788_v3  ;;  %5221 = vmatmul.mubr.f32.gmra.mrb[24].mxu0 %v19789_v22  ;;  %v19797_v3 = vand.u32 4294901760, %v19700_v12  ;;  %v19799_v22 = vld [vmem:[#allocation35_spill] sm:$0xff] }
 0x397   : > { %11381 = vmatpush1.bf16.msra.mxu0 %v19790_v32  ;;  %5229 = vmatprep.mubr.f32.mxu0 %v19791_v23  ;;  %v19800_v23 = vld [vmem:[#allocation38_spill] sm:$0xff]  ;;  %v19805_v12 = vld [vmem:[#allocation43_spill] sm:$0xff] }
 0x398   : > { %11383 = vmatprep.subr.bf16.mxu0 %v19792_v38  ;;  %8489 = vmatmul.mubr.f32.gmra.mrb[14].mxu1 %v16420_v14  ;;  %v19861_v14 = vld [vmem:[#allocation81_spill] sm:$0xff] }
 0x399   : > { %12021 = vmatpush1.bf16.msra.mxu1 %v19793_v45  ;;  %8495 = vmatprep.mubr.f32.mxu1 %v16428_v9  ;;  %v19801_v45 = vand.u32 4294901760, %v19703_v40  ;;  %v19810_v40 = vld [vmem:[#allocation51_spill] sm:$0xff]  ;;  %v19860_v9 = vld [vmem:[#allocation116_spill] sm:$0xff] }
 0x39a   : > { %12023 = vmatprep.subr.bf16.mxu1 %v19794_v7  ;;  %5233 = vmatmul.mubr.f32.gmra.mrb[26].mxu0 %v19795_v53  ;;  %v19803_v7 = vld [vmem:[#allocation188_spill] sm:$0xff] }
 0x39b   : > { %11385 = vmatpush1.bf16.msra.mxu0 %v19796_v1  ;;  %5241 = vmatprep.mubr.f32.mxu0 %v19797_v3  ;;  %v19804_v53 = vld [vmem:[#allocation28_spill] sm:$0xff] }
 0x39c   : > { %11387 = vmatprep.subr.bf16.mxu0 %v19798_v42  ;;  %8497 = vmatmul.mubr.f32.gmra.mrb[16].mxu1 %v16442_v56  ;;  %v19806_v3 = vld [vmem:[#allocation76_spill] sm:$0xff] }
 0x39d   : > { %12025 = vmatpush1.bf16.msra.mxu1 %v19799_v22  ;;  %8503 = vmatprep.mubr.f32.mxu1 %v16453_v62  ;;  %v19807_v22 = vld [vmem:[#allocation46_spill] sm:$0xff]  ;;  %v19855_v62 = vld [vmem:[#allocation11_spill] sm:$0xff]  ;;  %v19859_v56 = vld [vmem:[#allocation16_spill] sm:$0xff] }
 0x39e   : > { %12027 = vmatprep.subr.bf16.mxu1 %v19800_v23  ;;  %5245 = vmatmul.mubr.f32.gmra.mrb[28].mxu0 %v19801_v45  ;;  %v19809_v23 = vld [vmem:[#allocation33_spill] sm:$0xff]  ;;  %v19811_v45 = vld [vmem:[#allocation54_spill] sm:$0xff] }
 0x39f   : > { %11389 = vmatpush1.bf16.msra.mxu0 %v19802_v19  ;;  %5508 = vmatprep.mubr.f32.mxu0 %v19803_v7 }
 0x3a0   : > { %11391 = vmatprep.subr.bf16.mxu0 %v19804_v53  ;;  %8505 = vmatmul.mubr.f32.gmra.mrb[18].mxu1 %v16466_v52  ;;  %v19854_v52 = vld [vmem:[#allocation158_spill] sm:$0xff] }
 0x3a1   : > { %12029 = vmatpush1.bf16.msra.mxu1 %v19805_v12  ;;  %8705 = vmatprep.mubr.f32.mxu1 %v19806_v3  ;;  %v19816_v12 = vld [vmem:[#allocation39_spill] sm:$0xff] }
 0x3a2   : > { %12031 = vmatprep.subr.bf16.mxu1 %v19807_v22  ;;  %v19818_v22 = vld [vmem:[#allocation67_spill] sm:$0xff] }
 0x3a3   : > { %11393 = vmatpush1.bf16.msra.mxu0 %v19808_v57 }
 0x3a4   : > { %11395 = vmatprep.subr.bf16.mxu0 %v19809_v23 }
 0x3a5   : > { %12033 = vmatpush1.bf16.msra.mxu1 %v19810_v40  ;;  %v19821_v40 = vld [vmem:[#allocation44_spill] sm:$0xff] }
 0x3a6   : > { %12035 = vmatprep.subr.bf16.mxu1 %v19811_v45  ;;  %v19822_v45 = vld [vmem:[#allocation75_spill] sm:$0xff] }
 0x3a7   : > { %11397 = vmatpush1.bf16.msra.mxu0 %v19812_v35 }
 0x3a8   : > { %11399 = vmatprep.subr.bf16.mxu0 %v19813_v5 }
 0x3a9   : > { %12037 = vmatpush1.bf16.msra.mxu1 %v19814_v34  ;;  %v19825_v34 = vld [vmem:[#allocation49_spill] sm:$0xff] }
 0x3aa   : > { %12039 = vmatprep.subr.bf16.mxu1 %v19815_v4  ;;  %v19826_v4 = vld [vmem:[#allocation83_spill] sm:$0xff] }
 0x3ab   : > { %11401 = vmatpush1.bf16.msra.mxu0 %v19816_v12 }
 0x3ac   : > { %11403 = vmatprep.subr.bf16.mxu0 %v19817_v21 }
 0x3ad   : > { %12041 = vmatpush1.bf16.msra.mxu1 %v19818_v22  ;;  %v19829_v22 = vld [vmem:[#allocation136_spill] sm:$0xff] }
 0x3ae   : > { %12043 = vmatprep.subr.bf16.mxu1 %v19819_v54  ;;  %v19830_v54 = vld [vmem:[#allocation91_spill] sm:$0xff] }
 0x3af   : > { %11405 = vmatpush1.bf16.msra.mxu0 %v19820_v26 }
 0x3b0   : > { %11407 = vmatprep.subr.bf16.mxu0 %v19821_v40 }
 0x3b1   : > { %12045 = vmatpush1.bf16.msra.mxu1 %v19822_v45  ;;  %v19833_v45 = vld [vmem:[#allocation10_spill] sm:$0xff] }
 0x3b2   : > { %12047 = vmatprep.subr.bf16.mxu1 %v19823_v36  ;;  %v19834_v36 = vld [vmem:[#allocation99_spill] sm:$0xff] }
 0x3b3   : > { %11409 = vmatpush1.bf16.msra.mxu0 %v19824_v30 }
 0x3b4   : > { %11411 = vmatprep.subr.bf16.mxu0 %v19825_v34 }
 0x3b5   : > { %12049 = vmatpush1.bf16.msra.mxu1 %v19826_v4  ;;  %v19837_v4 = vld [vmem:[#allocation199_spill] sm:$0xff] }
 0x3b6   : > { %12051 = vmatprep.subr.bf16.mxu1 %v19827_v6  ;;  %v19838_v6 = vld [vmem:[#allocation107_spill] sm:$0xff] }
 0x3b7   : > { %11413 = vmatpush1.bf16.msra.mxu0 %v19828_v48 }
 0x3b8   : > { %11415 = vmatprep.subr.bf16.mxu0 %v19829_v22 }
 0x3b9   : > { %12053 = vmatpush1.bf16.msra.mxu1 %v19830_v54  ;;  %v19841_v54 = vld [vmem:[#allocation201_spill] sm:$0xff] }
 0x3ba   : > { %12055 = vmatprep.subr.bf16.mxu1 %v19831_v55  ;;  %v19842_v55 = vld [vmem:[#allocation115_spill] sm:$0xff] }
 0x3bb   : > { %11417 = vmatpush1.bf16.msra.mxu0 %v19832_v29 }
 0x3bc   : > { %11419 = vmatprep.subr.bf16.mxu0 %v19833_v45 }
 0x3bd   : > { %12057 = vmatpush1.bf16.msra.mxu1 %v19834_v36  ;;  %v19845_v36 = vld [vmem:[#allocation203_spill] sm:$0xff] }
 0x3be   : > { %12059 = vmatprep.subr.bf16.mxu1 %v19835_v41  ;;  %v19846_v41 = vld [vmem:[#allocation123_spill] sm:$0xff] }
 0x3bf   : > { %11421 = vmatpush1.bf16.msra.mxu0 %v19836_v59  ;;  %v19882_v59 = vld [vmem:[#allocation56_spill] sm:$0xff] }
 0x3c0   : > { %11423 = vmatprep.subr.bf16.mxu0 %v19837_v4  ;;  %v19878_v4 = vand.u32 4294901760, %v19806_v3  ;;  %v19883_v3 = vld [vmem:[#allocation61_spill] sm:$0xff] }
 0x3c1   : > { %12061 = vmatpush1.bf16.msra.mxu1 %v19838_v6  ;;  %v19849_v6 = vld [vmem:[#allocation5_spill] sm:$0xff] }
 0x3c2   : > { %12063 = vmatprep.subr.bf16.mxu1 %v19839_v24  ;;  %v19850_v24 = vld [vmem:[#allocation128_spill] sm:$0xff] }
 0x3c3   : > { %11425 = vmatpush1.bf16.msra.mxu0 %v19840_v58  ;;  %v19877_v58 = vld [vmem:[#allocation161_spill] sm:$0xff] }
 0x3c4   : > { %11427 = vmatprep.subr.bf16.mxu0 %v19841_v54  ;;  %v19875_v54 = vld [vmem:[#allocation37_spill] sm:$0xff] }
 0x3c5   : > { %12065 = vmatpush1.bf16.msra.mxu1 %v19842_v55  ;;  %v19852_v55 = vld [vmem:[#allocation9_spill] sm:$0xff] }
 0x3c6   : > { %12067 = vmatprep.subr.bf16.mxu1 %v19843_v61  ;;  %v19853_v61 = vld [vmem:[#allocation141_spill] sm:$0xff] }
 0x3c7   : > { %11429 = vmatpush1.bf16.msra.mxu0 %v19844_v17  ;;  %v19873_v17 = vld [vmem:[#allocation57_spill] sm:$0xff] }
 0x3c8   : > { %11431 = vmatprep.subr.bf16.mxu0 %v19845_v36  ;;  %v19872_v36 = vld [vmem:[#allocation195_spill] sm:$0xff] }
 0x3c9   : > { %12069 = vmatpush1.bf16.msra.mxu1 %v19846_v41  ;;  %v19857_v41 = vld [vmem:[#allocation147_spill] sm:$0xff] }
 0x3ca   : > { %12071 = vmatprep.subr.bf16.mxu1 %v19847_v46  ;;  %v19856_v46 = vld [vmem:[#allocation106_spill] sm:$0xff] }
 0x3cb   : > { %11433 = vmatpush1.bf16.msra.mxu0 %v19848_v31  ;;  %v19871_v31 = vld [vmem:[#allocation32_spill] sm:$0xff] }
 0x3cc   : > { %11435 = vmatprep.subr.bf16.mxu0 %v19849_v6 }
 0x3cd   : > { %12073 = vmatpush1.bf16.msra.mxu1 %v19850_v24  ;;  %v19858_v24 = vld [vmem:[#allocation138_spill] sm:$0xff] }
 0x3ce   : > { %5510 = vmatmul.mubr.f32.vlgmr.msra.gmra.mrb[20].mxu0 %v19851_v25  ;;  %12075 = vmatprep.subr.bf16.mxu1 %v19849_v6  ;;  %v19869_v6 = vld [vmem:[#allocation29_spill] sm:$0xff] }
 0x3cf   : > { %11437 = vmatpush1.bf16.msra.mxu0 %v19852_v55  ;;  %5516 = vmatprep.mubr.f32.mxu0 %v19853_v61 }
 0x3d0   : > { %8708 = vmatmul.mubr.f32.vlgmr.msra.gmra.mrb[10].mxu1 %v19854_v52  ;;  %11439 = vmatprep.subr.bf16.mxu0 %v19855_v62 }
 0x3d1   : > { %12077 = vmatpush1.bf16.msra.mxu1 %v19852_v55  ;;  %8715 = vmatprep.mubr.f32.mxu1 %v19856_v46  ;;  %v19866_v55 = vld [vmem:[#allocation127_spill] sm:$0xff] }
 0x3d2   : > { %12079 = vmatprep.subr.bf16.mxu1 %v19855_v62  ;;  %5518 = vmatmul.mubr.f32.gmra.mrb[22].mxu0 %v19857_v41  ;;  %v19864_v62 = vld [vmem:[#allocation121_spill] sm:$0xff] }
 0x3d3   : > { %11441 = vmatpush1.bf16.msra.mxu0 %v19150_v16  ;;  %5524 = vmatprep.mubr.f32.mxu0 %v19858_v24 }
 0x3d4   : > { %11443 = vmatprep.subr.bf16.mxu0 %v19859_v56  ;;  %8718 = vmatmul.mubr.f32.gmra.mrb[12].mxu1 %v19860_v9 }
 0x3d5   : > { %12081 = vmatpush1.bf16.msra.mxu1 %v19150_v16  ;;  %8725 = vmatprep.mubr.f32.mxu1 %v19861_v14  ;;  %v19868_v16 = vld [vmem:[#allocation58_spill] sm:$0xff] }
 0x3d6   : > { %12083 = vmatprep.subr.bf16.mxu1 %v19859_v56  ;;  %5526 = vmatmul.mubr.f32.gmra.mrb[24].mxu0 %v19862_v18  ;;  %v19870_v56 = vld [vmem:[#allocation152_spill] sm:$0xff] }
 0x3d7   : > { %11445 = vmatpush1.bf16.msra.mxu0 %v19863_v0  ;;  %5532 = vmatprep.mubr.f32.mxu0 %v19864_v62 }
 0x3d8   : > { %11447 = vmatprep.subr.bf16.mxu0 %v19865_v15  ;;  %8728 = vmatmul.mubr.f32.gmra.mrb[14].mxu1 %v19866_v55 }
 0x3d9   : > { %12085 = vmatpush1.bf16.msra.mxu1 %v19863_v0  ;;  %8735 = vmatprep.mubr.f32.mxu1 %v19867_v2  ;;  %v19874_v0 = vld [vmem:[#allocation155_spill] sm:$0xff] }
 0x3da   : > { %12087 = vmatprep.subr.bf16.mxu1 %v19865_v15  ;;  %5534 = vmatmul.mubr.f32.gmra.mrb[26].mxu0 %v19868_v16  ;;  %v19876_v15 = vld [vmem:[#allocation40_spill] sm:$0xff] }
 0x3db   : > { %11449 = vmatpush1.bf16.msra.mxu0 %v19869_v6  ;;  %5540 = vmatprep.mubr.f32.mxu0 %v19870_v56 }
 0x3dc   : > { %11451 = vmatprep.subr.bf16.mxu0 %v19871_v31  ;;  %8738 = vmatmul.mubr.f32.gmra.mrb[16].mxu1 %v19872_v36 }
 0x3dd   : > { %12089 = vmatpush1.bf16.msra.mxu1 %v19869_v6  ;;  %8745 = vmatprep.mubr.f32.mxu1 %v19873_v17  ;;  %v19879_v6 = vld [vmem:[#allocation45_spill] sm:$0xff] }
 0x3de   : > { %12091 = vmatprep.subr.bf16.mxu1 %v19871_v31  ;;  %5542 = vmatmul.mubr.f32.gmra.mrb[28].mxu0 %v19874_v0  ;;  %v19880_v31 = vld [vmem:[#allocation48_spill] sm:$0xff] }
 0x3df   : > { %11453 = vmatpush1.bf16.msra.mxu0 %v19875_v54  ;;  %5677 = vmatprep.mubr.f32.mxu0 %v19803_v7  ;;  %v19881_v7 = vld [vmem:[#allocation53_spill] sm:$0xff] }
 0x3e0   : > { %11455 = vmatprep.subr.bf16.mxu0 %v19876_v15  ;;  %8748 = vmatmul.mubr.f32.gmra.mrb[18].mxu1 %v19877_v58 }
 0x3e1   : > { %12093 = vmatpush1.bf16.msra.mxu1 %v19875_v54  ;;  %8885 = vmatprep.mubr.f32.mxu1 %v19878_v4  ;;  %v19884_v4 = vld [vmem:[#allocation64_spill] sm:$0xff] }
 0x3e2   : > { %12095 = vmatprep.subr.bf16.mxu1 %v19876_v15  ;;  %v19885_v15 = vld [vmem:[#allocation69_spill] sm:$0xff] }
 0x3e3   : > { %11457 = vmatpush1.bf16.msra.mxu0 %v19879_v6 }
 0x3e4   : > { %11459 = vmatprep.subr.bf16.mxu0 %v19880_v31 }
 0x3e5   : > { %12097 = vmatpush1.bf16.msra.mxu1 %v19879_v6  ;;  %v19886_v6 = vld [vmem:[#allocation72_spill] sm:$0xff] }
 0x3e6   : > { %12099 = vmatprep.subr.bf16.mxu1 %v19880_v31 }
 0x3e7   : > { %11461 = vmatpush1.bf16.msra.mxu0 %v19881_v7 }
 0x3e8   : > { %11463 = vmatprep.subr.bf16.mxu0 %v19882_v59 }
 0x3e9   : > { %12101 = vmatpush1.bf16.msra.mxu1 %v19881_v7 }
 0x3ea   : > { %12103 = vmatprep.subr.bf16.mxu1 %v19882_v59 }
 0x3eb   : > { %11465 = vmatpush1.bf16.msra.mxu0 %v19883_v3 }
 0x3ec   : > { %11467 = vmatprep.subr.bf16.mxu0 %v19884_v4 }
 0x3ed   : > { %12105 = vmatpush1.bf16.msra.mxu1 %v19883_v3 }
 0x3ee   : > { %12107 = vmatprep.subr.bf16.mxu1 %v19884_v4 }
 0x3ef   : > { %11469 = vmatpush1.bf16.msra.mxu0 %v19885_v15 }
 0x3f0   : > { %11471 = vmatprep.subr.bf16.mxu0 %v19886_v6 }
 0x3f1   : > { %12109 = vmatpush1.bf16.msra.mxu1 %v19885_v15 }
 0x3f2   : > { %12111 = vmatprep.subr.bf16.mxu1 %v19886_v6 }
 0x3f3   : > { %11473 = vmatpush1.bf16.msra.mxu0 %v19589_v33 }
 0x3f4   : > { %11475 = vmatprep.subr.bf16.mxu0 %v19590_v44 }
 0x3f5   : > { %12113 = vmatpush1.bf16.msra.mxu1 %v19589_v33 }
 0x3f6   : > { %12115 = vmatprep.subr.bf16.mxu1 %v19590_v44 }
 0x3f7   : > { %11477 = vmatpush1.bf16.msra.mxu0 %v19178_v8 }
 0x3f8   : > { %11479 = vmatprep.subr.bf16.mxu0 %v19593_v11 }
 0x3f9   : > { %12117 = vmatpush1.bf16.msra.mxu1 %v19178_v8 }
 0x3fa   : > { %12119 = vmatprep.subr.bf16.mxu1 %v19593_v11 }
 0x3fb   : > { %11481 = vmatpush1.bf16.msra.mxu0 %v19180_v13 }
 0x3fc   : > { %11483 = vmatprep.subr.bf16.mxu0 %v19596_v10 }
 0x3fd   : > { %12121 = vmatpush1.bf16.msra.mxu1 %v19180_v13 }
 0x3fe   : > { %12123 = vmatprep.subr.bf16.mxu1 %v19596_v10 }
 0x3ff   : > { %11485 = vmatpush1.bf16.msra.mxu0 %v19182_v60 }
 0x400   : > { %11487 = vmatprep.subr.bf16.mxu0 %v19183_v20 }
 0x401   : > { %12125 = vmatpush1.bf16.msra.mxu1 %v19182_v60 }
 0x402   : > { %12127 = vmatprep.subr.bf16.mxu1 %v19183_v20 }
 0x403   : > { %11489 = vmatpush1.bf16.msra.mxu0 %v19429_v63 }
 0x404   : > { %11491 = vmatprep.subr.bf16.mxu0 %v19430_v43 }
 0x405   : > { %12129 = vmatpush1.bf16.msra.mxu1 %v19429_v63  ;;  %v19888_v63 = vand.u32 4294901760, %v19856_v46 }
 0x406   : > { %12131 = vmatprep.subr.bf16.mxu1 %v19430_v43  ;;  %v19887_v43 = vand.u32 4294901760, %v19854_v52  ;;  %v19901_v52 = vld [vmem:[#allocation202_spill] sm:$0xff] }
 0x407   : > { %11493 = vmatpush1.bf16.msra.mxu0 %v19186_v39 }
 0x408   : > { %11495 = vmatprep.subr.bf16.mxu0 %v19187_v49 }
 0x409   : > { %12133 = vmatpush1.bf16.msra.mxu1 %v19186_v39 }
 0x40a   : > { %12135 = vmatprep.subr.bf16.mxu1 %v19187_v49 }
 0x40b   : > { %11497 = vmatpush1.bf16.msra.mxu0 %v19188_v27 }
 0x40d   : > { %12137 = vmatpush1.bf16.msra.mxu1 %v19188_v27 }
 0x40e   : > { %5679 = vmatmul.mubr.f32.vlgmr.msra.gmra.mrb[20].mxu0 %v19851_v25  ;;  %12139 = vmatprep.subr.bf16.mxu1 %v19774_v51  ;;  %v19889_v25 = vand.u32 4294901760, %v19860_v9  ;;  %v19890_v51 = vand.u32 4294901760, %v19861_v14  ;;  %v19894_v14 = vand.u32 4294901760, %v19873_v17  ;;  %v19898_v9 = vld [vmem:[#allocation199_spill] sm:$0xff] }
 0x40f   : > { %5685 = vmatprep.mubr.f32.mxu0 %v19853_v61  ;;  %v19902_v17 = vld [vmem:[#allocation203_spill] sm:$0xff] }
 0x410   : > { %8889 = vmatmul.mubr.f32.vlgmr.msra.gmra.mrb[10].mxu1 %v19887_v43  ;;  %v19892_v43 = vand.u32 4294901760, %v19867_v2  ;;  %v19895_v2 = vand.u32 4294901760, %v19877_v58  ;;  %v19903_v58 = vld [vmem:[#allocation204_spill] sm:$0xff] }
 0x411   : > { %12141 = vmatpush1.bf16.msra.mxu1 %v19778_v37  ;;  %8897 = vmatprep.mubr.f32.mxu1 %v19888_v63  ;;  %v19891_v63 = vand.u32 4294901760, %v19866_v55  ;;  %v19912_v37 = vld [vmem:[#allocation16_spill] sm:$0xff] }
 0x412   : > { %5687 = vmatmul.mubr.f32.gmra.mrb[22].mxu0 %v19857_v41  ;;  %12143 = vmatprep.subr.bf16.mxu1 %v19780_v28  ;;  %v19913_v28 = vld [vmem:[#allocation122_spill] sm:$0xff] }
 0x413   : > { %5693 = vmatprep.mubr.f32.mxu0 %v19858_v24 }
 0x414   : > { %8901 = vmatmul.mubr.f32.gmra.mrb[12].mxu1 %v19889_v25  ;;  %v19930_v25 = vld [vmem:[#allocation162_spill] sm:$0xff] }
 0x415   : > { %12145 = vmatpush1.bf16.msra.mxu1 %v19784_v50  ;;  %8909 = vmatprep.mubr.f32.mxu1 %v19890_v51  ;;  %v19914_v50 = vld [vmem:[#allocation21_spill] sm:$0xff] }
 0x416   : > { %5695 = vmatmul.mubr.f32.gmra.mrb[24].mxu0 %v19862_v18  ;;  %12147 = vmatprep.subr.bf16.mxu1 %v19786_v47  ;;  %v19893_v18 = vand.u32 4294901760, %v19872_v36  ;;  %v19915_v47 = vld [vmem:[#allocation84_spill] sm:$0xff] }
 0x417   : > { %5701 = vmatprep.mubr.f32.mxu0 %v19864_v62  ;;  %v19899_v62 = vld [vmem:[#allocation200_spill] sm:$0xff] }
 0x418   : > { %8913 = vmatmul.mubr.f32.gmra.mrb[14].mxu1 %v19891_v63 }
 0x419   : > { %12149 = vmatpush1.bf16.msra.mxu1 %v19790_v32  ;;  %8921 = vmatprep.mubr.f32.mxu1 %v19892_v43  ;;  %v19916_v32 = vld [vmem:[#allocation24_spill] sm:$0xff]  ;;  %v19931_v43 = vld [vmem:[#allocation163_spill] sm:$0xff] }
 0x41a   : > { %5703 = vmatmul.mubr.f32.gmra.mrb[26].mxu0 %v19868_v16  ;;  %12151 = vmatprep.subr.bf16.mxu1 %v19792_v38  ;;  %v19896_v16 = vld [vmem:[#allocation73_spill] sm:$0xff] }
 0x41b   : > { %5709 = vmatprep.mubr.f32.mxu0 %v19870_v56  ;;  %v19900_v56 = vld [vmem:[#allocation201_spill] sm:$0xff] }
 0x41c   : > { %8925 = vmatmul.mubr.f32.gmra.mrb[16].mxu1 %v19893_v18  ;;  %v19917_v38 = vld [vmem:[#allocation193_spill] sm:$0xff] }
 0x41d   : > { %12153 = vmatpush1.bf16.msra.mxu1 %v19796_v1  ;;  %8933 = vmatprep.mubr.f32.mxu1 %v19894_v14  ;;  %v19918_v1 = vld [vmem:[#allocation29_spill] sm:$0xff] }
 0x41e   : > { %5711 = vmatmul.mubr.f32.gmra.mrb[28].mxu0 %v19874_v0  ;;  %12155 = vmatprep.subr.bf16.mxu1 %v19798_v42  ;;  %v19897_v0 = vld [vmem:[#allocation197_spill] sm:$0xff]  ;;  %v19919_v42 = vld [vmem:[#allocation90_spill] sm:$0xff] }
 0x420   : > { %8937 = vmatmul.mubr.f32.gmra.mrb[18].mxu1 %v19895_v2 }
 0x421   : > { %12157 = vmatpush1.bf16.msra.mxu1 %v19802_v19  ;;  %9200 = vmatprep.mubr.f32.mxu1 %v19896_v16  ;;  %v19920_v19 = vld [vmem:[#allocation32_spill] sm:$0xff] }
 0x422   : > { %12159 = vmatprep.subr.bf16.mxu1 %v19804_v53  ;;  %v19921_v53 = vld [vmem:[#allocation92_spill] sm:$0xff] }
 0x425   : > { %12161 = vmatpush1.bf16.msra.mxu1 %v19808_v57  ;;  %v19911_v57 = vld [vmem:[#allocation133_spill] sm:$0xff] }
 0x426   : > { %12163 = vmatprep.subr.bf16.mxu1 %v19809_v23  ;;  %v19922_v23 = vld [vmem:[#allocation40_spill] sm:$0xff] }
 0x429   : > { %12165 = vmatpush1.bf16.msra.mxu1 %v19812_v35  ;;  %v19910_v35 = vld [vmem:[#allocation14_spill] sm:$0xff] }
 0x42a   : > { %12167 = vmatprep.subr.bf16.mxu1 %v19813_v5  ;;  %v19904_v5 = vld [vmem:[#allocation5_spill] sm:$0xff] }
 0x42d   : > { %12169 = vmatpush1.bf16.msra.mxu1 %v19816_v12  ;;  %v19923_v12 = vld [vmem:[#allocation45_spill] sm:$0xff] }
 0x42e   : > { %12171 = vmatprep.subr.bf16.mxu1 %v19817_v21  ;;  %v19909_v21 = vld [vmem:[#allocation130_spill] sm:$0xff] }
 0x431   : > { %12173 = vmatpush1.bf16.msra.mxu1 %v19820_v26  ;;  %v19908_v26 = vld [vmem:[#allocation11_spill] sm:$0xff] }
 0x432   : > { %12175 = vmatprep.subr.bf16.mxu1 %v19821_v40 }
 0x435   : > { %12177 = vmatpush1.bf16.msra.mxu1 %v19824_v30  ;;  %v19907_v30 = vld [vmem:[#allocation150_spill] sm:$0xff] }
 0x436   : > { %12179 = vmatprep.subr.bf16.mxu1 %v19825_v34 }
 0x439   : > { %12181 = vmatpush1.bf16.msra.mxu1 %v19828_v48  ;;  %v19905_v48 = vld [vmem:[#allocation196_spill] sm:$0xff] }
 0x43a   : > { %12183 = vmatprep.subr.bf16.mxu1 %v19829_v22 }
 0x43d   : > { %12185 = vmatpush1.bf16.msra.mxu1 %v19832_v29  ;;  %v19906_v29 = vld [vmem:[#allocation9_spill] sm:$0xff] }
 0x43e   : > { %12187 = vmatprep.subr.bf16.mxu1 %v19833_v45  ;;  %v19928_v45 = vld [vmem:[#allocation71_spill] sm:$0xff] }
 0x441   : > { %12189 = vmatpush1.bf16.msra.mxu1 %v19897_v0 }
 0x442   : > { %12191 = vmatprep.subr.bf16.mxu1 %v19898_v9 }
 0x445   : > { %12193 = vmatpush1.bf16.msra.mxu1 %v19899_v62 }
 0x446   : > { %12195 = vmatprep.subr.bf16.mxu1 %v19900_v56 }
 0x449   : > { %12197 = vmatpush1.bf16.msra.mxu1 %v19901_v52  ;;  %v19932_v52 = vld [vmem:[#allocation143_spill] sm:$0xff] }
 0x44a   : > { %12199 = vmatprep.subr.bf16.mxu1 %v19902_v17 }
 0x44d   : > { %12201 = vmatpush1.bf16.msra.mxu1 %v19903_v58  ;;  %v17006_v58 = vld [vmem:[%s17681_s3] sm:$0xff] }
 0x44e   : > { %12203 = vmatprep.subr.bf16.mxu1 %v19904_v5  ;;  %v17011_v5 = vld [vmem:[%s17681_s3 + $0x8] sm:$0xff] }
 0x450   : > { %9202 = vmatmul.mubr.f32.vlgmr.msra.gmra.mrb[10].mxu1 %v19905_v48 }
 0x451   : > { %12205 = vmatpush1.bf16.msra.mxu1 %v19906_v29  ;;  %9208 = vmatprep.mubr.f32.mxu1 %v19907_v30  ;;  %v19933_v29 = vld [vmem:[#allocation140_spill] sm:$0xff] }
 0x452   : > { %12207 = vmatprep.subr.bf16.mxu1 %v19908_v26 }
 0x454   : > { %9210 = vmatmul.mubr.f32.gmra.mrb[12].mxu1 %v19909_v21 }
 0x455   : > { %12209 = vmatpush1.bf16.msra.mxu1 %v19910_v35  ;;  %9216 = vmatprep.mubr.f32.mxu1 %v19911_v57  ;;  %v9588_v35 = vand.u32 4294901760, %v17011_v5 }
 0x456   : > { %12211 = vmatprep.subr.bf16.mxu1 %v19912_v37 }
 0x458   : > { %9218 = vmatmul.mubr.f32.gmra.mrb[14].mxu1 %v19913_v28 }
 0x459   : > { %12213 = vmatpush1.bf16.msra.mxu1 %v19914_v50  ;;  %9224 = vmatprep.mubr.f32.mxu1 %v19915_v47 }
 0x45a   : > { %12215 = vmatprep.subr.bf16.mxu1 %v19916_v32 }
 0x45c   : > { %9226 = vmatmul.mubr.f32.gmra.mrb[16].mxu1 %v19917_v38 }
 0x45d   : > { %12217 = vmatpush1.bf16.msra.mxu1 %v19918_v1  ;;  %9232 = vmatprep.mubr.f32.mxu1 %v19919_v42 }
 0x45e   : > { %12219 = vmatprep.subr.bf16.mxu1 %v19920_v19 }
 0x460   : > { %9234 = vmatmul.mubr.f32.gmra.mrb[18].mxu1 %v19921_v53 }
 0x461   : > { %12221 = vmatpush1.bf16.msra.mxu1 %v19875_v54  ;;  %9369 = vmatprep.mubr.f32.mxu1 %v19896_v16 }
 0x462   : > { %12223 = vmatprep.subr.bf16.mxu1 %v19922_v23  ;;  %v17041_v23 = vld [vmem:[%s17681_s3 + $0x18] sm:$0xff] }
 0x465   : > { %12225 = vmatpush1.bf16.msra.mxu1 %v19923_v12 }
 0x466   : > { %12227 = vmatprep.subr.bf16.mxu1 %v19880_v31  ;;  %v19924_v31 = vld [vmem:[#allocation109_spill] sm:$0xff] }
 0x469   : > { %12229 = vmatpush1.bf16.msra.mxu1 %v19881_v7 }
 0x46a   : > { %12231 = vmatprep.subr.bf16.mxu1 %v19882_v59 }
 0x46d   : > { %12233 = vmatpush1.bf16.msra.mxu1 %v19883_v3 }
 0x46e   : > { %12235 = vmatprep.subr.bf16.mxu1 %v19884_v4 }
 0x471   : > { %12237 = vmatpush1.bf16.msra.mxu1 %v19885_v15  ;;  %v19925_v15 = vld [vmem:[#allocation112_spill] sm:$0xff] }
 0x472   : > { %12239 = vmatprep.subr.bf16.mxu1 %v19886_v6  ;;  %v19929_v6 = vld [vmem:[#allocation74_spill] sm:$0xff] }
 0x475   : > { %12241 = vmatpush1.bf16.msra.mxu1 %v19589_v33 }
 0x476   : > { %12243 = vmatprep.subr.bf16.mxu1 %v19590_v44 }
 0x479   : > { %12245 = vmatpush1.bf16.msra.mxu1 %v19178_v8 }
 0x47a   : > { %12247 = vmatprep.subr.bf16.mxu1 %v19593_v11 }
 0x47d   : > { %12249 = vmatpush1.bf16.msra.mxu1 %v19180_v13 }
 0x47e   : > { %12251 = vmatprep.subr.bf16.mxu1 %v19596_v10 }
 0x481   : > { %12253 = vmatpush1.bf16.msra.mxu1 %v19182_v60 }
 0x482   : > { %12255 = vmatprep.subr.bf16.mxu1 %v19183_v20 }
 0x485   : > { %12257 = vmatpush1.bf16.msra.mxu1 %v19924_v31  ;;  %v19935_v31 = vld [vmem:[#allocation185_spill] sm:$0xff] }
 0x486   : > { %12259 = vmatprep.subr.bf16.mxu1 %v19925_v15 }
 0x489   : > { %12261 = vmatpush1.bf16.msra.mxu1 %v19186_v39  ;;  %v19926_v39 = vld [vmem:[#allocation95_spill] sm:$0xff] }
 0x48a   : > { %12263 = vmatprep.subr.bf16.mxu1 %v19187_v49 }
 0x48d   : > { %12265 = vmatpush1.bf16.msra.mxu1 %v19188_v27  ;;  %v19927_v27 = vld [vmem:[#allocation60_spill] sm:$0xff] }
 0x490   : > { %9371 = vmatmul.mubr.f32.vlgmr.msra.gmra.mrb[10].mxu1 %v19905_v48 }
 0x491   : > { %9377 = vmatprep.mubr.f32.mxu1 %v19907_v30 }
 0x494   : > { %9379 = vmatmul.mubr.f32.gmra.mrb[12].mxu1 %v19909_v21  ;;  %v9585_v21 = vand.u32 4294901760, %v17006_v58 }
 0x495   : > { %9385 = vmatprep.mubr.f32.mxu1 %v19911_v57 }
 0x496   : > { %v17022_v32 = vsub.f32 %v17006_v58, %v9585_v21 }
 0x498   : > { %9387 = vmatmul.mubr.f32.gmra.mrb[14].mxu1 %v19913_v28 }
 0x499   : > { %9393 = vmatprep.mubr.f32.mxu1 %v19915_v47 }
 0x49c   : > { %9395 = vmatmul.mubr.f32.gmra.mrb[16].mxu1 %v19917_v38  ;;  %v17027_v38 = vsub.f32 %v17011_v5, %v9588_v35 }
 0x49d   : > { %9401 = vmatprep.mubr.f32.mxu1 %v19919_v42  ;;  %v19934_v42 = vld [vmem:[#allocation77_spill] sm:$0xff] }
 0x4a0   : > { %9403 = vmatmul.mubr.f32.gmra.mrb[18].mxu1 %v19921_v53  ;;  %v17036_v53 = vld [vmem:[%s17681_s3 + $0x10] sm:$0xff] }
 0x4e1   : > { %v5680_v8 = vpop.f32.mrb[20].mxu0 }
 0x4e2   : > { %v7837_v13 = vmul.f32 1024.0, %v5680_v8  ;;  %v5682_v60 = vpop.f32.mrb[21].mxu0  ;;  %v18585_v8 = vand.u32 4294901760, %v17022_v32 }
 0x4e3   : > { %v7838_v20 = vmul.f32 1024.0, %v5682_v60 }
 0x4e4   : > { %v7847_v49 = vsub.f32 %v7837_v13, %v19926_v39  ;;  %v18584_v13 = vand.u32 4294901760, %v17027_v38 }
 0x4e5   : > { %v7848_v44 = vsub.f32 %v7838_v20, %v19927_v27  ;;  %v5688_v33 = vpop.f32.mrb[22].mxu0  ;;  %v9591_v20 = vand.u32 4294901760, %v17036_v53 }
 0x4e6   : > { %v7857_v11 = vmul.f32 4.0, %v7847_v49  ;;  %v7839_v10 = vmul.f32 1024.0, %v5688_v33  ;;  %v5690_v59 = vpop.f32.mrb[23].mxu0 }
 0x4e7   : > { %v7858_v40 = vmul.f32 4.0, %v7848_v44  ;;  %v7840_v34 = vmul.f32 1024.0, %v5690_v59  ;;  %v9692_v44 = vsub.f32 %v17027_v38, %v18584_v13  ;;  %v17073_v59 = vld [vmem:[%s17681_s3 + $0x20] sm:$0xff] }
 0x4e8   : > { %v16984_v22 = vmul.f32 %v7857_v11, %v19926_v39  ;;  %v7849_v54 = vsub.f32 %v7839_v10, %v19928_v45  ;;  %v9594_v39 = vand.u32 4294901760, %v17041_v23  ;;  %v17063_v11 = vsub.f32 %v17036_v53, %v9591_v20  ;;  %v17220_v53 = vld [vmem:[%s17681_s3 + $0x68] sm:$0xff] }
 0x4e9   : > { %v16988_v36 = vmul.f32 %v7858_v40, %v19927_v27  ;;  %v7850_v55 = vsub.f32 %v7840_v34, %v19929_v6  ;;  %v5696_v61 = vpop.f32.mrb[24].mxu0  ;;  %v9685_v27 = vsub.f32 %v17022_v32, %v18585_v8  ;;  %v17078_v40 = vld [vmem:[%s17681_s3 + $0x28] sm:$0xff] }
 0x4ea   : > { %v7859_v46 = vmul.f32 4.0, %v7849_v54  ;;  %v7841_v41 = vmul.f32 1024.0, %v5696_v61  ;;  %v5698_v24 = vpop.f32.mrb[25].mxu0  ;;  %v17068_v10 = vsub.f32 %v17041_v23, %v9594_v39  ;;  %v9693_v54 = vand.u32 4294901760, %v9692_v44 }
 0x4eb   : > { %v7860_v7 = vmul.f32 4.0, %v7850_v55  ;;  %v7842_v3 = vmul.f32 1024.0, %v5698_v24  ;;  %v18583_v55 = vand.u32 4294901760, %v17063_v11  ;;  %v17166_v44 = vpack.c.bf16 %v9588_v35, %v9585_v21 }
 0x4ec   : > { %v16992_v4 = vmul.f32 %v7859_v46, %v19928_v45  ;;  %v7851_v51 = vsub.f32 %v7841_v41, %v19930_v25  ;;  %v9686_v45 = vand.u32 4294901760, %v9685_v27  ;;  %v18582_v61 = vand.u32 4294901760, %v17068_v10 }
 0x4ed   : > { %v16996_v63 = vmul.f32 %v7860_v7, %v19929_v6  ;;  %v7852_v18 = vsub.f32 %v7842_v3, %v19931_v43  ;;  %v5704_v14 = vpop.f32.mrb[26].mxu0  ;;  %v9597_v6 = vand.u32 4294901760, %v17073_v59  ;;  %v9600_v46 = vand.u32 4294901760, %v17078_v40 }
 0x4ee   : > { %v7861_v2 = vmul.f32 4.0, %v7851_v51  ;;  %v7843_v16 = vmul.f32 1024.0, %v5704_v14  ;;  %v5706_v0 = vpop.f32.mrb[27].mxu0  ;;  %v12291_v41 = vpack.c.bf16 %v9693_v54, %v9686_v45  ;;  %v18588_v7 = vmov 0.0|0.0   ;;  %v17176_v54 = vld [vmem:[%s17681_s3 + $0x50] sm:$0xff] }
 0x4ef   : > { %v7862_v9 = vmul.f32 4.0, %v7852_v18  ;;  %v7844_v62 = vmul.f32 1024.0, %v5706_v0  ;;  %v17090_v24 = vsub.f32 %v17073_v59, %v9597_v6  ;;  %12290 = vmatprep.subr.bf16.mxu0 %v18588_v7  ;;  %v9699_v3 = vsub.f32 %v17063_v11, %v18583_v55  ;;  %12266 = vmatprep.subr.bf16.mxu1 %v18588_v7  ;;  %v17113_v18 = vld [vmem:[%s17681_s3 + $0x38] sm:$0xff] }
 0x4f0   : > { %v17000_v56 = vmul.f32 %v7861_v2, %v19930_v25  ;;  %v7853_v17 = vsub.f32 %v7843_v16, %v19932_v52  ;;  %v9706_v25 = vsub.f32 %v17068_v10, %v18582_v61  ;;  %v17103_v51 = vsub.f32 %v17078_v40, %v9600_v46  ;;  %12292 = vmatpush1.bf16.msra.mxu0 %v12291_v41  ;;  %v17181_v41 = vld [vmem:[%s17681_s3 + $0x58] sm:$0xff] }
 0x4f1   : > { %v17014_v48 = vmul.f32 %v7862_v9, %v19931_v43  ;;  %v7854_v30 = vsub.f32 %v7844_v62, %v19933_v29  ;;  %v5712_v26 = vpop.f32.mrb[28].mxu0  ;;  %v17108_v43 = vld [vmem:[%s17681_s3 + $0x30] sm:$0xff]  ;;  %v18581_v14 = vand.u32 4294901760, %v17090_v24  ;;  %v9606_v16 = vand.u32 4294901760, %v17113_v18  ;;  %12293 = vmatprep.subr.bf16.mxu0 %v18588_v7  ;;  %12268 = vmatpush1.bf16.msra.mxu1 %v17166_v44 }
 0x4f2   : > { %v7863_v57 = vmul.f32 4.0, %v7853_v17  ;;  %v7845_v37 = vmul.f32 1024.0, %v5712_v26  ;;  %v5714_v28 = vpop.f32.mrb[29].mxu0  ;;  %v9603_v2 = vand.u32 4294901760, %v17108_v43  ;;  %v9700_v0 = vand.u32 4294901760, %v9699_v3  ;;  %12269 = vmatprep.subr.bf16.mxu1 %v18588_v7 }
 0x4f3   : > { %v7864_v50 = vmul.f32 4.0, %v7854_v30  ;;  %v7846_v47 = vmul.f32 1024.0, %v5714_v28  ;;  %v9707_v9 = vand.u32 4294901760, %v9706_v25  ;;  %v18575_v62 = vand.u32 4294901760, %v17103_v51 }
 0x4f4   : > { %v17030_v1 = vmul.f32 %v7863_v57, %v19932_v52  ;;  %v7855_v19 = vsub.f32 %v7845_v37, %v19934_v42  ;;  %v9713_v52 = vsub.f32 %v17090_v24, %v18581_v14  ;;  %v17126_v17 = vsub.f32 %v17108_v43, %v9603_v2  ;;  %v17139_v57 = vld [vmem:[%s17681_s3 + $0x40] sm:$0xff]  ;;  %v17144_v37 = vld [vmem:[%s17681_s3 + $0x48] sm:$0xff] }
 0x4f5   : > { %v17044_v12 = vmul.f32 %v7864_v50, %v19933_v29  ;;  %v7856_v15 = vsub.f32 %v7846_v47, %v19935_v31  ;;  %v17131_v29 = vsub.f32 %v17113_v18, %v9606_v16  ;;  %v12294_v30 = vpack.c.bf16 %v9707_v9, %v9700_v0  ;;  %v19949_v14 = vld [vmem:[#allocation80_spill] sm:$0xff] }
 0x4f6   : > { %v7865_v60 = vmul.f32 4.0, %v7855_v19  ;;  %v9720_v26 = vsub.f32 %v17103_v51, %v18575_v62  ;;  %v9714_v28 = vand.u32 4294901760, %v9713_v52  ;;  %v18574_v50 = vand.u32 4294901760, %v17126_v17 }
 0x4f7   : > { %v7866_v49 = vmul.f32 4.0, %v7856_v15  ;;  %v18573_v47 = vand.u32 4294901760, %v17131_v29  ;;  %12295 = vmatpush1.bf16.msra.mxu0 %v12294_v30  ;;  %v9615_v21 = vand.u32 4294901760, %v17176_v54  ;;  %v9618_v25 = vand.u32 4294901760, %v17181_v41 }
 0x4f8   : > { %v17058_v33 = vmul.f32 %v7865_v60, %v19934_v42  ;;  %v9609_v42 = vand.u32 4294901760, %v17139_v57  ;;  %v9721_v19 = vand.u32 4294901760, %v9720_v26  ;;  %12296 = vmatprep.subr.bf16.mxu0 %v18588_v7  ;;  %v9727_v15 = vsub.f32 %v17126_v17, %v18574_v50 }
 0x4f9   : > { %v17081_v34 = vmul.f32 %v7866_v49, %v19935_v31  ;;  %v9612_v31 = vand.u32 4294901760, %v17144_v37  ;;  %v9734_v60 = vsub.f32 %v17131_v29, %v18573_v47  ;;  %v17196_v52 = vsub.f32 %v17176_v54, %v9615_v21 }
 0x4fa   : > { %v17160_v49 = vsub.f32 %v17139_v57, %v9609_v42  ;;  %v12297_v27 = vpack.c.bf16 %v9721_v19, %v9714_v28  ;;  %v9728_v58 = vand.u32 4294901760, %v9727_v15  ;;  %v17202_v30 = vpack.c.bf16 %v9594_v39, %v9591_v20  ;;  %v17215_v19 = vld [vmem:[%s17681_s3 + $0x60] sm:$0xff] }
 0x4fb   : > { %v17171_v45 = vsub.f32 %v17144_v37, %v9612_v31  ;;  %v9735_v3 = vand.u32 4294901760, %v9734_v60  ;;  %v17210_v28 = vsub.f32 %v17181_v41, %v9618_v25  ;;  %v18570_v20 = vand.u32 4294901760, %v17196_v52 }
 0x4fc   : > { %v18572_v5 = vand.u32 4294901760, %v17160_v49  ;;  %12298 = vmatpush1.bf16.msra.mxu0 %v12297_v27  ;;  %v9621_v39 = vand.u32 4294901760, %v17215_v19  ;;  %v9624_v15 = vand.u32 4294901760, %v17220_v53  ;;  %12271 = vmatpush1.bf16.msra.mxu1 %v17202_v30  ;;  %v17305_v57 = vpack.c.bf16 %v9618_v25, %v9615_v21  ;;  %v19965_v21 = vld [vmem:[#allocation192_spill] sm:$0xff] }
 0x4fd   : > { %v18569_v35 = vand.u32 4294901760, %v17171_v45  ;;  %12299 = vmatprep.subr.bf16.mxu0 %v18588_v7  ;;  %v12300_v0 = vpack.c.bf16 %v9735_v3, %v9728_v58  ;;  %v18571_v27 = vand.u32 4294901760, %v17210_v28  ;;  %12272 = vmatprep.subr.bf16.mxu1 %v18588_v7  ;;  %v9755_v58 = vsub.f32 %v17196_v52, %v18570_v20  ;;  %v293_v20 = vld [vmem:[%s17681_s3 + $0x70] sm:$0xff] }
 0x4fe   : > { %v9741_v9 = vsub.f32 %v17160_v49, %v18572_v5  ;;  %v17233_v3 = vsub.f32 %v17215_v19, %v9621_v39  ;;  %v294_v19 = vld [vmem:[%s17681_s3 + $0x78] sm:$0xff]  ;;  %v9627_v40 = vand.u32 4294901760, %v293_v20  ;;  %19938 = vst [vmem:[#allocation166_spill] sm:$0xff] %v17305_v57  ;;  %v18586_v54 = vmov 0.0  }
 0x4ff   : > { %v9748_v26 = vsub.f32 %v17171_v45, %v18569_v35  ;;  %v9762_v35 = vsub.f32 %v17210_v28, %v18571_v27 }
 0x500   : > { %v9742_v23 = vand.u32 4294901760, %v9741_v9  ;;  %12301 = vmatpush1.bf16.msra.mxu0 %v12300_v0  ;;  %v17236_v9 = vsub.f32 %v17220_v53, %v9624_v15  ;;  %v9756_v53 = vand.u32 4294901760, %v9755_v58  ;;  %v17264_v27 = vsub.f32 %v293_v20, %v9627_v40 }
 0x501   : > { %v9749_v60 = vand.u32 4294901760, %v9748_v26  ;;  %12302 = vmatprep.subr.bf16.mxu0 %v18588_v7  ;;  %v17242_v26 = vpack.c.bf16 %v9600_v46, %v9597_v6  ;;  %v9763_v6 = vand.u32 4294901760, %v9762_v35  ;;  %v9630_v46 = vand.u32 4294901760, %v294_v19 }
 0x502   : > { %v18580_v59 = vand.u32 4294901760, %v17236_v9  ;;  %v17270_v35 = vpack.c.bf16 %v9606_v16, %v9603_v2  ;;  %v18579_v62 = vand.u32 4294901760, %v17264_v27 }
 0x503   : > { %v12303_v0 = vpack.c.bf16 %v9749_v60, %v9742_v23  ;;  %v18576_v23 = vand.u32 4294901760, %v17233_v3  ;;  %12274 = vmatpush1.bf16.msra.mxu1 %v17242_v26  ;;  %v12306_v5 = vpack.c.bf16 %v9763_v6, %v9756_v53  ;;  %v17323_v25 = vpack.c.bf16 %v9630_v46, %v9627_v40  ;;  %v19957_v40 = vld [vmem:[#allocation119_spill] sm:$0xff] }
 0x504   : > { %12275 = vmatprep.subr.bf16.mxu1 %v18588_v7  ;;  %v9776_v58 = vsub.f32 %v17236_v9, %v18580_v59  ;;  %v9783_v2 = vsub.f32 %v17264_v27, %v18579_v62 }
 0x505   : > { %12304 = vmatpush1.bf16.msra.mxu0 %v12303_v0  ;;  %v9769_v60 = vsub.f32 %v17233_v3, %v18576_v23  ;;  %v17272_v0 = vsub.f32 %v294_v19, %v9630_v46  ;;  %v295_v23 = vld [vmem:[%s17681_s3 + $0x80] sm:$0xf]  ;;  %19940 = vst [vmem:[#allocation114_spill] sm:$0xff] %v17323_v25 }
 0x506   : > { %12305 = vmatprep.subr.bf16.mxu0 %v18588_v7  ;;  %v9777_v50 = vand.u32 4294901760, %v9776_v58  ;;  %v9582_v43 = vsel %vm486_vm2, %v295_v23, 0  ;;  %v9784_v53 = vand.u32 4294901760, %v9783_v2  ;;  %v19953_v58 = vld [vmem:[#allocation96_spill] sm:$0xff] }
 0x507   : > { %v9770_v47 = vand.u32 4294901760, %v9769_v60  ;;  %12277 = vmatpush1.bf16.msra.mxu1 %v17270_v35  ;;  %v18578_v20 = vand.u32 4294901760, %v17272_v0  ;;  %v17286_v16 = vand.u32 4294901760, %v9582_v43 }
 0x508   : > { %12278 = vmatprep.subr.bf16.mxu1 %v18588_v7 }
 0x509   : > { %12307 = vmatpush1.bf16.msra.mxu0 %v12306_v5  ;;  %v12309_v18 = vpack.c.bf16 %v9777_v50, %v9770_v47  ;;  %19936 = vst [vmem:[#allocation146_spill] sm:$0xff] %v17286_v16  ;;  %v17292_v5 = vpack.c.bf16 %v9612_v31, %v9609_v42  ;;  %v9790_v19 = vsub.f32 %v17272_v0, %v18578_v20 }
 0x50a   : > { %12308 = vmatprep.subr.bf16.mxu0 %v18588_v7  ;;  %v17298_v23 = vsub.f32 %v9582_v43, %v17286_v16  ;;  %v17314_v31 = vpack.c.bf16 %v9624_v15, %v9621_v39  ;;  %v19961_v39 = vld [vmem:[#allocation87_spill] sm:$0xff] }
 0x50b   : > { %19937 = vst [vmem:[#allocation142_spill] sm:$0xff] %v17292_v5  ;;  %12280 = vmatpush1.bf16.msra.mxu1 %v17292_v5  ;;  %v9791_v50 = vand.u32 4294901760, %v9790_v19 }
 0x50c   : > { %12281 = vmatprep.subr.bf16.mxu1 %v18588_v7  ;;  %v18577_v37 = vand.u32 4294901760, %v17298_v23  ;;  %19939 = vst [vmem:[#allocation131_spill] sm:$0xff] %v17314_v31 }
 0x50d   : > { %12310 = vmatpush1.bf16.msra.mxu0 %v12309_v18  ;;  %v12312_v47 = vpack.c.bf16 %v9791_v50, %v9784_v53  ;;  %v19941_v53 = vld [vmem:[#allocation63_spill] sm:$0xff] }
 0x50e   : > { %12311 = vmatprep.subr.bf16.mxu0 %v18588_v7  ;;  %v9797_v42 = vsub.f32 %v17298_v23, %v18577_v37  ;;  %vm9449_vm4 = vcmp.ne.f32.partialorder %v19941_v53, 0.0 }
 0x50f   : > { %12283 = vmatpush1.bf16.msra.mxu1 %v17305_v57  ;;  %v19976_v57 = vld [vmem:[#allocation88_spill] sm:$0xff] }
 0x510   : > { %12284 = vmatprep.subr.bf16.mxu1 %v18588_v7  ;;  %v9798_v41 = vand.u32 4294901760, %v9797_v42 }
 0x511   : > { %12313 = vmatpush1.bf16.msra.mxu0 %v12312_v47  ;;  %v19942_v47 = vld [vmem:[#allocation66_spill] sm:$0xff] }
 0x512   : > { %9793 = vmatprep.subr.mxu0 %v18586_v54  ;;  %vm9450_vm7 = vcmp.ne.f32.partialorder %v19942_v47, 0.0 }
 0x513   : > { %12286 = vmatpush1.bf16.msra.mxu1 %v17314_v31 }
 0x514   : > { %12287 = vmatprep.subr.bf16.mxu1 %v18588_v7 }
 0x515   : > { %9799 = vmatpush1.msra.mxu0 %v9798_v41 }
 0x516   : > { %12314 = vmatprep.subr.bf16.mxu0 %v18588_v7 }
 0x517   : > { %12289 = vmatpush1.bf16.msra.mxu1 %v17323_v25 }
 0x518   : > { %9632 = vmatprep.subr.mxu1 %v18586_v54 }
 0x51b   : > { %9634 = vmatpush1.msra.mxu1 %v17286_v16 }
 0x563   : > { %v9372_v43 = vpop.f32.mrb[10].mxu1 }
 0x564   : > { %v9409_v18 = vmul.f32 1024.0, %v9372_v43  ;;  %v9374_v2 = vpop.f32.mrb[11].mxu1 }
 0x565   : > { %v9410_v19 = vmul.f32 1024.0, %v9374_v2  ;;  %v19945_v2 = vld [vmem:[#allocation184_spill] sm:$0xff] }
 0x566   : > { %v9419_v50 = vsub.f32 %v9409_v18, %v19941_v53 }
 0x567   : > { %v9420_v42 = vsub.f32 %v9410_v19, %v19942_v47  ;;  %v9380_v41 = vpop.f32.mrb[12].mxu1 }
 0x568   : > { %v17345_v37 = vmul.f32 %v9419_v50, %v19941_v53  ;;  %vm9439_vm3 = vcmp.eq.f32.partialorder %v9419_v50, 0.0  ;;  %v9411_v20 = vmul.f32 1024.0, %v9380_v41  ;;  %v9382_v62 = vpop.f32.mrb[13].mxu1  ;;  %v19948_v50 = vld [vmem:[#allocation79_spill] sm:$0xff] }
 0x569   : > { %vm17348_vm5 = vmand %vm9439_vm3, %vm9449_vm4  ;;  %v17353_v43 = vmul.f32 %v9420_v42, %v19942_v47  ;;  %vm9440_vm6 = vcmp.eq.f32.partialorder %v9420_v42, 0.0  ;;  %v9412_v18 = vmul.f32 1024.0, %v9382_v62  ;;  %v19950_v47 = vld [vmem:[#allocation82_spill] sm:$0xff]  ;;  %vm9451_vm10 = vcmp.ne.f32.partialorder %v19948_v50, 0.0 }
 0x56a   : > { %12740 = vrcp.f32 %v17345_v37  ;;  %vm17360_vm8 = vmand %vm9440_vm6, %vm9450_vm7  ;;  %v9421_v41 = vsub.f32 %v9411_v20, %v19948_v50  ;;  %vm9452_vm13 = vcmp.ne.f32.partialorder %v19950_v47, 0.0 }
 0x56b   : > { %12742 = vrcp.f32 %v17353_v43  ;;  %v9422_v62 = vsub.f32 %v9412_v18, %v19950_v47  ;;  %v9388_v42 = vpop.f32.mrb[14].mxu1  ;;  %v19974_v60 = vsel %vm17360_vm8, %v19949_v14, 1.0 }
 0x56c   : > { %v17371_v55 = vmul.f32 %v9421_v41, %v19948_v50  ;;  %vm9441_vm9 = vcmp.eq.f32.partialorder %v9421_v41, 0.0  ;;  %v9413_v13 = vmul.f32 1024.0, %v9388_v42  ;;  %v9390_v8 = vpop.f32.mrb[15].mxu1  ;;  %v19956_v41 = vld [vmem:[#allocation164_spill] sm:$0xff] }
 0x56d   : > { %vm17374_vm11 = vmand %vm9441_vm9, %vm9451_vm10  ;;  %v17379_v20 = vmul.f32 %v9422_v62, %v19950_v47  ;;  %vm9442_vm12 = vcmp.eq.f32.partialorder %v9422_v62, 0.0  ;;  %v9414_v18 = vmul.f32 1024.0, %v9390_v8  ;;  %v19958_v47 = vld [vmem:[#allocation165_spill] sm:$0xff]  ;;  %vm9453_vm0 = vcmp.ne.f32.partialorder %v19956_v41, 0.0 }
 0x56e   : > { %v9501_v46 = vsel %vm17374_vm11, %v19953_v58, 1.0  ;;  %12744 = vrcp.f32 %v17371_v55  ;;  %vm17386_vm14 = vmand %vm9442_vm12, %vm9452_vm13  ;;  %v9423_v42 = vsub.f32 %v9413_v13, %v19956_v41  ;;  %vm9454_vm3 = vcmp.ne.f32.partialorder %v19958_v47, 0.0 }
 0x56f   : > { %12746 = vrcp.f32 %v17379_v20  ;;  %v9424_v8 = vsub.f32 %v9414_v18, %v19958_v47  ;;  %v9396_v62 = vpop.f32.mrb[16].mxu1  ;;  %vm9509_vm12 = vcmp.ne.f32.partialorder %v17345_v37, 0.0  ;;  %v19973_v37 = vld [vmem:[#allocation157_spill] sm:$0xff]  ;;  %vm9512_vm8 = vcmp.ne.f32.partialorder %v17379_v20, 0.0 }
 0x570   : > { %v17397_v54 = vmul.f32 %v9423_v42, %v19956_v41  ;;  %vm9443_vm15 = vcmp.eq.f32.partialorder %v9423_v42, 0.0  ;;  %v9415_v58 = vmul.f32 1024.0, %v9396_v62  ;;  %v9398_v6 = vpop.f32.mrb[17].mxu1  ;;  %v19964_v42 = vld [vmem:[#allocation105_spill] sm:$0xff] }
 0x571   : > { %vm17400_vm1 = vmand %vm9443_vm15, %vm9453_vm0  ;;  %v17405_v13 = vmul.f32 %v9424_v8, %v19958_v47  ;;  %vm9444_vm2 = vcmp.eq.f32.partialorder %v9424_v8, 0.0  ;;  %v9416_v18 = vmul.f32 1024.0, %v9398_v6  ;;  %vm9455_vm6 = vcmp.ne.f32.partialorder %v19964_v42, 0.0  ;;  %v19966_v6 = vld [vmem:[#allocation145_spill] sm:$0xff] }
 0x572   : > { %12748 = vrcp.f32 %v17397_v54  ;;  %vm17412_vm4 = vmand %vm9444_vm2, %vm9454_vm3  ;;  %v9425_v62 = vsub.f32 %v9415_v58, %v19964_v42  ;;  %vm9456_vm9 = vcmp.ne.f32.partialorder %v19966_v6, 0.0  ;;  %vm9510_vm15 = vcmp.ne.f32.partialorder %v17353_v43, 0.0 }
 0x573   : > { %12750 = vrcp.f32 %v17405_v13  ;;  %v9426_v47 = vsub.f32 %v9416_v18, %v19966_v6  ;;  %v9404_v8 = vpop.f32.mrb[18].mxu1  ;;  %vm9511_vm0 = vcmp.ne.f32.partialorder %v17371_v55, 0.0 }
 0x574   : > { %v12741_v7 = vpop.eup %12740  ;;  %v17424_v61 = vmul.f32 %v9425_v62, %v19964_v42  ;;  %vm9445_vm7 = vcmp.eq.f32.partialorder %v9425_v62, 0.0  ;;  %v9417_v19 = vmul.f32 1024.0, %v9404_v8  ;;  %v9406_v58 = vpop.f32.mrb[19].mxu1  ;;  %v19969_v62 = vld [vmem:[#allocation89_spill] sm:$0xff] }
 0x575   : > { %v12743_v16 = vpop.eup %12742  ;;  %v9520_v25 = vmul.f32 %v12741_v7, %v16984_v22  ;;  %vm17428_vm10 = vmand %vm9445_vm7, %vm9455_vm6  ;;  %v9436_v31 = vmul.f32 %v9426_v47, %v19966_v6  ;;  %vm9446_vm11 = vcmp.eq.f32.partialorder %v9426_v47, 0.0  ;;  %v9418_v18 = vmul.f32 1024.0, %v9406_v58  ;;  %v19975_v58 = vld [vmem:[#allocation97_spill] sm:$0xff] }
 0x576   : > { %v9522_v42 = vmul.f32 %v12743_v16, %v16988_v36  ;;  %v9505_v8 = vsel %vm17428_vm10, %v19969_v62, 1.0  ;;  %12752 = vrcp.f32 %v17424_v61  ;;  %vm17439_vm13 = vmand %vm9446_vm11, %vm9456_vm9  ;;  %v19972_v7 = vsel %vm17348_vm5, %v19945_v2, 1.0 }
 0x577   : > { %v9539_v6 = vsel %vm9509_vm12, %v9520_v25, %v19972_v7  ;;  %v9506_v36 = vsel %vm17439_vm13, %v19973_v37, 1.0  ;;  %12754 = vrcp.f32 %v9436_v31  ;;  %v9427_v62 = vsub.f32 %v9417_v19, %v19975_v58 }
 0x578   : > { %v12745_v16 = vpop.eup %12744  ;;  %v9540_v47 = vsel %vm9510_vm15, %v9522_v42, %v19974_v60  ;;  %v9428_v59 = vsub.f32 %v9418_v18, %v19976_v57  ;;  %vm9561_vm5 = vcmask 31744   ;;  %vm9457_vm2 = vcmp.ne.f32.partialorder %v19975_v58, 0.0  ;;  %v19980_v42 = vld [vmem:[#allocation55_spill] sm:$0xff] }
 0x579   : > { %v12747_v5 = vpop.eup %12746  ;;  %v9524_v25 = vmul.f32 %v12745_v16, %v16992_v4  ;;  %v9437_v2 = vmul.f32 %v9427_v62, %v19975_v58  ;;  %vm9447_vm3 = vcmp.eq.f32.partialorder %v9427_v62, 0.0  ;;  %vm9458_vm9 = vcmp.ne.f32.partialorder %v19976_v57, 0.0 }
 0x57a   : > { %v9526_v43 = vmul.f32 %v12747_v5, %v16996_v63  ;;  %v9438_v14 = vmul.f32 %v9428_v59, %v19976_v57  ;;  %vm17464_vm6 = vmand %vm9447_vm3, %vm9457_vm2  ;;  %vm9448_vm7 = vcmp.eq.f32.partialorder %v9428_v59, 0.0  ;;  %v9562_v55 = vsel %vm9561_vm5, %v9540_v47, 0.0 }
 0x57b   : > { %v9541_v53 = vsel %vm9511_vm0, %v9524_v25, %v9501_v46  ;;  %v19979_v63 = vsel %vm17386_vm14, %v19957_v40, 1.0  ;;  %v9507_v46 = vsel %vm17464_vm6, %v19980_v42, 1.0  ;;  %vm17477_vm10 = vmand %vm9448_vm7, %vm9458_vm9  ;;  %12756 = vrcp.f32 %v9437_v2 }
 0x57c   : > { %v12749_v4 = vpop.eup %12748  ;;  %v9549_v18 = vadd.f32 %v9541_v53, %v9539_v6  ;;  %v9542_v5 = vsel %vm9512_vm8, %v9526_v43, %v19979_v63  ;;  %v19983_v6 = vld [vmem:[#allocation132_spill] sm:$0xff]  ;;  %vm9513_vm14 = vcmp.ne.f32.partialorder %v17397_v54, 0.0  ;;  %12758 = vrcp.f32 %v9438_v14 }
 0x57d   : > { %v12751_v22 = vpop.eup %12750  ;;  %v9563_v57 = vsel %vm9561_vm5, %v9542_v5, 0.0  ;;  %v9528_v7 = vmul.f32 %v12749_v4, %v17000_v56  ;;  %v9508_v50 = vsel %vm17477_vm10, %v19983_v6, 1.0  ;;  %v19984_v16 = vsel %vm17400_vm1, %v19961_v39, 1.0 }
 0x57e   : > { %v9564_v40 = vadd.f32 %v9563_v57, %v9562_v55  ;;  %v9530_v37 = vmul.f32 %v12751_v22, %v17014_v48  ;;  %vm9514_vm11 = vcmp.ne.f32.partialorder %v17405_v13, 0.0  ;;  %v19985_v58 = vsel %vm17412_vm4, %v19965_v21, 1.0 }
 0x57f   : > { %v9543_v60 = vsel %vm9513_vm14, %v9528_v7, %v19984_v16  ;;  %vm9515_vm12 = vcmp.ne.f32.partialorder %v17424_v61, 0.0  ;;  %vm9516_vm1 = vcmp.ne.f32.partialorder %v9436_v31, 0.0  ;;  %vm9552_vm4 = vcmask 1040384  }
 0x580   : > { %v12753_v47 = vpop.eup %12752  ;;  %v9550_v56 = vadd.f32 %v9549_v18, %v9543_v60  ;;  %v9544_v62 = vsel %vm9514_vm11, %v9530_v37, %v19985_v58  ;;  %vm9517_vm13 = vcmp.ne.f32.partialorder %v9437_v2, 0.0  ;;  %vm9569_vm15 = vcmask 24576  }
 0x581   : > { %v12755_v59 = vpop.eup %12754  ;;  %v9565_v54 = vsel %vm9561_vm5, %v9544_v62, 0.0  ;;  %v9532_v48 = vmul.f32 %v12753_v47, %v17030_v1  ;;  %vm9518_vm0 = vcmp.ne.f32.partialorder %v9438_v14, 0.0  ;;  %v19986_v60 = vpack.c.bf16 %v17027_v38, %v17022_v32 }
 0x582   : > { %v9566_v25 = vadd.f32 %v9565_v54, %v9564_v40  ;;  %v9534_v39 = vmul.f32 %v12755_v59, %v17044_v12  ;;  %v19988_v59 = vpack.c.bf16 %v17068_v10, %v17063_v11 }
 0x583   : > { %v9545_v15 = vsel %vm9515_vm12, %v9532_v48, %v9505_v8 }
 0x584   : > { %v9551_v13 = vadd.f32 %v9550_v56, %v9545_v15  ;;  %v9546_v43 = vsel %vm9516_vm1, %v9534_v39, %v9506_v36  ;;  %v19987_v56 = vmov 0.0|0.0   ;;  %v19990_v39 = vpack.c.bf16 %v17131_v29, %v17126_v17 }
 0x585   : > { %v9567_v53 = vsel %vm9561_vm5, %v9546_v43, 0.0  ;;  %v12757_v19 = vpop.eup %12756  ;;  %v19991_v15 = vpack.c.bf16 %v17171_v45, %v17160_v49  ;;  %v19993_v43 = vpack.c.bf16 %v17236_v9, %v17233_v3 }
 0x586   : > { %v9568_v41 = vadd.f32 %v9567_v53, %v9566_v25  ;;  %v12759_v21 = vpop.eup %12758  ;;  %v9536_v4 = vmul.f32 %v12757_v19, %v17058_v33  ;;  %v19989_v25 = vpack.c.bf16 %v17103_v51, %v17090_v24  ;;  %v19994_v53 = vpack.c.bf16 %v17272_v0, %v17264_v27  ;;  %v19996_v19 = vld [vmem:[#allocation142_spill] sm:$0xff] }
 0x587   : > { %v9538_v1 = vmul.f32 %v12759_v21, %v17081_v34  ;;  %v19997_v21 = vld [vmem:[#allocation166_spill] sm:$0xff] }
 0x588   : > { %v9547_v55 = vsel %vm9517_vm13, %v9536_v4, %v9507_v46  ;;  %v19998_v4 = vld [vmem:[#allocation131_spill] sm:$0xff] }
 0x589   : > { %v9553_v61 = vsel %vm9552_vm4, %v9547_v55, 0.0  ;;  %v9548_v12 = vsel %vm9518_vm0, %v9538_v1, %v9508_v50  ;;  %v19999_v1 = vld [vmem:[#allocation114_spill] sm:$0xff]  ;;  %v20000_v55 = vand.u32 4294901760, %v17022_v32  ;;  %v20005_v32 = vand.u32 4294901760, %v17090_v24 }
 0x58a   : > { %v9554_v8 = vadd.f32 %v9553_v61, %v9551_v13  ;;  %v9570_v31 = vsel %vm9569_vm15, %v9548_v12, 0.0  ;;  %v19992_v13 = vpack.c.bf16 %v17210_v28, %v17196_v52  ;;  %v20001_v61 = vand.u32 4294901760, %v17027_v38 }
 0x58b   : > { %v9571_v36 = vadd.f32 %v9570_v31, %v9568_v41  ;;  %v19995_v41 = vmov 0.0   ;;  %v20003_v31 = vand.u32 4294901760, %v17063_v11  ;;  %v20006_v38 = vand.u32 4294901760, %v17103_v51 }
 0x58c   : > { %v9555_v18 = vrot.slane %v9554_v8, 4  ;;  %v12363_v12 = vpack.c.bf16 %v20001_v61, %v20000_v55  ;;  %v20009_v11 = vand.u32 4294901760, %v17160_v49  ;;  %v20011_v24 = vand.u32 4294901760, %v17196_v52 }
 0x58d   : > { %v9572_v63 = vrot.slane %v9571_v36, 4  ;;  %v20012_v51 = vand.u32 4294901760, %v17210_v28  ;;  %v20015_v49 = vand.u32 4294901760, %v17264_v27  ;;  %v20017_v52 = vand.u32 4294901760, %v17298_v23 }
 0x58e   : > { %v9556_v5 = vadd.f32 %v9555_v18, %v9554_v8  ;;  %v20002_v8 = vld [vmem:[#allocation146_spill] sm:$0xff] }
 0x58f   : > { %v9573_v42 = vadd.f32 %v9572_v63, %v9571_v36  ;;  %v20004_v36 = vand.u32 4294901760, %v17068_v10  ;;  %v12369_v63 = vpack.c.bf16 %v20006_v38, %v20005_v32  ;;  %v20010_v10 = vand.u32 4294901760, %v17171_v45 }
 0x590   : > { %v9557_v20 = vrot.slane %v9556_v5, 2  ;;  %v20016_v45 = vand.u32 4294901760, %v17272_v0 }
 0x591   : > { %v9574_v22 = vrot.slane %v9573_v42, 2  ;;  %v12366_v18 = vpack.c.bf16 %v20004_v36, %v20003_v31 }
 0x592   : > { %v9558_v33 = vadd.f32 %v9557_v20, %v9556_v5  ;;  %v20007_v5 = vand.u32 4294901760, %v17126_v17  ;;  %v20013_v17 = vand.u32 4294901760, %v17233_v3 }
 0x593   : > { %v9575_v57 = vadd.f32 %v9574_v22, %v9573_v42  ;;  %v20008_v42 = vand.u32 4294901760, %v17131_v29  ;;  %v12375_v22 = vpack.c.bf16 %v20010_v10, %v20009_v11  ;;  %v20014_v29 = vand.u32 4294901760, %v17236_v9 }
 0x594   : > { %v9559_v2 = vrot.slane %v9558_v33, 1 }
 0x595   : > { %v9576_v7 = vrot.slane %v9575_v57, 1  ;;  %v12372_v20 = vpack.c.bf16 %v20008_v42, %v20007_v5 }
 0x596   : > { %v9560_v34 = vadd.f32 %v9559_v2, %v9558_v33  ;;  %v12378_v33 = vpack.c.bf16 %v20012_v51, %v20011_v24  ;;  %v12384_v2 = vpack.c.bf16 %v20016_v45, %v20015_v49 }
 0x597   : > { %v9577_v6 = vadd.f32 %v9576_v7, %v9575_v57  ;;  %v12381_v57 = vpack.c.bf16 %v20014_v29, %v20013_v17 }
 0x598   : > { %v17505_v46 = vand.u32 4294901760, %v9560_v34 }
 0x599   : > { %v9579_v14 = vsel %vm9561_vm5, %v9577_v6, 0 }
 0x59a   : > { %v17508_v50 = vand.u32 4294901760, %v9579_v14  ;;  %v9672_v40 = vsub.f32 %v9560_v34, %v17505_v46 }
 0x59c   : > { %9831 = vmatprep.mubr.f32.mxu0 %v17508_v50  ;;  %v9666_v37 = vsub.f32 %v9579_v14, %v17508_v50  ;;  %v9673_v16 = vand.u32 4294901760, %v9672_v40 }
 0x59d   : > { %9833 = vmatmul.mubr.f32.vlgmr.msra.gmra.mrb[30].mxu0 %v17505_v46 }
 0x59e   : > { %12316 = vmatpush1.bf16.msra.mxu0 %v19986_v60  ;;  %9938 = vmatprep.mubr.f32.mxu0 %v9666_v37  ;;  %v9667_v47 = vand.u32 4294901760, %v9666_v37  ;;  %v9674_v58 = vsub.f32 %v9672_v40, %v9673_v16 }
 0x59f   : > { %12317 = vmatprep.subr.bf16.mxu0 %v19987_v56 }
 0x5a0   : > { %v9668_v62 = vsub.f32 %v9666_v37, %v9667_v47  ;;  %v9675_v48 = vand.u32 4294901760, %v9674_v58 }
 0x5a2   : > { %12319 = vmatpush1.bf16.msra.mxu0 %v19988_v59  ;;  %v9669_v54 = vand.u32 4294901760, %v9668_v62 }
 0x5a3   : > { %12320 = vmatprep.subr.bf16.mxu0 %v19987_v56 }
 0x5a4   : > { %9670 = vmatprep.mubr.f32.mxu1 %v9669_v54 }
 0x5a5   : > { %9676 = vmatmul.mubr.f32.vlgmr.msra.gmra.mrb[20].mxu1 %v9675_v48 }
 0x5a6   : > { %12322 = vmatpush1.bf16.msra.mxu0 %v19989_v25 }
 0x5a7   : > { %12323 = vmatprep.subr.bf16.mxu0 %v19987_v56 }
 0x5aa   : > { %12325 = vmatpush1.bf16.msra.mxu0 %v19990_v39 }
 0x5ab   : > { %12326 = vmatprep.subr.bf16.mxu0 %v19987_v56 }
 0x5ae   : > { %12328 = vmatpush1.bf16.msra.mxu0 %v19991_v15 }
 0x5af   : > { %12329 = vmatprep.subr.bf16.mxu0 %v19987_v56 }
 0x5b2   : > { %12331 = vmatpush1.bf16.msra.mxu0 %v19992_v13 }
 0x5b3   : > { %12332 = vmatprep.subr.bf16.mxu0 %v19987_v56 }
 0x5b6   : > { %12334 = vmatpush1.bf16.msra.mxu0 %v19993_v43 }
 0x5b7   : > { %12335 = vmatprep.subr.bf16.mxu0 %v19987_v56 }
 0x5ba   : > { %12337 = vmatpush1.bf16.msra.mxu0 %v19994_v53 }
 0x5bb   : > { %9902 = vmatprep.subr.mxu0 %v19995_v41 }
 0x5be   : > { %9905 = vmatpush1.msra.mxu0 %v17298_v23 }
 0x5bf   : > { %9941 = vmatmul.mubr.f32.vlgmr.msra.gmra.mrb[30].mxu0 %v9672_v40  ;;  %12338 = vmatprep.subr.bf16.mxu0 %v19987_v56 }
 0x5c0   : > { %12340 = vmatpush1.bf16.msra.mxu0 %v17166_v44  ;;  %10030 = vmatprep.mubr.f32.mxu0 %v9667_v47 }
 0x5c1   : > { %12341 = vmatprep.subr.bf16.mxu0 %v19987_v56 }
 0x5c4   : > { %12343 = vmatpush1.bf16.msra.mxu0 %v17202_v30 }
 0x5c5   : > { %12344 = vmatprep.subr.bf16.mxu0 %v19987_v56 }
 0x5c8   : > { %12346 = vmatpush1.bf16.msra.mxu0 %v17242_v26 }
 0x5c9   : > { %12347 = vmatprep.subr.bf16.mxu0 %v19987_v56 }
 0x5cc   : > { %12349 = vmatpush1.bf16.msra.mxu0 %v17270_v35 }
 0x5cd   : > { %12350 = vmatprep.subr.bf16.mxu0 %v19987_v56 }
 0x5d0   : > { %12352 = vmatpush1.bf16.msra.mxu0 %v19996_v19 }
 0x5d1   : > { %12353 = vmatprep.subr.bf16.mxu0 %v19987_v56 }
 0x5d4   : > { %12355 = vmatpush1.bf16.msra.mxu0 %v19997_v21 }
 0x5d5   : > { %12356 = vmatprep.subr.bf16.mxu0 %v19987_v56 }
 0x5d8   : > { %12358 = vmatpush1.bf16.msra.mxu0 %v19998_v4 }
 0x5d9   : > { %12359 = vmatprep.subr.bf16.mxu0 %v19987_v56 }
 0x5dc   : > { %12361 = vmatpush1.bf16.msra.mxu0 %v19999_v1 }
 0x5dd   : > { %9994 = vmatprep.subr.mxu0 %v19995_v41 }
 0x5e0   : > { %9996 = vmatpush1.msra.mxu0 %v20002_v8 }
 0x5e1   : > { %10034 = vmatmul.mubr.f32.vlgmr.msra.gmra.mrb[30].mxu0 %v9673_v16  ;;  %12362 = vmatprep.subr.bf16.mxu0 %v19987_v56 }
 0x5e2   : > { %12364 = vmatpush1.bf16.msra.mxu0 %v12363_v12  ;;  %10155 = vmatprep.mubr.f32.mxu0 %v17508_v50 }
 0x5e3   : > { %12365 = vmatprep.subr.bf16.mxu0 %v19987_v56 }
 0x5e6   : > { %12367 = vmatpush1.bf16.msra.mxu0 %v12366_v18 }
 0x5e7   : > { %12368 = vmatprep.subr.bf16.mxu0 %v19987_v56 }
 0x5ea   : > { %12370 = vmatpush1.bf16.msra.mxu0 %v12369_v63 }
 0x5eb   : > { %12371 = vmatprep.subr.bf16.mxu0 %v19987_v56 }
 0x5ee   : > { %12373 = vmatpush1.bf16.msra.mxu0 %v12372_v20 }
 0x5ef   : > { %12374 = vmatprep.subr.bf16.mxu0 %v19987_v56 }
 0x5f2   : > { %12376 = vmatpush1.bf16.msra.mxu0 %v12375_v22 }
 0x5f3   : > { %12377 = vmatprep.subr.bf16.mxu0 %v19987_v56 }
 0x5f6   : > { %12379 = vmatpush1.bf16.msra.mxu0 %v12378_v33 }
 0x5f7   : > { %12380 = vmatprep.subr.bf16.mxu0 %v19987_v56 }
 0x5fa   : > { %12382 = vmatpush1.bf16.msra.mxu0 %v12381_v57 }
 0x5fb   : > { %12383 = vmatprep.subr.bf16.mxu0 %v19987_v56 }
 0x5fe   : > { %12385 = vmatpush1.bf16.msra.mxu0 %v12384_v2 }
 0x5ff   : > { %10119 = vmatprep.subr.mxu0 %v19995_v41 }
 0x602   : > { %10123 = vmatpush1.msra.mxu0 %v20017_v52 }
 0x603   : > { %10157 = vmatmul.mubr.f32.vlgmr.msra.gmra.mrb[30].mxu0 %v17505_v46  ;;  %12386 = vmatprep.subr.bf16.mxu0 %v19987_v56 }
 0x604   : > { %12388 = vmatpush1.bf16.msra.mxu0 %v17166_v44  ;;  %10244 = vmatprep.mubr.f32.mxu0 %v17508_v50 }
 0x605   : > { %12389 = vmatprep.subr.bf16.mxu0 %v19987_v56 }
 0x608   : > { %12391 = vmatpush1.bf16.msra.mxu0 %v17202_v30 }
 0x609   : > { %12392 = vmatprep.subr.bf16.mxu0 %v19987_v56 }
 0x60c   : > { %12394 = vmatpush1.bf16.msra.mxu0 %v17242_v26 }
 0x60d   : > { %12395 = vmatprep.subr.bf16.mxu0 %v19987_v56 }
 0x610   : > { %12397 = vmatpush1.bf16.msra.mxu0 %v17270_v35 }
 0x611   : > { %12398 = vmatprep.subr.bf16.mxu0 %v19987_v56 }
 0x614   : > { %12400 = vmatpush1.bf16.msra.mxu0 %v19996_v19 }
 0x615   : > { %12401 = vmatprep.subr.bf16.mxu0 %v19987_v56 }
 0x618   : > { %12403 = vmatpush1.bf16.msra.mxu0 %v19997_v21 }
 0x619   : > { %12404 = vmatprep.subr.bf16.mxu0 %v19987_v56 }
 0x61c   : > { %12406 = vmatpush1.bf16.msra.mxu0 %v19998_v4 }
 0x61d   : > { %12407 = vmatprep.subr.bf16.mxu0 %v19987_v56 }
 0x620   : > { %12409 = vmatpush1.bf16.msra.mxu0 %v19999_v1 }
 0x621   : > { %10210 = vmatprep.subr.mxu0 %v19995_v41 }
 0x624   : > { %10212 = vmatpush1.msra.mxu0 %v20002_v8 }
 0x625   : > { %10246 = vmatmul.mubr.f32.vlgmr.msra.gmra.mrb[30].mxu0 %v17505_v46 }
 0x678   : > { %v9677_v44 = vpop.f32.mrb[20].mxu1 }
 0x679   : > { %v9679_v30 = vpop.f32.mrb[21].mxu1 }
 0x6f8   : > { %v10247_v28 = vpop.f32.mrb[30].mxu0 }
 0x6f9   : > { %v12420_v27 = vadd.f32 %v10247_v28, %v9677_v44  ;;  %v10249_v3 = vpop.f32.mrb[31].mxu0 }
 0x6fb   : > { %v10251_v9 = vmul.f32 0.00091827364, %v12420_v27 }
 0x6fd   : > { %10252 = vst.msk [vmem:[%s204_s30] sm:$0x1] %vm9569_vm15, %v10251_v9 }
 0x6fe   : > { %12809 = shalt.err (!%p12806_p3)
}
 0x6ff   : > { %s12810_s13 = scalar_lea.hbm %s17635_s8, 16  ;;  %s12814_s23 = scalar_lea.hbm %s17682_s4, 32 }
 0x700   : > { %p12811_p4 = scmp.ne.s32.totalorder %s17635_s8, %s12810_s13  ;;  %p12815_p9 = scmp.lt.u32.totalorder %s17635_s8, %s17682_s4 }
 0x701   : > { %p12816_p10 = scmp.lt.u32.totalorder %s12814_s23, %s12810_s13  ;;  %p12818_p12 = scmp.lt.u32.totalorder %s12810_s13, %s17635_s8 }
 0x702   : > { %p12812_p7 = pnand %p12811_p4, %p12926_p5 }
 0x703   : > { %p12817_p11 = por %p12816_p10, %p12815_p9 }
 0x704   : > { %p12813_p8 = pneg %p12812_p7 }
 0x705   : > { %p12819_p13 = por %p12818_p12, %p12817_p11 }
 0x707   : > { %p12820_p0 = pnand %p12819_p13, %p12813_p8 }
 0x709   : > { %12823 = shalt.err (!%p12820_p0)
}
 0x70a   : > { %12679 = dma.vmem_to_hbm [thread:$0]  (%p12926_p5), %s17637_s5, 16, %s17635_s8, %s10254_s9  }
 0x70b PF: > { %p12685_p1 = scmp.ge.s32.totalorder %s12858_s18, 2  ;;  %s10278_s29 = sand.u32 1, %s12846_s15  }
 0x70c   : > { %s10279_s22 = scalar_lea.sflag [#allocation3], %s10278_s29 }
 0x70d   : > { %p12682_p2 = pnand %p12685_p1, %p12930_p6 }
 0x70f   : > { %12841 = dma.done.wait (!%p12682_p2), %s10279_s22, 16  }
 0x710   : > { %12843 = vsyncadd (!%p12682_p2), %s10279_s22, 4294967280  ;;  %p14_p3 = scmp.ge.s32.totalorder %s12913_s21, 4   ;;  %s20018_s15 = smov %s12850_s16 }
 0x711   : > { %s20019_s16 = smov %s12854_s17  ;;  %s20020_s17 = smov %s12924_s24 }
 0x712   : > { %s20021_s18 = smov %s12913_s21  ;;  %16 = sbr.rel (!%p14_p3) target bundleno = 3 (0x3), region = 74 }
 0x719   :  { %10283 = vsyncpa [#allocation3], 1 }
 0x71a   :  { %10285 = vsyncpa [#allocation3 + $0x1], 1 }

</bundles_post_ra>
